<compile_context>
chip_gen: v6e
topology: v6e:2x2x1
jax: 0.10.0
libtpu: 0.0.40
codegen_flags: <defaults>
</compile_context>

<pallas_src>
import jax
import jax.numpy as jnp
from jax.experimental import pallas as pl
from jax.experimental.pallas import tpu as pltpu

EPS = 1e-5


# ---------------------------------------------------------------------------
# Small helpers
# ---------------------------------------------------------------------------
def _round_up(x, m):
    return (x + m - 1) // m * m


def _pick_tile(dim, cap):
    """Largest multiple of 128 that divides `dim` (a multiple of 128) and is <= cap."""
    best = 128
    t = 128
    while t <= min(dim, cap):
        if dim % t == 0:
            best = t
        t += 128
    return best


def _pad2(a, rows, cols):
    r, c = a.shape
    if r == rows and c == cols:
        return a
    return jnp.pad(a, ((0, rows - r), (0, cols - c)))


# ---------------------------------------------------------------------------
# Pallas kernels
# ---------------------------------------------------------------------------
def _matmul_bias_kernel(relu: bool, has_res: bool):
    """Tiled im2col-matmul + folded-BN bias (+ residual) (+ ReLU) kernel."""

    def kernel(x_ref, w_ref, b_ref, *rest):
        if has_res:
            r_ref, o_ref, acc_ref = rest
        else:
            o_ref, acc_ref = rest
        kk = pl.program_id(2)

        @pl.when(kk == 0)
        def _init():
            acc_ref[...] = jnp.zeros_like(acc_ref)

        acc_ref[...] += jnp.dot(x_ref[...], w_ref[...],
                                preferred_element_type=jnp.float32)

        @pl.when(kk == pl.num_programs(2) - 1)
        def _finish():
            y = acc_ref[...] + b_ref[...]
            if has_res:
                y = y + r_ref[...]
            if relu:
                y = jnp.maximum(y, 0.0)
            o_ref[...] = y

    return kernel


def pallas_matmul_bias(patches, w, bias, residual=None, relu=False):
    """Returns relu(patches @ w + bias (+ residual)) with Cout zero-padded to 128."""
    M, K = patches.shape
    Cout = w.shape[1]
    Kp = _round_up(K, 128)
    Np = _round_up(Cout, 128)
    Mp8 = _round_up(M, 8)
    if Mp8 <= 512:
        TM, Mp = Mp8, Mp8
    else:
        TM = 256
        Mp = _round_up(M, TM)
    TK = _pick_tile(Kp, 512)
    TN = _pick_tile(Np, 256)

    xp = _pad2(patches.astype(jnp.bfloat16), Mp, Kp)
    wp = _pad2(w, Kp, Np).astype(jnp.bfloat16)
    bp = _pad2(bias.reshape(1, Cout).astype(jnp.float32), 1, Np)

    args = [xp, wp, bp]
    in_specs = [
        pl.BlockSpec((TM, TK), lambda j, i, k: (i, k)),   # im2col patches
        pl.BlockSpec((TK, TN), lambda j, i, k: (k, j)),   # BN-folded weight
        pl.BlockSpec((1, TN), lambda j, i, k: (0, j)),    # bias row
    ]
    has_res = residual is not None
    if has_res:
        rp = _pad2(residual.astype(jnp.float32), Mp, Np)
        args.append(rp)
        in_specs.append(pl.BlockSpec((TM, TN), lambda j, i, k: (i, j)))

    bytes_accessed = (Mp * Kp + Kp * Np) * 2 + Mp * Np * 4 * (2 if has_res else 1)
    out = pl.pallas_call(
        _matmul_bias_kernel(relu, has_res),
        out_shape=jax.ShapeDtypeStruct((Mp, Np), jnp.float32),
        grid=(Np // TN, Mp // TM, Kp // TK),
        in_specs=in_specs,
        out_specs=pl.BlockSpec((TM, TN), lambda j, i, k: (i, j)),
        scratch_shapes=[pltpu.VMEM((TM, TN), jnp.float32)],
        compiler_params=pltpu.CompilerParams(
            dimension_semantics=("parallel", "parallel", "arbitrary"),
            vmem_limit_bytes=32 * 1024 * 1024,
        ),
        cost_estimate=pl.CostEstimate(flops=2 * Mp * Kp * Np,
                                      transcendentals=0,
                                      bytes_accessed=bytes_accessed),
    )(*args)
    if Mp != M:
        out = out[:M]
    return out  # (M, Np) — channels kept padded (padded channels are exactly zero)


def _maxpool_kernel(ee_ref, eo_ref, oe_ref, oo_ref, o_ref):
    # Parity planes of the (-inf)-padded input; 3x3/s2 max from 9 static shifted slices.
    Ho, Wo = o_ref.shape[1], o_ref.shape[2]
    ee = ee_ref[0]   # (Ho+1, Wo+1, C) : even rows, even cols
    eo = eo_ref[0]   #                  even rows, odd  cols
    oe = oe_ref[0]   #                  odd  rows, even cols
    oo = oo_ref[0]   #                  odd  rows, odd  cols
    m = ee[:Ho, :Wo]
    m = jnp.maximum(m, ee[:Ho, 1:Wo + 1])
    m = jnp.maximum(m, ee[1:Ho + 1, :Wo])
    m = jnp.maximum(m, ee[1:Ho + 1, 1:Wo + 1])
    m = jnp.maximum(m, eo[:Ho, :Wo])
    m = jnp.maximum(m, eo[1:Ho + 1, :Wo])
    m = jnp.maximum(m, oe[:Ho, :Wo])
    m = jnp.maximum(m, oe[:Ho, 1:Wo + 1])
    m = jnp.maximum(m, oo[:Ho, :Wo])
    o_ref[0] = m


def _head_kernel(x_ref, w_ref, b_ref, o_ref):
    # adaptive_avg_pool2d(.,1) == mean over spatial, then Linear.
    pooled = jnp.mean(x_ref[...], axis=1)
    o_ref[...] = jnp.dot(pooled, w_ref[...],
                         preferred_element_type=jnp.float32) + b_ref[...]


# ---------------------------------------------------------------------------
# Glue: im2col patch extraction (pure data movement, stays in plain JAX)
# ---------------------------------------------------------------------------
def extract_patches(x, k, stride, pad):
    """x: (N, H, W, C) -> (N*Ho*Wo, k*k*C); feature order = (kh, kw, c)."""
    N, H, W, C = x.shape
    Ho = (H + 2 * pad - k) // stride + 1
    Wo = (W + 2 * pad - k) // stride + 1
    xp = jnp.pad(x, ((0, 0), (pad, pad), (pad, pad), (0, 0)))
    cols = []
    for kh in range(k):
        for kw in range(k):
            sl = xp[:, kh:kh + stride * (Ho - 1) + 1:stride,
                    kw:kw + stride * (Wo - 1) + 1:stride, :]
            cols.append(sl)
    patches = jnp.concatenate(cols, axis=-1)  # (N, Ho, Wo, k*k*C)
    return patches.reshape(N * Ho * Wo, k * k * C), (N, Ho, Wo)


# ---------------------------------------------------------------------------
# Layers
# ---------------------------------------------------------------------------
def conv_bn(x_nhwc, p, stride, relu=False, residual_nhwc=None):
    N, H, W, c_act = x_nhwc.shape
    k, pad = p['k'], p['pad']
    w4 = p['w4']                                   # (kh, kw, cin, cout)
    cin, cout = w4.shape[2], w4.shape[3]
    if c_act > cin:
        # Incoming activation carries zero-padded channels; add matching zero weight rows.
        w4 = jnp.pad(w4, ((0, 0), (0, 0), (0, c_act - cin), (0, 0)))
    scale = p['gamma'] / jnp.sqrt(p['var'] + EPS)
    bias = p['beta'] - p['mean'] * scale
    w2 = (w4 * scale).reshape(k * k * c_act, cout)  # fold BN scale into weight columns
    patches, (N, Ho, Wo) = extract_patches(x_nhwc.astype(jnp.bfloat16), k, stride, pad)
    res = None
    if residual_nhwc is not None:
        res = residual_nhwc.reshape(N * Ho * Wo, residual_nhwc.shape[-1])
    out = pallas_matmul_bias(patches, w2, bias, residual=res, relu=relu)
    return out.reshape(N, Ho, Wo, out.shape[-1])


def maxpool_3x3_s2(x):
    N, H, W, C = x.shape
    Ho = (H + 2 - 3) // 2 + 1
    Wo = (W + 2 - 3) // 2 + 1
    neg = jnp.finfo(jnp.float32).min
    xp = jnp.pad(x, ((0, 0), (1, 1), (1, 1), (0, 0)), constant_values=neg)

    def parity(a):  # crop / pad to uniform (N, Ho+1, Wo+1, C)
        a = a[:, :Ho + 1, :Wo + 1, :]
        ph, pw = Ho + 1 - a.shape[1], Wo + 1 - a.shape[2]
        if ph or pw:
            a = jnp.pad(a, ((0, 0), (0, ph), (0, pw), (0, 0)), constant_values=neg)
        return a

    planes = [parity(xp[:, dh::2, dw::2, :]) for dh in (0, 1) for dw in (0, 1)]
    in_spec = pl.BlockSpec((1, Ho + 1, Wo + 1, C), lambda n: (n, 0, 0, 0))
    return pl.pallas_call(
        _maxpool_kernel,
        out_shape=jax.ShapeDtypeStruct((N, Ho, Wo, C), jnp.float32),
        grid=(N,),
        in_specs=[in_spec] * 4,
        out_specs=pl.BlockSpec((1, Ho, Wo, C), lambda n: (n, 0, 0, 0)),
        compiler_params=pltpu.CompilerParams(dimension_semantics=("parallel",)),
    )(*planes)


def pallas_head(x_nhwc, w_logit, b_logit):
    N, H, W, C = x_nhwc.shape
    x3 = x_nhwc.reshape(N, H * W, C)
    NC = w_logit.shape[1]
    return pl.pallas_call(
        _head_kernel,
        out_shape=jax.ShapeDtypeStruct((N, NC), jnp.float32),
        grid=(1,),
        in_specs=[pl.BlockSpec((N, H * W, C), lambda i: (0, 0, 0)),
                  pl.BlockSpec((C, NC), lambda i: (0, 0)),
                  pl.BlockSpec((1, NC), lambda i: (0, 0))],
        out_specs=pl.BlockSpec((N, NC), lambda i: (0, 0)),
        compiler_params=pltpu.CompilerParams(dimension_semantics=("arbitrary",)),
    )(x3, w_logit, b_logit.reshape(1, NC))


def basic_block(x, p, stride):
    z = conv_bn(x, p['cb1'], stride, relu=True)
    if 'sc' in p:
        shortcut = conv_bn(x, p['sc'], stride, relu=False)
    else:
        shortcut = x
    # conv_bn2 + residual add + final ReLU fused into one Pallas kernel.
    z = conv_bn(z, p['cb2'], 1, relu=True, residual_nhwc=shortcut)
    return z


# ---------------------------------------------------------------------------
# Parameter init (deterministic, synthetic — mirrors the nn.Module shapes)
# ---------------------------------------------------------------------------
def init_conv_bn(key, cin, cout, k, pad):
    # PyTorch Conv2d weight is OIHW; store as (kh, kw, cin, cout) matching im2col order.
    w = jax.random.normal(key, (cout, cin, k, k), jnp.float32) * (1.0 / (k * k * cin) ** 0.5)
    w4 = jnp.transpose(w, (2, 3, 1, 0))
    return {
        'w4': w4, 'k': k, 'pad': pad,
        'gamma': jnp.ones((cout,), jnp.float32),
        'beta': jnp.zeros((cout,), jnp.float32),
        'mean': jnp.zeros((cout,), jnp.float32),
        'var': jnp.ones((cout,), jnp.float32),
    }


def init_basic_block(key, cin, ch, cout, shortcut):
    k1, k2, k3 = jax.random.split(key, 3)
    d = {'cb1': init_conv_bn(k1, cin, ch, 3, 1),
         'cb2': init_conv_bn(k2, ch, cout, 3, 1)}
    if shortcut:
        d['sc'] = init_conv_bn(k3, cin, cout, 1, 0)
    return d


def init_resnet34_params(key, num_class=1000):
    keys = list(jax.random.split(key, 32))
    it = iter(keys)
    params = {'block0': init_conv_bn(next(it), 3, 64, 7, 3)}
    params['block1'] = [init_basic_block(next(it), 64, 64, 64, False) for _ in range(3)]
    params['block2'] = ([init_basic_block(next(it), 64, 128, 128, True)] +
                        [init_basic_block(next(it), 128, 128, 128, False) for _ in range(3)])
    params['block3'] = ([init_basic_block(next(it), 128, 256, 256, True)] +
                        [init_basic_block(next(it), 256, 256, 256, False) for _ in range(5)])
    params['block4'] = ([init_basic_block(next(it), 256, 512, 512, True)] +
                        [init_basic_block(next(it), 512, 512, 512, False) for _ in range(2)])
    kw, kb = jax.random.split(next(it))
    # PyTorch Linear weight is (num_class, 512); store transposed for x @ W^T + b.
    params['logit_w'] = (jax.random.normal(kw, (num_class, 512), jnp.float32) * 0.02).T
    params['logit_b'] = jax.random.normal(kb, (num_class,), jnp.float32) * 0.02
    return params


# ---------------------------------------------------------------------------
# Full forward pass
# ---------------------------------------------------------------------------
def resnet34_forward(params, x_nchw):
    x = jnp.transpose(x_nchw, (0, 2, 3, 1)).astype(jnp.float32)  # NCHW -> NHWC
    # block0: Conv(3->64, k7, s2, p3) + BN + ReLU (output channel-padded 64 -> 128).
    x = conv_bn(x, params['block0'], stride=2, relu=True)
    # block1: MaxPool(3,s2,p1) + 3 BasicBlocks
    x = maxpool_3x3_s2(x)
    first_stride = {'block1': 1, 'block2': 2, 'block3': 2, 'block4': 2}
    for name in ('block1', 'block2', 'block3', 'block4'):
        for j, bp in enumerate(params[name]):
            s = first_stride[name] if j == 0 else 1
            x = basic_block(x, bp, s)
    # Final stage has 512 real channels (no padding) -> head sees exactly 512.
    return pallas_head(x, params['logit_w'], params['logit_b'])


if __name__ == "__main__":
    key = jax.random.PRNGKey(0)
    kp, kx = jax.random.split(key)
    params = init_resnet34_params(kp, num_class=1000)

    x = jax.random.normal(kx, (2, 3, 16, 16), jnp.float32)  # NCHW like PyTorch

    fwd = jax.jit(lambda inp: resnet34_forward(params, inp))
    out = fwd(x)
    jax.block_until_ready(out)
    assert out.shape == (2, 1000), out.shape
    assert bool(jnp.all(jnp.isfinite(out)))
    print("KERNEL_OK")
</pallas_src>

<mosaic_0001>
module attributes {stable_mosaic.version = 11 : i64} {
  func.func @kernel(%arg0: i32, %arg1: i32, %arg2: i32, %arg3: memref<128x256xbf16, #tpu.memory_space<vmem>>, %arg4: memref<256x128xbf16, #tpu.memory_space<vmem>>, %arg5: memref<1x128xf32, #tpu.memory_space<vmem>>, %arg6: memref<128x128xf32, #tpu.memory_space<vmem>>, %arg7: memref<128x128xf32, #tpu.memory_space<vmem>>) attributes {dimension_semantics = [#tpu.dimension_semantics<parallel>, #tpu.dimension_semantics<parallel>, #tpu.dimension_semantics<arbitrary>], iteration_bounds = array<i64: 1, 1, 1>, scalar_prefetch = 0 : i64, scratch_operands = 1 : i64, tpu.core_type = #tpu.core_type<tc>, window_params = [{transform_indices = @transform_0, window_bounds = array<i64: 128, 256>}, {transform_indices = @transform_1, window_bounds = array<i64: 256, 128>}, {transform_indices = @transform_2, window_bounds = array<i64: 1, 128>}, {transform_indices = @transform_3, window_bounds = array<i64: 128, 128>}]} {
    %c0_i32 = arith.constant 0 : i32
    %0 = arith.cmpi eq, %arg2, %c0_i32 : i32
    %1 = arith.extui %0 : i1 to i32
    %c0_i32_0 = arith.constant 0 : i32
    %2 = arith.cmpi ne, %1, %c0_i32_0 : i32
    scf.if %2 {
      %cst_10 = arith.constant 0.000000e+00 : f32
      %12 = vector.broadcast %cst_10 : f32 to vector<128x128xf32>
      %c0_11 = arith.constant 0 : index
      %c0_12 = arith.constant 0 : index
      %13 = vector.load %arg7[%c0_11, %c0_12] : memref<128x128xf32, #tpu.memory_space<vmem>>, vector<128x128xf32>
      tpu.vector_store %arg7[%c0_11, %c0_12], %12 {strides = array<i32>} : memref<128x128xf32, #tpu.memory_space<vmem>>, vector<128x128xf32>,
    } else {
    }
    %c0 = arith.constant 0 : index
    %c0_1 = arith.constant 0 : index
    %3 = vector.load %arg7[%c0, %c0_1] : memref<128x128xf32, #tpu.memory_space<vmem>>, vector<128x128xf32>
    %c0_2 = arith.constant 0 : index
    %c0_3 = arith.constant 0 : index
    %4 = vector.load %arg3[%c0_2, %c0_3] : memref<128x256xbf16, #tpu.memory_space<vmem>>, vector<128x256xbf16>
    %c0_4 = arith.constant 0 : index
    %c0_5 = arith.constant 0 : index
    %5 = vector.load %arg4[%c0_4, %c0_5] : memref<256x128xbf16, #tpu.memory_space<vmem>>, vector<256x128xbf16>
    %cst = arith.constant dense<0.000000e+00> : vector<128x128xf32>
    %6 = tpu.matmul %4, %5, %cst {dimension_numbers = #tpu.dot_dimension_numbers<[1], [0], [0], [1], [0, 0, 1, 1], [], []>} : vector<128x256xbf16>, vector<256x128xbf16>, vector<128x128xf32> -> vector<128x128xf32>
    %7 = arith.addf %3, %6 : vector<128x128xf32>
    %c0_6 = arith.constant 0 : index
    %c0_7 = arith.constant 0 : index
    %8 = vector.load %arg7[%c0_6, %c0_7] : memref<128x128xf32, #tpu.memory_space<vmem>>, vector<128x128xf32>
    tpu.vector_store %arg7[%c0_6, %c0_7], %7 {strides = array<i32>} : memref<128x128xf32, #tpu.memory_space<vmem>>, vector<128x128xf32>,
    %c0_i32_8 = arith.constant 0 : i32
    %9 = arith.cmpi eq, %arg2, %c0_i32_8 : i32
    %10 = arith.extui %9 : i1 to i32
    %c0_i32_9 = arith.constant 0 : i32
    %11 = arith.cmpi ne, %10, %c0_i32_9 : i32
    scf.if %11 {
      %c0_10 = arith.constant 0 : index
      %c0_11 = arith.constant 0 : index
      %12 = vector.load %arg7[%c0_10, %c0_11] : memref<128x128xf32, #tpu.memory_space<vmem>>, vector<128x128xf32>
      %c0_12 = arith.constant 0 : index
      %c0_13 = arith.constant 0 : index
      %13 = vector.load %arg5[%c0_12, %c0_13] : memref<1x128xf32, #tpu.memory_space<vmem>>, vector<1x128xf32>
      %14 = vector.broadcast %13 : vector<1x128xf32> to vector<128x128xf32>
      %15 = arith.addf %12, %14 : vector<128x128xf32>
      %cst_14 = arith.constant 0.000000e+00 : f32
      %16 = vector.broadcast %cst_14 : f32 to vector<128x128xf32>
      %17 = arith.maximumf %15, %16 : vector<128x128xf32>
      %c0_15 = arith.constant 0 : index
      %c0_16 = arith.constant 0 : index
      %18 = vector.load %arg6[%c0_15, %c0_16] : memref<128x128xf32, #tpu.memory_space<vmem>>, vector<128x128xf32>
      tpu.vector_store %arg6[%c0_15, %c0_16], %17 {strides = array<i32>} : memref<128x128xf32, #tpu.memory_space<vmem>>, vector<128x128xf32>,
    } else {
    }
    return
  }
  func.func @transform_0(%arg0: i32, %arg1: i32, %arg2: i32) -> (i32, i32) {
    %c0_i32 = arith.constant 0 : i32
    return %arg1, %arg2 : i32, i32
  }
  func.func @transform_1(%arg0: i32, %arg1: i32, %arg2: i32) -> (i32, i32) {
    %c0_i32 = arith.constant 0 : i32
    return %arg2, %arg0 : i32, i32
  }
  func.func @transform_2(%arg0: i32, %arg1: i32, %arg2: i32) -> (i32, i32) {
    %c0_i32 = arith.constant 0 : i32
    %c0_i32_0 = arith.constant 0 : i32
    return %c0_i32, %arg0 : i32, i32
  }
  func.func @transform_3(%arg0: i32, %arg1: i32, %arg2: i32) -> (i32, i32) {
    %c0_i32 = arith.constant 0 : i32
    return %arg1, %arg0 : i32, i32
  }
}

module attributes {stable_mosaic.version = 11 : i64} {
  func.func @_maxpool_kernel(%arg0: i32, %arg1: memref<1x5x5x128xf32, #tpu.memory_space<vmem>>, %arg2: memref<1x5x5x128xf32, #tpu.memory_space<vmem>>, %arg3: memref<1x5x5x128xf32, #tpu.memory_space<vmem>>, %arg4: memref<1x5x5x128xf32, #tpu.memory_space<vmem>>, %arg5: memref<1x4x4x128xf32, #tpu.memory_space<vmem>>) attributes {dimension_semantics = [#tpu.dimension_semantics<parallel>], iteration_bounds = array<i64: 2>, scalar_prefetch = 0 : i64, scratch_operands = 0 : i64, tpu.core_type = #tpu.core_type<tc>, window_params = [{transform_indices = @transform_0, window_bounds = array<i64: 1, 5, 5, 128>}, {transform_indices = @transform_1, window_bounds = array<i64: 1, 5, 5, 128>}, {transform_indices = @transform_2, window_bounds = array<i64: 1, 5, 5, 128>}, {transform_indices = @transform_3, window_bounds = array<i64: 1, 5, 5, 128>}, {transform_indices = @transform_4, window_bounds = array<i64: 1, 4, 4, 128>}]} {
    %c0 = arith.constant 0 : index
    %c0_0 = arith.constant 0 : index
    %c0_1 = arith.constant 0 : index
    %c0_2 = arith.constant 0 : index
    %0 = vector.load %arg1[%c0, %c0_0, %c0_1, %c0_2] : memref<1x5x5x128xf32, #tpu.memory_space<vmem>>, vector<1x5x5x128xf32>
    %1 = vector.shape_cast %0 : vector<1x5x5x128xf32> to vector<5x5x128xf32>
    %c0_3 = arith.constant 0 : index
    %c0_4 = arith.constant 0 : index
    %c0_5 = arith.constant 0 : index
    %c0_6 = arith.constant 0 : index
    %2 = vector.load %arg2[%c0_3, %c0_4, %c0_5, %c0_6] : memref<1x5x5x128xf32, #tpu.memory_space<vmem>>, vector<1x5x5x128xf32>
    %3 = vector.shape_cast %2 : vector<1x5x5x128xf32> to vector<5x5x128xf32>
    %c0_7 = arith.constant 0 : index
    %c0_8 = arith.constant 0 : index
    %c0_9 = arith.constant 0 : index
    %c0_10 = arith.constant 0 : index
    %4 = vector.load %arg3[%c0_7, %c0_8, %c0_9, %c0_10] : memref<1x5x5x128xf32, #tpu.memory_space<vmem>>, vector<1x5x5x128xf32>
    %5 = vector.shape_cast %4 : vector<1x5x5x128xf32> to vector<5x5x128xf32>
    %c0_11 = arith.constant 0 : index
    %c0_12 = arith.constant 0 : index
    %c0_13 = arith.constant 0 : index
    %c0_14 = arith.constant 0 : index
    %6 = vector.load %arg4[%c0_11, %c0_12, %c0_13, %c0_14] : memref<1x5x5x128xf32, #tpu.memory_space<vmem>>, vector<1x5x5x128xf32>
    %7 = vector.shape_cast %6 : vector<1x5x5x128xf32> to vector<5x5x128xf32>
    %8 = vector.extract_strided_slice %1 {offsets = [0, 0, 0], sizes = [4, 4, 128], strides = [1, 1, 1]} : vector<5x5x128xf32> to vector<4x4x128xf32>
    %9 = vector.extract_strided_slice %1 {offsets = [0, 1, 0], sizes = [4, 4, 128], strides = [1, 1, 1]} : vector<5x5x128xf32> to vector<4x4x128xf32>
    %10 = arith.maximumf %8, %9 : vector<4x4x128xf32>
    %11 = vector.extract_strided_slice %1 {offsets = [1, 0, 0], sizes = [4, 4, 128], strides = [1, 1, 1]} : vector<5x5x128xf32> to vector<4x4x128xf32>
    %12 = arith.maximumf %10, %11 : vector<4x4x128xf32>
    %13 = vector.extract_strided_slice %1 {offsets = [1, 1, 0], sizes = [4, 4, 128], strides = [1, 1, 1]} : vector<5x5x128xf32> to vector<4x4x128xf32>
    %14 = arith.maximumf %12, %13 : vector<4x4x128xf32>
    %15 = vector.extract_strided_slice %3 {offsets = [0, 0, 0], sizes = [4, 4, 128], strides = [1, 1, 1]} : vector<5x5x128xf32> to vector<4x4x128xf32>
    %16 = arith.maximumf %14, %15 : vector<4x4x128xf32>
    %17 = vector.extract_strided_slice %3 {offsets = [1, 0, 0], sizes = [4, 4, 128], strides = [1, 1, 1]} : vector<5x5x128xf32> to vector<4x4x128xf32>
    %18 = arith.maximumf %16, %17 : vector<4x4x128xf32>
    %19 = vector.extract_strided_slice %5 {offsets = [0, 0, 0], sizes = [4, 4, 128], strides = [1, 1, 1]} : vector<5x5x128xf32> to vector<4x4x128xf32>
    %20 = arith.maximumf %18, %19 : vector<4x4x128xf32>
    %21 = vector.extract_strided_slice %5 {offsets = [0, 1, 0], sizes = [4, 4, 128], strides = [1, 1, 1]} : vector<5x5x128xf32> to vector<4x4x128xf32>
    %22 = arith.maximumf %20, %21 : vector<4x4x128xf32>
    %23 = vector.extract_strided_slice %7 {offsets = [0, 0, 0], sizes = [4, 4, 128], strides = [1, 1, 1]} : vector<5x5x128xf32> to vector<4x4x128xf32>
    %24 = arith.maximumf %22, %23 : vector<4x4x128xf32>
    %c0_15 = arith.constant 0 : index
    %c0_16 = arith.constant 0 : index
    %c0_17 = arith.constant 0 : index
    %c0_18 = arith.constant 0 : index
    %25 = vector.load %arg5[%c0_15, %c0_16, %c0_17, %c0_18] : memref<1x4x4x128xf32, #tpu.memory_space<vmem>>, vector<1x4x4x128xf32>
    %26 = vector.shape_cast %25 : vector<1x4x4x128xf32> to vector<4x4x128xf32>
    %27 = vector.shape_cast %24 : vector<4x4x128xf32> to vector<1x4x4x128xf32>
    tpu.vector_store %arg5[%c0_15, %c0_16, %c0_17, %c0_18], %27 {strides = array<i32>} : memref<1x4x4x128xf32, #tpu.memory_space<vmem>>, vector<1x4x4x128xf32>,
    return
  }
  func.func @transform_0(%arg0: i32) -> (i32, i32, i32, i32) {
    %c0_i32 = arith.constant 0 : i32
    %c0_i32_0 = arith.constant 0 : i32
    %c0_i32_1 = arith.constant 0 : i32
    %c0_i32_2 = arith.constant 0 : i32
    return %arg0, %c0_i32, %c0_i32_0, %c0_i32_1 : i32, i32, i32, i32
  }
  func.func @transform_1(%arg0: i32) -> (i32, i32, i32, i32) {
    %c0_i32 = arith.constant 0 : i32
    %c0_i32_0 = arith.constant 0 : i32
    %c0_i32_1 = arith.constant 0 : i32
    %c0_i32_2 = arith.constant 0 : i32
    return %arg0, %c0_i32, %c0_i32_0, %c0_i32_1 : i32, i32, i32, i32
  }
  func.func @transform_2(%arg0: i32) -> (i32, i32, i32, i32) {
    %c0_i32 = arith.constant 0 : i32
    %c0_i32_0 = arith.constant 0 : i32
    %c0_i32_1 = arith.constant 0 : i32
    %c0_i32_2 = arith.constant 0 : i32
    return %arg0, %c0_i32, %c0_i32_0, %c0_i32_1 : i32, i32, i32, i32
  }
  func.func @transform_3(%arg0: i32) -> (i32, i32, i32, i32) {
    %c0_i32 = arith.constant 0 : i32
    %c0_i32_0 = arith.constant 0 : i32
    %c0_i32_1 = arith.constant 0 : i32
    %c0_i32_2 = arith.constant 0 : i32
    return %arg0, %c0_i32, %c0_i32_0, %c0_i32_1 : i32, i32, i32, i32
  }
  func.func @transform_4(%arg0: i32) -> (i32, i32, i32, i32) {
    %c0_i32 = arith.constant 0 : i32
    %c0_i32_0 = arith.constant 0 : i32
    %c0_i32_1 = arith.constant 0 : i32
    %c0_i32_2 = arith.constant 0 : i32
    return %arg0, %c0_i32, %c0_i32_0, %c0_i32_1 : i32, i32, i32, i32
  }
}

module attributes {stable_mosaic.version = 11 : i64} {
  func.func @kernel(%arg0: i32, %arg1: i32, %arg2: i32, %arg3: memref<32x384xbf16, #tpu.memory_space<vmem>>, %arg4: memref<384x128xbf16, #tpu.memory_space<vmem>>, %arg5: memref<1x128xf32, #tpu.memory_space<vmem>>, %arg6: memref<32x128xf32, #tpu.memory_space<vmem>>, %arg7: memref<32x128xf32, #tpu.memory_space<vmem>>) attributes {dimension_semantics = [#tpu.dimension_semantics<parallel>, #tpu.dimension_semantics<parallel>, #tpu.dimension_semantics<arbitrary>], iteration_bounds = array<i64: 1, 1, 3>, scalar_prefetch = 0 : i64, scratch_operands = 1 : i64, tpu.core_type = #tpu.core_type<tc>, window_params = [{transform_indices = @transform_0, window_bounds = array<i64: 32, 384>}, {transform_indices = @transform_1, window_bounds = array<i64: 384, 128>}, {transform_indices = @transform_2, window_bounds = array<i64: 1, 128>}, {transform_indices = @transform_3, window_bounds = array<i64: 32, 128>}]} {
    %c0_i32 = arith.constant 0 : i32
    %0 = arith.cmpi eq, %arg2, %c0_i32 : i32
    %1 = arith.extui %0 : i1 to i32
    %c0_i32_0 = arith.constant 0 : i32
    %2 = arith.cmpi ne, %1, %c0_i32_0 : i32
    scf.if %2 {
      %cst_9 = arith.constant 0.000000e+00 : f32
      %12 = vector.broadcast %cst_9 : f32 to vector<32x128xf32>
      %c0_10 = arith.constant 0 : index
      %c0_11 = arith.constant 0 : index
      %13 = vector.load %arg7[%c0_10, %c0_11] : memref<32x128xf32, #tpu.memory_space<vmem>>, vector<32x128xf32>
      tpu.vector_store %arg7[%c0_10, %c0_11], %12 {strides = array<i32>} : memref<32x128xf32, #tpu.memory_space<vmem>>, vector<32x128xf32>,
    } else {
    }
    %c0 = arith.constant 0 : index
    %c0_1 = arith.constant 0 : index
    %3 = vector.load %arg7[%c0, %c0_1] : memref<32x128xf32, #tpu.memory_space<vmem>>, vector<32x128xf32>
    %c0_2 = arith.constant 0 : index
    %c0_3 = arith.constant 0 : index
    %4 = vector.load %arg3[%c0_2, %c0_3] : memref<32x384xbf16, #tpu.memory_space<vmem>>, vector<32x384xbf16>
    %c0_4 = arith.constant 0 : index
    %c0_5 = arith.constant 0 : index
    %5 = vector.load %arg4[%c0_4, %c0_5] : memref<384x128xbf16, #tpu.memory_space<vmem>>, vector<384x128xbf16>
    %cst = arith.constant dense<0.000000e+00> : vector<32x128xf32>
    %6 = tpu.matmul %4, %5, %cst {dimension_numbers = #tpu.dot_dimension_numbers<[1], [0], [0], [1], [0, 0, 1, 1], [], []>} : vector<32x384xbf16>, vector<384x128xbf16>, vector<32x128xf32> -> vector<32x128xf32>
    %7 = arith.addf %3, %6 : vector<32x128xf32>
    %c0_6 = arith.constant 0 : index
    %c0_7 = arith.constant 0 : index
    %8 = vector.load %arg7[%c0_6, %c0_7] : memref<32x128xf32, #tpu.memory_space<vmem>>, vector<32x128xf32>
    tpu.vector_store %arg7[%c0_6, %c0_7], %7 {strides = array<i32>} : memref<32x128xf32, #tpu.memory_space<vmem>>, vector<32x128xf32>,
    %c2_i32 = arith.constant 2 : i32
    %9 = arith.cmpi eq, %arg2, %c2_i32 : i32
    %10 = arith.extui %9 : i1 to i32
    %c0_i32_8 = arith.constant 0 : i32
    %11 = arith.cmpi ne, %10, %c0_i32_8 : i32
    scf.if %11 {
      %c0_9 = arith.constant 0 : index
      %c0_10 = arith.constant 0 : index
      %12 = vector.load %arg7[%c0_9, %c0_10] : memref<32x128xf32, #tpu.memory_space<vmem>>, vector<32x128xf32>
      %c0_11 = arith.constant 0 : index
      %c0_12 = arith.constant 0 : index
      %13 = vector.load %arg5[%c0_11, %c0_12] : memref<1x128xf32, #tpu.memory_space<vmem>>, vector<1x128xf32>
      %14 = vector.broadcast %13 : vector<1x128xf32> to vector<32x128xf32>
      %15 = arith.addf %12, %14 : vector<32x128xf32>
      %cst_13 = arith.constant 0.000000e+00 : f32
      %16 = vector.broadcast %cst_13 : f32 to vector<32x128xf32>
      %17 = arith.maximumf %15, %16 : vector<32x128xf32>
      %c0_14 = arith.constant 0 : index
      %c0_15 = arith.constant 0 : index
      %18 = vector.load %arg6[%c0_14, %c0_15] : memref<32x128xf32, #tpu.memory_space<vmem>>, vector<32x128xf32>
      tpu.vector_store %arg6[%c0_14, %c0_15], %17 {strides = array<i32>} : memref<32x128xf32, #tpu.memory_space<vmem>>, vector<32x128xf32>,
    } else {
    }
    return
  }
  func.func @transform_0(%arg0: i32, %arg1: i32, %arg2: i32) -> (i32, i32) {
    %c0_i32 = arith.constant 0 : i32
    return %arg1, %arg2 : i32, i32
  }
  func.func @transform_1(%arg0: i32, %arg1: i32, %arg2: i32) -> (i32, i32) {
    %c0_i32 = arith.constant 0 : i32
    return %arg2, %arg0 : i32, i32
  }
  func.func @transform_2(%arg0: i32, %arg1: i32, %arg2: i32) -> (i32, i32) {
    %c0_i32 = arith.constant 0 : i32
    %c0_i32_0 = arith.constant 0 : i32
    return %c0_i32, %arg0 : i32, i32
  }
  func.func @transform_3(%arg0: i32, %arg1: i32, %arg2: i32) -> (i32, i32) {
    %c0_i32 = arith.constant 0 : i32
    return %arg1, %arg0 : i32, i32
  }
}

module attributes {stable_mosaic.version = 11 : i64} {
  func.func @kernel(%arg0: i32, %arg1: i32, %arg2: i32, %arg3: memref<32x384xbf16, #tpu.memory_space<vmem>>, %arg4: memref<384x128xbf16, #tpu.memory_space<vmem>>, %arg5: memref<1x128xf32, #tpu.memory_space<vmem>>, %arg6: memref<32x128xf32, #tpu.memory_space<vmem>>, %arg7: memref<32x128xf32, #tpu.memory_space<vmem>>, %arg8: memref<32x128xf32, #tpu.memory_space<vmem>>) attributes {dimension_semantics = [#tpu.dimension_semantics<parallel>, #tpu.dimension_semantics<parallel>, #tpu.dimension_semantics<arbitrary>], iteration_bounds = array<i64: 1, 1, 3>, scalar_prefetch = 0 : i64, scratch_operands = 1 : i64, tpu.core_type = #tpu.core_type<tc>, window_params = [{transform_indices = @transform_0, window_bounds = array<i64: 32, 384>}, {transform_indices = @transform_1, window_bounds = array<i64: 384, 128>}, {transform_indices = @transform_2, window_bounds = array<i64: 1, 128>}, {transform_indices = @transform_3, window_bounds = array<i64: 32, 128>}, {transform_indices = @transform_4, window_bounds = array<i64: 32, 128>}]} {
    %c0_i32 = arith.constant 0 : i32
    %0 = arith.cmpi eq, %arg2, %c0_i32 : i32
    %1 = arith.extui %0 : i1 to i32
    %c0_i32_0 = arith.constant 0 : i32
    %2 = arith.cmpi ne, %1, %c0_i32_0 : i32
    scf.if %2 {
      %cst_9 = arith.constant 0.000000e+00 : f32
      %12 = vector.broadcast %cst_9 : f32 to vector<32x128xf32>
      %c0_10 = arith.constant 0 : index
      %c0_11 = arith.constant 0 : index
      %13 = vector.load %arg8[%c0_10, %c0_11] : memref<32x128xf32, #tpu.memory_space<vmem>>, vector<32x128xf32>
      tpu.vector_store %arg8[%c0_10, %c0_11], %12 {strides = array<i32>} : memref<32x128xf32, #tpu.memory_space<vmem>>, vector<32x128xf32>,
    } else {
    }
    %c0 = arith.constant 0 : index
    %c0_1 = arith.constant 0 : index
    %3 = vector.load %arg8[%c0, %c0_1] : memref<32x128xf32, #tpu.memory_space<vmem>>, vector<32x128xf32>
    %c0_2 = arith.constant 0 : index
    %c0_3 = arith.constant 0 : index
    %4 = vector.load %arg3[%c0_2, %c0_3] : memref<32x384xbf16, #tpu.memory_space<vmem>>, vector<32x384xbf16>
    %c0_4 = arith.constant 0 : index
    %c0_5 = arith.constant 0 : index
    %5 = vector.load %arg4[%c0_4, %c0_5] : memref<384x128xbf16, #tpu.memory_space<vmem>>, vector<384x128xbf16>
    %cst = arith.constant dense<0.000000e+00> : vector<32x128xf32>
    %6 = tpu.matmul %4, %5, %cst {dimension_numbers = #tpu.dot_dimension_numbers<[1], [0], [0], [1], [0, 0, 1, 1], [], []>} : vector<32x384xbf16>, vector<384x128xbf16>, vector<32x128xf32> -> vector<32x128xf32>
    %7 = arith.addf %3, %6 : vector<32x128xf32>
    %c0_6 = arith.constant 0 : index
    %c0_7 = arith.constant 0 : index
    %8 = vector.load %arg8[%c0_6, %c0_7] : memref<32x128xf32, #tpu.memory_space<vmem>>, vector<32x128xf32>
    tpu.vector_store %arg8[%c0_6, %c0_7], %7 {strides = array<i32>} : memref<32x128xf32, #tpu.memory_space<vmem>>, vector<32x128xf32>,
    %c2_i32 = arith.constant 2 : i32
    %9 = arith.cmpi eq, %arg2, %c2_i32 : i32
    %10 = arith.extui %9 : i1 to i32
    %c0_i32_8 = arith.constant 0 : i32
    %11 = arith.cmpi ne, %10, %c0_i32_8 : i32
    scf.if %11 {
      %c0_9 = arith.constant 0 : index
      %c0_10 = arith.constant 0 : index
      %12 = vector.load %arg8[%c0_9, %c0_10] : memref<32x128xf32, #tpu.memory_space<vmem>>, vector<32x128xf32>
      %c0_11 = arith.constant 0 : index
      %c0_12 = arith.constant 0 : index
      %13 = vector.load %arg5[%c0_11, %c0_12] : memref<1x128xf32, #tpu.memory_space<vmem>>, vector<1x128xf32>
      %14 = vector.broadcast %13 : vector<1x128xf32> to vector<32x128xf32>
      %15 = arith.addf %12, %14 : vector<32x128xf32>
      %c0_13 = arith.constant 0 : index
      %c0_14 = arith.constant 0 : index
      %16 = vector.load %arg6[%c0_13, %c0_14] : memref<32x128xf32, #tpu.memory_space<vmem>>, vector<32x128xf32>
      %17 = arith.addf %15, %16 : vector<32x128xf32>
      %cst_15 = arith.constant 0.000000e+00 : f32
      %18 = vector.broadcast %cst_15 : f32 to vector<32x128xf32>
      %19 = arith.maximumf %17, %18 : vector<32x128xf32>
      %c0_16 = arith.constant 0 : index
      %c0_17 = arith.constant 0 : index
      %20 = vector.load %arg7[%c0_16, %c0_17] : memref<32x128xf32, #tpu.memory_space<vmem>>, vector<32x128xf32>
      tpu.vector_store %arg7[%c0_16, %c0_17], %19 {strides = array<i32>} : memref<32x128xf32, #tpu.memory_space<vmem>>, vector<32x128xf32>,
    } else {
    }
    return
  }
  func.func @transform_0(%arg0: i32, %arg1: i32, %arg2: i32) -> (i32, i32) {
    %c0_i32 = arith.constant 0 : i32
    return %arg1, %arg2 : i32, i32
  }
  func.func @transform_1(%arg0: i32, %arg1: i32, %arg2: i32) -> (i32, i32) {
    %c0_i32 = arith.constant 0 : i32
    return %arg2, %arg0 : i32, i32
  }
  func.func @transform_2(%arg0: i32, %arg1: i32, %arg2: i32) -> (i32, i32) {
    %c0_i32 = arith.constant 0 : i32
    %c0_i32_0 = arith.constant 0 : i32
    return %c0_i32, %arg0 : i32, i32
  }
  func.func @transform_3(%arg0: i32, %arg1: i32, %arg2: i32) -> (i32, i32) {
    %c0_i32 = arith.constant 0 : i32
    return %arg1, %arg0 : i32, i32
  }
  func.func @transform_4(%arg0: i32, %arg1: i32, %arg2: i32) -> (i32, i32) {
    %c0_i32 = arith.constant 0 : i32
    return %arg1, %arg0 : i32, i32
  }
}

module attributes {stable_mosaic.version = 11 : i64} {
  func.func @kernel(%arg0: i32, %arg1: i32, %arg2: i32, %arg3: memref<32x384xbf16, #tpu.memory_space<vmem>>, %arg4: memref<384x128xbf16, #tpu.memory_space<vmem>>, %arg5: memref<1x128xf32, #tpu.memory_space<vmem>>, %arg6: memref<32x128xf32, #tpu.memory_space<vmem>>, %arg7: memref<32x128xf32, #tpu.memory_space<vmem>>, %arg8: memref<32x128xf32, #tpu.memory_space<vmem>>) attributes {dimension_semantics = [#tpu.dimension_semantics<parallel>, #tpu.dimension_semantics<parallel>, #tpu.dimension_semantics<arbitrary>], iteration_bounds = array<i64: 1, 1, 3>, scalar_prefetch = 0 : i64, scratch_operands = 1 : i64, tpu.core_type = #tpu.core_type<tc>, window_params = [{transform_indices = @transform_0, window_bounds = array<i64: 32, 384>}, {transform_indices = @transform_1, window_bounds = array<i64: 384, 128>}, {transform_indices = @transform_2, window_bounds = array<i64: 1, 128>}, {transform_indices = @transform_3, window_bounds = array<i64: 32, 128>}, {transform_indices = @transform_4, window_bounds = array<i64: 32, 128>}]} {
    %c0_i32 = arith.constant 0 : i32
    %0 = arith.cmpi eq, %arg2, %c0_i32 : i32
    %1 = arith.extui %0 : i1 to i32
    %c0_i32_0 = arith.constant 0 : i32
    %2 = arith.cmpi ne, %1, %c0_i32_0 : i32
    scf.if %2 {
      %cst_9 = arith.constant 0.000000e+00 : f32
      %12 = vector.broadcast %cst_9 : f32 to vector<32x128xf32>
      %c0_10 = arith.constant 0 : index
      %c0_11 = arith.constant 0 : index
      %13 = vector.load %arg8[%c0_10, %c0_11] : memref<32x128xf32, #tpu.memory_space<vmem>>, vector<32x128xf32>
      tpu.vector_store %arg8[%c0_10, %c0_11], %12 {strides = array<i32>} : memref<32x128xf32, #tpu.memory_space<vmem>>, vector<32x128xf32>,
    } else {
    }
    %c0 = arith.constant 0 : index
    %c0_1 = arith.constant 0 : index
    %3 = vector.load %arg8[%c0, %c0_1] : memref<32x128xf32, #tpu.memory_space<vmem>>, vector<32x128xf32>
    %c0_2 = arith.constant 0 : index
    %c0_3 = arith.constant 0 : index
    %4 = vector.load %arg3[%c0_2, %c0_3] : memref<32x384xbf16, #tpu.memory_space<vmem>>, vector<32x384xbf16>
    %c0_4 = arith.constant 0 : index
    %c0_5 = arith.constant 0 : index
    %5 = vector.load %arg4[%c0_4, %c0_5] : memref<384x128xbf16, #tpu.memory_space<vmem>>, vector<384x128xbf16>
    %cst = arith.constant dense<0.000000e+00> : vector<32x128xf32>
    %6 = tpu.matmul %4, %5, %cst {dimension_numbers = #tpu.dot_dimension_numbers<[1], [0], [0], [1], [0, 0, 1, 1], [], []>} : vector<32x384xbf16>, vector<384x128xbf16>, vector<32x128xf32> -> vector<32x128xf32>
    %7 = arith.addf %3, %6 : vector<32x128xf32>
    %c0_6 = arith.constant 0 : index
    %c0_7 = arith.constant 0 : index
    %8 = vector.load %arg8[%c0_6, %c0_7] : memref<32x128xf32, #tpu.memory_space<vmem>>, vector<32x128xf32>
    tpu.vector_store %arg8[%c0_6, %c0_7], %7 {strides = array<i32>} : memref<32x128xf32, #tpu.memory_space<vmem>>, vector<32x128xf32>,
    %c2_i32 = arith.constant 2 : i32
    %9 = arith.cmpi eq, %arg2, %c2_i32 : i32
    %10 = arith.extui %9 : i1 to i32
    %c0_i32_8 = arith.constant 0 : i32
    %11 = arith.cmpi ne, %10, %c0_i32_8 : i32
    scf.if %11 {
      %c0_9 = arith.constant 0 : index
      %c0_10 = arith.constant 0 : index
      %12 = vector.load %arg8[%c0_9, %c0_10] : memref<32x128xf32, #tpu.memory_space<vmem>>, vector<32x128xf32>
      %c0_11 = arith.constant 0 : index
      %c0_12 = arith.constant 0 : index
      %13 = vector.load %arg5[%c0_11, %c0_12] : memref<1x128xf32, #tpu.memory_space<vmem>>, vector<1x128xf32>
      %14 = vector.broadcast %13 : vector<1x128xf32> to vector<32x128xf32>
      %15 = arith.addf %12, %14 : vector<32x128xf32>
      %c0_13 = arith.constant 0 : index
      %c0_14 = arith.constant 0 : index
      %16 = vector.load %arg6[%c0_13, %c0_14] : memref<32x128xf32, #tpu.memory_space<vmem>>, vector<32x128xf32>
      %17 = arith.addf %15, %16 : vector<32x128xf32>
      %cst_15 = arith.constant 0.000000e+00 : f32
      %18 = vector.broadcast %cst_15 : f32 to vector<32x128xf32>
      %19 = arith.maximumf %17, %18 : vector<32x128xf32>
      %c0_16 = arith.constant 0 : index
      %c0_17 = arith.constant 0 : index
      %20 = vector.load %arg7[%c0_16, %c0_17] : memref<32x128xf32, #tpu.memory_space<vmem>>, vector<32x128xf32>
      tpu.vector_store %arg7[%c0_16, %c0_17], %19 {strides = array<i32>} : memref<32x128xf32, #tpu.memory_space<vmem>>, vector<32x128xf32>,
    } else {
    }
    return
  }
  func.func @transform_0(%arg0: i32, %arg1: i32, %arg2: i32) -> (i32, i32) {
    %c0_i32 = arith.constant 0 : i32
    return %arg1, %arg2 : i32, i32
  }
  func.func @transform_1(%arg0: i32, %arg1: i32, %arg2: i32) -> (i32, i32) {
    %c0_i32 = arith.constant 0 : i32
    return %arg2, %arg0 : i32, i32
  }
  func.func @transform_2(%arg0: i32, %arg1: i32, %arg2: i32) -> (i32, i32) {
    %c0_i32 = arith.constant 0 : i32
    %c0_i32_0 = arith.constant 0 : i32
    return %c0_i32, %arg0 : i32, i32
  }
  func.func @transform_3(%arg0: i32, %arg1: i32, %arg2: i32) -> (i32, i32) {
    %c0_i32 = arith.constant 0 : i32
    return %arg1, %arg0 : i32, i32
  }
  func.func @transform_4(%arg0: i32, %arg1: i32, %arg2: i32) -> (i32, i32) {
    %c0_i32 = arith.constant 0 : i32
    return %arg1, %arg0 : i32, i32
  }
}

module attributes {stable_mosaic.version = 11 : i64} {
  func.func @kernel(%arg0: i32, %arg1: i32, %arg2: i32, %arg3: memref<8x384xbf16, #tpu.memory_space<vmem>>, %arg4: memref<384x128xbf16, #tpu.memory_space<vmem>>, %arg5: memref<1x128xf32, #tpu.memory_space<vmem>>, %arg6: memref<8x128xf32, #tpu.memory_space<vmem>>, %arg7: memref<8x128xf32, #tpu.memory_space<vmem>>) attributes {dimension_semantics = [#tpu.dimension_semantics<parallel>, #tpu.dimension_semantics<parallel>, #tpu.dimension_semantics<arbitrary>], iteration_bounds = array<i64: 1, 1, 3>, scalar_prefetch = 0 : i64, scratch_operands = 1 : i64, tpu.core_type = #tpu.core_type<tc>, window_params = [{transform_indices = @transform_0, window_bounds = array<i64: 8, 384>}, {transform_indices = @transform_1, window_bounds = array<i64: 384, 128>}, {transform_indices = @transform_2, window_bounds = array<i64: 1, 128>}, {transform_indices = @transform_3, window_bounds = array<i64: 8, 128>}]} {
    %c0_i32 = arith.constant 0 : i32
    %0 = arith.cmpi eq, %arg2, %c0_i32 : i32
    %1 = arith.extui %0 : i1 to i32
    %c0_i32_0 = arith.constant 0 : i32
    %2 = arith.cmpi ne, %1, %c0_i32_0 : i32
    scf.if %2 {
      %cst_9 = arith.constant 0.000000e+00 : f32
      %12 = vector.broadcast %cst_9 : f32 to vector<8x128xf32>
      %c0_10 = arith.constant 0 : index
      %c0_11 = arith.constant 0 : index
      %13 = vector.load %arg7[%c0_10, %c0_11] : memref<8x128xf32, #tpu.memory_space<vmem>>, vector<8x128xf32>
      tpu.vector_store %arg7[%c0_10, %c0_11], %12 {strides = array<i32>} : memref<8x128xf32, #tpu.memory_space<vmem>>, vector<8x128xf32>,
    } else {
    }
    %c0 = arith.constant 0 : index
    %c0_1 = arith.constant 0 : index
    %3 = vector.load %arg7[%c0, %c0_1] : memref<8x128xf32, #tpu.memory_space<vmem>>, vector<8x128xf32>
    %c0_2 = arith.constant 0 : index
    %c0_3 = arith.constant 0 : index
    %4 = vector.load %arg3[%c0_2, %c0_3] : memref<8x384xbf16, #tpu.memory_space<vmem>>, vector<8x384xbf16>
    %c0_4 = arith.constant 0 : index
    %c0_5 = arith.constant 0 : index
    %5 = vector.load %arg4[%c0_4, %c0_5] : memref<384x128xbf16, #tpu.memory_space<vmem>>, vector<384x128xbf16>
    %cst = arith.constant dense<0.000000e+00> : vector<8x128xf32>
    %6 = tpu.matmul %4, %5, %cst {dimension_numbers = #tpu.dot_dimension_numbers<[1], [0], [0], [1], [0, 0, 1, 1], [], []>} : vector<8x384xbf16>, vector<384x128xbf16>, vector<8x128xf32> -> vector<8x128xf32>
    %7 = arith.addf %3, %6 : vector<8x128xf32>
    %c0_6 = arith.constant 0 : index
    %c0_7 = arith.constant 0 : index
    %8 = vector.load %arg7[%c0_6, %c0_7] : memref<8x128xf32, #tpu.memory_space<vmem>>, vector<8x128xf32>
    tpu.vector_store %arg7[%c0_6, %c0_7], %7 {strides = array<i32>} : memref<8x128xf32, #tpu.memory_space<vmem>>, vector<8x128xf32>,
    %c2_i32 = arith.constant 2 : i32
    %9 = arith.cmpi eq, %arg2, %c2_i32 : i32
    %10 = arith.extui %9 : i1 to i32
    %c0_i32_8 = arith.constant 0 : i32
    %11 = arith.cmpi ne, %10, %c0_i32_8 : i32
    scf.if %11 {
      %c0_9 = arith.constant 0 : index
      %c0_10 = arith.constant 0 : index
      %12 = vector.load %arg7[%c0_9, %c0_10] : memref<8x128xf32, #tpu.memory_space<vmem>>, vector<8x128xf32>
      %c0_11 = arith.constant 0 : index
      %c0_12 = arith.constant 0 : index
      %13 = vector.load %arg5[%c0_11, %c0_12] : memref<1x128xf32, #tpu.memory_space<vmem>>, vector<1x128xf32>
      %14 = vector.broadcast %13 : vector<1x128xf32> to vector<8x128xf32>
      %15 = arith.addf %12, %14 : vector<8x128xf32>
      %cst_13 = arith.constant 0.000000e+00 : f32
      %16 = vector.broadcast %cst_13 : f32 to vector<8x128xf32>
      %17 = arith.maximumf %15, %16 : vector<8x128xf32>
      %c0_14 = arith.constant 0 : index
      %c0_15 = arith.constant 0 : index
      %18 = vector.load %arg6[%c0_14, %c0_15] : memref<8x128xf32, #tpu.memory_space<vmem>>, vector<8x128xf32>
      tpu.vector_store %arg6[%c0_14, %c0_15], %17 {strides = array<i32>} : memref<8x128xf32, #tpu.memory_space<vmem>>, vector<8x128xf32>,
    } else {
    }
    return
  }
  func.func @transform_0(%arg0: i32, %arg1: i32, %arg2: i32) -> (i32, i32) {
    %c0_i32 = arith.constant 0 : i32
    return %arg1, %arg2 : i32, i32
  }
  func.func @transform_1(%arg0: i32, %arg1: i32, %arg2: i32) -> (i32, i32) {
    %c0_i32 = arith.constant 0 : i32
    return %arg2, %arg0 : i32, i32
  }
  func.func @transform_2(%arg0: i32, %arg1: i32, %arg2: i32) -> (i32, i32) {
    %c0_i32 = arith.constant 0 : i32
    %c0_i32_0 = arith.constant 0 : i32
    return %c0_i32, %arg0 : i32, i32
  }
  func.func @transform_3(%arg0: i32, %arg1: i32, %arg2: i32) -> (i32, i32) {
    %c0_i32 = arith.constant 0 : i32
    return %arg1, %arg0 : i32, i32
  }
}

module attributes {stable_mosaic.version = 11 : i64} {
  func.func @kernel(%arg0: i32, %arg1: i32, %arg2: i32, %arg3: memref<8x128xbf16, #tpu.memory_space<vmem>>, %arg4: memref<128x128xbf16, #tpu.memory_space<vmem>>, %arg5: memref<1x128xf32, #tpu.memory_space<vmem>>, %arg6: memref<8x128xf32, #tpu.memory_space<vmem>>, %arg7: memref<8x128xf32, #tpu.memory_space<vmem>>) attributes {dimension_semantics = [#tpu.dimension_semantics<parallel>, #tpu.dimension_semantics<parallel>, #tpu.dimension_semantics<arbitrary>], iteration_bounds = array<i64: 1, 1, 1>, scalar_prefetch = 0 : i64, scratch_operands = 1 : i64, tpu.core_type = #tpu.core_type<tc>, window_params = [{transform_indices = @transform_0, window_bounds = array<i64: 8, 128>}, {transform_indices = @transform_1, window_bounds = array<i64: 128, 128>}, {transform_indices = @transform_2, window_bounds = array<i64: 1, 128>}, {transform_indices = @transform_3, window_bounds = array<i64: 8, 128>}]} {
    %c0_i32 = arith.constant 0 : i32
    %0 = arith.cmpi eq, %arg2, %c0_i32 : i32
    %1 = arith.extui %0 : i1 to i32
    %c0_i32_0 = arith.constant 0 : i32
    %2 = arith.cmpi ne, %1, %c0_i32_0 : i32
    scf.if %2 {
      %cst_10 = arith.constant 0.000000e+00 : f32
      %12 = vector.broadcast %cst_10 : f32 to vector<8x128xf32>
      %c0_11 = arith.constant 0 : index
      %c0_12 = arith.constant 0 : index
      %13 = vector.load %arg7[%c0_11, %c0_12] : memref<8x128xf32, #tpu.memory_space<vmem>>, vector<8x128xf32>
      tpu.vector_store %arg7[%c0_11, %c0_12], %12 {strides = array<i32>} : memref<8x128xf32, #tpu.memory_space<vmem>>, vector<8x128xf32>,
    } else {
    }
    %c0 = arith.constant 0 : index
    %c0_1 = arith.constant 0 : index
    %3 = vector.load %arg7[%c0, %c0_1] : memref<8x128xf32, #tpu.memory_space<vmem>>, vector<8x128xf32>
    %c0_2 = arith.constant 0 : index
    %c0_3 = arith.constant 0 : index
    %4 = vector.load %arg3[%c0_2, %c0_3] : memref<8x128xbf16, #tpu.memory_space<vmem>>, vector<8x128xbf16>
    %c0_4 = arith.constant 0 : index
    %c0_5 = arith.constant 0 : index
    %5 = vector.load %arg4[%c0_4, %c0_5] : memref<128x128xbf16, #tpu.memory_space<vmem>>, vector<128x128xbf16>
    %cst = arith.constant dense<0.000000e+00> : vector<8x128xf32>
    %6 = tpu.matmul %4, %5, %cst {dimension_numbers = #tpu.dot_dimension_numbers<[1], [0], [0], [1], [0, 0, 1, 1], [], []>} : vector<8x128xbf16>, vector<128x128xbf16>, vector<8x128xf32> -> vector<8x128xf32>
    %7 = arith.addf %3, %6 : vector<8x128xf32>
    %c0_6 = arith.constant 0 : index
    %c0_7 = arith.constant 0 : index
    %8 = vector.load %arg7[%c0_6, %c0_7] : memref<8x128xf32, #tpu.memory_space<vmem>>, vector<8x128xf32>
    tpu.vector_store %arg7[%c0_6, %c0_7], %7 {strides = array<i32>} : memref<8x128xf32, #tpu.memory_space<vmem>>, vector<8x128xf32>,
    %c0_i32_8 = arith.constant 0 : i32
    %9 = arith.cmpi eq, %arg2, %c0_i32_8 : i32
    %10 = arith.extui %9 : i1 to i32
    %c0_i32_9 = arith.constant 0 : i32
    %11 = arith.cmpi ne, %10, %c0_i32_9 : i32
    scf.if %11 {
      %c0_10 = arith.constant 0 : index
      %c0_11 = arith.constant 0 : index
      %12 = vector.load %arg7[%c0_10, %c0_11] : memref<8x128xf32, #tpu.memory_space<vmem>>, vector<8x128xf32>
      %c0_12 = arith.constant 0 : index
      %c0_13 = arith.constant 0 : index
      %13 = vector.load %arg5[%c0_12, %c0_13] : memref<1x128xf32, #tpu.memory_space<vmem>>, vector<1x128xf32>
      %14 = vector.broadcast %13 : vector<1x128xf32> to vector<8x128xf32>
      %15 = arith.addf %12, %14 : vector<8x128xf32>
      %c0_14 = arith.constant 0 : index
      %c0_15 = arith.constant 0 : index
      %16 = vector.load %arg6[%c0_14, %c0_15] : memref<8x128xf32, #tpu.memory_space<vmem>>, vector<8x128xf32>
      tpu.vector_store %arg6[%c0_14, %c0_15], %15 {strides = array<i32>} : memref<8x128xf32, #tpu.memory_space<vmem>>, vector<8x128xf32>,
    } else {
    }
    return
  }
  func.func @transform_0(%arg0: i32, %arg1: i32, %arg2: i32) -> (i32, i32) {
    %c0_i32 = arith.constant 0 : i32
    return %arg1, %arg2 : i32, i32
  }
  func.func @transform_1(%arg0: i32, %arg1: i32, %arg2: i32) -> (i32, i32) {
    %c0_i32 = arith.constant 0 : i32
    return %arg2, %arg0 : i32, i32
  }
  func.func @transform_2(%arg0: i32, %arg1: i32, %arg2: i32) -> (i32, i32) {
    %c0_i32 = arith.constant 0 : i32
    %c0_i32_0 = arith.constant 0 : i32
    return %c0_i32, %arg0 : i32, i32
  }
  func.func @transform_3(%arg0: i32, %arg1: i32, %arg2: i32) -> (i32, i32) {
    %c0_i32 = arith.constant 0 : i32
    return %arg1, %arg0 : i32, i32
  }
}

module attributes {stable_mosaic.version = 11 : i64} {
  func.func @kernel(%arg0: i32, %arg1: i32, %arg2: i32, %arg3: memref<8x384xbf16, #tpu.memory_space<vmem>>, %arg4: memref<384x128xbf16, #tpu.memory_space<vmem>>, %arg5: memref<1x128xf32, #tpu.memory_space<vmem>>, %arg6: memref<8x128xf32, #tpu.memory_space<vmem>>, %arg7: memref<8x128xf32, #tpu.memory_space<vmem>>, %arg8: memref<8x128xf32, #tpu.memory_space<vmem>>) attributes {dimension_semantics = [#tpu.dimension_semantics<parallel>, #tpu.dimension_semantics<parallel>, #tpu.dimension_semantics<arbitrary>], iteration_bounds = array<i64: 1, 1, 3>, scalar_prefetch = 0 : i64, scratch_operands = 1 : i64, tpu.core_type = #tpu.core_type<tc>, window_params = [{transform_indices = @transform_0, window_bounds = array<i64: 8, 384>}, {transform_indices = @transform_1, window_bounds = array<i64: 384, 128>}, {transform_indices = @transform_2, window_bounds = array<i64: 1, 128>}, {transform_indices = @transform_3, window_bounds = array<i64: 8, 128>}, {transform_indices = @transform_4, window_bounds = array<i64: 8, 128>}]} {
    %c0_i32 = arith.constant 0 : i32
    %0 = arith.cmpi eq, %arg2, %c0_i32 : i32
    %1 = arith.extui %0 : i1 to i32
    %c0_i32_0 = arith.constant 0 : i32
    %2 = arith.cmpi ne, %1, %c0_i32_0 : i32
    scf.if %2 {
      %cst_9 = arith.constant 0.000000e+00 : f32
      %12 = vector.broadcast %cst_9 : f32 to vector<8x128xf32>
      %c0_10 = arith.constant 0 : index
      %c0_11 = arith.constant 0 : index
      %13 = vector.load %arg8[%c0_10, %c0_11] : memref<8x128xf32, #tpu.memory_space<vmem>>, vector<8x128xf32>
      tpu.vector_store %arg8[%c0_10, %c0_11], %12 {strides = array<i32>} : memref<8x128xf32, #tpu.memory_space<vmem>>, vector<8x128xf32>,
    } else {
    }
    %c0 = arith.constant 0 : index
    %c0_1 = arith.constant 0 : index
    %3 = vector.load %arg8[%c0, %c0_1] : memref<8x128xf32, #tpu.memory_space<vmem>>, vector<8x128xf32>
    %c0_2 = arith.constant 0 : index
    %c0_3 = arith.constant 0 : index
    %4 = vector.load %arg3[%c0_2, %c0_3] : memref<8x384xbf16, #tpu.memory_space<vmem>>, vector<8x384xbf16>
    %c0_4 = arith.constant 0 : index
    %c0_5 = arith.constant 0 : index
    %5 = vector.load %arg4[%c0_4, %c0_5] : memref<384x128xbf16, #tpu.memory_space<vmem>>, vector<384x128xbf16>
    %cst = arith.constant dense<0.000000e+00> : vector<8x128xf32>
    %6 = tpu.matmul %4, %5, %cst {dimension_numbers = #tpu.dot_dimension_numbers<[1], [0], [0], [1], [0, 0, 1, 1], [], []>} : vector<8x384xbf16>, vector<384x128xbf16>, vector<8x128xf32> -> vector<8x128xf32>
    %7 = arith.addf %3, %6 : vector<8x128xf32>
    %c0_6 = arith.constant 0 : index
    %c0_7 = arith.constant 0 : index
    %8 = vector.load %arg8[%c0_6, %c0_7] : memref<8x128xf32, #tpu.memory_space<vmem>>, vector<8x128xf32>
    tpu.vector_store %arg8[%c0_6, %c0_7], %7 {strides = array<i32>} : memref<8x128xf32, #tpu.memory_space<vmem>>, vector<8x128xf32>,
    %c2_i32 = arith.constant 2 : i32
    %9 = arith.cmpi eq, %arg2, %c2_i32 : i32
    %10 = arith.extui %9 : i1 to i32
    %c0_i32_8 = arith.constant 0 : i32
    %11 = arith.cmpi ne, %10, %c0_i32_8 : i32
    scf.if %11 {
      %c0_9 = arith.constant 0 : index
      %c0_10 = arith.constant 0 : index
      %12 = vector.load %arg8[%c0_9, %c0_10] : memref<8x128xf32, #tpu.memory_space<vmem>>, vector<8x128xf32>
      %c0_11 = arith.constant 0 : index
      %c0_12 = arith.constant 0 : index
      %13 = vector.load %arg5[%c0_11, %c0_12] : memref<1x128xf32, #tpu.memory_space<vmem>>, vector<1x128xf32>
      %14 = vector.broadcast %13 : vector<1x128xf32> to vector<8x128xf32>
      %15 = arith.addf %12, %14 : vector<8x128xf32>
      %c0_13 = arith.constant 0 : index
      %c0_14 = arith.constant 0 : index
      %16 = vector.load %arg6[%c0_13, %c0_14] : memref<8x128xf32, #tpu.memory_space<vmem>>, vector<8x128xf32>
      %17 = arith.addf %15, %16 : vector<8x128xf32>
      %cst_15 = arith.constant 0.000000e+00 : f32
      %18 = vector.broadcast %cst_15 : f32 to vector<8x128xf32>
      %19 = arith.maximumf %17, %18 : vector<8x128xf32>
      %c0_16 = arith.constant 0 : index
      %c0_17 = arith.constant 0 : index
      %20 = vector.load %arg7[%c0_16, %c0_17] : memref<8x128xf32, #tpu.memory_space<vmem>>, vector<8x128xf32>
      tpu.vector_store %arg7[%c0_16, %c0_17], %19 {strides = array<i32>} : memref<8x128xf32, #tpu.memory_space<vmem>>, vector<8x128xf32>,
    } else {
    }
    return
  }
  func.func @transform_0(%arg0: i32, %arg1: i32, %arg2: i32) -> (i32, i32) {
    %c0_i32 = arith.constant 0 : i32
    return %arg1, %arg2 : i32, i32
  }
  func.func @transform_1(%arg0: i32, %arg1: i32, %arg2: i32) -> (i32, i32) {
    %c0_i32 = arith.constant 0 : i32
    return %arg2, %arg0 : i32, i32
  }
  func.func @transform_2(%arg0: i32, %arg1: i32, %arg2: i32) -> (i32, i32) {
    %c0_i32 = arith.constant 0 : i32
    %c0_i32_0 = arith.constant 0 : i32
    return %c0_i32, %arg0 : i32, i32
  }
  func.func @transform_3(%arg0: i32, %arg1: i32, %arg2: i32) -> (i32, i32) {
    %c0_i32 = arith.constant 0 : i32
    return %arg1, %arg0 : i32, i32
  }
  func.func @transform_4(%arg0: i32, %arg1: i32, %arg2: i32) -> (i32, i32) {
    %c0_i32 = arith.constant 0 : i32
    return %arg1, %arg0 : i32, i32
  }
}

module attributes {stable_mosaic.version = 11 : i64} {
  func.func @kernel(%arg0: i32, %arg1: i32, %arg2: i32, %arg3: memref<8x384xbf16, #tpu.memory_space<vmem>>, %arg4: memref<384x256xbf16, #tpu.memory_space<vmem>>, %arg5: memref<1x256xf32, #tpu.memory_space<vmem>>, %arg6: memref<8x256xf32, #tpu.memory_space<vmem>>, %arg7: memref<8x256xf32, #tpu.memory_space<vmem>>) attributes {dimension_semantics = [#tpu.dimension_semantics<parallel>, #tpu.dimension_semantics<parallel>, #tpu.dimension_semantics<arbitrary>], iteration_bounds = array<i64: 1, 1, 3>, scalar_prefetch = 0 : i64, scratch_operands = 1 : i64, tpu.core_type = #tpu.core_type<tc>, window_params = [{transform_indices = @transform_0, window_bounds = array<i64: 8, 384>}, {transform_indices = @transform_1, window_bounds = array<i64: 384, 256>}, {transform_indices = @transform_2, window_bounds = array<i64: 1, 256>}, {transform_indices = @transform_3, window_bounds = array<i64: 8, 256>}]} {
    %c0_i32 = arith.constant 0 : i32
    %0 = arith.cmpi eq, %arg2, %c0_i32 : i32
    %1 = arith.extui %0 : i1 to i32
    %c0_i32_0 = arith.constant 0 : i32
    %2 = arith.cmpi ne, %1, %c0_i32_0 : i32
    scf.if %2 {
      %cst_9 = arith.constant 0.000000e+00 : f32
      %12 = vector.broadcast %cst_9 : f32 to vector<8x256xf32>
      %c0_10 = arith.constant 0 : index
      %c0_11 = arith.constant 0 : index
      %13 = vector.load %arg7[%c0_10, %c0_11] : memref<8x256xf32, #tpu.memory_space<vmem>>, vector<8x256xf32>
      tpu.vector_store %arg7[%c0_10, %c0_11], %12 {strides = array<i32>} : memref<8x256xf32, #tpu.memory_space<vmem>>, vector<8x256xf32>,
    } else {
    }
    %c0 = arith.constant 0 : index
    %c0_1 = arith.constant 0 : index
    %3 = vector.load %arg7[%c0, %c0_1] : memref<8x256xf32, #tpu.memory_space<vmem>>, vector<8x256xf32>
    %c0_2 = arith.constant 0 : index
    %c0_3 = arith.constant 0 : index
    %4 = vector.load %arg3[%c0_2, %c0_3] : memref<8x384xbf16, #tpu.memory_space<vmem>>, vector<8x384xbf16>
    %c0_4 = arith.constant 0 : index
    %c0_5 = arith.constant 0 : index
    %5 = vector.load %arg4[%c0_4, %c0_5] : memref<384x256xbf16, #tpu.memory_space<vmem>>, vector<384x256xbf16>
    %cst = arith.constant dense<0.000000e+00> : vector<8x256xf32>
    %6 = tpu.matmul %4, %5, %cst {dimension_numbers = #tpu.dot_dimension_numbers<[1], [0], [0], [1], [0, 0, 1, 1], [], []>} : vector<8x384xbf16>, vector<384x256xbf16>, vector<8x256xf32> -> vector<8x256xf32>
    %7 = arith.addf %3, %6 : vector<8x256xf32>
    %c0_6 = arith.constant 0 : index
    %c0_7 = arith.constant 0 : index
    %8 = vector.load %arg7[%c0_6, %c0_7] : memref<8x256xf32, #tpu.memory_space<vmem>>, vector<8x256xf32>
    tpu.vector_store %arg7[%c0_6, %c0_7], %7 {strides = array<i32>} : memref<8x256xf32, #tpu.memory_space<vmem>>, vector<8x256xf32>,
    %c2_i32 = arith.constant 2 : i32
    %9 = arith.cmpi eq, %arg2, %c2_i32 : i32
    %10 = arith.extui %9 : i1 to i32
    %c0_i32_8 = arith.constant 0 : i32
    %11 = arith.cmpi ne, %10, %c0_i32_8 : i32
    scf.if %11 {
      %c0_9 = arith.constant 0 : index
      %c0_10 = arith.constant 0 : index
      %12 = vector.load %arg7[%c0_9, %c0_10] : memref<8x256xf32, #tpu.memory_space<vmem>>, vector<8x256xf32>
      %c0_11 = arith.constant 0 : index
      %c0_12 = arith.constant 0 : index
      %13 = vector.load %arg5[%c0_11, %c0_12] : memref<1x256xf32, #tpu.memory_space<vmem>>, vector<1x256xf32>
      %14 = vector.broadcast %13 : vector<1x256xf32> to vector<8x256xf32>
      %15 = arith.addf %12, %14 : vector<8x256xf32>
      %cst_13 = arith.constant 0.000000e+00 : f32
      %16 = vector.broadcast %cst_13 : f32 to vector<8x256xf32>
      %17 = arith.maximumf %15, %16 : vector<8x256xf32>
      %c0_14 = arith.constant 0 : index
      %c0_15 = arith.constant 0 : index
      %18 = vector.load %arg6[%c0_14, %c0_15] : memref<8x256xf32, #tpu.memory_space<vmem>>, vector<8x256xf32>
      tpu.vector_store %arg6[%c0_14, %c0_15], %17 {strides = array<i32>} : memref<8x256xf32, #tpu.memory_space<vmem>>, vector<8x256xf32>,
    } else {
    }
    return
  }
  func.func @transform_0(%arg0: i32, %arg1: i32, %arg2: i32) -> (i32, i32) {
    %c0_i32 = arith.constant 0 : i32
    return %arg1, %arg2 : i32, i32
  }
  func.func @transform_1(%arg0: i32, %arg1: i32, %arg2: i32) -> (i32, i32) {
    %c0_i32 = arith.constant 0 : i32
    return %arg2, %arg0 : i32, i32
  }
  func.func @transform_2(%arg0: i32, %arg1: i32, %arg2: i32) -> (i32, i32) {
    %c0_i32 = arith.constant 0 : i32
    %c0_i32_0 = arith.constant 0 : i32
    return %c0_i32, %arg0 : i32, i32
  }
  func.func @transform_3(%arg0: i32, %arg1: i32, %arg2: i32) -> (i32, i32) {
    %c0_i32 = arith.constant 0 : i32
    return %arg1, %arg0 : i32, i32
  }
}

module attributes {stable_mosaic.version = 11 : i64} {
  func.func @kernel(%arg0: i32, %arg1: i32, %arg2: i32, %arg3: memref<8x128xbf16, #tpu.memory_space<vmem>>, %arg4: memref<128x256xbf16, #tpu.memory_space<vmem>>, %arg5: memref<1x256xf32, #tpu.memory_space<vmem>>, %arg6: memref<8x256xf32, #tpu.memory_space<vmem>>, %arg7: memref<8x256xf32, #tpu.memory_space<vmem>>) attributes {dimension_semantics = [#tpu.dimension_semantics<parallel>, #tpu.dimension_semantics<parallel>, #tpu.dimension_semantics<arbitrary>], iteration_bounds = array<i64: 1, 1, 1>, scalar_prefetch = 0 : i64, scratch_operands = 1 : i64, tpu.core_type = #tpu.core_type<tc>, window_params = [{transform_indices = @transform_0, window_bounds = array<i64: 8, 128>}, {transform_indices = @transform_1, window_bounds = array<i64: 128, 256>}, {transform_indices = @transform_2, window_bounds = array<i64: 1, 256>}, {transform_indices = @transform_3, window_bounds = array<i64: 8, 256>}]} {
    %c0_i32 = arith.constant 0 : i32
    %0 = arith.cmpi eq, %arg2, %c0_i32 : i32
    %1 = arith.extui %0 : i1 to i32
    %c0_i32_0 = arith.constant 0 : i32
    %2 = arith.cmpi ne, %1, %c0_i32_0 : i32
    scf.if %2 {
      %cst_10 = arith.constant 0.000000e+00 : f32
      %12 = vector.broadcast %cst_10 : f32 to vector<8x256xf32>
      %c0_11 = arith.constant 0 : index
      %c0_12 = arith.constant 0 : index
      %13 = vector.load %arg7[%c0_11, %c0_12] : memref<8x256xf32, #tpu.memory_space<vmem>>, vector<8x256xf32>
      tpu.vector_store %arg7[%c0_11, %c0_12], %12 {strides = array<i32>} : memref<8x256xf32, #tpu.memory_space<vmem>>, vector<8x256xf32>,
    } else {
    }
    %c0 = arith.constant 0 : index
    %c0_1 = arith.constant 0 : index
    %3 = vector.load %arg7[%c0, %c0_1] : memref<8x256xf32, #tpu.memory_space<vmem>>, vector<8x256xf32>
    %c0_2 = arith.constant 0 : index
    %c0_3 = arith.constant 0 : index
    %4 = vector.load %arg3[%c0_2, %c0_3] : memref<8x128xbf16, #tpu.memory_space<vmem>>, vector<8x128xbf16>
    %c0_4 = arith.constant 0 : index
    %c0_5 = arith.constant 0 : index
    %5 = vector.load %arg4[%c0_4, %c0_5] : memref<128x256xbf16, #tpu.memory_space<vmem>>, vector<128x256xbf16>
    %cst = arith.constant dense<0.000000e+00> : vector<8x256xf32>
    %6 = tpu.matmul %4, %5, %cst {dimension_numbers = #tpu.dot_dimension_numbers<[1], [0], [0], [1], [0, 0, 1, 1], [], []>} : vector<8x128xbf16>, vector<128x256xbf16>, vector<8x256xf32> -> vector<8x256xf32>
    %7 = arith.addf %3, %6 : vector<8x256xf32>
    %c0_6 = arith.constant 0 : index
    %c0_7 = arith.constant 0 : index
    %8 = vector.load %arg7[%c0_6, %c0_7] : memref<8x256xf32, #tpu.memory_space<vmem>>, vector<8x256xf32>
    tpu.vector_store %arg7[%c0_6, %c0_7], %7 {strides = array<i32>} : memref<8x256xf32, #tpu.memory_space<vmem>>, vector<8x256xf32>,
    %c0_i32_8 = arith.constant 0 : i32
    %9 = arith.cmpi eq, %arg2, %c0_i32_8 : i32
    %10 = arith.extui %9 : i1 to i32
    %c0_i32_9 = arith.constant 0 : i32
    %11 = arith.cmpi ne, %10, %c0_i32_9 : i32
    scf.if %11 {
      %c0_10 = arith.constant 0 : index
      %c0_11 = arith.constant 0 : index
      %12 = vector.load %arg7[%c0_10, %c0_11] : memref<8x256xf32, #tpu.memory_space<vmem>>, vector<8x256xf32>
      %c0_12 = arith.constant 0 : index
      %c0_13 = arith.constant 0 : index
      %13 = vector.load %arg5[%c0_12, %c0_13] : memref<1x256xf32, #tpu.memory_space<vmem>>, vector<1x256xf32>
      %14 = vector.broadcast %13 : vector<1x256xf32> to vector<8x256xf32>
      %15 = arith.addf %12, %14 : vector<8x256xf32>
      %c0_14 = arith.constant 0 : index
      %c0_15 = arith.constant 0 : index
      %16 = vector.load %arg6[%c0_14, %c0_15] : memref<8x256xf32, #tpu.memory_space<vmem>>, vector<8x256xf32>
      tpu.vector_store %arg6[%c0_14, %c0_15], %15 {strides = array<i32>} : memref<8x256xf32, #tpu.memory_space<vmem>>, vector<8x256xf32>,
    } else {
    }
    return
  }
  func.func @transform_0(%arg0: i32, %arg1: i32, %arg2: i32) -> (i32, i32) {
    %c0_i32 = arith.constant 0 : i32
    return %arg1, %arg2 : i32, i32
  }
  func.func @transform_1(%arg0: i32, %arg1: i32, %arg2: i32) -> (i32, i32) {
    %c0_i32 = arith.constant 0 : i32
    return %arg2, %arg0 : i32, i32
  }
  func.func @transform_2(%arg0: i32, %arg1: i32, %arg2: i32) -> (i32, i32) {
    %c0_i32 = arith.constant 0 : i32
    %c0_i32_0 = arith.constant 0 : i32
    return %c0_i32, %arg0 : i32, i32
  }
  func.func @transform_3(%arg0: i32, %arg1: i32, %arg2: i32) -> (i32, i32) {
    %c0_i32 = arith.constant 0 : i32
    return %arg1, %arg0 : i32, i32
  }
}

module attributes {stable_mosaic.version = 11 : i64} {
  func.func @kernel(%arg0: i32, %arg1: i32, %arg2: i32, %arg3: memref<8x384xbf16, #tpu.memory_space<vmem>>, %arg4: memref<384x256xbf16, #tpu.memory_space<vmem>>, %arg5: memref<1x256xf32, #tpu.memory_space<vmem>>, %arg6: memref<8x256xf32, #tpu.memory_space<vmem>>, %arg7: memref<8x256xf32, #tpu.memory_space<vmem>>) attributes {dimension_semantics = [#tpu.dimension_semantics<parallel>, #tpu.dimension_semantics<parallel>, #tpu.dimension_semantics<arbitrary>], iteration_bounds = array<i64: 1, 1, 6>, scalar_prefetch = 0 : i64, scratch_operands = 1 : i64, tpu.core_type = #tpu.core_type<tc>, window_params = [{transform_indices = @transform_0, window_bounds = array<i64: 8, 384>}, {transform_indices = @transform_1, window_bounds = array<i64: 384, 256>}, {transform_indices = @transform_2, window_bounds = array<i64: 1, 256>}, {transform_indices = @transform_3, window_bounds = array<i64: 8, 256>}]} {
    %c0_i32 = arith.constant 0 : i32
    %0 = arith.cmpi eq, %arg2, %c0_i32 : i32
    %1 = arith.extui %0 : i1 to i32
    %c0_i32_0 = arith.constant 0 : i32
    %2 = arith.cmpi ne, %1, %c0_i32_0 : i32
    scf.if %2 {
      %cst_9 = arith.constant 0.000000e+00 : f32
      %12 = vector.broadcast %cst_9 : f32 to vector<8x256xf32>
      %c0_10 = arith.constant 0 : index
      %c0_11 = arith.constant 0 : index
      %13 = vector.load %arg7[%c0_10, %c0_11] : memref<8x256xf32, #tpu.memory_space<vmem>>, vector<8x256xf32>
      tpu.vector_store %arg7[%c0_10, %c0_11], %12 {strides = array<i32>} : memref<8x256xf32, #tpu.memory_space<vmem>>, vector<8x256xf32>,
    } else {
    }
    %c0 = arith.constant 0 : index
    %c0_1 = arith.constant 0 : index
    %3 = vector.load %arg7[%c0, %c0_1] : memref<8x256xf32, #tpu.memory_space<vmem>>, vector<8x256xf32>
    %c0_2 = arith.constant 0 : index
    %c0_3 = arith.constant 0 : index
    %4 = vector.load %arg3[%c0_2, %c0_3] : memref<8x384xbf16, #tpu.memory_space<vmem>>, vector<8x384xbf16>
    %c0_4 = arith.constant 0 : index
    %c0_5 = arith.constant 0 : index
    %5 = vector.load %arg4[%c0_4, %c0_5] : memref<384x256xbf16, #tpu.memory_space<vmem>>, vector<384x256xbf16>
    %cst = arith.constant dense<0.000000e+00> : vector<8x256xf32>
    %6 = tpu.matmul %4, %5, %cst {dimension_numbers = #tpu.dot_dimension_numbers<[1], [0], [0], [1], [0, 0, 1, 1], [], []>} : vector<8x384xbf16>, vector<384x256xbf16>, vector<8x256xf32> -> vector<8x256xf32>
    %7 = arith.addf %3, %6 : vector<8x256xf32>
    %c0_6 = arith.constant 0 : index
    %c0_7 = arith.constant 0 : index
    %8 = vector.load %arg7[%c0_6, %c0_7] : memref<8x256xf32, #tpu.memory_space<vmem>>, vector<8x256xf32>
    tpu.vector_store %arg7[%c0_6, %c0_7], %7 {strides = array<i32>} : memref<8x256xf32, #tpu.memory_space<vmem>>, vector<8x256xf32>,
    %c5_i32 = arith.constant 5 : i32
    %9 = arith.cmpi eq, %arg2, %c5_i32 : i32
    %10 = arith.extui %9 : i1 to i32
    %c0_i32_8 = arith.constant 0 : i32
    %11 = arith.cmpi ne, %10, %c0_i32_8 : i32
    scf.if %11 {
      %c0_9 = arith.constant 0 : index
      %c0_10 = arith.constant 0 : index
      %12 = vector.load %arg7[%c0_9, %c0_10] : memref<8x256xf32, #tpu.memory_space<vmem>>, vector<8x256xf32>
      %c0_11 = arith.constant 0 : index
      %c0_12 = arith.constant 0 : index
      %13 = vector.load %arg5[%c0_11, %c0_12] : memref<1x256xf32, #tpu.memory_space<vmem>>, vector<1x256xf32>
      %14 = vector.broadcast %13 : vector<1x256xf32> to vector<8x256xf32>
      %15 = arith.addf %12, %14 : vector<8x256xf32>
      %cst_13 = arith.constant 0.000000e+00 : f32
      %16 = vector.broadcast %cst_13 : f32 to vector<8x256xf32>
      %17 = arith.maximumf %15, %16 : vector<8x256xf32>
      %c0_14 = arith.constant 0 : index
      %c0_15 = arith.constant 0 : index
      %18 = vector.load %arg6[%c0_14, %c0_15] : memref<8x256xf32, #tpu.memory_space<vmem>>, vector<8x256xf32>
      tpu.vector_store %arg6[%c0_14, %c0_15], %17 {strides = array<i32>} : memref<8x256xf32, #tpu.memory_space<vmem>>, vector<8x256xf32>,
    } else {
    }
    return
  }
  func.func @transform_0(%arg0: i32, %arg1: i32, %arg2: i32) -> (i32, i32) {
    %c0_i32 = arith.constant 0 : i32
    return %arg1, %arg2 : i32, i32
  }
  func.func @transform_1(%arg0: i32, %arg1: i32, %arg2: i32) -> (i32, i32) {
    %c0_i32 = arith.constant 0 : i32
    return %arg2, %arg0 : i32, i32
  }
  func.func @transform_2(%arg0: i32, %arg1: i32, %arg2: i32) -> (i32, i32) {
    %c0_i32 = arith.constant 0 : i32
    %c0_i32_0 = arith.constant 0 : i32
    return %c0_i32, %arg0 : i32, i32
  }
  func.func @transform_3(%arg0: i32, %arg1: i32, %arg2: i32) -> (i32, i32) {
    %c0_i32 = arith.constant 0 : i32
    return %arg1, %arg0 : i32, i32
  }
}

module attributes {stable_mosaic.version = 11 : i64} {
  func.func @kernel(%arg0: i32, %arg1: i32, %arg2: i32, %arg3: memref<8x384xbf16, #tpu.memory_space<vmem>>, %arg4: memref<384x256xbf16, #tpu.memory_space<vmem>>, %arg5: memref<1x256xf32, #tpu.memory_space<vmem>>, %arg6: memref<8x256xf32, #tpu.memory_space<vmem>>, %arg7: memref<8x256xf32, #tpu.memory_space<vmem>>, %arg8: memref<8x256xf32, #tpu.memory_space<vmem>>) attributes {dimension_semantics = [#tpu.dimension_semantics<parallel>, #tpu.dimension_semantics<parallel>, #tpu.dimension_semantics<arbitrary>], iteration_bounds = array<i64: 1, 1, 6>, scalar_prefetch = 0 : i64, scratch_operands = 1 : i64, tpu.core_type = #tpu.core_type<tc>, window_params = [{transform_indices = @transform_0, window_bounds = array<i64: 8, 384>}, {transform_indices = @transform_1, window_bounds = array<i64: 384, 256>}, {transform_indices = @transform_2, window_bounds = array<i64: 1, 256>}, {transform_indices = @transform_3, window_bounds = array<i64: 8, 256>}, {transform_indices = @transform_4, window_bounds = array<i64: 8, 256>}]} {
    %c0_i32 = arith.constant 0 : i32
    %0 = arith.cmpi eq, %arg2, %c0_i32 : i32
    %1 = arith.extui %0 : i1 to i32
    %c0_i32_0 = arith.constant 0 : i32
    %2 = arith.cmpi ne, %1, %c0_i32_0 : i32
    scf.if %2 {
      %cst_9 = arith.constant 0.000000e+00 : f32
      %12 = vector.broadcast %cst_9 : f32 to vector<8x256xf32>
      %c0_10 = arith.constant 0 : index
      %c0_11 = arith.constant 0 : index
      %13 = vector.load %arg8[%c0_10, %c0_11] : memref<8x256xf32, #tpu.memory_space<vmem>>, vector<8x256xf32>
      tpu.vector_store %arg8[%c0_10, %c0_11], %12 {strides = array<i32>} : memref<8x256xf32, #tpu.memory_space<vmem>>, vector<8x256xf32>,
    } else {
    }
    %c0 = arith.constant 0 : index
    %c0_1 = arith.constant 0 : index
    %3 = vector.load %arg8[%c0, %c0_1] : memref<8x256xf32, #tpu.memory_space<vmem>>, vector<8x256xf32>
    %c0_2 = arith.constant 0 : index
    %c0_3 = arith.constant 0 : index
    %4 = vector.load %arg3[%c0_2, %c0_3] : memref<8x384xbf16, #tpu.memory_space<vmem>>, vector<8x384xbf16>
    %c0_4 = arith.constant 0 : index
    %c0_5 = arith.constant 0 : index
    %5 = vector.load %arg4[%c0_4, %c0_5] : memref<384x256xbf16, #tpu.memory_space<vmem>>, vector<384x256xbf16>
    %cst = arith.constant dense<0.000000e+00> : vector<8x256xf32>
    %6 = tpu.matmul %4, %5, %cst {dimension_numbers = #tpu.dot_dimension_numbers<[1], [0], [0], [1], [0, 0, 1, 1], [], []>} : vector<8x384xbf16>, vector<384x256xbf16>, vector<8x256xf32> -> vector<8x256xf32>
    %7 = arith.addf %3, %6 : vector<8x256xf32>
    %c0_6 = arith.constant 0 : index
    %c0_7 = arith.constant 0 : index
    %8 = vector.load %arg8[%c0_6, %c0_7] : memref<8x256xf32, #tpu.memory_space<vmem>>, vector<8x256xf32>
    tpu.vector_store %arg8[%c0_6, %c0_7], %7 {strides = array<i32>} : memref<8x256xf32, #tpu.memory_space<vmem>>, vector<8x256xf32>,
    %c5_i32 = arith.constant 5 : i32
    %9 = arith.cmpi eq, %arg2, %c5_i32 : i32
    %10 = arith.extui %9 : i1 to i32
    %c0_i32_8 = arith.constant 0 : i32
    %11 = arith.cmpi ne, %10, %c0_i32_8 : i32
    scf.if %11 {
      %c0_9 = arith.constant 0 : index
      %c0_10 = arith.constant 0 : index
      %12 = vector.load %arg8[%c0_9, %c0_10] : memref<8x256xf32, #tpu.memory_space<vmem>>, vector<8x256xf32>
      %c0_11 = arith.constant 0 : index
      %c0_12 = arith.constant 0 : index
      %13 = vector.load %arg5[%c0_11, %c0_12] : memref<1x256xf32, #tpu.memory_space<vmem>>, vector<1x256xf32>
      %14 = vector.broadcast %13 : vector<1x256xf32> to vector<8x256xf32>
      %15 = arith.addf %12, %14 : vector<8x256xf32>
      %c0_13 = arith.constant 0 : index
      %c0_14 = arith.constant 0 : index
      %16 = vector.load %arg6[%c0_13, %c0_14] : memref<8x256xf32, #tpu.memory_space<vmem>>, vector<8x256xf32>
      %17 = arith.addf %15, %16 : vector<8x256xf32>
      %cst_15 = arith.constant 0.000000e+00 : f32
      %18 = vector.broadcast %cst_15 : f32 to vector<8x256xf32>
      %19 = arith.maximumf %17, %18 : vector<8x256xf32>
      %c0_16 = arith.constant 0 : index
      %c0_17 = arith.constant 0 : index
      %20 = vector.load %arg7[%c0_16, %c0_17] : memref<8x256xf32, #tpu.memory_space<vmem>>, vector<8x256xf32>
      tpu.vector_store %arg7[%c0_16, %c0_17], %19 {strides = array<i32>} : memref<8x256xf32, #tpu.memory_space<vmem>>, vector<8x256xf32>,
    } else {
    }
    return
  }
  func.func @transform_0(%arg0: i32, %arg1: i32, %arg2: i32) -> (i32, i32) {
    %c0_i32 = arith.constant 0 : i32
    return %arg1, %arg2 : i32, i32
  }
  func.func @transform_1(%arg0: i32, %arg1: i32, %arg2: i32) -> (i32, i32) {
    %c0_i32 = arith.constant 0 : i32
    return %arg2, %arg0 : i32, i32
  }
  func.func @transform_2(%arg0: i32, %arg1: i32, %arg2: i32) -> (i32, i32) {
    %c0_i32 = arith.constant 0 : i32
    %c0_i32_0 = arith.constant 0 : i32
    return %c0_i32, %arg0 : i32, i32
  }
  func.func @transform_3(%arg0: i32, %arg1: i32, %arg2: i32) -> (i32, i32) {
    %c0_i32 = arith.constant 0 : i32
    return %arg1, %arg0 : i32, i32
  }
  func.func @transform_4(%arg0: i32, %arg1: i32, %arg2: i32) -> (i32, i32) {
    %c0_i32 = arith.constant 0 : i32
    return %arg1, %arg0 : i32, i32
  }
}

module attributes {stable_mosaic.version = 11 : i64} {
  func.func @kernel(%arg0: i32, %arg1: i32, %arg2: i32, %arg3: memref<8x384xbf16, #tpu.memory_space<vmem>>, %arg4: memref<384x256xbf16, #tpu.memory_space<vmem>>, %arg5: memref<1x256xf32, #tpu.memory_space<vmem>>, %arg6: memref<8x256xf32, #tpu.memory_space<vmem>>, %arg7: memref<8x256xf32, #tpu.memory_space<vmem>>) attributes {dimension_semantics = [#tpu.dimension_semantics<parallel>, #tpu.dimension_semantics<parallel>, #tpu.dimension_semantics<arbitrary>], iteration_bounds = array<i64: 2, 1, 6>, scalar_prefetch = 0 : i64, scratch_operands = 1 : i64, tpu.core_type = #tpu.core_type<tc>, window_params = [{transform_indices = @transform_0, window_bounds = array<i64: 8, 384>}, {transform_indices = @transform_1, window_bounds = array<i64: 384, 256>}, {transform_indices = @transform_2, window_bounds = array<i64: 1, 256>}, {transform_indices = @transform_3, window_bounds = array<i64: 8, 256>}]} {
    %c0_i32 = arith.constant 0 : i32
    %0 = arith.cmpi eq, %arg2, %c0_i32 : i32
    %1 = arith.extui %0 : i1 to i32
    %c0_i32_0 = arith.constant 0 : i32
    %2 = arith.cmpi ne, %1, %c0_i32_0 : i32
    scf.if %2 {
      %cst_9 = arith.constant 0.000000e+00 : f32
      %12 = vector.broadcast %cst_9 : f32 to vector<8x256xf32>
      %c0_10 = arith.constant 0 : index
      %c0_11 = arith.constant 0 : index
      %13 = vector.load %arg7[%c0_10, %c0_11] : memref<8x256xf32, #tpu.memory_space<vmem>>, vector<8x256xf32>
      tpu.vector_store %arg7[%c0_10, %c0_11], %12 {strides = array<i32>} : memref<8x256xf32, #tpu.memory_space<vmem>>, vector<8x256xf32>,
    } else {
    }
    %c0 = arith.constant 0 : index
    %c0_1 = arith.constant 0 : index
    %3 = vector.load %arg7[%c0, %c0_1] : memref<8x256xf32, #tpu.memory_space<vmem>>, vector<8x256xf32>
    %c0_2 = arith.constant 0 : index
    %c0_3 = arith.constant 0 : index
    %4 = vector.load %arg3[%c0_2, %c0_3] : memref<8x384xbf16, #tpu.memory_space<vmem>>, vector<8x384xbf16>
    %c0_4 = arith.constant 0 : index
    %c0_5 = arith.constant 0 : index
    %5 = vector.load %arg4[%c0_4, %c0_5] : memref<384x256xbf16, #tpu.memory_space<vmem>>, vector<384x256xbf16>
    %cst = arith.constant dense<0.000000e+00> : vector<8x256xf32>
    %6 = tpu.matmul %4, %5, %cst {dimension_numbers = #tpu.dot_dimension_numbers<[1], [0], [0], [1], [0, 0, 1, 1], [], []>} : vector<8x384xbf16>, vector<384x256xbf16>, vector<8x256xf32> -> vector<8x256xf32>
    %7 = arith.addf %3, %6 : vector<8x256xf32>
    %c0_6 = arith.constant 0 : index
    %c0_7 = arith.constant 0 : index
    %8 = vector.load %arg7[%c0_6, %c0_7] : memref<8x256xf32, #tpu.memory_space<vmem>>, vector<8x256xf32>
    tpu.vector_store %arg7[%c0_6, %c0_7], %7 {strides = array<i32>} : memref<8x256xf32, #tpu.memory_space<vmem>>, vector<8x256xf32>,
    %c5_i32 = arith.constant 5 : i32
    %9 = arith.cmpi eq, %arg2, %c5_i32 : i32
    %10 = arith.extui %9 : i1 to i32
    %c0_i32_8 = arith.constant 0 : i32
    %11 = arith.cmpi ne, %10, %c0_i32_8 : i32
    scf.if %11 {
      %c0_9 = arith.constant 0 : index
      %c0_10 = arith.constant 0 : index
      %12 = vector.load %arg7[%c0_9, %c0_10] : memref<8x256xf32, #tpu.memory_space<vmem>>, vector<8x256xf32>
      %c0_11 = arith.constant 0 : index
      %c0_12 = arith.constant 0 : index
      %13 = vector.load %arg5[%c0_11, %c0_12] : memref<1x256xf32, #tpu.memory_space<vmem>>, vector<1x256xf32>
      %14 = vector.broadcast %13 : vector<1x256xf32> to vector<8x256xf32>
      %15 = arith.addf %12, %14 : vector<8x256xf32>
      %cst_13 = arith.constant 0.000000e+00 : f32
      %16 = vector.broadcast %cst_13 : f32 to vector<8x256xf32>
      %17 = arith.maximumf %15, %16 : vector<8x256xf32>
      %c0_14 = arith.constant 0 : index
      %c0_15 = arith.constant 0 : index
      %18 = vector.load %arg6[%c0_14, %c0_15] : memref<8x256xf32, #tpu.memory_space<vmem>>, vector<8x256xf32>
      tpu.vector_store %arg6[%c0_14, %c0_15], %17 {strides = array<i32>} : memref<8x256xf32, #tpu.memory_space<vmem>>, vector<8x256xf32>,
    } else {
    }
    return
  }
  func.func @transform_0(%arg0: i32, %arg1: i32, %arg2: i32) -> (i32, i32) {
    %c0_i32 = arith.constant 0 : i32
    return %arg1, %arg2 : i32, i32
  }
  func.func @transform_1(%arg0: i32, %arg1: i32, %arg2: i32) -> (i32, i32) {
    %c0_i32 = arith.constant 0 : i32
    return %arg2, %arg0 : i32, i32
  }
  func.func @transform_2(%arg0: i32, %arg1: i32, %arg2: i32) -> (i32, i32) {
    %c0_i32 = arith.constant 0 : i32
    %c0_i32_0 = arith.constant 0 : i32
    return %c0_i32, %arg0 : i32, i32
  }
  func.func @transform_3(%arg0: i32, %arg1: i32, %arg2: i32) -> (i32, i32) {
    %c0_i32 = arith.constant 0 : i32
    return %arg1, %arg0 : i32, i32
  }
}

module attributes {stable_mosaic.version = 11 : i64} {
  func.func @kernel(%arg0: i32, %arg1: i32, %arg2: i32, %arg3: memref<8x256xbf16, #tpu.memory_space<vmem>>, %arg4: memref<256x256xbf16, #tpu.memory_space<vmem>>, %arg5: memref<1x256xf32, #tpu.memory_space<vmem>>, %arg6: memref<8x256xf32, #tpu.memory_space<vmem>>, %arg7: memref<8x256xf32, #tpu.memory_space<vmem>>) attributes {dimension_semantics = [#tpu.dimension_semantics<parallel>, #tpu.dimension_semantics<parallel>, #tpu.dimension_semantics<arbitrary>], iteration_bounds = array<i64: 2, 1, 1>, scalar_prefetch = 0 : i64, scratch_operands = 1 : i64, tpu.core_type = #tpu.core_type<tc>, window_params = [{transform_indices = @transform_0, window_bounds = array<i64: 8, 256>}, {transform_indices = @transform_1, window_bounds = array<i64: 256, 256>}, {transform_indices = @transform_2, window_bounds = array<i64: 1, 256>}, {transform_indices = @transform_3, window_bounds = array<i64: 8, 256>}]} {
    %c0_i32 = arith.constant 0 : i32
    %0 = arith.cmpi eq, %arg2, %c0_i32 : i32
    %1 = arith.extui %0 : i1 to i32
    %c0_i32_0 = arith.constant 0 : i32
    %2 = arith.cmpi ne, %1, %c0_i32_0 : i32
    scf.if %2 {
      %cst_10 = arith.constant 0.000000e+00 : f32
      %12 = vector.broadcast %cst_10 : f32 to vector<8x256xf32>
      %c0_11 = arith.constant 0 : index
      %c0_12 = arith.constant 0 : index
      %13 = vector.load %arg7[%c0_11, %c0_12] : memref<8x256xf32, #tpu.memory_space<vmem>>, vector<8x256xf32>
      tpu.vector_store %arg7[%c0_11, %c0_12], %12 {strides = array<i32>} : memref<8x256xf32, #tpu.memory_space<vmem>>, vector<8x256xf32>,
    } else {
    }
    %c0 = arith.constant 0 : index
    %c0_1 = arith.constant 0 : index
    %3 = vector.load %arg7[%c0, %c0_1] : memref<8x256xf32, #tpu.memory_space<vmem>>, vector<8x256xf32>
    %c0_2 = arith.constant 0 : index
    %c0_3 = arith.constant 0 : index
    %4 = vector.load %arg3[%c0_2, %c0_3] : memref<8x256xbf16, #tpu.memory_space<vmem>>, vector<8x256xbf16>
    %c0_4 = arith.constant 0 : index
    %c0_5 = arith.constant 0 : index
    %5 = vector.load %arg4[%c0_4, %c0_5] : memref<256x256xbf16, #tpu.memory_space<vmem>>, vector<256x256xbf16>
    %cst = arith.constant dense<0.000000e+00> : vector<8x256xf32>
    %6 = tpu.matmul %4, %5, %cst {dimension_numbers = #tpu.dot_dimension_numbers<[1], [0], [0], [1], [0, 0, 1, 1], [], []>} : vector<8x256xbf16>, vector<256x256xbf16>, vector<8x256xf32> -> vector<8x256xf32>
    %7 = arith.addf %3, %6 : vector<8x256xf32>
    %c0_6 = arith.constant 0 : index
    %c0_7 = arith.constant 0 : index
    %8 = vector.load %arg7[%c0_6, %c0_7] : memref<8x256xf32, #tpu.memory_space<vmem>>, vector<8x256xf32>
    tpu.vector_store %arg7[%c0_6, %c0_7], %7 {strides = array<i32>} : memref<8x256xf32, #tpu.memory_space<vmem>>, vector<8x256xf32>,
    %c0_i32_8 = arith.constant 0 : i32
    %9 = arith.cmpi eq, %arg2, %c0_i32_8 : i32
    %10 = arith.extui %9 : i1 to i32
    %c0_i32_9 = arith.constant 0 : i32
    %11 = arith.cmpi ne, %10, %c0_i32_9 : i32
    scf.if %11 {
      %c0_10 = arith.constant 0 : index
      %c0_11 = arith.constant 0 : index
      %12 = vector.load %arg7[%c0_10, %c0_11] : memref<8x256xf32, #tpu.memory_space<vmem>>, vector<8x256xf32>
      %c0_12 = arith.constant 0 : index
      %c0_13 = arith.constant 0 : index
      %13 = vector.load %arg5[%c0_12, %c0_13] : memref<1x256xf32, #tpu.memory_space<vmem>>, vector<1x256xf32>
      %14 = vector.broadcast %13 : vector<1x256xf32> to vector<8x256xf32>
      %15 = arith.addf %12, %14 : vector<8x256xf32>
      %c0_14 = arith.constant 0 : index
      %c0_15 = arith.constant 0 : index
      %16 = vector.load %arg6[%c0_14, %c0_15] : memref<8x256xf32, #tpu.memory_space<vmem>>, vector<8x256xf32>
      tpu.vector_store %arg6[%c0_14, %c0_15], %15 {strides = array<i32>} : memref<8x256xf32, #tpu.memory_space<vmem>>, vector<8x256xf32>,
    } else {
    }
    return
  }
  func.func @transform_0(%arg0: i32, %arg1: i32, %arg2: i32) -> (i32, i32) {
    %c0_i32 = arith.constant 0 : i32
    return %arg1, %arg2 : i32, i32
  }
  func.func @transform_1(%arg0: i32, %arg1: i32, %arg2: i32) -> (i32, i32) {
    %c0_i32 = arith.constant 0 : i32
    return %arg2, %arg0 : i32, i32
  }
  func.func @transform_2(%arg0: i32, %arg1: i32, %arg2: i32) -> (i32, i32) {
    %c0_i32 = arith.constant 0 : i32
    %c0_i32_0 = arith.constant 0 : i32
    return %c0_i32, %arg0 : i32, i32
  }
  func.func @transform_3(%arg0: i32, %arg1: i32, %arg2: i32) -> (i32, i32) {
    %c0_i32 = arith.constant 0 : i32
    return %arg1, %arg0 : i32, i32
  }
}

module attributes {stable_mosaic.version = 11 : i64} {
  func.func @kernel(%arg0: i32, %arg1: i32, %arg2: i32, %arg3: memref<8x512xbf16, #tpu.memory_space<vmem>>, %arg4: memref<512x256xbf16, #tpu.memory_space<vmem>>, %arg5: memref<1x256xf32, #tpu.memory_space<vmem>>, %arg6: memref<8x256xf32, #tpu.memory_space<vmem>>, %arg7: memref<8x256xf32, #tpu.memory_space<vmem>>, %arg8: memref<8x256xf32, #tpu.memory_space<vmem>>) attributes {dimension_semantics = [#tpu.dimension_semantics<parallel>, #tpu.dimension_semantics<parallel>, #tpu.dimension_semantics<arbitrary>], iteration_bounds = array<i64: 2, 1, 9>, scalar_prefetch = 0 : i64, scratch_operands = 1 : i64, tpu.core_type = #tpu.core_type<tc>, window_params = [{transform_indices = @transform_0, window_bounds = array<i64: 8, 512>}, {transform_indices = @transform_1, window_bounds = array<i64: 512, 256>}, {transform_indices = @transform_2, window_bounds = array<i64: 1, 256>}, {transform_indices = @transform_3, window_bounds = array<i64: 8, 256>}, {transform_indices = @transform_4, window_bounds = array<i64: 8, 256>}]} {
    %c0_i32 = arith.constant 0 : i32
    %0 = arith.cmpi eq, %arg2, %c0_i32 : i32
    %1 = arith.extui %0 : i1 to i32
    %c0_i32_0 = arith.constant 0 : i32
    %2 = arith.cmpi ne, %1, %c0_i32_0 : i32
    scf.if %2 {
      %cst_9 = arith.constant 0.000000e+00 : f32
      %12 = vector.broadcast %cst_9 : f32 to vector<8x256xf32>
      %c0_10 = arith.constant 0 : index
      %c0_11 = arith.constant 0 : index
      %13 = vector.load %arg8[%c0_10, %c0_11] : memref<8x256xf32, #tpu.memory_space<vmem>>, vector<8x256xf32>
      tpu.vector_store %arg8[%c0_10, %c0_11], %12 {strides = array<i32>} : memref<8x256xf32, #tpu.memory_space<vmem>>, vector<8x256xf32>,
    } else {
    }
    %c0 = arith.constant 0 : index
    %c0_1 = arith.constant 0 : index
    %3 = vector.load %arg8[%c0, %c0_1] : memref<8x256xf32, #tpu.memory_space<vmem>>, vector<8x256xf32>
    %c0_2 = arith.constant 0 : index
    %c0_3 = arith.constant 0 : index
    %4 = vector.load %arg3[%c0_2, %c0_3] : memref<8x512xbf16, #tpu.memory_space<vmem>>, vector<8x512xbf16>
    %c0_4 = arith.constant 0 : index
    %c0_5 = arith.constant 0 : index
    %5 = vector.load %arg4[%c0_4, %c0_5] : memref<512x256xbf16, #tpu.memory_space<vmem>>, vector<512x256xbf16>
    %cst = arith.constant dense<0.000000e+00> : vector<8x256xf32>
    %6 = tpu.matmul %4, %5, %cst {dimension_numbers = #tpu.dot_dimension_numbers<[1], [0], [0], [1], [0, 0, 1, 1], [], []>} : vector<8x512xbf16>, vector<512x256xbf16>, vector<8x256xf32> -> vector<8x256xf32>
    %7 = arith.addf %3, %6 : vector<8x256xf32>
    %c0_6 = arith.constant 0 : index
    %c0_7 = arith.constant 0 : index
    %8 = vector.load %arg8[%c0_6, %c0_7] : memref<8x256xf32, #tpu.memory_space<vmem>>, vector<8x256xf32>
    tpu.vector_store %arg8[%c0_6, %c0_7], %7 {strides = array<i32>} : memref<8x256xf32, #tpu.memory_space<vmem>>, vector<8x256xf32>,
    %c8_i32 = arith.constant 8 : i32
    %9 = arith.cmpi eq, %arg2, %c8_i32 : i32
    %10 = arith.extui %9 : i1 to i32
    %c0_i32_8 = arith.constant 0 : i32
    %11 = arith.cmpi ne, %10, %c0_i32_8 : i32
    scf.if %11 {
      %c0_9 = arith.constant 0 : index
      %c0_10 = arith.constant 0 : index
      %12 = vector.load %arg8[%c0_9, %c0_10] : memref<8x256xf32, #tpu.memory_space<vmem>>, vector<8x256xf32>
      %c0_11 = arith.constant 0 : index
      %c0_12 = arith.constant 0 : index
      %13 = vector.load %arg5[%c0_11, %c0_12] : memref<1x256xf32, #tpu.memory_space<vmem>>, vector<1x256xf32>
      %14 = vector.broadcast %13 : vector<1x256xf32> to vector<8x256xf32>
      %15 = arith.addf %12, %14 : vector<8x256xf32>
      %c0_13 = arith.constant 0 : index
      %c0_14 = arith.constant 0 : index
      %16 = vector.load %arg6[%c0_13, %c0_14] : memref<8x256xf32, #tpu.memory_space<vmem>>, vector<8x256xf32>
      %17 = arith.addf %15, %16 : vector<8x256xf32>
      %cst_15 = arith.constant 0.000000e+00 : f32
      %18 = vector.broadcast %cst_15 : f32 to vector<8x256xf32>
      %19 = arith.maximumf %17, %18 : vector<8x256xf32>
      %c0_16 = arith.constant 0 : index
      %c0_17 = arith.constant 0 : index
      %20 = vector.load %arg7[%c0_16, %c0_17] : memref<8x256xf32, #tpu.memory_space<vmem>>, vector<8x256xf32>
      tpu.vector_store %arg7[%c0_16, %c0_17], %19 {strides = array<i32>} : memref<8x256xf32, #tpu.memory_space<vmem>>, vector<8x256xf32>,
    } else {
    }
    return
  }
  func.func @transform_0(%arg0: i32, %arg1: i32, %arg2: i32) -> (i32, i32) {
    %c0_i32 = arith.constant 0 : i32
    return %arg1, %arg2 : i32, i32
  }
  func.func @transform_1(%arg0: i32, %arg1: i32, %arg2: i32) -> (i32, i32) {
    %c0_i32 = arith.constant 0 : i32
    return %arg2, %arg0 : i32, i32
  }
  func.func @transform_2(%arg0: i32, %arg1: i32, %arg2: i32) -> (i32, i32) {
    %c0_i32 = arith.constant 0 : i32
    %c0_i32_0 = arith.constant 0 : i32
    return %c0_i32, %arg0 : i32, i32
  }
  func.func @transform_3(%arg0: i32, %arg1: i32, %arg2: i32) -> (i32, i32) {
    %c0_i32 = arith.constant 0 : i32
    return %arg1, %arg0 : i32, i32
  }
  func.func @transform_4(%arg0: i32, %arg1: i32, %arg2: i32) -> (i32, i32) {
    %c0_i32 = arith.constant 0 : i32
    return %arg1, %arg0 : i32, i32
  }
}

module attributes {stable_mosaic.version = 11 : i64} {
  func.func @kernel(%arg0: i32, %arg1: i32, %arg2: i32, %arg3: memref<8x512xbf16, #tpu.memory_space<vmem>>, %arg4: memref<512x256xbf16, #tpu.memory_space<vmem>>, %arg5: memref<1x256xf32, #tpu.memory_space<vmem>>, %arg6: memref<8x256xf32, #tpu.memory_space<vmem>>, %arg7: memref<8x256xf32, #tpu.memory_space<vmem>>) attributes {dimension_semantics = [#tpu.dimension_semantics<parallel>, #tpu.dimension_semantics<parallel>, #tpu.dimension_semantics<arbitrary>], iteration_bounds = array<i64: 2, 1, 9>, scalar_prefetch = 0 : i64, scratch_operands = 1 : i64, tpu.core_type = #tpu.core_type<tc>, window_params = [{transform_indices = @transform_0, window_bounds = array<i64: 8, 512>}, {transform_indices = @transform_1, window_bounds = array<i64: 512, 256>}, {transform_indices = @transform_2, window_bounds = array<i64: 1, 256>}, {transform_indices = @transform_3, window_bounds = array<i64: 8, 256>}]} {
    %c0_i32 = arith.constant 0 : i32
    %0 = arith.cmpi eq, %arg2, %c0_i32 : i32
    %1 = arith.extui %0 : i1 to i32
    %c0_i32_0 = arith.constant 0 : i32
    %2 = arith.cmpi ne, %1, %c0_i32_0 : i32
    scf.if %2 {
      %cst_9 = arith.constant 0.000000e+00 : f32
      %12 = vector.broadcast %cst_9 : f32 to vector<8x256xf32>
      %c0_10 = arith.constant 0 : index
      %c0_11 = arith.constant 0 : index
      %13 = vector.load %arg7[%c0_10, %c0_11] : memref<8x256xf32, #tpu.memory_space<vmem>>, vector<8x256xf32>
      tpu.vector_store %arg7[%c0_10, %c0_11], %12 {strides = array<i32>} : memref<8x256xf32, #tpu.memory_space<vmem>>, vector<8x256xf32>,
    } else {
    }
    %c0 = arith.constant 0 : index
    %c0_1 = arith.constant 0 : index
    %3 = vector.load %arg7[%c0, %c0_1] : memref<8x256xf32, #tpu.memory_space<vmem>>, vector<8x256xf32>
    %c0_2 = arith.constant 0 : index
    %c0_3 = arith.constant 0 : index
    %4 = vector.load %arg3[%c0_2, %c0_3] : memref<8x512xbf16, #tpu.memory_space<vmem>>, vector<8x512xbf16>
    %c0_4 = arith.constant 0 : index
    %c0_5 = arith.constant 0 : index
    %5 = vector.load %arg4[%c0_4, %c0_5] : memref<512x256xbf16, #tpu.memory_space<vmem>>, vector<512x256xbf16>
    %cst = arith.constant dense<0.000000e+00> : vector<8x256xf32>
    %6 = tpu.matmul %4, %5, %cst {dimension_numbers = #tpu.dot_dimension_numbers<[1], [0], [0], [1], [0, 0, 1, 1], [], []>} : vector<8x512xbf16>, vector<512x256xbf16>, vector<8x256xf32> -> vector<8x256xf32>
    %7 = arith.addf %3, %6 : vector<8x256xf32>
    %c0_6 = arith.constant 0 : index
    %c0_7 = arith.constant 0 : index
    %8 = vector.load %arg7[%c0_6, %c0_7] : memref<8x256xf32, #tpu.memory_space<vmem>>, vector<8x256xf32>
    tpu.vector_store %arg7[%c0_6, %c0_7], %7 {strides = array<i32>} : memref<8x256xf32, #tpu.memory_space<vmem>>, vector<8x256xf32>,
    %c8_i32 = arith.constant 8 : i32
    %9 = arith.cmpi eq, %arg2, %c8_i32 : i32
    %10 = arith.extui %9 : i1 to i32
    %c0_i32_8 = arith.constant 0 : i32
    %11 = arith.cmpi ne, %10, %c0_i32_8 : i32
    scf.if %11 {
      %c0_9 = arith.constant 0 : index
      %c0_10 = arith.constant 0 : index
      %12 = vector.load %arg7[%c0_9, %c0_10] : memref<8x256xf32, #tpu.memory_space<vmem>>, vector<8x256xf32>
      %c0_11 = arith.constant 0 : index
      %c0_12 = arith.constant 0 : index
      %13 = vector.load %arg5[%c0_11, %c0_12] : memref<1x256xf32, #tpu.memory_space<vmem>>, vector<1x256xf32>
      %14 = vector.broadcast %13 : vector<1x256xf32> to vector<8x256xf32>
      %15 = arith.addf %12, %14 : vector<8x256xf32>
      %cst_13 = arith.constant 0.000000e+00 : f32
      %16 = vector.broadcast %cst_13 : f32 to vector<8x256xf32>
      %17 = arith.maximumf %15, %16 : vector<8x256xf32>
      %c0_14 = arith.constant 0 : index
      %c0_15 = arith.constant 0 : index
      %18 = vector.load %arg6[%c0_14, %c0_15] : memref<8x256xf32, #tpu.memory_space<vmem>>, vector<8x256xf32>
      tpu.vector_store %arg6[%c0_14, %c0_15], %17 {strides = array<i32>} : memref<8x256xf32, #tpu.memory_space<vmem>>, vector<8x256xf32>,
    } else {
    }
    return
  }
  func.func @transform_0(%arg0: i32, %arg1: i32, %arg2: i32) -> (i32, i32) {
    %c0_i32 = arith.constant 0 : i32
    return %arg1, %arg2 : i32, i32
  }
  func.func @transform_1(%arg0: i32, %arg1: i32, %arg2: i32) -> (i32, i32) {
    %c0_i32 = arith.constant 0 : i32
    return %arg2, %arg0 : i32, i32
  }
  func.func @transform_2(%arg0: i32, %arg1: i32, %arg2: i32) -> (i32, i32) {
    %c0_i32 = arith.constant 0 : i32
    %c0_i32_0 = arith.constant 0 : i32
    return %c0_i32, %arg0 : i32, i32
  }
  func.func @transform_3(%arg0: i32, %arg1: i32, %arg2: i32) -> (i32, i32) {
    %c0_i32 = arith.constant 0 : i32
    return %arg1, %arg0 : i32, i32
  }
}

module attributes {stable_mosaic.version = 11 : i64} {
  func.func @_head_kernel(%arg0: i32, %arg1: memref<2x1x512xf32, #tpu.memory_space<vmem>>, %arg2: memref<512x1000xf32, #tpu.memory_space<vmem>>, %arg3: memref<1x1000xf32, #tpu.memory_space<vmem>>, %arg4: memref<2x1000xf32, #tpu.memory_space<vmem>>) attributes {dimension_semantics = [#tpu.dimension_semantics<arbitrary>], iteration_bounds = array<i64: 1>, scalar_prefetch = 0 : i64, scratch_operands = 0 : i64, tpu.core_type = #tpu.core_type<tc>, window_params = [{pipeline_mode = #tpu.pipeline_mode<synchronous>, transform_indices = @transform_0, window_bounds = array<i64: 2, 1, 512>}, {pipeline_mode = #tpu.pipeline_mode<synchronous>, transform_indices = @transform_1, window_bounds = array<i64: 512, 1000>}, {pipeline_mode = #tpu.pipeline_mode<synchronous>, transform_indices = @transform_2, window_bounds = array<i64: 1, 1000>}, {pipeline_mode = #tpu.pipeline_mode<synchronous>, transform_indices = @transform_3, window_bounds = array<i64: 2, 1000>}]} {
    %c0 = arith.constant 0 : index
    %c0_0 = arith.constant 0 : index
    %c0_1 = arith.constant 0 : index
    %0 = vector.load %arg1[%c0, %c0_0, %c0_1] : memref<2x1x512xf32, #tpu.memory_space<vmem>>, vector<2x1x512xf32>
    %cst = arith.constant dense<0.000000e+00> : vector<2x512xf32>
    %1 = vector.multi_reduction <add>, %0, %cst [1] : vector<2x1x512xf32> to vector<2x512xf32>
    %cst_2 = arith.constant 1.000000e+00 : f32
    %2 = vector.broadcast %cst_2 : f32 to vector<2x512xf32>
    %3 = arith.divf %1, %2 : vector<2x512xf32>
    %c0_3 = arith.constant 0 : index
    %c0_4 = arith.constant 0 : index
    %4 = vector.load %arg2[%c0_3, %c0_4] : memref<512x1000xf32, #tpu.memory_space<vmem>>, vector<512x1000xf32>
    %cst_5 = arith.constant dense<0.000000e+00> : vector<2x1000xf32>
    %5 = tpu.matmul %3, %4, %cst_5 {dimension_numbers = #tpu.dot_dimension_numbers<[1], [0], [0], [1], [0, 0, 1, 1], [], []>} : vector<2x512xf32>, vector<512x1000xf32>, vector<2x1000xf32> -> vector<2x1000xf32>
    %c0_6 = arith.constant 0 : index
    %c0_7 = arith.constant 0 : index
    %6 = vector.load %arg3[%c0_6, %c0_7] : memref<1x1000xf32, #tpu.memory_space<vmem>>, vector<1x1000xf32>
    %7 = vector.broadcast %6 : vector<1x1000xf32> to vector<2x1000xf32>
    %8 = arith.addf %5, %7 : vector<2x1000xf32>
    %c0_8 = arith.constant 0 : index
    %c0_9 = arith.constant 0 : index
    %9 = vector.load %arg4[%c0_8, %c0_9] : memref<2x1000xf32, #tpu.memory_space<vmem>>, vector<2x1000xf32>
    tpu.vector_store %arg4[%c0_8, %c0_9], %8 {strides = array<i32>} : memref<2x1000xf32, #tpu.memory_space<vmem>>, vector<2x1000xf32>,
    return
  }
  func.func @transform_0(%arg0: i32) -> (i32, i32, i32) {
    %c0_i32 = arith.constant 0 : i32
    %c0_i32_0 = arith.constant 0 : i32
    %c0_i32_1 = arith.constant 0 : i32
    %c0_i32_2 = arith.constant 0 : i32
    return %c0_i32, %c0_i32_0, %c0_i32_1 : i32, i32, i32
  }
  func.func @transform_1(%arg0: i32) -> (i32, i32) {
    %c0_i32 = arith.constant 0 : i32
    %c0_i32_0 = arith.constant 0 : i32
    %c0_i32_1 = arith.constant 0 : i32
    return %c0_i32, %c0_i32_0 : i32, i32
  }
  func.func @transform_2(%arg0: i32) -> (i32, i32) {
    %c0_i32 = arith.constant 0 : i32
    %c0_i32_0 = arith.constant 0 : i32
    %c0_i32_1 = arith.constant 0 : i32
    return %c0_i32, %c0_i32_0 : i32, i32
  }
  func.func @transform_3(%arg0: i32) -> (i32, i32) {
    %c0_i32 = arith.constant 0 : i32
    %c0_i32_0 = arith.constant 0 : i32
    %c0_i32_1 = arith.constant 0 : i32
    return %c0_i32, %c0_i32_0 : i32, i32
  }
}

</mosaic_0001>

<bundles_post_ra>
// kernel: _lambda_.39
= control target key start
LH: loop header
LB: loop body
LE: loop exit
PB: predicated region body
PF: predicated region fallthrough
CT: control target
= control target key end

     0   :  { %s486_s15 = smov 0   ;;  %s535_s0 = inlined_call_operand.vmem [shape: f32[2,5,5,128], index: 0, kind: input, shape index: {}]   ;;  %s536_s1 = inlined_call_operand.vmem [shape: f32[2,5,5,128], index: 1, kind: input, shape index: {}]   ;;  %s537_s2 = inlined_call_operand.vmem [shape: f32[2,5,5,128], index: 2, kind: input, shape index: {}]   ;;  %s538_s3 = inlined_call_operand.vmem [shape: f32[2,5,5,128], index: 3, kind: input, shape index: {}]   ;;  %s539_s4 = inlined_call_operand.vmem [shape: f32[2,4,4,128], index: 4, kind: output, shape index: {}]  }
   0x1 LB: > { %s430_s16 = sadd.s32 4294967295, %s459_s15   ;;  %p434_p0 = scmp.ge.s32.totalorder %s459_s15, 1  ;;  %s459_s15 = sphi %s486_s15, %s14_s15  }
   0x2   : > { %p192_p1 = scmp.lt.s32.totalorder %s459_s15, 3 }
   0x4   : > { %p193_p2 = pnand %p434_p0, %p192_p1 }
   0x5   : > { %p233_p3 = scmp.lt.s32.totalorder (!%p193_p2), %s430_s16, 1 }
   0x6   : > { %196 = sbr.rel (%p193_p2) target bundleno = 36 (0x24), region = 36 }
   0xb   : > { %s541_s16 = smov (!%p233_p3, %s430_s16), 1 }
   0xc   : > { %s497_s17 = smul.u32 40, %s541_s16  ;;  %s443_s30 = sshll.u32 %s541_s16, 4 }
   0xd   : > { %s257_s7 = scalar_lea.vmem %s539_s4, %s443_s30 }
   0xe   : > { %s237_s20 = scalar_lea.vmem %s535_s0, %s497_s17  ;;  %s507_s23 = scalar_lea.vmem %s536_s1, %s497_s17 }
   0xf   : > { %v258_v0 = vld [vmem:[%s237_s20] sm:$0x1f]  ;;  %v259_v1 = vld [vmem:[%s237_s20 + $0x8] sm:$0x1f]  ;;  %v260_v4 = vld [vmem:[%s237_s20 + $0x10] sm:$0x1f]  ;;  %s513_s26 = scalar_lea.vmem %s537_s2, %s497_s17  ;;  %s252_s29 = scalar_lea.vmem %s538_s3, %s497_s17 }
  0x10   : > { %v280_v2 = vrot.slane %v258_v0, 1  ;;  %v281_v3 = vrot.slane %v259_v1, 1  ;;  %v282_v6 = vrot.slane %v260_v4, 1  ;;  %v261_v8 = vld [vmem:[%s237_s20 + $0x18] sm:$0x1f] }
  0x11   : > { %v283_v9 = vrot.slane %v261_v8, 1  ;;  %v262_v13 = vld [vmem:[%s237_s20 + $0x20] sm:$0x1f]  ;;  %v264_v15 = vld [vmem:[%s507_s23 + $0x8] sm:$0x1f] }
  0x12   : > { %v288_v5 = vmax.f32 %v258_v0, %v280_v2  ;;  %v289_v7 = vmax.f32 %v259_v1, %v281_v3  ;;  %v290_v12 = vmax.f32 %v260_v4, %v282_v6  ;;  %v263_v14 = vld [vmem:[%s507_s23] sm:$0x1f]  ;;  %v297_v17 = vrot.slane %v262_v13, 1  ;;  %v265_v22 = vld [vmem:[%s507_s23 + $0x10] sm:$0x1f] }
  0x13   : > { %v291_v16 = vmax.f32 %v261_v8, %v283_v9  ;;  %v268_v18 = vld [vmem:[%s513_s26] sm:$0x1f]  ;;  %v269_v23 = vld [vmem:[%s513_s26 + $0x8] sm:$0x1f]  ;;  %v266_v27 = vld [vmem:[%s507_s23 + $0x18] sm:$0x1f] }
  0x14   : > { %v292_v10 = vmax.f32 %v288_v5, %v259_v1  ;;  %v293_v11 = vmax.f32 %v289_v7, %v260_v4  ;;  %v294_v21 = vmax.f32 %v290_v12, %v261_v8  ;;  %v319_v29 = vrot.slane %v268_v18, 1  ;;  %v270_v30 = vld [vmem:[%s513_s26 + $0x10] sm:$0x1f]  ;;  %v267_v36 = vld [vmem:[%s507_s23 + $0x20] sm:$0x1f] }
  0x15   : > { %v295_v24 = vmax.f32 %v291_v16, %v262_v13  ;;  %v320_v34 = vrot.slane %v269_v23, 1  ;;  %v271_v37 = vld [vmem:[%s513_s26 + $0x18] sm:$0x1f]  ;;  %v321_v42 = vrot.slane %v270_v30, 1  ;;  %v272_v43 = vld [vmem:[%s252_s29] sm:$0x1f] }
  0x16   : > { %v299_v19 = vmax.f32 %v292_v10, %v281_v3  ;;  %v300_v20 = vmax.f32 %v293_v11, %v282_v6  ;;  %v301_v28 = vmax.f32 %v294_v21, %v283_v9  ;;  %v273_v44 = vld [vmem:[%s252_s29 + $0x8] sm:$0x1f]  ;;  %v322_v46 = vrot.slane %v271_v37, 1  ;;  %v274_v50 = vld [vmem:[%s252_s29 + $0x10] sm:$0x1f] }
  0x17   : > { %v302_v31 = vmax.f32 %v295_v24, %v297_v17  ;;  %v275_v55 = vld [vmem:[%s252_s29 + $0x18] sm:$0x1f] }
  0x18   : > { %v303_v25 = vmax.f32 %v299_v19, %v263_v14  ;;  %v304_v26 = vmax.f32 %v300_v20, %v264_v15  ;;  %v305_v35 = vmax.f32 %v301_v28, %v265_v22 }
  0x19   : > { %v306_v38 = vmax.f32 %v302_v31, %v266_v27 }
  0x1a   : > { %v307_v32 = vmax.f32 %v303_v25, %v264_v15  ;;  %v308_v33 = vmax.f32 %v304_v26, %v265_v22  ;;  %v309_v41 = vmax.f32 %v305_v35, %v266_v27 }
  0x1b   : > { %v310_v45 = vmax.f32 %v306_v38, %v267_v36 }
  0x1c   : > { %v311_v39 = vmax.f32 %v307_v32, %v268_v18  ;;  %v312_v40 = vmax.f32 %v308_v33, %v269_v23  ;;  %v313_v49 = vmax.f32 %v309_v41, %v270_v30 }
  0x1d   : > { %v314_v51 = vmax.f32 %v310_v45, %v271_v37 }
  0x1e   : > { %v327_v47 = vmax.f32 %v311_v39, %v319_v29  ;;  %v328_v48 = vmax.f32 %v312_v40, %v320_v34  ;;  %v329_v54 = vmax.f32 %v313_v49, %v321_v42 }
  0x1f   : > { %v330_v56 = vmax.f32 %v314_v51, %v322_v46 }
  0x20   : > { %v331_v52 = vmax.f32 %v327_v47, %v272_v43  ;;  %v332_v53 = vmax.f32 %v328_v48, %v273_v44  ;;  %v333_v57 = vmax.f32 %v329_v54, %v274_v50 }
  0x21   : > { %v334_v58 = vmax.f32 %v330_v56, %v275_v55 }
  0x22   : > { %335 = vst [vmem:[%s257_s7] sm:$0xf] %v331_v52  ;;  %336 = vst [vmem:[%s257_s7 + $0x4] sm:$0xf] %v332_v53 }
  0x23   : > { %337 = vst [vmem:[%s257_s7 + $0x8] sm:$0xf] %v333_v57  ;;  %338 = vst [vmem:[%s257_s7 + $0xc] sm:$0xf] %v334_v58 }
  0x24 PF: > { %s14_s15 = sadd.s32 1, %s459_s15  }
  0x25   : > { %p11_p4 = scmp.ge.s32.totalorder %s14_s15, 4  }
  0x27   :  { %13 = sbr.rel (!%p11_p4) target bundleno = 1 (0x1), region = 75 }

// kernel: _lambda_.38
= control target key start
LH: loop header
LB: loop body
LE: loop exit
PB: predicated region body
PF: predicated region fallthrough
CT: control target
= control target key end

     0   :  { %s820_s1 = inlined_call_operand.vmem [shape: bf16[256,128], index: 1, kind: input, shape index: {}]   ;;  %s821_s0 = inlined_call_operand.vmem [shape: bf16[128,256], index: 0, kind: input, shape index: {}]   ;;  %s822_s2 = inlined_call_operand.vmem [shape: f32[1,128], index: 2, kind: input, shape index: {}]   ;;  %s823_s3 = inlined_call_operand.vmem [shape: f32[128,128], index: 3, kind: output, shape index: {}]  }
   0x1   :  { %v595_v0 = vld [vmem:[%s820_s1 + $0x78] sm:$0xff]   ;;  %v597_v2 = vld [vmem:[%s820_s1 + $0x70] sm:$0xff]   ;;  %v599_v4 = vld [vmem:[%s820_s1 + $0x68] sm:$0xff]  }
   0x2   :  { %v596_v1 = vld [vmem:[%s820_s1 + $0x38] sm:$0xff]   ;;  %515 = vmatprep.subr.bf16.mxu0 %v595_v0  ;;  %579 = vmatprep.subr.bf16.mxu1 %v595_v0  ;;  %v598_v3 = vld [vmem:[%s820_s1 + $0x30] sm:$0xff]   ;;  %v600_v5 = vld [vmem:[%s820_s1 + $0x28] sm:$0xff]  }
   0x3   :  { %516 = vmatpush3.bf16.msra.mxu0 %v596_v1  ;;  %587 = vmatpush3.bf16.msra.mxu1 %v596_v1  ;;  %v601_v6 = vld [vmem:[%s820_s1 + $0x60] sm:$0xff]   ;;  %v603_v8 = vld [vmem:[%s820_s1 + $0x58] sm:$0xff]   ;;  %v605_v10 = vld [vmem:[%s820_s1 + $0x50] sm:$0xff]  }
   0x4   :  { %517 = vmatprep.subr.bf16.mxu0 %v597_v2  ;;  %580 = vmatprep.subr.bf16.mxu1 %v597_v2  ;;  %v602_v7 = vld [vmem:[%s820_s1 + $0x20] sm:$0xff]   ;;  %v604_v9 = vld [vmem:[%s820_s1 + $0x18] sm:$0xff]   ;;  %v606_v13 = vld [vmem:[%s820_s1 + $0x10] sm:$0xff]  }
   0x5   :  { %v613_v11 = vld [vmem:[%s821_s0 + $0x4] ss:$8 sps:$4 sm:$0xff]   ;;  %v611_v18 = vld [vmem:[%s821_s0] ss:$8 sps:$4 sm:$0xff]   ;;  %v617_v20 = vld [vmem:[%s821_s0 + $0x14] ss:$8 sps:$4 sm:$0xff]  }
   0x6   :  { %v616_v12 = vld [vmem:[%s821_s0 + $0x44] ss:$8 sps:$4 sm:$0xff]   ;;  %307 = vmatprep.mubr.bf16.mxu0 %v613_v11  ;;  %v614_v19 = vld [vmem:[%s821_s0 + $0x40] ss:$8 sps:$4 sm:$0xff]   ;;  %v619_v21 = vld [vmem:[%s821_s0 + $0x54] ss:$8 sps:$4 sm:$0xff]  }
   0x7   :  { %518 = vmatpush3.bf16.msra.mxu0 %v598_v3  ;;  %588 = vmatpush3.bf16.msra.mxu1 %v598_v3  ;;  %v607_v14 = vld [vmem:[%s820_s1 + $0x48] sm:$0xff]   ;;  %v609_v16 = vld [vmem:[%s820_s1 + $0x40] sm:$0xff]   ;;  %v621_v22 = vld [vmem:[%s821_s0 + $0x10] ss:$8 sps:$4 sm:$0xff]  }
   0x8   :  { %519 = vmatprep.subr.bf16.mxu0 %v599_v4  ;;  %581 = vmatprep.subr.bf16.mxu1 %v599_v4  ;;  %v608_v15 = vld [vmem:[%s820_s1 + $0x8] sm:$0xff]   ;;  %v610_v17 = vld [vmem:[%s820_s1] sm:$0xff]   ;;  %v622_v23 = vld [vmem:[%s821_s0 + $0x50] ss:$8 sps:$4 sm:$0xff]  }
   0x9   :  { %339 = vmatprep.mubr.bf16.mxu1 %v616_v12  ;;  %v623_v24 = vld [vmem:[%s821_s0 + $0x24] ss:$8 sps:$4 sm:$0xff]   ;;  %v627_v26 = vld [vmem:[%s821_s0 + $0x20] ss:$8 sps:$4 sm:$0xff]   ;;  %v629_v28 = vld [vmem:[%s821_s0 + $0x34] ss:$8 sps:$4 sm:$0xff]  }
   0xa   :  { %v625_v25 = vld [vmem:[%s821_s0 + $0x64] ss:$8 sps:$4 sm:$0xff]   ;;  %v628_v27 = vld [vmem:[%s821_s0 + $0x60] ss:$8 sps:$4 sm:$0xff]   ;;  %v631_v29 = vld [vmem:[%s821_s0 + $0x74] ss:$8 sps:$4 sm:$0xff]  }
   0xb   :  { %520 = vmatpush3.bf16.msra.mxu0 %v600_v5  ;;  %589 = vmatpush3.bf16.msra.mxu1 %v600_v5  ;;  %v633_v30 = vld [vmem:[%s821_s0 + $0x30] ss:$8 sps:$4 sm:$0xff]   ;;  %v754_v35 = vld [vmem:[%s822_s2] ss:$0 sm:$0xff] }
   0xc   :  { %521 = vmatprep.subr.bf16.mxu0 %v601_v6  ;;  %582 = vmatprep.subr.bf16.mxu1 %v601_v6  ;;  %v634_v31 = vld [vmem:[%s821_s0 + $0x70] ss:$8 sps:$4 sm:$0xff]  }
   0xf   :  { %522 = vmatpush3.bf16.msra.mxu0 %v602_v7  ;;  %590 = vmatpush3.bf16.msra.mxu1 %v602_v7 }
  0x10   :  { %523 = vmatprep.subr.bf16.mxu0 %v603_v8  ;;  %583 = vmatprep.subr.bf16.mxu1 %v603_v8 }
  0x13   :  { %524 = vmatpush3.bf16.msra.mxu0 %v604_v9  ;;  %591 = vmatpush3.bf16.msra.mxu1 %v604_v9 }
  0x14   :  { %525 = vmatprep.subr.bf16.mxu0 %v605_v10  ;;  %584 = vmatprep.subr.bf16.mxu1 %v605_v10 }
  0x17   :  { %526 = vmatpush3.bf16.msra.mxu0 %v606_v13  ;;  %592 = vmatpush3.bf16.msra.mxu1 %v606_v13 }
  0x18   :  { %527 = vmatprep.subr.bf16.mxu0 %v607_v14  ;;  %585 = vmatprep.subr.bf16.mxu1 %v607_v14 }
  0x1b   :  { %528 = vmatpush3.bf16.msra.mxu0 %v608_v15  ;;  %593 = vmatpush3.bf16.msra.mxu1 %v608_v15 }
  0x1c   :  { %529 = vmatprep.subr.bf16.mxu0 %v609_v16  ;;  %586 = vmatprep.subr.bf16.mxu1 %v609_v16 }
  0x1f   :  { %530 = vmatpush3.bf16.msra.mxu0 %v610_v17  ;;  %594 = vmatpush3.bf16.msra.mxu1 %v610_v17 }
  0x22   :  { %308 = vmatmul.mubr.bf16.vlgmr.msra.gmra.mxu0 %v611_v18  ;;  %340 = vmatmul.mubr.bf16.vlgmr.msra.gmra.mxu1 %v614_v19 }
  0x23   :  { %315 = vmatprep.mubr.bf16.mxu0 %v617_v20  ;;  %347 = vmatprep.mubr.bf16.mxu1 %v619_v21 }
  0x2a   :  { %316 = vmatmul.mubr.bf16.gmra.mxu0 %v621_v22  ;;  %348 = vmatmul.mubr.bf16.gmra.mxu1 %v622_v23 }
  0x2b   :  { %323 = vmatprep.mubr.bf16.mxu0 %v623_v24  ;;  %355 = vmatprep.mubr.bf16.mxu1 %v625_v25 }
  0x32   :  { %324 = vmatmul.mubr.bf16.gmra.mxu0 %v627_v26  ;;  %356 = vmatmul.mubr.bf16.gmra.mxu1 %v628_v27 }
  0x33   :  { %331 = vmatprep.mubr.bf16.mxu0 %v629_v28  ;;  %363 = vmatprep.mubr.bf16.mxu1 %v631_v29 }
  0x3a   :  { %332 = vmatmul.mubr.bf16.gmra.mxu0 %v633_v30  ;;  %364 = vmatmul.mubr.bf16.gmra.mxu1 %v634_v31 }
  0xe2   :  { %v531_v32 = vpop.f32.mrf.mxu0  ;;  %v555_v33 = vpop.f32.mrf.mxu1 }
  0xe4   :  { %v532_v34 = vpop.f32.mrf.mxu0  ;;  %v556_v36 = vpop.f32.mrf.mxu1 }
  0xe5   :  { %v533_v37 = vadd.f32 %v532_v34, %v531_v32  ;;  %v557_v38 = vadd.f32 %v556_v36, %v555_v33 }
  0xe6   :  { %v534_v39 = vpop.f32.mrf.mxu0  ;;  %v558_v40 = vpop.f32.mrf.mxu1 }
  0xe7   :  { %v430_v41 = vadd.f32 %v533_v37, %v754_v35  ;;  %v438_v42 = vadd.f32 %v557_v38, %v754_v35 }
  0xe8   :  { %v535_v43 = vpop.f32.mrf.mxu0  ;;  %v559_v44 = vpop.f32.mrf.mxu1 }
  0xe9   :  { %v446_v45 = vmax.f32 %v430_v41, 0.0  ;;  %v454_v46 = vmax.f32 %v438_v42, 0.0  ;;  %v536_v47 = vadd.f32 %v535_v43, %v534_v39  ;;  %v560_v48 = vadd.f32 %v559_v44, %v558_v40 }
  0xea   :  { %v537_v49 = vpop.f32.mrf.mxu0  ;;  %v561_v50 = vpop.f32.mrf.mxu1 }
  0xeb   :  { %462 = vst [vmem:[%s823_s3] sm:$0xff] %v446_v45  ;;  %470 = vst [vmem:[%s823_s3 + $0x40] sm:$0xff] %v454_v46  ;;  %v431_v51 = vadd.f32 %v536_v47, %v754_v35  ;;  %v439_v52 = vadd.f32 %v560_v48, %v754_v35 }
  0xec   :  { %v538_v53 = vpop.f32.mrf.mxu0  ;;  %v562_v54 = vpop.f32.mrf.mxu1 }
  0xed   :  { %v447_v55 = vmax.f32 %v431_v51, 0.0  ;;  %v455_v56 = vmax.f32 %v439_v52, 0.0  ;;  %v539_v57 = vadd.f32 %v538_v53, %v537_v49  ;;  %v563_v58 = vadd.f32 %v562_v54, %v561_v50 }
  0xee   :  { %v540_v59 = vpop.f32.mrf.mxu0  ;;  %v564_v60 = vpop.f32.mrf.mxu1 }
  0xef   :  { %463 = vst [vmem:[%s823_s3 + $0x8] sm:$0xff] %v447_v55  ;;  %471 = vst [vmem:[%s823_s3 + $0x48] sm:$0xff] %v455_v56  ;;  %v432_v61 = vadd.f32 %v539_v57, %v754_v35  ;;  %v440_v62 = vadd.f32 %v563_v58, %v754_v35 }
  0xf0   :  { %v541_v63 = vpop.f32.mrf.mxu0  ;;  %v565_v0 = vpop.f32.mrf.mxu1 }
  0xf1   :  { %v448_v1 = vmax.f32 %v432_v61, 0.0  ;;  %v456_v2 = vmax.f32 %v440_v62, 0.0  ;;  %v542_v3 = vadd.f32 %v541_v63, %v540_v59  ;;  %v566_v4 = vadd.f32 %v565_v0, %v564_v60 }
  0xf2   :  { %v543_v5 = vpop.f32.mrf.mxu0  ;;  %v567_v6 = vpop.f32.mrf.mxu1 }
  0xf3   :  { %464 = vst [vmem:[%s823_s3 + $0x10] sm:$0xff] %v448_v1  ;;  %472 = vst [vmem:[%s823_s3 + $0x50] sm:$0xff] %v456_v2  ;;  %v433_v7 = vadd.f32 %v542_v3, %v754_v35  ;;  %v441_v8 = vadd.f32 %v566_v4, %v754_v35 }
  0xf4   :  { %v544_v9 = vpop.f32.mrf.mxu0  ;;  %v568_v10 = vpop.f32.mrf.mxu1 }
  0xf5   :  { %v449_v11 = vmax.f32 %v433_v7, 0.0  ;;  %v457_v12 = vmax.f32 %v441_v8, 0.0  ;;  %v545_v13 = vadd.f32 %v544_v9, %v543_v5  ;;  %v569_v14 = vadd.f32 %v568_v10, %v567_v6 }
  0xf6   :  { %v546_v15 = vpop.f32.mrf.mxu0  ;;  %v570_v16 = vpop.f32.mrf.mxu1 }
  0xf7   :  { %465 = vst [vmem:[%s823_s3 + $0x18] sm:$0xff] %v449_v11  ;;  %473 = vst [vmem:[%s823_s3 + $0x58] sm:$0xff] %v457_v12  ;;  %v434_v17 = vadd.f32 %v545_v13, %v754_v35  ;;  %v442_v18 = vadd.f32 %v569_v14, %v754_v35 }
  0xf8   :  { %v547_v19 = vpop.f32.mrf.mxu0  ;;  %v571_v20 = vpop.f32.mrf.mxu1 }
  0xf9   :  { %v450_v21 = vmax.f32 %v434_v17, 0.0  ;;  %v458_v22 = vmax.f32 %v442_v18, 0.0  ;;  %v548_v23 = vadd.f32 %v547_v19, %v546_v15  ;;  %v572_v24 = vadd.f32 %v571_v20, %v570_v16 }
  0xfa   :  { %v549_v25 = vpop.f32.mrf.mxu0  ;;  %v573_v26 = vpop.f32.mrf.mxu1 }
  0xfb   :  { %466 = vst [vmem:[%s823_s3 + $0x20] sm:$0xff] %v450_v21  ;;  %474 = vst [vmem:[%s823_s3 + $0x60] sm:$0xff] %v458_v22  ;;  %v435_v27 = vadd.f32 %v548_v23, %v754_v35  ;;  %v443_v28 = vadd.f32 %v572_v24, %v754_v35 }
  0xfc   :  { %v550_v29 = vpop.f32.mrf.mxu0  ;;  %v574_v30 = vpop.f32.mrf.mxu1 }
  0xfd   :  { %v451_v31 = vmax.f32 %v435_v27, 0.0  ;;  %v459_v32 = vmax.f32 %v443_v28, 0.0  ;;  %v551_v33 = vadd.f32 %v550_v29, %v549_v25  ;;  %v575_v34 = vadd.f32 %v574_v30, %v573_v26 }
  0xfe   :  { %v552_v36 = vpop.f32.mrf.mxu0  ;;  %v576_v37 = vpop.f32.mrf.mxu1 }
  0xff   :  { %467 = vst [vmem:[%s823_s3 + $0x28] sm:$0xff] %v451_v31  ;;  %475 = vst [vmem:[%s823_s3 + $0x68] sm:$0xff] %v459_v32  ;;  %v436_v38 = vadd.f32 %v551_v33, %v754_v35  ;;  %v444_v39 = vadd.f32 %v575_v34, %v754_v35 }
 0x100   :  { %v553_v40 = vpop.f32.mrf.mxu0  ;;  %v577_v41 = vpop.f32.mrf.mxu1 }
 0x101   :  { %v452_v42 = vmax.f32 %v436_v38, 0.0  ;;  %v460_v43 = vmax.f32 %v444_v39, 0.0  ;;  %v554_v44 = vadd.f32 %v553_v40, %v552_v36  ;;  %v578_v45 = vadd.f32 %v577_v41, %v576_v37 }
 0x103   :  { %468 = vst [vmem:[%s823_s3 + $0x30] sm:$0xff] %v452_v42  ;;  %476 = vst [vmem:[%s823_s3 + $0x70] sm:$0xff] %v460_v43  ;;  %v437_v46 = vadd.f32 %v554_v44, %v754_v35  ;;  %v445_v47 = vadd.f32 %v578_v45, %v754_v35 }
 0x105   :  { %v453_v48 = vmax.f32 %v437_v46, 0.0  ;;  %v461_v49 = vmax.f32 %v445_v47, 0.0 }
 0x107   :  { %469 = vst [vmem:[%s823_s3 + $0x38] sm:$0xff] %v453_v48  ;;  %477 = vst [vmem:[%s823_s3 + $0x78] sm:$0xff] %v461_v49 }

// kernel: _lambda_.40
= control target key start
LH: loop header
LB: loop body
LE: loop exit
PB: predicated region body
PF: predicated region fallthrough
CT: control target
= control target key end

     0   :  { %s1037_s12 = smov 0   ;;  %s1039_s13 = smov 0   ;;  %s1153_s0 = inlined_call_operand.vmem [shape: bf16[32,1152], index: 0, kind: input, shape index: {}]   ;;  %s1154_s1 = inlined_call_operand.vmem [shape: bf16[1152,128], index: 1, kind: input, shape index: {}]   ;;  %s1155_s2 = inlined_call_operand.vmem [shape: f32[1,128], index: 2, kind: input, shape index: {}]   ;;  %s1156_s3 = inlined_call_operand.vmem [shape: f32[32,128], index: 3, kind: output, shape index: {}]  }
   0x1   :  { %s1041_s14 = smov 0   ;;  %s1043_s15 = smov 0  }
   0x2   :  { %s1045_s16 = smov 0  }
   0x3 LB: > { %s25_s17 = sadd.s32 1, %s1010_s15  ;;  %p48_p1 = scmp.ne.s32.totalorder %s1002_s13, %s998_s12  ;;  %s1014_s16 = sphi %s1045_s16, %s13_s16   ;;  %s1010_s15 = sphi %s1043_s15, %s1160_s15   ;;  %s1006_s14 = sphi %s1041_s14, %s1159_s14   ;;  %s1002_s13 = sphi %s1039_s13, %s1158_s13   ;;  %s998_s12 = sphi %s1037_s12, %s1157_s12  }
   0x4   : > { %p26_p0 = scmp.ge.s32.totalorder %s25_s17, 3  ;;  %p49_p2 = scmp.eq.s32.totalorder %s1014_s16, 0 }
   0x5   : > { %s41_s19 = sadd.s32 1, %s1002_s13  ;;  %p793_p5 = scmp.ge.s32.totalorder %s1014_s16, 3 }
   0x6   : > { %s1162_s17 = smov (%p26_p0, %s25_s17), 0  ;;  %p50_p3 = por %p49_p2, %p48_p1 }
   0x7   : > { %s37_s18 = ssub.s32 %s1010_s15, %s1162_s17  ;;  %162 = sbr.rel (%p793_p5) target bundleno = 21 (0x15), region = 20 }
   0x8   : > { %p39_p4 = scmp.eq.s32.totalorder %s37_s18, 0 }
   0xa   : > { %s1072_s20 = scalar_select %p39_p4, %s1002_s13, %s41_s19  }
   0xc   : > { %165 = sbr.rel (!%p50_p3) target bundleno = 21 (0x15), region = 24  ;;  %s167_s21 = sand.u32 (%p50_p3), 1, %s1002_s13  }
   0xd   : > { %s842_s22 = smul.u32 (%p50_p3), 12, %s1010_s15 }
   0xe   : > { %s901_s23 = smul.u32 (%p50_p3), 48, %s167_s21 }
   0xf   : > { %s175_s26 = scalar_lea.vmem (%p50_p3), %s1153_s0, %s842_s22 }
  0x10   : > { %v190_v0 = vld [vmem:[%s175_s26] sm:$0xff] (%p50_p3)  ;;  %v194_v2 = vld [vmem:[%s175_s26 + $0x48] sm:$0xff] (%p50_p3)  ;;  %s169_s27 = scalar_lea.vmem (%p50_p3), [#allocation3], %s901_s23  ;;  %v799_v6 = vld [vmem:[%s175_s26 + $0x50] sm:$0xf] (%p50_p3) }
  0x11   : > { %v192_v1 = vld [vmem:[%s175_s26 + $0x24] sm:$0xff]  ;;  %191 = vst [vmem:[%s169_s27] sm:$0xff] %v190_v0  ;;  %195 = vst [vmem:[%s169_s27 + $0x18] sm:$0xff] %v194_v2  ;;  %v196_v3 = vld [vmem:[%s175_s26 + $0x6c] sm:$0xff] }
  0x12   : > { %193 = vst [vmem:[%s169_s27 + $0xc] sm:$0xff] %v192_v1  ;;  %v795_v4 = vld [vmem:[%s175_s26 + $0x8] sm:$0xf]  ;;  %v797_v5 = vld [vmem:[%s175_s26 + $0x2c] sm:$0xf]  ;;  %197 = vst [vmem:[%s169_s27 + $0x24] sm:$0xff] %v196_v3 }
  0x13   : > { %796 = vst [vmem:[%s169_s27 + $0x8] sm:$0xf] %v795_v4  ;;  %798 = vst [vmem:[%s169_s27 + $0x14] sm:$0xf] %v797_v5  ;;  %v801_v7 = vld [vmem:[%s175_s26 + $0x74] sm:$0xf] }
  0x14   : > { %800 = vst [vmem:[%s169_s27 + $0x20] sm:$0xf] %v799_v6  ;;  %802 = vst [vmem:[%s169_s27 + $0x2c] sm:$0xf] %v801_v7 }
  0x15 PF: > { %p803_p6 = scmp.ge.s32.totalorder %s1014_s16, 1  ;;  %p230_p7 = scmp.lt.s32.totalorder %s1014_s16, 4 }
  0x17   : > { %p231_p8 = pnand %p803_p6, %p230_p7 }
  0x18   : > { %s237_s28 = sand.u32 (!%p231_p8), 1, %s998_s12   ;;  %s276_s29 = smul.u32 (!%p231_p8), 48, %s1006_s14 }
  0x19   : > { %234 = sbr.rel (%p231_p8) target bundleno = 297 (0x129), region = 54  ;;  %p805_p10 = scmp.ne.s32.totalorder (!%p231_p8), %s1006_s14, 0 }
  0x1a   : > { %s902_s30 = smul.u32 (!%p231_p8), 48, %s237_s28  ;;  %p277_p9 = scmp.lt.s32.totalorder (!%p231_p8), %s276_s29, 143 }
  0x1c   : > { %s1089_s8 = scalar_lea.vmem (!%p231_p8), [#allocation3], %s902_s30 }
  0x1e   : > { %s1164_s29 = smov (!%p277_p9, %s276_s29), 143  ;;  %301 = sbr.rel (%p805_p10) target bundleno = 38 (0x26), region = 62 }
  0x1f   : > { %s804_s4 = sshll.u32 %s1164_s29, 2 }
  0x20   : > { %s1087_s7 = scalar_lea.vmem %s1154_s1, %s804_s4 }
  0x23   : > { %v1016_v8 = vmov 0.0  }
  0x24   : > { %302 = vst [vmem:[#allocation2 + $0x10] sm:$0xff] %v1016_v8  ;;  %303 = vst [vmem:[#allocation2] sm:$0xff] %v1016_v8 }
  0x25   : > { %304 = vst [vmem:[#allocation2 + $0x18] sm:$0xff] %v1016_v8  ;;  %305 = vst [vmem:[#allocation2 + $0x8] sm:$0xff] %v1016_v8 }
  0x26 PF: > { %v944_v9 = vld [vmem:[%s1087_s7 + $0x78] sm:$0xff]   ;;  %v947_v12 = vld [vmem:[%s1087_s7 + $0x70] sm:$0xff]   ;;  %v950_v15 = vld [vmem:[%s1087_s7 + $0x68] sm:$0xff]   ;;  %p836_p11 = scmp.ne.s32.totalorder %s1006_s14, 2 }
  0x27   : > { %v945_v10 = vld [vmem:[%s1087_s7 + $0x38] sm:$0xff]   ;;  %843 = vmatprep.subr.bf16.mxu0 %v944_v9  ;;  %v948_v13 = vld [vmem:[%s1087_s7 + $0x30] sm:$0xff]   ;;  %v951_v16 = vld [vmem:[%s1087_s7 + $0x28] sm:$0xff]  }
  0x28   : > { %v946_v11 = vld [vmem:[%s1087_s7 + $0xb8] sm:$0xff]   ;;  %844 = vmatpush3.bf16.msra.mxu0 %v945_v10  ;;  %v949_v14 = vld [vmem:[%s1087_s7 + $0xb0] sm:$0xff]   ;;  %v952_v17 = vld [vmem:[%s1087_s7 + $0xa8] sm:$0xff]  }
  0x29   : > { %881 = vmatprep.subr.bf16.mxu1 %v946_v11  ;;  %845 = vmatprep.subr.bf16.mxu0 %v947_v12  ;;  %v953_v18 = vld [vmem:[%s1087_s7 + $0x60] sm:$0xff]   ;;  %v956_v21 = vld [vmem:[%s1087_s7 + $0x58] sm:$0xff]   ;;  %v959_v24 = vld [vmem:[%s1087_s7 + $0x50] sm:$0xff]  }
  0x2a   : > { %882 = vmatpush3.bf16.msra.mxu1 %v946_v11  ;;  %v954_v19 = vld [vmem:[%s1087_s7 + $0x20] sm:$0xff]   ;;  %v958_v22 = vld [vmem:[%s1087_s7 + $0x98] sm:$0xff]   ;;  %v961_v25 = vld [vmem:[%s1087_s7 + $0x90] sm:$0xff]  }
  0x2b   : > { %883 = vmatprep.subr.bf16.mxu1 %v949_v14  ;;  %v955_v20 = vld [vmem:[%s1087_s7 + $0xa0] sm:$0xff]   ;;  %v957_v23 = vld [vmem:[%s1087_s7 + $0x18] sm:$0xff]   ;;  %v960_v26 = vld [vmem:[%s1087_s7 + $0x10] sm:$0xff]  }
  0x2c   : > { %846 = vmatpush3.bf16.msra.mxu0 %v948_v13  ;;  %v962_v27 = vld [vmem:[%s1087_s7 + $0x48] sm:$0xff]   ;;  %v965_v30 = vld [vmem:[%s1087_s7 + $0x40] sm:$0xff]   ;;  %v306_v44 = vld [vmem:[#allocation2 + $0x10] sm:$0xff] }
  0x2d   : > { %847 = vmatprep.subr.bf16.mxu0 %v950_v15  ;;  %v963_v28 = vld [vmem:[%s1087_s7 + $0x8] sm:$0xff]   ;;  %v967_v31 = vld [vmem:[%s1087_s7 + $0x80] sm:$0xff]   ;;  %v308_v58 = vld [vmem:[#allocation2 + $0x18] sm:$0xff] }
  0x2e   : > { %884 = vmatpush3.bf16.msra.mxu1 %v949_v14  ;;  %v964_v29 = vld [vmem:[%s1087_s7 + $0x88] sm:$0xff]   ;;  %v970_v32 = vld [vmem:[%s1089_s8 + $0x4] ss:$12 sps:$4 sm:$0xff]  }
  0x2f   : > { %885 = vmatprep.subr.bf16.mxu1 %v952_v17  ;;  %v971_v33 = vld [vmem:[%s1089_s8 + $0x8] ss:$12 sps:$4 sm:$0xff]   ;;  %574 = vmatprep.mubr.bf16.mxu0 %v970_v32  ;;  %v968_v35 = vld [vmem:[%s1089_s8] ss:$12 sps:$4 sm:$0xff]   ;;  %v975_v38 = vld [vmem:[%s1089_s8 + $0x18] ss:$12 sps:$4 sm:$0xff]  }
  0x30   : > { %848 = vmatpush3.bf16.msra.mxu0 %v951_v16  ;;  %v966_v34 = vld [vmem:[%s1087_s7] sm:$0xff]   ;;  %897 = vmatprep.mubr.bf16.mxu1 %v971_v33  ;;  %v973_v36 = vld [vmem:[%s1089_s8 + $0x1c] ss:$12 sps:$4 sm:$0xff]  }
  0x31   : > { %849 = vmatprep.subr.bf16.mxu0 %v953_v18  ;;  %v972_v37 = vld [vmem:[%s1089_s8 + $0x20] ss:$12 sps:$4 sm:$0xff]  }
  0x32   : > { %886 = vmatpush3.bf16.msra.mxu1 %v952_v17  ;;  %v307_v52 = vld [vmem:[#allocation2] sm:$0xff]  ;;  %v309_v0 = vld [vmem:[#allocation2 + $0x8] sm:$0xff] }
  0x33   : > { %887 = vmatprep.subr.bf16.mxu1 %v955_v20 }
  0x34   : > { %850 = vmatpush3.bf16.msra.mxu0 %v954_v19 }
  0x35   : > { %851 = vmatprep.subr.bf16.mxu0 %v956_v21 }
  0x36   : > { %888 = vmatpush3.bf16.msra.mxu1 %v955_v20 }
  0x37   : > { %889 = vmatprep.subr.bf16.mxu1 %v958_v22 }
  0x38   : > { %852 = vmatpush3.bf16.msra.mxu0 %v957_v23 }
  0x39   : > { %853 = vmatprep.subr.bf16.mxu0 %v959_v24 }
  0x3a   : > { %890 = vmatpush3.bf16.msra.mxu1 %v958_v22 }
  0x3b   : > { %891 = vmatprep.subr.bf16.mxu1 %v961_v25 }
  0x3c   : > { %854 = vmatpush3.bf16.msra.mxu0 %v960_v26 }
  0x3d   : > { %855 = vmatprep.subr.bf16.mxu0 %v962_v27 }
  0x3e   : > { %892 = vmatpush3.bf16.msra.mxu1 %v961_v25 }
  0x3f   : > { %893 = vmatprep.subr.bf16.mxu1 %v964_v29 }
  0x40   : > { %856 = vmatpush3.bf16.msra.mxu0 %v963_v28 }
  0x41   : > { %857 = vmatprep.subr.bf16.mxu0 %v965_v30 }
  0x42   : > { %894 = vmatpush3.bf16.msra.mxu1 %v964_v29 }
  0x43   : > { %895 = vmatprep.subr.bf16.mxu1 %v967_v31 }
  0x44   : > { %858 = vmatpush3.bf16.msra.mxu0 %v966_v34 }
  0x46   : > { %896 = vmatpush3.bf16.msra.mxu1 %v967_v31 }
  0x47   : > { %575 = vmatmul.mubr.bf16.vlgmr.msra.gmra.mxu0 %v968_v35 }
  0x48   : > { %582 = vmatprep.mubr.bf16.mxu0 %v973_v36 }
  0x49   : > { %898 = vmatmul.mubr.bf16.vlgmr.msra.gmra.mxu1 %v972_v37 }
  0x4f   : > { %583 = vmatmul.mubr.bf16.gmra.mxu0 %v975_v38 }
 0x107   : > { %v859_v39 = vpop.f32.mrf.mxu0 }
 0x109   : > { %v860_v40 = vpop.f32.mrf.mxu0  ;;  %v899_v41 = vpop.f32.mrf.mxu1 }
 0x10a   : > { %v861_v42 = vadd.f32 %v860_v40, %v859_v39 }
 0x10b   : > { %v862_v43 = vpop.f32.mrf.mxu0  ;;  %v625_v45 = vpop.f32.mrf.mxu1 }
 0x10c   : > { %v626_v46 = vadd.f32 %v861_v42, %v625_v45 }
 0x10d   : > { %v863_v47 = vpop.f32.mrf.mxu0  ;;  %v900_v48 = vpop.f32.mrf.mxu1 }
 0x10e   : > { %v640_v49 = vadd.f32 %v626_v46, %v306_v44  ;;  %v864_v50 = vadd.f32 %v863_v47, %v862_v43 }
 0x10f   : > { %v865_v51 = vpop.f32.mrf.mxu0  ;;  %v628_v53 = vpop.f32.mrf.mxu1 }
 0x110   : > { %644 = vst [vmem:[#allocation2 + $0x10] sm:$0xff] %v640_v49  ;;  %v629_v54 = vadd.f32 %v864_v50, %v628_v53 }
 0x111   : > { %v866_v55 = vpop.f32.mrf.mxu0 }
 0x112   : > { %v641_v56 = vadd.f32 %v629_v54, %v307_v52  ;;  %v867_v57 = vadd.f32 %v866_v55, %v865_v51 }
 0x113   : > { %v868_v59 = vpop.f32.mrf.mxu0 }
 0x114   : > { %645 = vst [vmem:[#allocation2] sm:$0xff] %v641_v56  ;;  %v634_v60 = vadd.f32 %v899_v41, %v867_v57 }
 0x115   : > { %v869_v61 = vpop.f32.mrf.mxu0 }
 0x116   : > { %v642_v62 = vadd.f32 %v634_v60, %v308_v58  ;;  %v870_v63 = vadd.f32 %v869_v61, %v868_v59 }
 0x118   : > { %646 = vst [vmem:[#allocation2 + $0x18] sm:$0xff] %v642_v62  ;;  %v637_v1 = vadd.f32 %v900_v48, %v870_v63  ;;  %651 = sbr.rel (%p836_p11) target bundleno = 297 (0x129), region = 66 }
 0x11a   : > { %v643_v2 = vadd.f32 %v637_v1, %v309_v0 }
 0x11c   : > { %647 = vst [vmem:[#allocation2 + $0x8] sm:$0xff] %v643_v2 }
 0x11d   : > { %v652_v3 = vld [vmem:[#allocation2 + $0x10] sm:$0xff]  ;;  %v837_v4 = vld [vmem:[%s1155_s2] ss:$0 sm:$0xff] }
 0x11e   : > { %v653_v5 = vld [vmem:[#allocation2] sm:$0xff]  ;;  %v663_v6 = vadd.f32 %v837_v4, %v652_v3 }
 0x11f   : > { %v664_v7 = vadd.f32 %v837_v4, %v653_v5  ;;  %v654_v8 = vld [vmem:[#allocation2 + $0x18] sm:$0xff] }
 0x120   : > { %v665_v10 = vadd.f32 %v837_v4, %v654_v8  ;;  %v667_v12 = vmax.f32 %v663_v6, 0.0 }
 0x121   : > { %v668_v13 = vmax.f32 %v664_v7, 0.0 }
 0x122   : > { %v669_v14 = vmax.f32 %v665_v10, 0.0  ;;  %671 = vst [vmem:[%s1156_s3] sm:$0xff] %v667_v12 }
 0x123   : > { %v655_v9 = vld [vmem:[#allocation2 + $0x8] sm:$0xff]  ;;  %672 = vst [vmem:[%s1156_s3 + $0x8] sm:$0xff] %v668_v13 }
 0x124   : > { %v666_v11 = vadd.f32 %v837_v4, %v655_v9  ;;  %673 = vst [vmem:[%s1156_s3 + $0x10] sm:$0xff] %v669_v14 }
 0x126   : > { %v670_v15 = vmax.f32 %v666_v11, 0.0 }
 0x128   : > { %674 = vst [vmem:[%s1156_s3 + $0x18] sm:$0xff] %v670_v15 }
 0x129 PF: > { %s13_s16 = sadd.s32 1, %s1014_s16   ;;  %s1157_s12 = smov %s1002_s13 }
 0x12a   : > { %p10_p12 = scmp.ge.s32.totalorder %s13_s16, 5   ;;  %s1158_s13 = smov %s1072_s20 }
 0x12b   : > { %s1159_s14 = smov %s1010_s15  ;;  %s1160_s15 = smov %s1162_s17 }
 0x12c   :  { %12 = sbr.rel (!%p10_p12) target bundleno = 3 (0x3), region = 113 }

// kernel: _lambda_.41
= control target key start
LH: loop header
LB: loop body
LE: loop exit
PB: predicated region body
PF: predicated region fallthrough
CT: control target
= control target key end

     0   :  { %9 = vsyncpa [#allocation5], 0  ;;  %s1361_s0 = inlined_call_operand.vmem [shape: bf16[32,1152], index: 0, kind: input, shape index: {}]   ;;  %s1362_s1 = inlined_call_operand.hbm [shape: bf16[1152,128], index: 1, kind: input, shape index: {}]   ;;  %s1363_s2 = inlined_call_operand.vmem [shape: f32[1,128], index: 2, kind: input, shape index: {}]   ;;  %s1364_s3 = inlined_call_operand.vmem [shape: f32[32,128], index: 3, kind: input, shape index: {}]   ;;  %s1365_s4 = inlined_call_operand.vmem [shape: f32[32,128], index: 4, kind: output, shape index: {}]  }
   0x1   :  { %11 = vsyncpa [#allocation5 + $0x1], 0  ;;  %s1206_s15 = smov 0   ;;  %s1208_s16 = smov 0  }
   0x2   :  { %s1210_s17 = smov 0   ;;  %s1212_s18 = smov 0  }
   0x3   :  { %s1214_s19 = smov 0   ;;  %s1216_s20 = smov 0  }
   0x4 LB: > { %s897_s21 = sadd.s32 4294967295, %s1175_s20   ;;  %s29_s22 = sadd.s32 1, %s1171_s19  ;;  %s1175_s20 = sphi %s1216_s20, %s17_s20   ;;  %s1171_s19 = sphi %s1214_s19, %s1372_s19   ;;  %s1167_s18 = sphi %s1212_s18, %s1371_s18   ;;  %s1163_s17 = sphi %s1210_s17, %s1370_s17   ;;  %s1159_s16 = sphi %s1208_s16, %s1369_s16   ;;  %s1155_s15 = sphi %s1206_s15, %s1368_s15  }
   0x5   : > { %p30_p0 = scmp.ge.s32.totalorder %s29_s22, 3  ;;  %s45_s23 = sadd.s32 1, %s1163_s17 }
   0x6   : > { %p52_p1 = scmp.ne.s32.totalorder %s1163_s17, %s1159_s16  ;;  %p53_p2 = scmp.eq.s32.totalorder %s1175_s20, 0 }
   0x7   : > { %s1374_s22 = smov (%p30_p0, %s29_s22), 0  ;;  %p86_p4 = scmp.ne.s32.totalorder %s1159_s16, %s1155_s15 }
   0x8   : > { %p1242_p3 = por %p53_p2, %p52_p1  ;;  %s41_s25 = ssub.s32 %s1171_s19, %s1374_s22 }
   0x9   : > { %p87_p5 = scmp.eq.s32.totalorder %s897_s21, 0  ;;  %p43_p6 = scmp.eq.s32.totalorder %s41_s25, 0 }
   0xa   : > { %p901_p8 = scmp.ge.s32.totalorder %s1175_s20, 3 }
   0xb   : > { %p1249_p7 = por %p87_p5, %p86_p4 }
   0xc   : > { %s1254_s27 = scalar_select %p43_p6, %s1163_s17, %s45_s23  }
   0xd   : > { %206 = sbr.rel (%p901_p8) target bundleno = 44 (0x2c), region = 24 }
  0x12   : > { %209 = sbr.rel (!%p1242_p3) target bundleno = 27 (0x1b), region = 28  ;;  %s211_s28 = sand.u32 (%p1242_p3), 1, %s1163_s17  }
  0x13   : > { %s950_s29 = smul.u32 (%p1242_p3), 12, %s1171_s19 }
  0x14   : > { %s1010_s30 = smul.u32 (%p1242_p3), 48, %s211_s28 }
  0x15   : > { %s219_s7 = scalar_lea.vmem (%p1242_p3), %s1361_s0, %s950_s29 }
  0x16   : > { %v234_v0 = vld [vmem:[%s219_s7] sm:$0xff] (%p1242_p3)  ;;  %v238_v2 = vld [vmem:[%s219_s7 + $0x48] sm:$0xff] (%p1242_p3)  ;;  %s213_s8 = scalar_lea.vmem (%p1242_p3), [#allocation3], %s1010_s30  ;;  %v907_v6 = vld [vmem:[%s219_s7 + $0x50] sm:$0xf] (%p1242_p3) }
  0x17   : > { %v236_v1 = vld [vmem:[%s219_s7 + $0x24] sm:$0xff]  ;;  %235 = vst [vmem:[%s213_s8] sm:$0xff] %v234_v0  ;;  %239 = vst [vmem:[%s213_s8 + $0x18] sm:$0xff] %v238_v2  ;;  %v240_v3 = vld [vmem:[%s219_s7 + $0x6c] sm:$0xff] }
  0x18   : > { %237 = vst [vmem:[%s213_s8 + $0xc] sm:$0xff] %v236_v1  ;;  %v903_v4 = vld [vmem:[%s219_s7 + $0x8] sm:$0xf]  ;;  %v905_v5 = vld [vmem:[%s219_s7 + $0x2c] sm:$0xf]  ;;  %241 = vst [vmem:[%s213_s8 + $0x24] sm:$0xff] %v240_v3 }
  0x19   : > { %904 = vst [vmem:[%s213_s8 + $0x8] sm:$0xf] %v903_v4  ;;  %906 = vst [vmem:[%s213_s8 + $0x14] sm:$0xf] %v905_v5  ;;  %v909_v7 = vld [vmem:[%s219_s7 + $0x74] sm:$0xf] }
  0x1a   : > { %908 = vst [vmem:[%s213_s8 + $0x20] sm:$0xf] %v907_v6  ;;  %910 = vst [vmem:[%s213_s8 + $0x2c] sm:$0xf] %v909_v7 }
  0x1b PF: > { %s264_s9 = sand.u32 1, %s1163_s17   ;;  %s951_s10 = smul.u32 3072, %s1171_s19 }
  0x1c   : > { %s1011_s11 = smul.u32 192, %s264_s9  ;;  %s265_s23 = scalar_lea.sflag [#allocation5], %s264_s9 }
  0x1d   : > { %s275_s14 = scalar_lea.hbm %s1362_s1, %s951_s10  ;;  %s1177_s28 = smov [#allocation4]  }
  0x1e   : > { %s268_s15 = scalar_lea.vmem [#allocation4], %s1011_s11  ;;  %s1115_s29 = sshll.u32 %s1177_s28, 4  ;;  %s1116_s29 = int_to_ptr.vmem [resolvable:$false] %s1115_s29 }
  0x1f   : > { %s276_s21 = sshll.u32 %s268_s15, 4  ;;  %s1117_s30 = scalar_lea.vmem %s1116_s29, 6144  ;;  %s277_s21 = int_to_ptr.vmem [resolvable:$true] %s276_s21 }
  0x20   : > { %s1111_s25 = scalar_lea.vmem %s277_s21, 3072  ;;  %p1118_p12 = scmp.lt.s32.totalorder %s277_s21, %s1116_s29 }
  0x21   : > { %p1112_p9 = scmp.ne.s32.totalorder %s277_s21, %s1111_s25  ;;  %p1119_p13 = scmp.lt.s32.totalorder %s1117_s30, %s1111_s25 }
  0x23   : > { %p1113_p10 = pnand %p1112_p9, %p1242_p3  ;;  %p1120_p0 = por %p1119_p13, %p1118_p12 }
  0x25   : > { %p1114_p11 = pneg %p1113_p10 }
  0x27   : > { %p1121_p1 = pnand %p1120_p0, %p1114_p11 }
  0x29   : > { %1124 = shalt.err (!%p1121_p1)
}
  0x2a   : > { %s1178_s5 = smov 64   ;;  %s1179_s6 = smov 4  }
  0x2b   : > { %1014 = dma.hbm_to_vmem [thread:$0]  (%p1242_p3), %s275_s14, 3072, %s277_s21, %s265_s23, %s1178_s5, %s1178_s5, %s1179_s6  }
  0x2c PF: > { %p912_p2 = scmp.ge.s32.totalorder %s1175_s20, 1  ;;  %p284_p4 = scmp.lt.s32.totalorder %s1175_s20, 4 }
  0x2e   : > { %p285_p5 = pnand %p912_p2, %p284_p4 }
  0x2f   : > { %s291_s7 = sand.u32 (!%p285_p5), 1, %s1159_s16  }
  0x30   : > { %288 = sbr.rel (%p285_p5) target bundleno = 325 (0x145), region = 58  ;;  %s298_s11 = scalar_lea.sflag (!%p285_p5), [#allocation5], %s291_s7 }
  0x31   : > { %s1012_s8 = smul.u32 (!%p285_p5), 48, %s291_s7 }
  0x32   : > { %s1013_s9 = smul.u32 (!%p285_p5), 192, %s291_s7 }
  0x33   : > { %s1276_s10 = scalar_lea.vmem (!%p285_p5), [#allocation3], %s1012_s8 }
  0x34   : > { %s1278_s12 = scalar_lea.vmem (!%p285_p5), [#allocation4], %s1013_s9 }
  0x35   : > { %1150 = dma.done.wait (%p1249_p7), %s298_s11, 3072  }
  0x36   : > { %1152 = vsyncadd (%p1249_p7), %s298_s11, 4294964224  ;;  %p913_p3 = scmp.ne.s32.totalorder %s1167_s18, 0 }
  0x38   : > { %372 = sbr.rel (%p913_p3) target bundleno = 64 (0x40), region = 70 }
  0x3d   : > { %v1180_v8 = vmov 0.0  }
  0x3e   : > { %373 = vst [vmem:[#allocation2 + $0x10] sm:$0xff] %v1180_v8  ;;  %374 = vst [vmem:[#allocation2] sm:$0xff] %v1180_v8 }
  0x3f   : > { %375 = vst [vmem:[#allocation2 + $0x18] sm:$0xff] %v1180_v8  ;;  %376 = vst [vmem:[#allocation2 + $0x8] sm:$0xff] %v1180_v8 }
  0x40 PF: > { %v1067_v9 = vld [vmem:[%s1278_s12 + $0x78] sm:$0xff]   ;;  %v1070_v12 = vld [vmem:[%s1278_s12 + $0x70] sm:$0xff]   ;;  %v1073_v15 = vld [vmem:[%s1278_s12 + $0x68] sm:$0xff]   ;;  %p944_p6 = scmp.ne.s32.totalorder %s1167_s18, 2 }
  0x41   : > { %v1068_v10 = vld [vmem:[%s1278_s12 + $0x38] sm:$0xff]   ;;  %952 = vmatprep.subr.bf16.mxu0 %v1067_v9  ;;  %v1071_v13 = vld [vmem:[%s1278_s12 + $0x30] sm:$0xff]   ;;  %v1074_v16 = vld [vmem:[%s1278_s12 + $0x28] sm:$0xff]  }
  0x42   : > { %v1069_v11 = vld [vmem:[%s1278_s12 + $0xb8] sm:$0xff]   ;;  %953 = vmatpush3.bf16.msra.mxu0 %v1068_v10  ;;  %v1072_v14 = vld [vmem:[%s1278_s12 + $0xb0] sm:$0xff]   ;;  %v1075_v17 = vld [vmem:[%s1278_s12 + $0xa8] sm:$0xff]  }
  0x43   : > { %990 = vmatprep.subr.bf16.mxu1 %v1069_v11  ;;  %954 = vmatprep.subr.bf16.mxu0 %v1070_v12  ;;  %v1076_v18 = vld [vmem:[%s1278_s12 + $0x60] sm:$0xff]   ;;  %v1079_v21 = vld [vmem:[%s1278_s12 + $0x58] sm:$0xff]   ;;  %v1082_v24 = vld [vmem:[%s1278_s12 + $0x50] sm:$0xff]  }
  0x44   : > { %991 = vmatpush3.bf16.msra.mxu1 %v1069_v11  ;;  %v1077_v19 = vld [vmem:[%s1278_s12 + $0x20] sm:$0xff]   ;;  %v1081_v22 = vld [vmem:[%s1278_s12 + $0x98] sm:$0xff]   ;;  %v1084_v25 = vld [vmem:[%s1278_s12 + $0x90] sm:$0xff]  }
  0x45   : > { %992 = vmatprep.subr.bf16.mxu1 %v1072_v14  ;;  %v1078_v20 = vld [vmem:[%s1278_s12 + $0xa0] sm:$0xff]   ;;  %v1080_v23 = vld [vmem:[%s1278_s12 + $0x18] sm:$0xff]   ;;  %v1083_v26 = vld [vmem:[%s1278_s12 + $0x10] sm:$0xff]  }
  0x46   : > { %955 = vmatpush3.bf16.msra.mxu0 %v1071_v13  ;;  %v1085_v27 = vld [vmem:[%s1278_s12 + $0x48] sm:$0xff]   ;;  %v1088_v30 = vld [vmem:[%s1278_s12 + $0x40] sm:$0xff]   ;;  %v377_v44 = vld [vmem:[#allocation2 + $0x10] sm:$0xff] }
  0x47   : > { %956 = vmatprep.subr.bf16.mxu0 %v1073_v15  ;;  %v1086_v28 = vld [vmem:[%s1278_s12 + $0x8] sm:$0xff]   ;;  %v1090_v31 = vld [vmem:[%s1278_s12 + $0x80] sm:$0xff]   ;;  %v379_v58 = vld [vmem:[#allocation2 + $0x18] sm:$0xff] }
  0x48   : > { %993 = vmatpush3.bf16.msra.mxu1 %v1072_v14  ;;  %v1087_v29 = vld [vmem:[%s1278_s12 + $0x88] sm:$0xff]   ;;  %v1093_v32 = vld [vmem:[%s1276_s10 + $0x4] ss:$12 sps:$4 sm:$0xff]  }
  0x49   : > { %994 = vmatprep.subr.bf16.mxu1 %v1075_v17  ;;  %v1094_v33 = vld [vmem:[%s1276_s10 + $0x8] ss:$12 sps:$4 sm:$0xff]   ;;  %645 = vmatprep.mubr.bf16.mxu0 %v1093_v32  ;;  %v1091_v35 = vld [vmem:[%s1276_s10] ss:$12 sps:$4 sm:$0xff]   ;;  %v1098_v38 = vld [vmem:[%s1276_s10 + $0x18] ss:$12 sps:$4 sm:$0xff]  }
  0x4a   : > { %957 = vmatpush3.bf16.msra.mxu0 %v1074_v16  ;;  %v1089_v34 = vld [vmem:[%s1278_s12] sm:$0xff]   ;;  %1006 = vmatprep.mubr.bf16.mxu1 %v1094_v33  ;;  %v1096_v36 = vld [vmem:[%s1276_s10 + $0x1c] ss:$12 sps:$4 sm:$0xff]  }
  0x4b   : > { %958 = vmatprep.subr.bf16.mxu0 %v1076_v18  ;;  %v1095_v37 = vld [vmem:[%s1276_s10 + $0x20] ss:$12 sps:$4 sm:$0xff]  }
  0x4c   : > { %995 = vmatpush3.bf16.msra.mxu1 %v1075_v17  ;;  %v378_v52 = vld [vmem:[#allocation2] sm:$0xff]  ;;  %v380_v0 = vld [vmem:[#allocation2 + $0x8] sm:$0xff] }
  0x4d   : > { %996 = vmatprep.subr.bf16.mxu1 %v1078_v20 }
  0x4e   : > { %959 = vmatpush3.bf16.msra.mxu0 %v1077_v19 }
  0x4f   : > { %960 = vmatprep.subr.bf16.mxu0 %v1079_v21 }
  0x50   : > { %997 = vmatpush3.bf16.msra.mxu1 %v1078_v20 }
  0x51   : > { %998 = vmatprep.subr.bf16.mxu1 %v1081_v22 }
  0x52   : > { %961 = vmatpush3.bf16.msra.mxu0 %v1080_v23 }
  0x53   : > { %962 = vmatprep.subr.bf16.mxu0 %v1082_v24 }
  0x54   : > { %999 = vmatpush3.bf16.msra.mxu1 %v1081_v22 }
  0x55   : > { %1000 = vmatprep.subr.bf16.mxu1 %v1084_v25 }
  0x56   : > { %963 = vmatpush3.bf16.msra.mxu0 %v1083_v26 }
  0x57   : > { %964 = vmatprep.subr.bf16.mxu0 %v1085_v27 }
  0x58   : > { %1001 = vmatpush3.bf16.msra.mxu1 %v1084_v25 }
  0x59   : > { %1002 = vmatprep.subr.bf16.mxu1 %v1087_v29 }
  0x5a   : > { %965 = vmatpush3.bf16.msra.mxu0 %v1086_v28 }
  0x5b   : > { %966 = vmatprep.subr.bf16.mxu0 %v1088_v30 }
  0x5c   : > { %1003 = vmatpush3.bf16.msra.mxu1 %v1087_v29 }
  0x5d   : > { %1004 = vmatprep.subr.bf16.mxu1 %v1090_v31 }
  0x5e   : > { %967 = vmatpush3.bf16.msra.mxu0 %v1089_v34 }
  0x60   : > { %1005 = vmatpush3.bf16.msra.mxu1 %v1090_v31 }
  0x61   : > { %646 = vmatmul.mubr.bf16.vlgmr.msra.gmra.mxu0 %v1091_v35 }
  0x62   : > { %653 = vmatprep.mubr.bf16.mxu0 %v1096_v36 }
  0x63   : > { %1007 = vmatmul.mubr.bf16.vlgmr.msra.gmra.mxu1 %v1095_v37 }
  0x69   : > { %654 = vmatmul.mubr.bf16.gmra.mxu0 %v1098_v38 }
 0x121   : > { %v968_v39 = vpop.f32.mrf.mxu0 }
 0x123   : > { %v969_v40 = vpop.f32.mrf.mxu0  ;;  %v1008_v41 = vpop.f32.mrf.mxu1 }
 0x124   : > { %v970_v42 = vadd.f32 %v969_v40, %v968_v39 }
 0x125   : > { %v971_v43 = vpop.f32.mrf.mxu0  ;;  %v696_v45 = vpop.f32.mrf.mxu1 }
 0x126   : > { %v697_v46 = vadd.f32 %v970_v42, %v696_v45 }
 0x127   : > { %v972_v47 = vpop.f32.mrf.mxu0  ;;  %v1009_v48 = vpop.f32.mrf.mxu1 }
 0x128   : > { %v711_v49 = vadd.f32 %v697_v46, %v377_v44  ;;  %v973_v50 = vadd.f32 %v972_v47, %v971_v43 }
 0x129   : > { %v974_v51 = vpop.f32.mrf.mxu0  ;;  %v699_v53 = vpop.f32.mrf.mxu1 }
 0x12a   : > { %715 = vst [vmem:[#allocation2 + $0x10] sm:$0xff] %v711_v49  ;;  %v700_v54 = vadd.f32 %v973_v50, %v699_v53 }
 0x12b   : > { %v975_v55 = vpop.f32.mrf.mxu0 }
 0x12c   : > { %v712_v56 = vadd.f32 %v700_v54, %v378_v52  ;;  %v976_v57 = vadd.f32 %v975_v55, %v974_v51 }
 0x12d   : > { %v977_v59 = vpop.f32.mrf.mxu0 }
 0x12e   : > { %716 = vst [vmem:[#allocation2] sm:$0xff] %v712_v56  ;;  %v705_v60 = vadd.f32 %v1008_v41, %v976_v57 }
 0x12f   : > { %v978_v61 = vpop.f32.mrf.mxu0 }
 0x130   : > { %v713_v62 = vadd.f32 %v705_v60, %v379_v58  ;;  %v979_v63 = vadd.f32 %v978_v61, %v977_v59 }
 0x132   : > { %717 = vst [vmem:[#allocation2 + $0x18] sm:$0xff] %v713_v62  ;;  %v708_v1 = vadd.f32 %v1009_v48, %v979_v63  ;;  %722 = sbr.rel (%p944_p6) target bundleno = 325 (0x145), region = 74 }
 0x134   : > { %v714_v2 = vadd.f32 %v708_v1, %v380_v0 }
 0x136   : > { %718 = vst [vmem:[#allocation2 + $0x8] sm:$0xff] %v714_v2 }
 0x137   : > { %v723_v3 = vld [vmem:[#allocation2 + $0x10] sm:$0xff]  ;;  %v945_v4 = vld [vmem:[%s1363_s2] ss:$0 sm:$0xff]  ;;  %v739_v8 = vld [vmem:[%s1364_s3 + $0x8] sm:$0xff] }
 0x138   : > { %v738_v5 = vld [vmem:[%s1364_s3] sm:$0xff]  ;;  %v734_v6 = vadd.f32 %v945_v4, %v723_v3  ;;  %v740_v12 = vld [vmem:[%s1364_s3 + $0x10] sm:$0xff]  ;;  %v741_v14 = vld [vmem:[%s1364_s3 + $0x18] sm:$0xff] }
 0x139   : > { %v724_v7 = vld [vmem:[#allocation2] sm:$0xff]  ;;  %v725_v9 = vld [vmem:[#allocation2 + $0x18] sm:$0xff] }
 0x13a   : > { %v735_v10 = vadd.f32 %v945_v4, %v724_v7  ;;  %v736_v11 = vadd.f32 %v945_v4, %v725_v9  ;;  %v742_v15 = vadd.f32 %v738_v5, %v734_v6 }
 0x13c   : > { %v743_v17 = vadd.f32 %v739_v8, %v735_v10  ;;  %v744_v18 = vadd.f32 %v740_v12, %v736_v11  ;;  %v746_v19 = vmax.f32 %v742_v15, 0.0 }
 0x13d   : > { %v726_v13 = vld [vmem:[#allocation2 + $0x8] sm:$0xff] }
 0x13e   : > { %v737_v16 = vadd.f32 %v945_v4, %v726_v13  ;;  %v747_v21 = vmax.f32 %v743_v17, 0.0  ;;  %v748_v22 = vmax.f32 %v744_v18, 0.0  ;;  %750 = vst [vmem:[%s1365_s4] sm:$0xff] %v746_v19 }
 0x140   : > { %v745_v20 = vadd.f32 %v741_v14, %v737_v16  ;;  %751 = vst [vmem:[%s1365_s4 + $0x8] sm:$0xff] %v747_v21  ;;  %752 = vst [vmem:[%s1365_s4 + $0x10] sm:$0xff] %v748_v22 }
 0x142   : > { %v749_v23 = vmax.f32 %v745_v20, 0.0 }
 0x144   : > { %753 = vst [vmem:[%s1365_s4 + $0x18] sm:$0xff] %v749_v23 }
 0x145 PF: > { %s17_s20 = sadd.s32 1, %s1175_s20   ;;  %s1368_s15 = smov %s1159_s16 }
 0x146   : > { %p14_p7 = scmp.ge.s32.totalorder %s17_s20, 5   ;;  %s1369_s16 = smov %s1163_s17 }
 0x147   : > { %s1370_s17 = smov %s1254_s27  ;;  %s1371_s18 = smov %s1171_s19 }
 0x148   : > { %s1372_s19 = smov %s1374_s22  ;;  %16 = sbr.rel (!%p14_p7) target bundleno = 4 (0x4), region = 130 }
 0x14d   :  { %782 = vsyncpa [#allocation5], 1 }
 0x14e   :  { %784 = vsyncpa [#allocation5 + $0x1], 1 }

// kernel: _lambda_.45
= control target key start
LH: loop header
LB: loop body
LE: loop exit
PB: predicated region body
PF: predicated region fallthrough
CT: control target
= control target key end

     0   :  { %s1129_s15 = smov 0   ;;  %s1131_s16 = smov 0   ;;  %s1257_s0 = inlined_call_operand.vmem [shape: bf16[32,1152], index: 0, kind: input, shape index: {}]   ;;  %s1258_s1 = inlined_call_operand.vmem [shape: bf16[1152,128], index: 1, kind: input, shape index: {}]   ;;  %s1259_s2 = inlined_call_operand.vmem [shape: f32[1,128], index: 2, kind: input, shape index: {}]   ;;  %s1260_s3 = inlined_call_operand.vmem [shape: f32[32,128], index: 3, kind: input, shape index: {}]   ;;  %s1261_s4 = inlined_call_operand.vmem [shape: f32[32,128], index: 4, kind: output, shape index: {}]  }
   0x1   :  { %s1133_s17 = smov 0   ;;  %s1135_s18 = smov 0  }
   0x2   :  { %s1137_s19 = smov 0  }
   0x3 LB: > { %s26_s20 = sadd.s32 1, %s1097_s18  ;;  %p49_p1 = scmp.ne.s32.totalorder %s1089_s16, %s1085_s15  ;;  %s1101_s19 = sphi %s1137_s19, %s14_s19   ;;  %s1097_s18 = sphi %s1135_s18, %s1265_s18   ;;  %s1093_s17 = sphi %s1133_s17, %s1264_s17   ;;  %s1089_s16 = sphi %s1131_s16, %s1263_s16   ;;  %s1085_s15 = sphi %s1129_s15, %s1262_s15  }
   0x4   : > { %p27_p0 = scmp.ge.s32.totalorder %s26_s20, 3  ;;  %p50_p2 = scmp.eq.s32.totalorder %s1101_s19, 0 }
   0x5   : > { %s42_s22 = sadd.s32 1, %s1089_s16  ;;  %p880_p5 = scmp.ge.s32.totalorder %s1101_s19, 3 }
   0x6   : > { %s1267_s20 = smov (%p27_p0, %s26_s20), 0  ;;  %p51_p3 = por %p50_p2, %p49_p1 }
   0x7   : > { %s38_s21 = ssub.s32 %s1097_s18, %s1267_s20  ;;  %203 = sbr.rel (%p880_p5) target bundleno = 21 (0x15), region = 24 }
   0x8   : > { %p40_p4 = scmp.eq.s32.totalorder %s38_s21, 0 }
   0xa   : > { %s1164_s23 = scalar_select %p40_p4, %s1089_s16, %s42_s22  }
   0xc   : > { %206 = sbr.rel (!%p51_p3) target bundleno = 21 (0x15), region = 28  ;;  %s208_s24 = sand.u32 (%p51_p3), 1, %s1089_s16  }
   0xd   : > { %s929_s25 = smul.u32 (%p51_p3), 12, %s1097_s18 }
   0xe   : > { %s988_s26 = smul.u32 (%p51_p3), 48, %s208_s24 }
   0xf   : > { %s216_s29 = scalar_lea.vmem (%p51_p3), %s1257_s0, %s929_s25 }
  0x10   : > { %v231_v0 = vld [vmem:[%s216_s29] sm:$0xff] (%p51_p3)  ;;  %v235_v2 = vld [vmem:[%s216_s29 + $0x48] sm:$0xff] (%p51_p3)  ;;  %s210_s30 = scalar_lea.vmem (%p51_p3), [#allocation3], %s988_s26  ;;  %v886_v6 = vld [vmem:[%s216_s29 + $0x50] sm:$0xf] (%p51_p3) }
  0x11   : > { %v233_v1 = vld [vmem:[%s216_s29 + $0x24] sm:$0xff]  ;;  %232 = vst [vmem:[%s210_s30] sm:$0xff] %v231_v0  ;;  %236 = vst [vmem:[%s210_s30 + $0x18] sm:$0xff] %v235_v2  ;;  %v237_v3 = vld [vmem:[%s216_s29 + $0x6c] sm:$0xff] }
  0x12   : > { %234 = vst [vmem:[%s210_s30 + $0xc] sm:$0xff] %v233_v1  ;;  %v882_v4 = vld [vmem:[%s216_s29 + $0x8] sm:$0xf]  ;;  %v884_v5 = vld [vmem:[%s216_s29 + $0x2c] sm:$0xf]  ;;  %238 = vst [vmem:[%s210_s30 + $0x24] sm:$0xff] %v237_v3 }
  0x13   : > { %883 = vst [vmem:[%s210_s30 + $0x8] sm:$0xf] %v882_v4  ;;  %885 = vst [vmem:[%s210_s30 + $0x14] sm:$0xf] %v884_v5  ;;  %v888_v7 = vld [vmem:[%s216_s29 + $0x74] sm:$0xf] }
  0x14   : > { %887 = vst [vmem:[%s210_s30 + $0x20] sm:$0xf] %v886_v6  ;;  %889 = vst [vmem:[%s210_s30 + $0x2c] sm:$0xf] %v888_v7 }
  0x15 PF: > { %p890_p6 = scmp.ge.s32.totalorder %s1101_s19, 1  ;;  %p271_p7 = scmp.lt.s32.totalorder %s1101_s19, 4 }
  0x17   : > { %p272_p8 = pnand %p890_p6, %p271_p7 }
  0x18   : > { %s278_s5 = sand.u32 (!%p272_p8), 1, %s1085_s15   ;;  %s327_s6 = smul.u32 (!%p272_p8), 48, %s1093_s17 }
  0x19   : > { %275 = sbr.rel (%p272_p8) target bundleno = 299 (0x12b), region = 58  ;;  %p892_p10 = scmp.ne.s32.totalorder (!%p272_p8), %s1093_s17, 0 }
  0x1a   : > { %s989_s7 = smul.u32 (!%p272_p8), 48, %s278_s5  ;;  %p328_p9 = scmp.lt.s32.totalorder (!%p272_p8), %s327_s6, 143 }
  0x1c   : > { %s1181_s12 = scalar_lea.vmem (!%p272_p8), [#allocation3], %s989_s7 }
  0x1e   : > { %s1269_s6 = smov (!%p328_p9, %s327_s6), 143  ;;  %361 = sbr.rel (%p892_p10) target bundleno = 38 (0x26), region = 66 }
  0x1f   : > { %s891_s8 = sshll.u32 %s1269_s6, 2 }
  0x20   : > { %s1179_s11 = scalar_lea.vmem %s1258_s1, %s891_s8 }
  0x23   : > { %v1103_v8 = vmov 0.0  }
  0x24   : > { %362 = vst [vmem:[#allocation2 + $0x10] sm:$0xff] %v1103_v8  ;;  %363 = vst [vmem:[#allocation2] sm:$0xff] %v1103_v8 }
  0x25   : > { %364 = vst [vmem:[#allocation2 + $0x18] sm:$0xff] %v1103_v8  ;;  %365 = vst [vmem:[#allocation2 + $0x8] sm:$0xff] %v1103_v8 }
  0x26 PF: > { %v1031_v9 = vld [vmem:[%s1179_s11 + $0x78] sm:$0xff]   ;;  %v1034_v12 = vld [vmem:[%s1179_s11 + $0x70] sm:$0xff]   ;;  %v1037_v15 = vld [vmem:[%s1179_s11 + $0x68] sm:$0xff]   ;;  %p923_p11 = scmp.ne.s32.totalorder %s1093_s17, 2 }
  0x27   : > { %v1032_v10 = vld [vmem:[%s1179_s11 + $0x38] sm:$0xff]   ;;  %930 = vmatprep.subr.bf16.mxu0 %v1031_v9  ;;  %v1035_v13 = vld [vmem:[%s1179_s11 + $0x30] sm:$0xff]   ;;  %v1038_v16 = vld [vmem:[%s1179_s11 + $0x28] sm:$0xff]  }
  0x28   : > { %v1033_v11 = vld [vmem:[%s1179_s11 + $0xb8] sm:$0xff]   ;;  %931 = vmatpush3.bf16.msra.mxu0 %v1032_v10  ;;  %v1036_v14 = vld [vmem:[%s1179_s11 + $0xb0] sm:$0xff]   ;;  %v1039_v17 = vld [vmem:[%s1179_s11 + $0xa8] sm:$0xff]  }
  0x29   : > { %968 = vmatprep.subr.bf16.mxu1 %v1033_v11  ;;  %932 = vmatprep.subr.bf16.mxu0 %v1034_v12  ;;  %v1040_v18 = vld [vmem:[%s1179_s11 + $0x60] sm:$0xff]   ;;  %v1043_v21 = vld [vmem:[%s1179_s11 + $0x58] sm:$0xff]   ;;  %v1046_v24 = vld [vmem:[%s1179_s11 + $0x50] sm:$0xff]  }
  0x2a   : > { %969 = vmatpush3.bf16.msra.mxu1 %v1033_v11  ;;  %v1041_v19 = vld [vmem:[%s1179_s11 + $0x20] sm:$0xff]   ;;  %v1045_v22 = vld [vmem:[%s1179_s11 + $0x98] sm:$0xff]   ;;  %v1048_v25 = vld [vmem:[%s1179_s11 + $0x90] sm:$0xff]  }
  0x2b   : > { %970 = vmatprep.subr.bf16.mxu1 %v1036_v14  ;;  %v1042_v20 = vld [vmem:[%s1179_s11 + $0xa0] sm:$0xff]   ;;  %v1044_v23 = vld [vmem:[%s1179_s11 + $0x18] sm:$0xff]   ;;  %v1047_v26 = vld [vmem:[%s1179_s11 + $0x10] sm:$0xff]  }
  0x2c   : > { %933 = vmatpush3.bf16.msra.mxu0 %v1035_v13  ;;  %v1049_v27 = vld [vmem:[%s1179_s11 + $0x48] sm:$0xff]   ;;  %v1052_v30 = vld [vmem:[%s1179_s11 + $0x40] sm:$0xff]   ;;  %v366_v44 = vld [vmem:[#allocation2 + $0x10] sm:$0xff] }
  0x2d   : > { %934 = vmatprep.subr.bf16.mxu0 %v1037_v15  ;;  %v1050_v28 = vld [vmem:[%s1179_s11 + $0x8] sm:$0xff]   ;;  %v1054_v31 = vld [vmem:[%s1179_s11 + $0x80] sm:$0xff]   ;;  %v368_v58 = vld [vmem:[#allocation2 + $0x18] sm:$0xff] }
  0x2e   : > { %971 = vmatpush3.bf16.msra.mxu1 %v1036_v14  ;;  %v1051_v29 = vld [vmem:[%s1179_s11 + $0x88] sm:$0xff]   ;;  %v1057_v32 = vld [vmem:[%s1181_s12 + $0x4] ss:$12 sps:$4 sm:$0xff]  }
  0x2f   : > { %972 = vmatprep.subr.bf16.mxu1 %v1039_v17  ;;  %v1058_v33 = vld [vmem:[%s1181_s12 + $0x8] ss:$12 sps:$4 sm:$0xff]   ;;  %634 = vmatprep.mubr.bf16.mxu0 %v1057_v32  ;;  %v1055_v35 = vld [vmem:[%s1181_s12] ss:$12 sps:$4 sm:$0xff]   ;;  %v1062_v38 = vld [vmem:[%s1181_s12 + $0x18] ss:$12 sps:$4 sm:$0xff]  }
  0x30   : > { %935 = vmatpush3.bf16.msra.mxu0 %v1038_v16  ;;  %v1053_v34 = vld [vmem:[%s1179_s11] sm:$0xff]   ;;  %984 = vmatprep.mubr.bf16.mxu1 %v1058_v33  ;;  %v1060_v36 = vld [vmem:[%s1181_s12 + $0x1c] ss:$12 sps:$4 sm:$0xff]  }
  0x31   : > { %936 = vmatprep.subr.bf16.mxu0 %v1040_v18  ;;  %v1059_v37 = vld [vmem:[%s1181_s12 + $0x20] ss:$12 sps:$4 sm:$0xff]  }
  0x32   : > { %973 = vmatpush3.bf16.msra.mxu1 %v1039_v17  ;;  %v367_v52 = vld [vmem:[#allocation2] sm:$0xff]  ;;  %v369_v0 = vld [vmem:[#allocation2 + $0x8] sm:$0xff] }
  0x33   : > { %974 = vmatprep.subr.bf16.mxu1 %v1042_v20 }
  0x34   : > { %937 = vmatpush3.bf16.msra.mxu0 %v1041_v19 }
  0x35   : > { %938 = vmatprep.subr.bf16.mxu0 %v1043_v21 }
  0x36   : > { %975 = vmatpush3.bf16.msra.mxu1 %v1042_v20 }
  0x37   : > { %976 = vmatprep.subr.bf16.mxu1 %v1045_v22 }
  0x38   : > { %939 = vmatpush3.bf16.msra.mxu0 %v1044_v23 }
  0x39   : > { %940 = vmatprep.subr.bf16.mxu0 %v1046_v24 }
  0x3a   : > { %977 = vmatpush3.bf16.msra.mxu1 %v1045_v22 }
  0x3b   : > { %978 = vmatprep.subr.bf16.mxu1 %v1048_v25 }
  0x3c   : > { %941 = vmatpush3.bf16.msra.mxu0 %v1047_v26 }
  0x3d   : > { %942 = vmatprep.subr.bf16.mxu0 %v1049_v27 }
  0x3e   : > { %979 = vmatpush3.bf16.msra.mxu1 %v1048_v25 }
  0x3f   : > { %980 = vmatprep.subr.bf16.mxu1 %v1051_v29 }
  0x40   : > { %943 = vmatpush3.bf16.msra.mxu0 %v1050_v28 }
  0x41   : > { %944 = vmatprep.subr.bf16.mxu0 %v1052_v30 }
  0x42   : > { %981 = vmatpush3.bf16.msra.mxu1 %v1051_v29 }
  0x43   : > { %982 = vmatprep.subr.bf16.mxu1 %v1054_v31 }
  0x44   : > { %945 = vmatpush3.bf16.msra.mxu0 %v1053_v34 }
  0x46   : > { %983 = vmatpush3.bf16.msra.mxu1 %v1054_v31 }
  0x47   : > { %635 = vmatmul.mubr.bf16.vlgmr.msra.gmra.mxu0 %v1055_v35 }
  0x48   : > { %642 = vmatprep.mubr.bf16.mxu0 %v1060_v36 }
  0x49   : > { %985 = vmatmul.mubr.bf16.vlgmr.msra.gmra.mxu1 %v1059_v37 }
  0x4f   : > { %643 = vmatmul.mubr.bf16.gmra.mxu0 %v1062_v38 }
 0x107   : > { %v946_v39 = vpop.f32.mrf.mxu0 }
 0x109   : > { %v947_v40 = vpop.f32.mrf.mxu0  ;;  %v986_v41 = vpop.f32.mrf.mxu1 }
 0x10a   : > { %v948_v42 = vadd.f32 %v947_v40, %v946_v39 }
 0x10b   : > { %v949_v43 = vpop.f32.mrf.mxu0  ;;  %v685_v45 = vpop.f32.mrf.mxu1 }
 0x10c   : > { %v686_v46 = vadd.f32 %v948_v42, %v685_v45 }
 0x10d   : > { %v950_v47 = vpop.f32.mrf.mxu0  ;;  %v987_v48 = vpop.f32.mrf.mxu1 }
 0x10e   : > { %v700_v49 = vadd.f32 %v686_v46, %v366_v44  ;;  %v951_v50 = vadd.f32 %v950_v47, %v949_v43 }
 0x10f   : > { %v952_v51 = vpop.f32.mrf.mxu0  ;;  %v688_v53 = vpop.f32.mrf.mxu1 }
 0x110   : > { %704 = vst [vmem:[#allocation2 + $0x10] sm:$0xff] %v700_v49  ;;  %v689_v54 = vadd.f32 %v951_v50, %v688_v53 }
 0x111   : > { %v953_v55 = vpop.f32.mrf.mxu0 }
 0x112   : > { %v701_v56 = vadd.f32 %v689_v54, %v367_v52  ;;  %v954_v57 = vadd.f32 %v953_v55, %v952_v51 }
 0x113   : > { %v955_v59 = vpop.f32.mrf.mxu0 }
 0x114   : > { %705 = vst [vmem:[#allocation2] sm:$0xff] %v701_v56  ;;  %v694_v60 = vadd.f32 %v986_v41, %v954_v57 }
 0x115   : > { %v956_v61 = vpop.f32.mrf.mxu0 }
 0x116   : > { %v702_v62 = vadd.f32 %v694_v60, %v368_v58  ;;  %v957_v63 = vadd.f32 %v956_v61, %v955_v59 }
 0x118   : > { %706 = vst [vmem:[#allocation2 + $0x18] sm:$0xff] %v702_v62  ;;  %v697_v1 = vadd.f32 %v987_v48, %v957_v63  ;;  %711 = sbr.rel (%p923_p11) target bundleno = 299 (0x12b), region = 70 }
 0x11a   : > { %v703_v2 = vadd.f32 %v697_v1, %v369_v0 }
 0x11c   : > { %707 = vst [vmem:[#allocation2 + $0x8] sm:$0xff] %v703_v2 }
 0x11d   : > { %v712_v3 = vld [vmem:[#allocation2 + $0x10] sm:$0xff]  ;;  %v924_v4 = vld [vmem:[%s1259_s2] ss:$0 sm:$0xff]  ;;  %v728_v8 = vld [vmem:[%s1260_s3 + $0x8] sm:$0xff] }
 0x11e   : > { %v727_v5 = vld [vmem:[%s1260_s3] sm:$0xff]  ;;  %v723_v6 = vadd.f32 %v924_v4, %v712_v3  ;;  %v729_v12 = vld [vmem:[%s1260_s3 + $0x10] sm:$0xff]  ;;  %v730_v14 = vld [vmem:[%s1260_s3 + $0x18] sm:$0xff] }
 0x11f   : > { %v713_v7 = vld [vmem:[#allocation2] sm:$0xff]  ;;  %v714_v9 = vld [vmem:[#allocation2 + $0x18] sm:$0xff] }
 0x120   : > { %v724_v10 = vadd.f32 %v924_v4, %v713_v7  ;;  %v725_v11 = vadd.f32 %v924_v4, %v714_v9  ;;  %v731_v15 = vadd.f32 %v727_v5, %v723_v6 }
 0x122   : > { %v732_v17 = vadd.f32 %v728_v8, %v724_v10  ;;  %v733_v18 = vadd.f32 %v729_v12, %v725_v11  ;;  %v735_v19 = vmax.f32 %v731_v15, 0.0 }
 0x123   : > { %v715_v13 = vld [vmem:[#allocation2 + $0x8] sm:$0xff] }
 0x124   : > { %v726_v16 = vadd.f32 %v924_v4, %v715_v13  ;;  %v736_v21 = vmax.f32 %v732_v17, 0.0  ;;  %v737_v22 = vmax.f32 %v733_v18, 0.0  ;;  %739 = vst [vmem:[%s1261_s4] sm:$0xff] %v735_v19 }
 0x126   : > { %v734_v20 = vadd.f32 %v730_v14, %v726_v16  ;;  %740 = vst [vmem:[%s1261_s4 + $0x8] sm:$0xff] %v736_v21  ;;  %741 = vst [vmem:[%s1261_s4 + $0x10] sm:$0xff] %v737_v22 }
 0x128   : > { %v738_v23 = vmax.f32 %v734_v20, 0.0 }
 0x12a   : > { %742 = vst [vmem:[%s1261_s4 + $0x18] sm:$0xff] %v738_v23 }
 0x12b PF: > { %s14_s19 = sadd.s32 1, %s1101_s19   ;;  %s1262_s15 = smov %s1089_s16 }
 0x12c   : > { %p11_p12 = scmp.ge.s32.totalorder %s14_s19, 5   ;;  %s1263_s16 = smov %s1164_s23 }
 0x12d   : > { %s1264_s17 = smov %s1097_s18  ;;  %s1265_s18 = smov %s1267_s20 }
 0x12e   :  { %13 = sbr.rel (!%p11_p12) target bundleno = 3 (0x3), region = 120 }

// kernel: _lambda_.46
= control target key start
LH: loop header
LB: loop body
LE: loop exit
PB: predicated region body
PF: predicated region fallthrough
CT: control target
= control target key end

     0   :  { %s865_s12 = smov 0   ;;  %s867_s13 = smov 0   ;;  %s940_s0 = inlined_call_operand.vmem [shape: bf16[8,1152], index: 0, kind: input, shape index: {}]   ;;  %s941_s1 = inlined_call_operand.vmem [shape: bf16[1152,128], index: 1, kind: input, shape index: {}]   ;;  %s942_s2 = inlined_call_operand.vmem [shape: f32[1,128], index: 2, kind: input, shape index: {}]   ;;  %s943_s3 = inlined_call_operand.vmem [shape: f32[8,128], index: 3, kind: output, shape index: {}]  }
   0x1   :  { %s869_s14 = smov 0  }
   0x2 LB: > { %s25_s15 = sadd.s32 1, %s836_s13  ;;  %p677_p0 = scmp.ge.s32.totalorder %s840_s14, 1  ;;  %s840_s14 = sphi %s869_s14, %s13_s14   ;;  %s836_s13 = sphi %s867_s13, %s945_s13   ;;  %s832_s12 = sphi %s865_s12, %s944_s12  }
   0x3   : > { %p26_p1 = scmp.ge.s32.totalorder %s25_s15, 3  ;;  %p189_p2 = scmp.lt.s32.totalorder %s840_s14, 4 }
   0x5   : > { %s947_s15 = smov (%p26_p1, %s25_s15), 0  ;;  %p190_p3 = pnand %p677_p0, %p189_p2 }
   0x6   : > { %s230_s16 = smul.u32 (!%p190_p3), 3, %s832_s12  ;;  %p680_p6 = scmp.ne.s32.totalorder (!%p190_p3), %s832_s12, 0 }
   0x7   : > { %193 = sbr.rel (%p190_p3) target bundleno = 270 (0x10e), region = 32 }
   0x8   : > { %s240_s17 = smul.u32 (!%p190_p3), 48, %s832_s12  ;;  %p233_p4 = scmp.lt.s32.totalorder (!%p190_p3), %s230_s16, 8 }
   0xa   : > { %p241_p5 = scmp.lt.s32.totalorder (!%p190_p3), %s240_s17, 143 }
   0xc   : > { %s949_s16 = smov (!%p233_p4, %s230_s16), 8  ;;  %s951_s17 = smov (!%p241_p5, %s240_s17), 143 }
   0xd   : > { %s678_s18 = sshll.u32 %s949_s16, 2  ;;  %s679_s22 = sshll.u32 %s951_s17, 2 }
   0xe   : > { %s890_s21 = scalar_lea.vmem %s940_s0, %s678_s18  ;;  %s895_s25 = scalar_lea.vmem %s941_s1, %s679_s22 }
   0xf   : > { %263 = sbr.rel (%p680_p6) target bundleno = 22 (0x16), region = 36 }
  0x14   : > { %v842_v0 = vmov 0.0  }
  0x15   : > { %264 = vst [vmem:[#allocation2] sm:$0xff] %v842_v0 }
  0x16 PF: > { %v791_v1 = vld [vmem:[%s895_s25 + $0x78] sm:$0xff]   ;;  %v843_v2 = vmov 0.0   ;;  %vm844_vm0 = vmmov 0   ;;  %v794_v5 = vld [vmem:[%s895_s25 + $0x70] sm:$0xff]   ;;  %v797_v8 = vld [vmem:[%s895_s25 + $0x68] sm:$0xff]   ;;  %p708_p7 = scmp.ne.s32.totalorder %s832_s12, 2 }
  0x17   : > { %744 = vmatprep.subr.bf16.mxu1 %v843_v2  ;;  %v792_v3 = vld [vmem:[%s895_s25 + $0xb8] sm:$0xff]   ;;  %713 = vmatprep.subr.bf16.mxu0 %v791_v1  ;;  %v795_v6 = vld [vmem:[%s895_s25 + $0xb0] sm:$0xff]   ;;  %v798_v9 = vld [vmem:[%s895_s25 + $0xa8] sm:$0xff]  }
  0x18   : > { %v793_v4 = vld [vmem:[%s895_s25 + $0x38] sm:$0xff]   ;;  %760 = vmatprep.mubr.msk.bf16.mxu1 %vm844_vm0, %v843_v2  ;;  %745 = vmatpush3.bf16.msra.mxu1 %v792_v3  ;;  %v796_v7 = vld [vmem:[%s895_s25 + $0x30] sm:$0xff]   ;;  %v799_v10 = vld [vmem:[%s895_s25 + $0x28] sm:$0xff]  }
  0x19   : > { %714 = vmatpush3.bf16.msra.mxu0 %v793_v4  ;;  %746 = vmatprep.subr.bf16.mxu1 %v843_v2  ;;  %v800_v11 = vld [vmem:[%s895_s25 + $0x60] sm:$0xff]   ;;  %v803_v14 = vld [vmem:[%s895_s25 + $0x58] sm:$0xff]   ;;  %v806_v17 = vld [vmem:[%s895_s25 + $0x50] sm:$0xff]  }
  0x1a   : > { %715 = vmatprep.subr.bf16.mxu0 %v794_v5  ;;  %v801_v12 = vld [vmem:[%s895_s25 + $0xa0] sm:$0xff]   ;;  %v804_v15 = vld [vmem:[%s895_s25 + $0x98] sm:$0xff]   ;;  %v807_v18 = vld [vmem:[%s895_s25 + $0x90] sm:$0xff]  }
  0x1b   : > { %v802_v13 = vld [vmem:[%s895_s25 + $0x20] sm:$0xff]   ;;  %v805_v16 = vld [vmem:[%s895_s25 + $0x18] sm:$0xff]   ;;  %v808_v19 = vld [vmem:[%s895_s25 + $0x10] sm:$0xff]  }
  0x1c   : > { %747 = vmatpush3.bf16.msra.mxu1 %v795_v6  ;;  %v809_v20 = vld [vmem:[%s895_s25 + $0x48] sm:$0xff]   ;;  %v266_v23 = vld [vmem:[%s890_s21] sm:$0xff] }
  0x1d   : > { %716 = vmatpush3.bf16.msra.mxu0 %v796_v7  ;;  %748 = vmatprep.subr.bf16.mxu1 %v843_v2  ;;  %v810_v21 = vld [vmem:[%s895_s25 + $0x88] sm:$0xff]   ;;  %v812_v24 = vld [vmem:[%s895_s25 + $0x40] sm:$0xff]   ;;  %v682_v25 = vcombine.high %v266_v23, %v266_v23  ;;  %v681_v29 = vcombine.low %v266_v23, %v266_v23 }
  0x1e   : > { %717 = vmatprep.subr.bf16.mxu0 %v797_v8  ;;  %v811_v22 = vld [vmem:[%s895_s25 + $0x8] sm:$0xff]   ;;  %v813_v26 = vld [vmem:[%s895_s25 + $0x80] sm:$0xff]  }
  0x1f   : > { %503 = vmatprep.mubr.bf16.mxu0 %v682_v25  ;;  %v814_v27 = vld [vmem:[%s895_s25] sm:$0xff]   ;;  %v817_v28 = vld [vmem:[%s890_s21 + $0x8] ss:$0 sps:$4 sm:$0xff]  }
  0x20   : > { %749 = vmatpush3.bf16.msra.mxu1 %v798_v9  ;;  %v265_v36 = vld [vmem:[#allocation2] sm:$0xff] }
  0x21   : > { %718 = vmatpush3.bf16.msra.mxu0 %v799_v10  ;;  %750 = vmatprep.subr.bf16.mxu1 %v843_v2 }
  0x22   : > { %719 = vmatprep.subr.bf16.mxu0 %v800_v11 }
  0x24   : > { %751 = vmatpush3.bf16.msra.mxu1 %v801_v12 }
  0x25   : > { %720 = vmatpush3.bf16.msra.mxu0 %v802_v13  ;;  %752 = vmatprep.subr.bf16.mxu1 %v843_v2 }
  0x26   : > { %721 = vmatprep.subr.bf16.mxu0 %v803_v14 }
  0x28   : > { %753 = vmatpush3.bf16.msra.mxu1 %v804_v15 }
  0x29   : > { %722 = vmatpush3.bf16.msra.mxu0 %v805_v16  ;;  %754 = vmatprep.subr.bf16.mxu1 %v843_v2 }
  0x2a   : > { %723 = vmatprep.subr.bf16.mxu0 %v806_v17 }
  0x2c   : > { %755 = vmatpush3.bf16.msra.mxu1 %v807_v18 }
  0x2d   : > { %724 = vmatpush3.bf16.msra.mxu0 %v808_v19  ;;  %756 = vmatprep.subr.bf16.mxu1 %v843_v2 }
  0x2e   : > { %725 = vmatprep.subr.bf16.mxu0 %v809_v20 }
  0x30   : > { %757 = vmatpush3.bf16.msra.mxu1 %v810_v21 }
  0x31   : > { %726 = vmatpush3.bf16.msra.mxu0 %v811_v22  ;;  %758 = vmatprep.subr.bf16.mxu1 %v843_v2 }
  0x32   : > { %727 = vmatprep.subr.bf16.mxu0 %v812_v24 }
  0x34   : > { %759 = vmatpush3.bf16.msra.mxu1 %v813_v26 }
  0x35   : > { %728 = vmatpush3.bf16.msra.mxu0 %v814_v27 }
  0x37   : > { %761 = vmatmul.mubr.bf16.vlgmr.msra.gmra.mxu1 %v817_v28 }
  0x38   : > { %504 = vmatmul.mubr.bf16.vlgmr.msra.gmra.mxu0 %v681_v29 }
  0xf7   : > { %v545_v30 = vpop.f32.mrf.mxu1 }
  0xf8   : > { %v729_v31 = vpop.f32.mrf.mxu0 }
  0xf9   : > { %v762_v32 = vpop.f32.mrf.mxu1 }
  0xfa   : > { %v730_v33 = vpop.f32.mrf.mxu0 }
  0xfb   : > { %v731_v34 = vadd.f32 %v730_v33, %v729_v31  ;;  %v548_v35 = vpop.f32.mrf.mxu1 }
  0xfc   : > { %v732_v37 = vpop.f32.mrf.mxu0 }
  0xfd   : > { %v546_v38 = vadd.f32 %v731_v34, %v545_v30  ;;  %v763_v39 = vpop.f32.mrf.mxu1  ;;  %556 = sbr.rel (%p708_p7) target bundleno = 270 (0x10e), region = 40 }
  0xfe   : > { %v733_v40 = vpop.f32.mrf.mxu0 }
  0xff   : > { %v551_v41 = vadd.f32 %v546_v38, %v265_v36 }
 0x101   : > { %552 = vst [vmem:[#allocation2] sm:$0xff] %v551_v41 }
 0x102   : > { %v709_v43 = vld [vmem:[%s942_s2] ss:$0 sm:$0xff] }
 0x108   : > { %v557_v42 = vld [vmem:[#allocation2] sm:$0xff] }
 0x109   : > { %v565_v44 = vadd.f32 %v709_v43, %v557_v42 }
 0x10b   : > { %v566_v45 = vmax.f32 %v565_v44, 0.0 }
 0x10d   : > { %567 = vst [vmem:[%s943_s3] sm:$0xff] %v566_v45 }
 0x10e PF: > { %s13_s14 = sadd.s32 1, %s840_s14   ;;  %s944_s12 = smov %s836_s13 }
 0x10f   : > { %p10_p8 = scmp.ge.s32.totalorder %s13_s14, 5   ;;  %s945_s13 = smov %s947_s15 }
 0x111   :  { %12 = sbr.rel (!%p10_p8) target bundleno = 2 (0x2), region = 76 }

// kernel: _lambda_.47
= control target key start
LH: loop header
LB: loop body
LE: loop exit
PB: predicated region body
PF: predicated region fallthrough
CT: control target
= control target key end

     0   :  { %v193_v0 = vmov 0.0   ;;  %vm194_vm0 = vmmov 0   ;;  %s248_s1 = inlined_call_operand.vmem [shape: bf16[128,128], index: 1, kind: input, shape index: {}]   ;;  %s249_s0 = inlined_call_operand.vmem [shape: bf16[8,128], index: 0, kind: input, shape index: {}]   ;;  %s250_s2 = inlined_call_operand.vmem [shape: f32[1,128], index: 2, kind: input, shape index: {}]   ;;  %s251_s3 = inlined_call_operand.vmem [shape: f32[8,128], index: 3, kind: output, shape index: {}]  }
   0x1   :  { %163 = vmatprep.subr.bf16.mxu0 %v193_v0  ;;  %v185_v1 = vld [vmem:[%s248_s1 + $0x38] sm:$0xff]   ;;  %179 = vmatprep.mubr.msk.bf16.mxu0 %vm194_vm0, %v193_v0  ;;  %v186_v2 = vld [vmem:[%s248_s1 + $0x30] sm:$0xff]   ;;  %v187_v3 = vld [vmem:[%s248_s1 + $0x28] sm:$0xff]  }
   0x2   :  { %164 = vmatpush3.bf16.msra.mxu0 %v185_v1  ;;  %v188_v4 = vld [vmem:[%s248_s1 + $0x20] sm:$0xff]   ;;  %v189_v5 = vld [vmem:[%s248_s1 + $0x18] sm:$0xff]   ;;  %v190_v6 = vld [vmem:[%s248_s1 + $0x10] sm:$0xff]  }
   0x3   :  { %165 = vmatprep.subr.bf16.mxu0 %v193_v0  ;;  %v191_v7 = vld [vmem:[%s248_s1 + $0x8] sm:$0xff]   ;;  %v192_v8 = vld [vmem:[%s248_s1] sm:$0xff]  }
   0x4   :  { %v21_v9 = vld [vmem:[%s249_s0] sm:$0xf] }
   0x5   :  { %v153_v10 = vld [vmem:[%s250_s2] ss:$0 sm:$0xff] }
   0x6   :  { %166 = vmatpush3.bf16.msra.mxu0 %v186_v2 }
   0x7   :  { %167 = vmatprep.subr.bf16.mxu0 %v193_v0 }
   0xa   :  { %168 = vmatpush3.bf16.msra.mxu0 %v187_v3 }
   0xb   :  { %169 = vmatprep.subr.bf16.mxu0 %v193_v0 }
   0xe   :  { %170 = vmatpush3.bf16.msra.mxu0 %v188_v4 }
   0xf   :  { %171 = vmatprep.subr.bf16.mxu0 %v193_v0 }
  0x12   :  { %172 = vmatpush3.bf16.msra.mxu0 %v189_v5 }
  0x13   :  { %173 = vmatprep.subr.bf16.mxu0 %v193_v0 }
  0x16   :  { %174 = vmatpush3.bf16.msra.mxu0 %v190_v6 }
  0x17   :  { %175 = vmatprep.subr.bf16.mxu0 %v193_v0 }
  0x1a   :  { %176 = vmatpush3.bf16.msra.mxu0 %v191_v7 }
  0x1b   :  { %177 = vmatprep.subr.bf16.mxu0 %v193_v0 }
  0x1e   :  { %178 = vmatpush3.bf16.msra.mxu0 %v192_v8 }
  0x21   :  { %180 = vmatmul.mubr.bf16.vlgmr.msra.gmra.mxu0 %v21_v9 }
  0xe1   :  { %v120_v11 = vpop.f32.mrf.mxu0 }
  0xe2   :  { %v139_v12 = vadd.f32 %v153_v10, %v120_v11 }
  0xe3   :  { %v181_v13 = vpop.f32.mrf.mxu0 }
  0xe4   :  { %140 = vst [vmem:[%s251_s3] sm:$0xff] %v139_v12 }
  0xe5   :  { %v123_v14 = vpop.f32.mrf.mxu0 }
  0xe7   :  { %v182_v15 = vpop.f32.mrf.mxu0 }

// kernel: _lambda_.48
= control target key start
LH: loop header
LB: loop body
LE: loop exit
PB: predicated region body
PF: predicated region fallthrough
CT: control target
= control target key end

     0   :  { %s946_s15 = smov 0   ;;  %s948_s16 = smov 0   ;;  %s1024_s0 = inlined_call_operand.vmem [shape: bf16[8,1152], index: 0, kind: input, shape index: {}]   ;;  %s1025_s1 = inlined_call_operand.vmem [shape: bf16[1152,128], index: 1, kind: input, shape index: {}]   ;;  %s1026_s2 = inlined_call_operand.vmem [shape: f32[1,128], index: 2, kind: input, shape index: {}]   ;;  %s1027_s3 = inlined_call_operand.vmem [shape: f32[8,128], index: 3, kind: input, shape index: {}]   ;;  %s1028_s4 = inlined_call_operand.vmem [shape: f32[8,128], index: 4, kind: output, shape index: {}]  }
   0x1   :  { %s950_s17 = smov 0  }
   0x2 LB: > { %s26_s18 = sadd.s32 1, %s912_s16  ;;  %p753_p0 = scmp.ge.s32.totalorder %s916_s17, 1  ;;  %s916_s17 = sphi %s950_s17, %s14_s17   ;;  %s912_s16 = sphi %s948_s16, %s1030_s16   ;;  %s908_s15 = sphi %s946_s15, %s1029_s15  }
   0x3   : > { %p27_p1 = scmp.ge.s32.totalorder %s26_s18, 3  ;;  %p228_p2 = scmp.lt.s32.totalorder %s916_s17, 4 }
   0x5   : > { %s1032_s18 = smov (%p27_p1, %s26_s18), 0  ;;  %p229_p3 = pnand %p753_p0, %p228_p2 }
   0x6   : > { %s278_s19 = smul.u32 (!%p229_p3), 3, %s908_s15  ;;  %p756_p6 = scmp.ne.s32.totalorder (!%p229_p3), %s908_s15, 0 }
   0x7   : > { %232 = sbr.rel (%p229_p3) target bundleno = 272 (0x110), region = 36 }
   0x8   : > { %s288_s20 = smul.u32 (!%p229_p3), 48, %s908_s15  ;;  %p281_p4 = scmp.lt.s32.totalorder (!%p229_p3), %s278_s19, 8 }
   0xa   : > { %p289_p5 = scmp.lt.s32.totalorder (!%p229_p3), %s288_s20, 143 }
   0xc   : > { %s1034_s19 = smov (!%p281_p4, %s278_s19), 8  ;;  %s1036_s20 = smov (!%p289_p5, %s288_s20), 143 }
   0xd   : > { %s754_s21 = sshll.u32 %s1034_s19, 2  ;;  %s755_s25 = sshll.u32 %s1036_s20, 2 }
   0xe   : > { %s971_s24 = scalar_lea.vmem %s1024_s0, %s754_s21  ;;  %s976_s28 = scalar_lea.vmem %s1025_s1, %s755_s25 }
   0xf   : > { %318 = sbr.rel (%p756_p6) target bundleno = 22 (0x16), region = 40 }
  0x14   : > { %v918_v0 = vmov 0.0  }
  0x15   : > { %319 = vst [vmem:[#allocation2] sm:$0xff] %v918_v0 }
  0x16 PF: > { %v867_v1 = vld [vmem:[%s976_s28 + $0x78] sm:$0xff]   ;;  %v919_v2 = vmov 0.0   ;;  %vm920_vm0 = vmmov 0   ;;  %v870_v5 = vld [vmem:[%s976_s28 + $0x70] sm:$0xff]   ;;  %v873_v8 = vld [vmem:[%s976_s28 + $0x68] sm:$0xff]   ;;  %p784_p7 = scmp.ne.s32.totalorder %s908_s15, 2 }
  0x17   : > { %820 = vmatprep.subr.bf16.mxu1 %v919_v2  ;;  %v868_v3 = vld [vmem:[%s976_s28 + $0xb8] sm:$0xff]   ;;  %789 = vmatprep.subr.bf16.mxu0 %v867_v1  ;;  %v871_v6 = vld [vmem:[%s976_s28 + $0xb0] sm:$0xff]   ;;  %v874_v9 = vld [vmem:[%s976_s28 + $0xa8] sm:$0xff]  }
  0x18   : > { %v869_v4 = vld [vmem:[%s976_s28 + $0x38] sm:$0xff]   ;;  %836 = vmatprep.mubr.msk.bf16.mxu1 %vm920_vm0, %v919_v2  ;;  %821 = vmatpush3.bf16.msra.mxu1 %v868_v3  ;;  %v872_v7 = vld [vmem:[%s976_s28 + $0x30] sm:$0xff]   ;;  %v875_v10 = vld [vmem:[%s976_s28 + $0x28] sm:$0xff]  }
  0x19   : > { %790 = vmatpush3.bf16.msra.mxu0 %v869_v4  ;;  %822 = vmatprep.subr.bf16.mxu1 %v919_v2  ;;  %v876_v11 = vld [vmem:[%s976_s28 + $0x60] sm:$0xff]   ;;  %v879_v14 = vld [vmem:[%s976_s28 + $0x58] sm:$0xff]   ;;  %v882_v17 = vld [vmem:[%s976_s28 + $0x50] sm:$0xff]  }
  0x1a   : > { %791 = vmatprep.subr.bf16.mxu0 %v870_v5  ;;  %v877_v12 = vld [vmem:[%s976_s28 + $0xa0] sm:$0xff]   ;;  %v880_v15 = vld [vmem:[%s976_s28 + $0x98] sm:$0xff]   ;;  %v883_v18 = vld [vmem:[%s976_s28 + $0x90] sm:$0xff]  }
  0x1b   : > { %v878_v13 = vld [vmem:[%s976_s28 + $0x20] sm:$0xff]   ;;  %v881_v16 = vld [vmem:[%s976_s28 + $0x18] sm:$0xff]   ;;  %v884_v19 = vld [vmem:[%s976_s28 + $0x10] sm:$0xff]  }
  0x1c   : > { %823 = vmatpush3.bf16.msra.mxu1 %v871_v6  ;;  %v885_v20 = vld [vmem:[%s976_s28 + $0x48] sm:$0xff]   ;;  %v321_v23 = vld [vmem:[%s971_s24] sm:$0xff] }
  0x1d   : > { %792 = vmatpush3.bf16.msra.mxu0 %v872_v7  ;;  %824 = vmatprep.subr.bf16.mxu1 %v919_v2  ;;  %v886_v21 = vld [vmem:[%s976_s28 + $0x88] sm:$0xff]   ;;  %v888_v24 = vld [vmem:[%s976_s28 + $0x40] sm:$0xff]   ;;  %v758_v25 = vcombine.high %v321_v23, %v321_v23  ;;  %v757_v29 = vcombine.low %v321_v23, %v321_v23 }
  0x1e   : > { %793 = vmatprep.subr.bf16.mxu0 %v873_v8  ;;  %v887_v22 = vld [vmem:[%s976_s28 + $0x8] sm:$0xff]   ;;  %v889_v26 = vld [vmem:[%s976_s28 + $0x80] sm:$0xff]  }
  0x1f   : > { %558 = vmatprep.mubr.bf16.mxu0 %v758_v25  ;;  %v890_v27 = vld [vmem:[%s976_s28] sm:$0xff]   ;;  %v893_v28 = vld [vmem:[%s971_s24 + $0x8] ss:$0 sps:$4 sm:$0xff]  }
  0x20   : > { %825 = vmatpush3.bf16.msra.mxu1 %v874_v9  ;;  %v320_v36 = vld [vmem:[#allocation2] sm:$0xff] }
  0x21   : > { %794 = vmatpush3.bf16.msra.mxu0 %v875_v10  ;;  %826 = vmatprep.subr.bf16.mxu1 %v919_v2 }
  0x22   : > { %795 = vmatprep.subr.bf16.mxu0 %v876_v11 }
  0x24   : > { %827 = vmatpush3.bf16.msra.mxu1 %v877_v12 }
  0x25   : > { %796 = vmatpush3.bf16.msra.mxu0 %v878_v13  ;;  %828 = vmatprep.subr.bf16.mxu1 %v919_v2 }
  0x26   : > { %797 = vmatprep.subr.bf16.mxu0 %v879_v14 }
  0x28   : > { %829 = vmatpush3.bf16.msra.mxu1 %v880_v15 }
  0x29   : > { %798 = vmatpush3.bf16.msra.mxu0 %v881_v16  ;;  %830 = vmatprep.subr.bf16.mxu1 %v919_v2 }
  0x2a   : > { %799 = vmatprep.subr.bf16.mxu0 %v882_v17 }
  0x2c   : > { %831 = vmatpush3.bf16.msra.mxu1 %v883_v18 }
  0x2d   : > { %800 = vmatpush3.bf16.msra.mxu0 %v884_v19  ;;  %832 = vmatprep.subr.bf16.mxu1 %v919_v2 }
  0x2e   : > { %801 = vmatprep.subr.bf16.mxu0 %v885_v20 }
  0x30   : > { %833 = vmatpush3.bf16.msra.mxu1 %v886_v21 }
  0x31   : > { %802 = vmatpush3.bf16.msra.mxu0 %v887_v22  ;;  %834 = vmatprep.subr.bf16.mxu1 %v919_v2 }
  0x32   : > { %803 = vmatprep.subr.bf16.mxu0 %v888_v24 }
  0x34   : > { %835 = vmatpush3.bf16.msra.mxu1 %v889_v26 }
  0x35   : > { %804 = vmatpush3.bf16.msra.mxu0 %v890_v27 }
  0x37   : > { %837 = vmatmul.mubr.bf16.vlgmr.msra.gmra.mxu1 %v893_v28 }
  0x38   : > { %559 = vmatmul.mubr.bf16.vlgmr.msra.gmra.mxu0 %v757_v29 }
  0xf7   : > { %v600_v30 = vpop.f32.mrf.mxu1 }
  0xf8   : > { %v805_v31 = vpop.f32.mrf.mxu0 }
  0xf9   : > { %v838_v32 = vpop.f32.mrf.mxu1 }
  0xfa   : > { %v806_v33 = vpop.f32.mrf.mxu0 }
  0xfb   : > { %v807_v34 = vadd.f32 %v806_v33, %v805_v31  ;;  %v603_v35 = vpop.f32.mrf.mxu1 }
  0xfc   : > { %v808_v37 = vpop.f32.mrf.mxu0 }
  0xfd   : > { %v601_v38 = vadd.f32 %v807_v34, %v600_v30  ;;  %v839_v39 = vpop.f32.mrf.mxu1  ;;  %611 = sbr.rel (%p784_p7) target bundleno = 272 (0x110), region = 44 }
  0xfe   : > { %v809_v40 = vpop.f32.mrf.mxu0 }
  0xff   : > { %v606_v41 = vadd.f32 %v601_v38, %v320_v36 }
 0x101   : > { %607 = vst [vmem:[#allocation2] sm:$0xff] %v606_v41 }
 0x102   : > { %v785_v43 = vld [vmem:[%s1026_s2] ss:$0 sm:$0xff] }
 0x103   : > { %v621_v44 = vld [vmem:[%s1027_s3] sm:$0xff] }
 0x108   : > { %v612_v42 = vld [vmem:[#allocation2] sm:$0xff] }
 0x109   : > { %v620_v45 = vadd.f32 %v785_v43, %v612_v42 }
 0x10b   : > { %v622_v46 = vadd.f32 %v621_v44, %v620_v45 }
 0x10d   : > { %v623_v47 = vmax.f32 %v622_v46, 0.0 }
 0x10f   : > { %624 = vst [vmem:[%s1028_s4] sm:$0xff] %v623_v47 }
 0x110 PF: > { %s14_s17 = sadd.s32 1, %s916_s17   ;;  %s1029_s15 = smov %s912_s16 }
 0x111   : > { %p11_p8 = scmp.ge.s32.totalorder %s14_s17, 5   ;;  %s1030_s16 = smov %s1032_s18 }
 0x113   :  { %13 = sbr.rel (!%p11_p8) target bundleno = 2 (0x2), region = 83 }

// kernel: _lambda_.55
= control target key start
LH: loop header
LB: loop body
LE: loop exit
PB: predicated region body
PF: predicated region fallthrough
CT: control target
= control target key end

     0   :  { %s1027_s12 = smov 0   ;;  %s1029_s13 = smov 0   ;;  %s1129_s0 = inlined_call_operand.vmem [shape: bf16[8,1152], index: 0, kind: input, shape index: {}]   ;;  %s1130_s1 = inlined_call_operand.vmem [shape: bf16[1152,256], index: 1, kind: input, shape index: {}]   ;;  %s1131_s2 = inlined_call_operand.vmem [shape: f32[1,256], index: 2, kind: input, shape index: {}]   ;;  %s1132_s3 = inlined_call_operand.vmem [shape: f32[8,256], index: 3, kind: output, shape index: {}]  }
   0x1   :  { %s1031_s14 = smov 0  }
   0x2 LB: > { %s25_s15 = sadd.s32 1, %s999_s13  ;;  %p818_p0 = scmp.ge.s32.totalorder %s1003_s14, 1  ;;  %s1003_s14 = sphi %s1031_s14, %s13_s14   ;;  %s999_s13 = sphi %s1029_s13, %s1134_s13   ;;  %s995_s12 = sphi %s1027_s12, %s1133_s12  }
   0x3   : > { %p26_p1 = scmp.ge.s32.totalorder %s25_s15, 3  ;;  %p194_p2 = scmp.lt.s32.totalorder %s1003_s14, 4 }
   0x5   : > { %s1136_s15 = smov (%p26_p1, %s25_s15), 0  ;;  %p195_p3 = pnand %p818_p0, %p194_p2 }
   0x6   : > { %s240_s16 = smul.u32 (!%p195_p3), 3, %s995_s12  ;;  %p822_p6 = scmp.ne.s32.totalorder (!%p195_p3), %s995_s12, 0 }
   0x7   : > { %198 = sbr.rel (%p195_p3) target bundleno = 300 (0x12c), region = 32 }
   0x8   : > { %s250_s17 = smul.u32 (!%p195_p3), 48, %s995_s12  ;;  %p243_p4 = scmp.lt.s32.totalorder (!%p195_p3), %s240_s16, 8 }
   0xa   : > { %p252_p5 = scmp.lt.s32.totalorder (!%p195_p3), %s250_s17, 143 }
   0xc   : > { %s1138_s16 = smov (!%p243_p4, %s240_s16), 8  ;;  %s1140_s17 = smov (!%p252_p5, %s250_s17), 143 }
   0xd   : > { %s819_s18 = sshll.u32 %s1138_s16, 2  ;;  %s879_s22 = sshll.u32 %s1140_s17, 3 }
   0xe   : > { %s1052_s21 = scalar_lea.vmem %s1129_s0, %s819_s18  ;;  %s1057_s25 = scalar_lea.vmem %s1130_s1, %s879_s22 }
   0xf   : > { %281 = sbr.rel (%p822_p6) target bundleno = 22 (0x16), region = 36 }
  0x14   : > { %v1005_v0 = vmov 0.0  }
  0x15   : > { %282 = vst [vmem:[#allocation2] sm:$0xff] %v1005_v0  ;;  %283 = vst [vmem:[#allocation2 + $0x8] sm:$0xff] %v1005_v0 }
  0x16 PF: > { %v906_v1 = vld [vmem:[%s1057_s25 + $0x74] ss:$8 sps:$4 sm:$0xff]   ;;  %v908_v2 = vld [vmem:[%s1057_s25 + $0x70] ss:$8 sps:$4 sm:$0xff]   ;;  %v1006_v3 = vmov 0   ;;  %v286_v34 = vld [vmem:[%s1052_s21] sm:$0xff] }
  0x17   : > { %660 = vmatprep.mubr.bf16.mxu1 %v1006_v3  ;;  %587 = vmatprep.subr.bf16.mxu0 %v906_v1  ;;  %v909_v4 = vld [vmem:[%s1057_s25 + $0x64] ss:$8 sps:$4 sm:$0xff]   ;;  %v911_v5 = vld [vmem:[%s1057_s25 + $0x60] ss:$8 sps:$4 sm:$0xff]   ;;  %v912_v6 = vld [vmem:[%s1057_s25 + $0x54] ss:$8 sps:$4 sm:$0xff]   ;;  %v824_v36 = vcombine.high %v286_v34, %v286_v34  ;;  %v823_v53 = vcombine.low %v286_v34, %v286_v34 }
  0x18   : > { %588 = vmatpush1.bf16.msra.mxu0 %v908_v2  ;;  %v914_v7 = vld [vmem:[%s1057_s25 + $0x50] ss:$8 sps:$4 sm:$0xff]   ;;  %v915_v8 = vld [vmem:[%s1057_s25 + $0x44] ss:$8 sps:$4 sm:$0xff]   ;;  %v927_v9 = vld [vmem:[%s1057_s25 + $0x174] ss:$8 sps:$4 sm:$0xff]  }
  0x19   : > { %589 = vmatprep.subr.bf16.mxu0 %v909_v4  ;;  %v929_v10 = vld [vmem:[%s1057_s25 + $0x170] ss:$8 sps:$4 sm:$0xff]   ;;  %v917_v11 = vld [vmem:[%s1057_s25 + $0x40] ss:$8 sps:$4 sm:$0xff]   ;;  %v918_v12 = vld [vmem:[%s1057_s25 + $0x34] ss:$8 sps:$4 sm:$0xff]   ;;  %628 = vmatprep.subr.bf16.mxu1 %v927_v9 }
  0x1a   : > { %v933_v13 = vld [vmem:[%s1057_s25 + $0x164] ss:$8 sps:$4 sm:$0xff]   ;;  %629 = vmatpush1.bf16.msra.mxu1 %v929_v10  ;;  %v935_v14 = vld [vmem:[%s1057_s25 + $0x160] ss:$8 sps:$4 sm:$0xff]   ;;  %v920_v15 = vld [vmem:[%s1057_s25 + $0x30] ss:$8 sps:$4 sm:$0xff]   ;;  %619 = vmatprep.mubr.bf16.mxu0 %v824_v36 }
  0x1b   : > { %630 = vmatprep.subr.bf16.mxu1 %v933_v13  ;;  %v939_v16 = vld [vmem:[%s1057_s25 + $0x154] ss:$8 sps:$4 sm:$0xff]   ;;  %v921_v17 = vld [vmem:[%s1057_s25 + $0x24] ss:$8 sps:$4 sm:$0xff]   ;;  %v941_v18 = vld [vmem:[%s1057_s25 + $0x150] ss:$8 sps:$4 sm:$0xff]  }
  0x1c   : > { %590 = vmatpush1.bf16.msra.mxu0 %v911_v5  ;;  %v945_v19 = vld [vmem:[%s1057_s25 + $0x144] ss:$8 sps:$4 sm:$0xff]   ;;  %v923_v20 = vld [vmem:[%s1057_s25 + $0x20] ss:$8 sps:$4 sm:$0xff]   ;;  %v924_v21 = vld [vmem:[%s1057_s25 + $0x14] ss:$8 sps:$4 sm:$0xff]  }
  0x1d   : > { %591 = vmatprep.subr.bf16.mxu0 %v912_v6  ;;  %v947_v22 = vld [vmem:[%s1057_s25 + $0x140] ss:$8 sps:$4 sm:$0xff]   ;;  %v951_v23 = vld [vmem:[%s1057_s25 + $0x134] ss:$8 sps:$4 sm:$0xff]   ;;  %v926_v24 = vld [vmem:[%s1057_s25 + $0x10] ss:$8 sps:$4 sm:$0xff]  }
  0x1e   : > { %631 = vmatpush1.bf16.msra.mxu1 %v935_v14  ;;  %v930_v25 = vld [vmem:[%s1057_s25 + $0x4] ss:$8 sps:$4 sm:$0xff]   ;;  %v953_v26 = vld [vmem:[%s1057_s25 + $0x130] ss:$8 sps:$4 sm:$0xff]   ;;  %v932_v28 = vld [vmem:[%s1057_s25] ss:$8 sps:$4 sm:$0xff]  }
  0x1f   : > { %632 = vmatprep.subr.bf16.mxu1 %v939_v16  ;;  %v957_v27 = vld [vmem:[%s1057_s25 + $0x124] ss:$8 sps:$4 sm:$0xff]   ;;  %v936_v29 = vld [vmem:[%s1057_s25 + $0xf4] ss:$8 sps:$4 sm:$0xff]   ;;  %v959_v30 = vld [vmem:[%s1057_s25 + $0x120] ss:$8 sps:$4 sm:$0xff]  }
  0x20   : > { %592 = vmatpush1.bf16.msra.mxu0 %v914_v7  ;;  %v963_v31 = vld [vmem:[%s1057_s25 + $0x114] ss:$8 sps:$4 sm:$0xff]   ;;  %v938_v32 = vld [vmem:[%s1057_s25 + $0xf0] ss:$8 sps:$4 sm:$0xff]   ;;  %v942_v33 = vld [vmem:[%s1057_s25 + $0xe4] ss:$8 sps:$4 sm:$0xff]  }
  0x21   : > { %593 = vmatprep.subr.bf16.mxu0 %v915_v8  ;;  %v965_v35 = vld [vmem:[%s1057_s25 + $0x110] ss:$8 sps:$4 sm:$0xff]   ;;  %v969_v37 = vld [vmem:[%s1057_s25 + $0x104] ss:$8 sps:$4 sm:$0xff]   ;;  %v944_v38 = vld [vmem:[%s1057_s25 + $0xe0] ss:$8 sps:$4 sm:$0xff]  }
  0x22   : > { %633 = vmatpush1.bf16.msra.mxu1 %v941_v18  ;;  %v948_v39 = vld [vmem:[%s1057_s25 + $0xd4] ss:$8 sps:$4 sm:$0xff]   ;;  %v971_v40 = vld [vmem:[%s1057_s25 + $0x100] ss:$8 sps:$4 sm:$0xff]   ;;  %v950_v41 = vld [vmem:[%s1057_s25 + $0xd0] ss:$8 sps:$4 sm:$0xff]  }
  0x23   : > { %634 = vmatprep.subr.bf16.mxu1 %v945_v19  ;;  %v954_v42 = vld [vmem:[%s1057_s25 + $0xc4] ss:$8 sps:$4 sm:$0xff]   ;;  %v975_v43 = vld [vmem:[%s1052_s21 + $0x8] ss:$0 sps:$4 sm:$0xff]   ;;  %v960_v45 = vld [vmem:[%s1057_s25 + $0xb4] ss:$8 sps:$4 sm:$0xff]  }
  0x24   : > { %594 = vmatpush1.bf16.msra.mxu0 %v917_v11  ;;  %v956_v44 = vld [vmem:[%s1057_s25 + $0xc0] ss:$8 sps:$4 sm:$0xff]   ;;  %v962_v46 = vld [vmem:[%s1057_s25 + $0xb0] ss:$8 sps:$4 sm:$0xff]   ;;  %v966_v47 = vld [vmem:[%s1057_s25 + $0xa4] ss:$8 sps:$4 sm:$0xff]  }
  0x25   : > { %595 = vmatprep.subr.bf16.mxu0 %v918_v12  ;;  %v968_v48 = vld [vmem:[%s1057_s25 + $0xa0] ss:$8 sps:$4 sm:$0xff]   ;;  %v972_v49 = vld [vmem:[%s1057_s25 + $0x94] ss:$8 sps:$4 sm:$0xff]   ;;  %v974_v50 = vld [vmem:[%s1057_s25 + $0x90] ss:$8 sps:$4 sm:$0xff]  }
  0x26   : > { %635 = vmatpush1.bf16.msra.mxu1 %v947_v22  ;;  %v976_v51 = vld [vmem:[%s1057_s25 + $0x84] ss:$8 sps:$4 sm:$0xff]   ;;  %v978_v52 = vld [vmem:[%s1057_s25 + $0x80] ss:$8 sps:$4 sm:$0xff]   ;;  %p874_p7 = scmp.ne.s32.totalorder %s995_s12, 2 }
  0x27   : > { %636 = vmatprep.subr.bf16.mxu1 %v951_v23  ;;  %v284_v58 = vld [vmem:[#allocation2] sm:$0xff]  ;;  %v285_v61 = vld [vmem:[#allocation2 + $0x8] sm:$0xff] }
  0x28   : > { %596 = vmatpush1.bf16.msra.mxu0 %v920_v15 }
  0x29   : > { %597 = vmatprep.subr.bf16.mxu0 %v921_v17 }
  0x2a   : > { %637 = vmatpush1.bf16.msra.mxu1 %v953_v26 }
  0x2b   : > { %638 = vmatprep.subr.bf16.mxu1 %v957_v27 }
  0x2c   : > { %598 = vmatpush1.bf16.msra.mxu0 %v923_v20 }
  0x2d   : > { %599 = vmatprep.subr.bf16.mxu0 %v924_v21 }
  0x2e   : > { %639 = vmatpush1.bf16.msra.mxu1 %v959_v30 }
  0x2f   : > { %640 = vmatprep.subr.bf16.mxu1 %v963_v31 }
  0x30   : > { %600 = vmatpush1.bf16.msra.mxu0 %v926_v24 }
  0x31   : > { %601 = vmatprep.subr.bf16.mxu0 %v930_v25 }
  0x32   : > { %641 = vmatpush1.bf16.msra.mxu1 %v965_v35 }
  0x33   : > { %642 = vmatprep.subr.bf16.mxu1 %v969_v37 }
  0x34   : > { %602 = vmatpush1.bf16.msra.mxu0 %v932_v28 }
  0x35   : > { %603 = vmatprep.subr.bf16.mxu0 %v936_v29 }
  0x36   : > { %643 = vmatpush1.bf16.msra.mxu1 %v971_v40 }
  0x38   : > { %604 = vmatpush2.bf16.msra.mxu0 %v938_v32 }
  0x39   : > { %605 = vmatprep.subr.bf16.mxu0 %v942_v33  ;;  %661 = vmatmul.mubr.bf16.vlgmr.msra.gmra.mxu1 %v975_v43 }
  0x3c   : > { %606 = vmatpush2.bf16.msra.mxu0 %v944_v38 }
  0x3d   : > { %607 = vmatprep.subr.bf16.mxu0 %v948_v39 }
  0x40   : > { %608 = vmatpush2.bf16.msra.mxu0 %v950_v41 }
  0x41   : > { %609 = vmatprep.subr.bf16.mxu0 %v954_v42 }
  0x44   : > { %610 = vmatpush2.bf16.msra.mxu0 %v956_v44 }
  0x45   : > { %611 = vmatprep.subr.bf16.mxu0 %v960_v45 }
  0x48   : > { %612 = vmatpush2.bf16.msra.mxu0 %v962_v46 }
  0x49   : > { %613 = vmatprep.subr.bf16.mxu0 %v966_v47 }
  0x4c   : > { %614 = vmatpush2.bf16.msra.mxu0 %v968_v48 }
  0x4d   : > { %615 = vmatprep.subr.bf16.mxu0 %v972_v49 }
  0x50   : > { %616 = vmatpush2.bf16.msra.mxu0 %v974_v50 }
  0x51   : > { %617 = vmatprep.subr.bf16.mxu0 %v976_v51 }
  0x54   : > { %618 = vmatpush2.bf16.msra.mxu0 %v978_v52 }
  0x57   : > { %620 = vmatmul.mubr.bf16.vlgmr.msra.gmra.mxu0 %v823_v53 }
  0xf9   : > { %v662_v54 = vpop.f32.mrf.mxu1 }
  0xfb   : > { %v664_v55 = vpop.f32.mrf.mxu1 }
  0xfd   : > { %v666_v56 = vpop.f32.mrf.mxu1 }
  0xff   : > { %v667_v57 = vpop.f32.mrf.mxu1 }
 0x117   : > { %v621_v59 = vpop.f32.mrf.mxu0 }
 0x118   : > { %v663_v60 = vadd.f32 %v662_v54, %v621_v59 }
 0x119   : > { %v623_v62 = vpop.f32.mrf.mxu0 }
 0x11a   : > { %v669_v63 = vadd.f32 %v663_v60, %v284_v58  ;;  %v665_v0 = vadd.f32 %v664_v55, %v623_v62  ;;  %676 = sbr.rel (%p874_p7) target bundleno = 300 (0x12c), region = 40 }
 0x11b   : > { %v625_v1 = vpop.f32.mrf.mxu0 }
 0x11c   : > { %671 = vst [vmem:[#allocation2] sm:$0xff] %v669_v63  ;;  %v670_v2 = vadd.f32 %v665_v0, %v285_v61 }
 0x11d   : > { %v626_v3 = vpop.f32.mrf.mxu0 }
 0x11e   : > { %672 = vst [vmem:[#allocation2 + $0x8] sm:$0xff] %v670_v2 }
 0x11f   : > { %v681_v4 = vlaneseq  ;;  %v679_v6 = vld [vmem:[%s1131_s2] sm:$0x3] }
 0x121   : > { %v682_v5 = vshrl.u32 %v681_v4, 7 }
 0x123   : > { %v683_v7 = vsub.s32 0, %v682_v5  ;;  %v687_v8 = vsub.s32 1, %v682_v5  ;;  %v677_v9 = vld [vmem:[#allocation2] sm:$0xff] }
 0x125   : > { %v678_v10 = vld [vmem:[#allocation2 + $0x8] sm:$0xff]  ;;  %v684_v11 = vrot.slane %v679_v6, %v683_v7  ;;  %v688_v12 = vrot.slane %v679_v6, %v687_v8 }
 0x127   : > { %v691_v13 = vadd.f32 %v684_v11, %v677_v9  ;;  %v692_v14 = vadd.f32 %v688_v12, %v678_v10 }
 0x129   : > { %v693_v15 = vmax.f32 %v691_v13, 0.0  ;;  %v694_v16 = vmax.f32 %v692_v14, 0.0 }
 0x12b   : > { %695 = vst [vmem:[%s1132_s3] sm:$0xff] %v693_v15  ;;  %696 = vst [vmem:[%s1132_s3 + $0x8] sm:$0xff] %v694_v16 }
 0x12c PF: > { %s13_s14 = sadd.s32 1, %s1003_s14   ;;  %s1133_s12 = smov %s999_s13 }
 0x12d   : > { %p10_p8 = scmp.ge.s32.totalorder %s13_s14, 5   ;;  %s1134_s13 = smov %s1136_s15 }
 0x12f   :  { %12 = sbr.rel (!%p10_p8) target bundleno = 2 (0x2), region = 76 }

// kernel: _lambda_.56
= control target key start
LH: loop header
LB: loop body
LE: loop exit
PB: predicated region body
PF: predicated region fallthrough
CT: control target
= control target key end

     0   :  { %8 = vsyncpa [#allocation4], 0  ;;  %s271_s12 = smov [#allocation3]   ;;  %s310_s0 = inlined_call_operand.vmem [shape: bf16[8,128], index: 0, kind: input, shape index: {}]   ;;  %s311_s1 = inlined_call_operand.hbm [shape: bf16[128,256], index: 1, kind: input, shape index: {}]   ;;  %s312_s2 = inlined_call_operand.vmem [shape: f32[1,256], index: 2, kind: input, shape index: {}]   ;;  %s313_s3 = inlined_call_operand.vmem [shape: f32[8,256], index: 3, kind: output, shape index: {}]  }
   0x1   :  { %s16_s13 = sshll.u32 %s271_s12, 4  ;;  %s17_s13 = int_to_ptr.vmem [resolvable:$true] %s16_s13 }
   0x2   :  { %s257_s14 = scalar_lea.vmem %s17_s13, 2048  ;;  %p262_p1 = scmp.lt.s32.totalorder %s17_s13, %s17_s13 }
   0x3   :  { %p258_p0 = scmp.ne.s32.totalorder %s17_s13, %s257_s14  ;;  %p263_p2 = scmp.lt.s32.totalorder %s257_s14, %s257_s14 }
   0x5   :  { %p264_p3 = por %p263_p2, %p262_p1 }
   0x7   :  { %p265_p4 = pnand %p264_p3, %p258_p0 }
   0x9   :  { %268 = shalt.err (!%p265_p4)
}
   0xa   :  { %s272_s15 = smov 128   ;;  %s273_s16 = smov 8  }
   0xb   :  { %22 = dma.hbm_to_vmem [thread:$0]  %s311_s1, 2048, %s17_s13, [#allocation4], %s272_s15, %s272_s15, %s273_s16  }
   0xc   :  { %269 = dma.done.wait [#allocation4], 2048  }
   0xd   :  { %270 = vsyncadd [#allocation4], 4294965248  ;;  %v274_v0 = vmov 0   ;;  %v225_v1 = vld [vmem:[#allocation3 + $0x74] ss:$8 sps:$4 sm:$0xff]   ;;  %v186_v18 = vlaneseq }
   0xe   :  { %166 = vmatprep.mubr.bf16.mxu0 %v274_v0  ;;  %v227_v2 = vld [vmem:[#allocation3 + $0x70] ss:$8 sps:$4 sm:$0xff]   ;;  %134 = vmatprep.subr.bf16.mxu0 %v225_v1  ;;  %v228_v3 = vld [vmem:[#allocation3 + $0x64] ss:$8 sps:$4 sm:$0xff]   ;;  %v230_v4 = vld [vmem:[#allocation3 + $0x60] ss:$8 sps:$4 sm:$0xff]  }
   0xf   :  { %135 = vmatpush1.bf16.msra.mxu0 %v227_v2  ;;  %v231_v5 = vld [vmem:[#allocation3 + $0x54] ss:$8 sps:$4 sm:$0xff]   ;;  %v233_v6 = vld [vmem:[#allocation3 + $0x50] ss:$8 sps:$4 sm:$0xff]   ;;  %v234_v7 = vld [vmem:[#allocation3 + $0x44] ss:$8 sps:$4 sm:$0xff]  }
  0x10   :  { %136 = vmatprep.subr.bf16.mxu0 %v228_v3  ;;  %v236_v8 = vld [vmem:[#allocation3 + $0x40] ss:$8 sps:$4 sm:$0xff]   ;;  %v237_v9 = vld [vmem:[#allocation3 + $0x34] ss:$8 sps:$4 sm:$0xff]   ;;  %v239_v10 = vld [vmem:[#allocation3 + $0x30] ss:$8 sps:$4 sm:$0xff]  }
  0x11   :  { %v240_v11 = vld [vmem:[#allocation3 + $0x24] ss:$8 sps:$4 sm:$0xff]   ;;  %v242_v12 = vld [vmem:[#allocation3 + $0x20] ss:$8 sps:$4 sm:$0xff]   ;;  %v243_v13 = vld [vmem:[#allocation3 + $0x14] ss:$8 sps:$4 sm:$0xff]  }
  0x12   :  { %v245_v14 = vld [vmem:[#allocation3 + $0x10] ss:$8 sps:$4 sm:$0xff]   ;;  %v246_v15 = vld [vmem:[#allocation3 + $0x4] ss:$8 sps:$4 sm:$0xff]   ;;  %v248_v16 = vld [vmem:[#allocation3] ss:$8 sps:$4 sm:$0xff]  }
  0x13   :  { %137 = vmatpush1.bf16.msra.mxu0 %v230_v4  ;;  %v37_v17 = vld [vmem:[%s310_s0] sm:$0xf]  ;;  %v187_v19 = vshrl.u32 %v186_v18, 7 }
  0x14   :  { %138 = vmatprep.subr.bf16.mxu0 %v231_v5  ;;  %v184_v21 = vld [vmem:[%s312_s2] sm:$0x3] }
  0x15   :  { %v188_v20 = vsub.s32 0, %v187_v19  ;;  %v192_v22 = vsub.s32 1, %v187_v19 }
  0x17   :  { %139 = vmatpush1.bf16.msra.mxu0 %v233_v6  ;;  %v189_v23 = vrot.slane %v184_v21, %v188_v20  ;;  %v193_v24 = vrot.slane %v184_v21, %v192_v22 }
  0x18   :  { %140 = vmatprep.subr.bf16.mxu0 %v234_v7 }
  0x1b   :  { %141 = vmatpush1.bf16.msra.mxu0 %v236_v8 }
  0x1c   :  { %142 = vmatprep.subr.bf16.mxu0 %v237_v9 }
  0x1f   :  { %143 = vmatpush1.bf16.msra.mxu0 %v239_v10 }
  0x20   :  { %144 = vmatprep.subr.bf16.mxu0 %v240_v11 }
  0x23   :  { %145 = vmatpush1.bf16.msra.mxu0 %v242_v12 }
  0x24   :  { %146 = vmatprep.subr.bf16.mxu0 %v243_v13 }
  0x27   :  { %147 = vmatpush1.bf16.msra.mxu0 %v245_v14 }
  0x28   :  { %148 = vmatprep.subr.bf16.mxu0 %v246_v15 }
  0x2b   :  { %149 = vmatpush1.bf16.msra.mxu0 %v248_v16 }
  0x2e   :  { %167 = vmatmul.mubr.bf16.vlgmr.msra.gmra.mxu0 %v37_v17 }
  0xee   :  { %v168_v25 = vpop.f32.mrf.mxu0 }
  0xef   :  { %v196_v26 = vadd.f32 %v189_v23, %v168_v25 }
  0xf0   :  { %v170_v27 = vpop.f32.mrf.mxu0 }
  0xf1   :  { %198 = vst [vmem:[%s313_s3] sm:$0xff] %v196_v26  ;;  %v197_v28 = vadd.f32 %v193_v24, %v170_v27 }
  0xf2   :  { %v172_v29 = vpop.f32.mrf.mxu0 }
  0xf3   :  { %199 = vst [vmem:[%s313_s3 + $0x8] sm:$0xff] %v197_v28 }
  0xf4   :  { %v173_v30 = vpop.f32.mrf.mxu0 }
  0xf5   :  { %204 = vsyncpa [#allocation4], 1 }

// kernel: _lambda_.58
= control target key start
LH: loop header
LB: loop body
LE: loop exit
PB: predicated region body
PF: predicated region fallthrough
CT: control target
= control target key end

     0   :  { %s1027_s12 = smov 0   ;;  %s1029_s13 = smov 0   ;;  %s1129_s0 = inlined_call_operand.vmem [shape: bf16[8,2304], index: 0, kind: input, shape index: {}]   ;;  %s1130_s1 = inlined_call_operand.vmem [shape: bf16[2304,256], index: 1, kind: input, shape index: {}]   ;;  %s1131_s2 = inlined_call_operand.vmem [shape: f32[1,256], index: 2, kind: input, shape index: {}]   ;;  %s1132_s3 = inlined_call_operand.vmem [shape: f32[8,256], index: 3, kind: output, shape index: {}]  }
   0x1   :  { %s1031_s14 = smov 0  }
   0x2 LB: > { %s25_s15 = sadd.s32 1, %s999_s13  ;;  %p818_p0 = scmp.ge.s32.totalorder %s1003_s14, 1  ;;  %s1003_s14 = sphi %s1031_s14, %s13_s14   ;;  %s999_s13 = sphi %s1029_s13, %s1134_s13   ;;  %s995_s12 = sphi %s1027_s12, %s1133_s12  }
   0x3   : > { %p26_p1 = scmp.ge.s32.totalorder %s25_s15, 6  ;;  %p194_p2 = scmp.lt.s32.totalorder %s1003_s14, 7 }
   0x5   : > { %s1136_s15 = smov (%p26_p1, %s25_s15), 0  ;;  %p195_p3 = pnand %p818_p0, %p194_p2 }
   0x6   : > { %s240_s16 = smul.u32 (!%p195_p3), 3, %s995_s12  ;;  %p822_p6 = scmp.ne.s32.totalorder (!%p195_p3), %s995_s12, 0 }
   0x7   : > { %198 = sbr.rel (%p195_p3) target bundleno = 300 (0x12c), region = 32 }
   0x8   : > { %s250_s17 = smul.u32 (!%p195_p3), 48, %s995_s12  ;;  %p243_p4 = scmp.lt.s32.totalorder (!%p195_p3), %s240_s16, 17 }
   0xa   : > { %p252_p5 = scmp.lt.s32.totalorder (!%p195_p3), %s250_s17, 287 }
   0xc   : > { %s1138_s16 = smov (!%p243_p4, %s240_s16), 17  ;;  %s1140_s17 = smov (!%p252_p5, %s250_s17), 287 }
   0xd   : > { %s819_s18 = sshll.u32 %s1138_s16, 2  ;;  %s879_s22 = sshll.u32 %s1140_s17, 3 }
   0xe   : > { %s1052_s21 = scalar_lea.vmem %s1129_s0, %s819_s18  ;;  %s1057_s25 = scalar_lea.vmem %s1130_s1, %s879_s22 }
   0xf   : > { %281 = sbr.rel (%p822_p6) target bundleno = 22 (0x16), region = 36 }
  0x14   : > { %v1005_v0 = vmov 0.0  }
  0x15   : > { %282 = vst [vmem:[#allocation2] sm:$0xff] %v1005_v0  ;;  %283 = vst [vmem:[#allocation2 + $0x8] sm:$0xff] %v1005_v0 }
  0x16 PF: > { %v906_v1 = vld [vmem:[%s1057_s25 + $0x74] ss:$8 sps:$4 sm:$0xff]   ;;  %v908_v2 = vld [vmem:[%s1057_s25 + $0x70] ss:$8 sps:$4 sm:$0xff]   ;;  %v1006_v3 = vmov 0   ;;  %v286_v34 = vld [vmem:[%s1052_s21] sm:$0xff] }
  0x17   : > { %660 = vmatprep.mubr.bf16.mxu1 %v1006_v3  ;;  %587 = vmatprep.subr.bf16.mxu0 %v906_v1  ;;  %v909_v4 = vld [vmem:[%s1057_s25 + $0x64] ss:$8 sps:$4 sm:$0xff]   ;;  %v911_v5 = vld [vmem:[%s1057_s25 + $0x60] ss:$8 sps:$4 sm:$0xff]   ;;  %v912_v6 = vld [vmem:[%s1057_s25 + $0x54] ss:$8 sps:$4 sm:$0xff]   ;;  %v824_v36 = vcombine.high %v286_v34, %v286_v34  ;;  %v823_v53 = vcombine.low %v286_v34, %v286_v34 }
  0x18   : > { %588 = vmatpush1.bf16.msra.mxu0 %v908_v2  ;;  %v914_v7 = vld [vmem:[%s1057_s25 + $0x50] ss:$8 sps:$4 sm:$0xff]   ;;  %v915_v8 = vld [vmem:[%s1057_s25 + $0x44] ss:$8 sps:$4 sm:$0xff]   ;;  %v927_v9 = vld [vmem:[%s1057_s25 + $0x174] ss:$8 sps:$4 sm:$0xff]  }
  0x19   : > { %589 = vmatprep.subr.bf16.mxu0 %v909_v4  ;;  %v929_v10 = vld [vmem:[%s1057_s25 + $0x170] ss:$8 sps:$4 sm:$0xff]   ;;  %v917_v11 = vld [vmem:[%s1057_s25 + $0x40] ss:$8 sps:$4 sm:$0xff]   ;;  %v918_v12 = vld [vmem:[%s1057_s25 + $0x34] ss:$8 sps:$4 sm:$0xff]   ;;  %628 = vmatprep.subr.bf16.mxu1 %v927_v9 }
  0x1a   : > { %v933_v13 = vld [vmem:[%s1057_s25 + $0x164] ss:$8 sps:$4 sm:$0xff]   ;;  %629 = vmatpush1.bf16.msra.mxu1 %v929_v10  ;;  %v935_v14 = vld [vmem:[%s1057_s25 + $0x160] ss:$8 sps:$4 sm:$0xff]   ;;  %v920_v15 = vld [vmem:[%s1057_s25 + $0x30] ss:$8 sps:$4 sm:$0xff]   ;;  %619 = vmatprep.mubr.bf16.mxu0 %v824_v36 }
  0x1b   : > { %630 = vmatprep.subr.bf16.mxu1 %v933_v13  ;;  %v939_v16 = vld [vmem:[%s1057_s25 + $0x154] ss:$8 sps:$4 sm:$0xff]   ;;  %v921_v17 = vld [vmem:[%s1057_s25 + $0x24] ss:$8 sps:$4 sm:$0xff]   ;;  %v941_v18 = vld [vmem:[%s1057_s25 + $0x150] ss:$8 sps:$4 sm:$0xff]  }
  0x1c   : > { %590 = vmatpush1.bf16.msra.mxu0 %v911_v5  ;;  %v945_v19 = vld [vmem:[%s1057_s25 + $0x144] ss:$8 sps:$4 sm:$0xff]   ;;  %v923_v20 = vld [vmem:[%s1057_s25 + $0x20] ss:$8 sps:$4 sm:$0xff]   ;;  %v924_v21 = vld [vmem:[%s1057_s25 + $0x14] ss:$8 sps:$4 sm:$0xff]  }
  0x1d   : > { %591 = vmatprep.subr.bf16.mxu0 %v912_v6  ;;  %v947_v22 = vld [vmem:[%s1057_s25 + $0x140] ss:$8 sps:$4 sm:$0xff]   ;;  %v951_v23 = vld [vmem:[%s1057_s25 + $0x134] ss:$8 sps:$4 sm:$0xff]   ;;  %v926_v24 = vld [vmem:[%s1057_s25 + $0x10] ss:$8 sps:$4 sm:$0xff]  }
  0x1e   : > { %631 = vmatpush1.bf16.msra.mxu1 %v935_v14  ;;  %v930_v25 = vld [vmem:[%s1057_s25 + $0x4] ss:$8 sps:$4 sm:$0xff]   ;;  %v953_v26 = vld [vmem:[%s1057_s25 + $0x130] ss:$8 sps:$4 sm:$0xff]   ;;  %v932_v28 = vld [vmem:[%s1057_s25] ss:$8 sps:$4 sm:$0xff]  }
  0x1f   : > { %632 = vmatprep.subr.bf16.mxu1 %v939_v16  ;;  %v957_v27 = vld [vmem:[%s1057_s25 + $0x124] ss:$8 sps:$4 sm:$0xff]   ;;  %v936_v29 = vld [vmem:[%s1057_s25 + $0xf4] ss:$8 sps:$4 sm:$0xff]   ;;  %v959_v30 = vld [vmem:[%s1057_s25 + $0x120] ss:$8 sps:$4 sm:$0xff]  }
  0x20   : > { %592 = vmatpush1.bf16.msra.mxu0 %v914_v7  ;;  %v963_v31 = vld [vmem:[%s1057_s25 + $0x114] ss:$8 sps:$4 sm:$0xff]   ;;  %v938_v32 = vld [vmem:[%s1057_s25 + $0xf0] ss:$8 sps:$4 sm:$0xff]   ;;  %v942_v33 = vld [vmem:[%s1057_s25 + $0xe4] ss:$8 sps:$4 sm:$0xff]  }
  0x21   : > { %593 = vmatprep.subr.bf16.mxu0 %v915_v8  ;;  %v965_v35 = vld [vmem:[%s1057_s25 + $0x110] ss:$8 sps:$4 sm:$0xff]   ;;  %v969_v37 = vld [vmem:[%s1057_s25 + $0x104] ss:$8 sps:$4 sm:$0xff]   ;;  %v944_v38 = vld [vmem:[%s1057_s25 + $0xe0] ss:$8 sps:$4 sm:$0xff]  }
  0x22   : > { %633 = vmatpush1.bf16.msra.mxu1 %v941_v18  ;;  %v948_v39 = vld [vmem:[%s1057_s25 + $0xd4] ss:$8 sps:$4 sm:$0xff]   ;;  %v971_v40 = vld [vmem:[%s1057_s25 + $0x100] ss:$8 sps:$4 sm:$0xff]   ;;  %v950_v41 = vld [vmem:[%s1057_s25 + $0xd0] ss:$8 sps:$4 sm:$0xff]  }
  0x23   : > { %634 = vmatprep.subr.bf16.mxu1 %v945_v19  ;;  %v954_v42 = vld [vmem:[%s1057_s25 + $0xc4] ss:$8 sps:$4 sm:$0xff]   ;;  %v975_v43 = vld [vmem:[%s1052_s21 + $0x8] ss:$0 sps:$4 sm:$0xff]   ;;  %v960_v45 = vld [vmem:[%s1057_s25 + $0xb4] ss:$8 sps:$4 sm:$0xff]  }
  0x24   : > { %594 = vmatpush1.bf16.msra.mxu0 %v917_v11  ;;  %v956_v44 = vld [vmem:[%s1057_s25 + $0xc0] ss:$8 sps:$4 sm:$0xff]   ;;  %v962_v46 = vld [vmem:[%s1057_s25 + $0xb0] ss:$8 sps:$4 sm:$0xff]   ;;  %v966_v47 = vld [vmem:[%s1057_s25 + $0xa4] ss:$8 sps:$4 sm:$0xff]  }
  0x25   : > { %595 = vmatprep.subr.bf16.mxu0 %v918_v12  ;;  %v968_v48 = vld [vmem:[%s1057_s25 + $0xa0] ss:$8 sps:$4 sm:$0xff]   ;;  %v972_v49 = vld [vmem:[%s1057_s25 + $0x94] ss:$8 sps:$4 sm:$0xff]   ;;  %v974_v50 = vld [vmem:[%s1057_s25 + $0x90] ss:$8 sps:$4 sm:$0xff]  }
  0x26   : > { %635 = vmatpush1.bf16.msra.mxu1 %v947_v22  ;;  %v976_v51 = vld [vmem:[%s1057_s25 + $0x84] ss:$8 sps:$4 sm:$0xff]   ;;  %v978_v52 = vld [vmem:[%s1057_s25 + $0x80] ss:$8 sps:$4 sm:$0xff]   ;;  %p874_p7 = scmp.ne.s32.totalorder %s995_s12, 5 }
  0x27   : > { %636 = vmatprep.subr.bf16.mxu1 %v951_v23  ;;  %v284_v58 = vld [vmem:[#allocation2] sm:$0xff]  ;;  %v285_v61 = vld [vmem:[#allocation2 + $0x8] sm:$0xff] }
  0x28   : > { %596 = vmatpush1.bf16.msra.mxu0 %v920_v15 }
  0x29   : > { %597 = vmatprep.subr.bf16.mxu0 %v921_v17 }
  0x2a   : > { %637 = vmatpush1.bf16.msra.mxu1 %v953_v26 }
  0x2b   : > { %638 = vmatprep.subr.bf16.mxu1 %v957_v27 }
  0x2c   : > { %598 = vmatpush1.bf16.msra.mxu0 %v923_v20 }
  0x2d   : > { %599 = vmatprep.subr.bf16.mxu0 %v924_v21 }
  0x2e   : > { %639 = vmatpush1.bf16.msra.mxu1 %v959_v30 }
  0x2f   : > { %640 = vmatprep.subr.bf16.mxu1 %v963_v31 }
  0x30   : > { %600 = vmatpush1.bf16.msra.mxu0 %v926_v24 }
  0x31   : > { %601 = vmatprep.subr.bf16.mxu0 %v930_v25 }
  0x32   : > { %641 = vmatpush1.bf16.msra.mxu1 %v965_v35 }
  0x33   : > { %642 = vmatprep.subr.bf16.mxu1 %v969_v37 }
  0x34   : > { %602 = vmatpush1.bf16.msra.mxu0 %v932_v28 }
  0x35   : > { %603 = vmatprep.subr.bf16.mxu0 %v936_v29 }
  0x36   : > { %643 = vmatpush1.bf16.msra.mxu1 %v971_v40 }
  0x38   : > { %604 = vmatpush2.bf16.msra.mxu0 %v938_v32 }
  0x39   : > { %605 = vmatprep.subr.bf16.mxu0 %v942_v33  ;;  %661 = vmatmul.mubr.bf16.vlgmr.msra.gmra.mxu1 %v975_v43 }
  0x3c   : > { %606 = vmatpush2.bf16.msra.mxu0 %v944_v38 }
  0x3d   : > { %607 = vmatprep.subr.bf16.mxu0 %v948_v39 }
  0x40   : > { %608 = vmatpush2.bf16.msra.mxu0 %v950_v41 }
  0x41   : > { %609 = vmatprep.subr.bf16.mxu0 %v954_v42 }
  0x44   : > { %610 = vmatpush2.bf16.msra.mxu0 %v956_v44 }
  0x45   : > { %611 = vmatprep.subr.bf16.mxu0 %v960_v45 }
  0x48   : > { %612 = vmatpush2.bf16.msra.mxu0 %v962_v46 }
  0x49   : > { %613 = vmatprep.subr.bf16.mxu0 %v966_v47 }
  0x4c   : > { %614 = vmatpush2.bf16.msra.mxu0 %v968_v48 }
  0x4d   : > { %615 = vmatprep.subr.bf16.mxu0 %v972_v49 }
  0x50   : > { %616 = vmatpush2.bf16.msra.mxu0 %v974_v50 }
  0x51   : > { %617 = vmatprep.subr.bf16.mxu0 %v976_v51 }
  0x54   : > { %618 = vmatpush2.bf16.msra.mxu0 %v978_v52 }
  0x57   : > { %620 = vmatmul.mubr.bf16.vlgmr.msra.gmra.mxu0 %v823_v53 }
  0xf9   : > { %v662_v54 = vpop.f32.mrf.mxu1 }
  0xfb   : > { %v664_v55 = vpop.f32.mrf.mxu1 }
  0xfd   : > { %v666_v56 = vpop.f32.mrf.mxu1 }
  0xff   : > { %v667_v57 = vpop.f32.mrf.mxu1 }
 0x117   : > { %v621_v59 = vpop.f32.mrf.mxu0 }
 0x118   : > { %v663_v60 = vadd.f32 %v662_v54, %v621_v59 }
 0x119   : > { %v623_v62 = vpop.f32.mrf.mxu0 }
 0x11a   : > { %v669_v63 = vadd.f32 %v663_v60, %v284_v58  ;;  %v665_v0 = vadd.f32 %v664_v55, %v623_v62  ;;  %676 = sbr.rel (%p874_p7) target bundleno = 300 (0x12c), region = 40 }
 0x11b   : > { %v625_v1 = vpop.f32.mrf.mxu0 }
 0x11c   : > { %671 = vst [vmem:[#allocation2] sm:$0xff] %v669_v63  ;;  %v670_v2 = vadd.f32 %v665_v0, %v285_v61 }
 0x11d   : > { %v626_v3 = vpop.f32.mrf.mxu0 }
 0x11e   : > { %672 = vst [vmem:[#allocation2 + $0x8] sm:$0xff] %v670_v2 }
 0x11f   : > { %v681_v4 = vlaneseq  ;;  %v679_v6 = vld [vmem:[%s1131_s2] sm:$0x3] }
 0x121   : > { %v682_v5 = vshrl.u32 %v681_v4, 7 }
 0x123   : > { %v683_v7 = vsub.s32 0, %v682_v5  ;;  %v687_v8 = vsub.s32 1, %v682_v5  ;;  %v677_v9 = vld [vmem:[#allocation2] sm:$0xff] }
 0x125   : > { %v678_v10 = vld [vmem:[#allocation2 + $0x8] sm:$0xff]  ;;  %v684_v11 = vrot.slane %v679_v6, %v683_v7  ;;  %v688_v12 = vrot.slane %v679_v6, %v687_v8 }
 0x127   : > { %v691_v13 = vadd.f32 %v684_v11, %v677_v9  ;;  %v692_v14 = vadd.f32 %v688_v12, %v678_v10 }
 0x129   : > { %v693_v15 = vmax.f32 %v691_v13, 0.0  ;;  %v694_v16 = vmax.f32 %v692_v14, 0.0 }
 0x12b   : > { %695 = vst [vmem:[%s1132_s3] sm:$0xff] %v693_v15  ;;  %696 = vst [vmem:[%s1132_s3 + $0x8] sm:$0xff] %v694_v16 }
 0x12c PF: > { %s13_s14 = sadd.s32 1, %s1003_s14   ;;  %s1133_s12 = smov %s999_s13 }
 0x12d   : > { %p10_p8 = scmp.ge.s32.totalorder %s13_s14, 8   ;;  %s1134_s13 = smov %s1136_s15 }
 0x12f   :  { %12 = sbr.rel (!%p10_p8) target bundleno = 2 (0x2), region = 76 }

// kernel: _lambda_.57
= control target key start
LH: loop header
LB: loop body
LE: loop exit
PB: predicated region body
PF: predicated region fallthrough
CT: control target
= control target key end

     0   :  { %s1121_s15 = smov 0   ;;  %s1123_s16 = smov 0   ;;  %s1229_s0 = inlined_call_operand.vmem [shape: bf16[8,2304], index: 0, kind: input, shape index: {}]   ;;  %s1230_s1 = inlined_call_operand.vmem [shape: bf16[2304,256], index: 1, kind: input, shape index: {}]   ;;  %s1231_s2 = inlined_call_operand.vmem [shape: f32[1,256], index: 2, kind: input, shape index: {}]   ;;  %s1232_s3 = inlined_call_operand.vmem [shape: f32[8,256], index: 3, kind: input, shape index: {}]   ;;  %s1233_s4 = inlined_call_operand.vmem [shape: f32[8,256], index: 4, kind: output, shape index: {}]  }
   0x1   :  { %s1125_s17 = smov 0  }
   0x2 LB: > { %s26_s18 = sadd.s32 1, %s1088_s16  ;;  %p907_p0 = scmp.ge.s32.totalorder %s1092_s17, 1  ;;  %s1092_s17 = sphi %s1125_s17, %s14_s17   ;;  %s1088_s16 = sphi %s1123_s16, %s1235_s16   ;;  %s1084_s15 = sphi %s1121_s15, %s1234_s15  }
   0x3   : > { %p27_p1 = scmp.ge.s32.totalorder %s26_s18, 6  ;;  %p236_p2 = scmp.lt.s32.totalorder %s1092_s17, 7 }
   0x5   : > { %s1237_s18 = smov (%p27_p1, %s26_s18), 0  ;;  %p237_p3 = pnand %p907_p0, %p236_p2 }
   0x6   : > { %s293_s19 = smul.u32 (!%p237_p3), 3, %s1084_s15  ;;  %p911_p6 = scmp.ne.s32.totalorder (!%p237_p3), %s1084_s15, 0 }
   0x7   : > { %240 = sbr.rel (%p237_p3) target bundleno = 302 (0x12e), region = 36 }
   0x8   : > { %s303_s20 = smul.u32 (!%p237_p3), 48, %s1084_s15  ;;  %p296_p4 = scmp.lt.s32.totalorder (!%p237_p3), %s293_s19, 17 }
   0xa   : > { %p305_p5 = scmp.lt.s32.totalorder (!%p237_p3), %s303_s20, 287 }
   0xc   : > { %s1239_s19 = smov (!%p296_p4, %s293_s19), 17  ;;  %s1241_s20 = smov (!%p305_p5, %s303_s20), 287 }
   0xd   : > { %s908_s21 = sshll.u32 %s1239_s19, 2  ;;  %s968_s25 = sshll.u32 %s1241_s20, 3 }
   0xe   : > { %s1146_s24 = scalar_lea.vmem %s1229_s0, %s908_s21  ;;  %s1151_s28 = scalar_lea.vmem %s1230_s1, %s968_s25 }
   0xf   : > { %344 = sbr.rel (%p911_p6) target bundleno = 22 (0x16), region = 40 }
  0x14   : > { %v1094_v0 = vmov 0.0  }
  0x15   : > { %345 = vst [vmem:[#allocation2] sm:$0xff] %v1094_v0  ;;  %346 = vst [vmem:[#allocation2 + $0x8] sm:$0xff] %v1094_v0 }
  0x16 PF: > { %v995_v1 = vld [vmem:[%s1151_s28 + $0x74] ss:$8 sps:$4 sm:$0xff]   ;;  %v997_v2 = vld [vmem:[%s1151_s28 + $0x70] ss:$8 sps:$4 sm:$0xff]   ;;  %v1095_v3 = vmov 0   ;;  %v349_v34 = vld [vmem:[%s1146_s24] sm:$0xff] }
  0x17   : > { %723 = vmatprep.mubr.bf16.mxu1 %v1095_v3  ;;  %650 = vmatprep.subr.bf16.mxu0 %v995_v1  ;;  %v998_v4 = vld [vmem:[%s1151_s28 + $0x64] ss:$8 sps:$4 sm:$0xff]   ;;  %v1000_v5 = vld [vmem:[%s1151_s28 + $0x60] ss:$8 sps:$4 sm:$0xff]   ;;  %v1001_v6 = vld [vmem:[%s1151_s28 + $0x54] ss:$8 sps:$4 sm:$0xff]   ;;  %v913_v36 = vcombine.high %v349_v34, %v349_v34  ;;  %v912_v53 = vcombine.low %v349_v34, %v349_v34 }
  0x18   : > { %651 = vmatpush1.bf16.msra.mxu0 %v997_v2  ;;  %v1003_v7 = vld [vmem:[%s1151_s28 + $0x50] ss:$8 sps:$4 sm:$0xff]   ;;  %v1004_v8 = vld [vmem:[%s1151_s28 + $0x44] ss:$8 sps:$4 sm:$0xff]   ;;  %v1016_v9 = vld [vmem:[%s1151_s28 + $0x174] ss:$8 sps:$4 sm:$0xff]  }
  0x19   : > { %652 = vmatprep.subr.bf16.mxu0 %v998_v4  ;;  %v1018_v10 = vld [vmem:[%s1151_s28 + $0x170] ss:$8 sps:$4 sm:$0xff]   ;;  %v1006_v11 = vld [vmem:[%s1151_s28 + $0x40] ss:$8 sps:$4 sm:$0xff]   ;;  %v1007_v12 = vld [vmem:[%s1151_s28 + $0x34] ss:$8 sps:$4 sm:$0xff]   ;;  %691 = vmatprep.subr.bf16.mxu1 %v1016_v9 }
  0x1a   : > { %v1022_v13 = vld [vmem:[%s1151_s28 + $0x164] ss:$8 sps:$4 sm:$0xff]   ;;  %692 = vmatpush1.bf16.msra.mxu1 %v1018_v10  ;;  %v1024_v14 = vld [vmem:[%s1151_s28 + $0x160] ss:$8 sps:$4 sm:$0xff]   ;;  %v1009_v15 = vld [vmem:[%s1151_s28 + $0x30] ss:$8 sps:$4 sm:$0xff]   ;;  %682 = vmatprep.mubr.bf16.mxu0 %v913_v36 }
  0x1b   : > { %693 = vmatprep.subr.bf16.mxu1 %v1022_v13  ;;  %v1028_v16 = vld [vmem:[%s1151_s28 + $0x154] ss:$8 sps:$4 sm:$0xff]   ;;  %v1010_v17 = vld [vmem:[%s1151_s28 + $0x24] ss:$8 sps:$4 sm:$0xff]   ;;  %v1030_v18 = vld [vmem:[%s1151_s28 + $0x150] ss:$8 sps:$4 sm:$0xff]  }
  0x1c   : > { %653 = vmatpush1.bf16.msra.mxu0 %v1000_v5  ;;  %v1034_v19 = vld [vmem:[%s1151_s28 + $0x144] ss:$8 sps:$4 sm:$0xff]   ;;  %v1012_v20 = vld [vmem:[%s1151_s28 + $0x20] ss:$8 sps:$4 sm:$0xff]   ;;  %v1013_v21 = vld [vmem:[%s1151_s28 + $0x14] ss:$8 sps:$4 sm:$0xff]  }
  0x1d   : > { %654 = vmatprep.subr.bf16.mxu0 %v1001_v6  ;;  %v1036_v22 = vld [vmem:[%s1151_s28 + $0x140] ss:$8 sps:$4 sm:$0xff]   ;;  %v1040_v23 = vld [vmem:[%s1151_s28 + $0x134] ss:$8 sps:$4 sm:$0xff]   ;;  %v1015_v24 = vld [vmem:[%s1151_s28 + $0x10] ss:$8 sps:$4 sm:$0xff]  }
  0x1e   : > { %694 = vmatpush1.bf16.msra.mxu1 %v1024_v14  ;;  %v1019_v25 = vld [vmem:[%s1151_s28 + $0x4] ss:$8 sps:$4 sm:$0xff]   ;;  %v1042_v26 = vld [vmem:[%s1151_s28 + $0x130] ss:$8 sps:$4 sm:$0xff]   ;;  %v1021_v28 = vld [vmem:[%s1151_s28] ss:$8 sps:$4 sm:$0xff]  }
  0x1f   : > { %695 = vmatprep.subr.bf16.mxu1 %v1028_v16  ;;  %v1046_v27 = vld [vmem:[%s1151_s28 + $0x124] ss:$8 sps:$4 sm:$0xff]   ;;  %v1025_v29 = vld [vmem:[%s1151_s28 + $0xf4] ss:$8 sps:$4 sm:$0xff]   ;;  %v1048_v30 = vld [vmem:[%s1151_s28 + $0x120] ss:$8 sps:$4 sm:$0xff]  }
  0x20   : > { %655 = vmatpush1.bf16.msra.mxu0 %v1003_v7  ;;  %v1052_v31 = vld [vmem:[%s1151_s28 + $0x114] ss:$8 sps:$4 sm:$0xff]   ;;  %v1027_v32 = vld [vmem:[%s1151_s28 + $0xf0] ss:$8 sps:$4 sm:$0xff]   ;;  %v1031_v33 = vld [vmem:[%s1151_s28 + $0xe4] ss:$8 sps:$4 sm:$0xff]  }
  0x21   : > { %656 = vmatprep.subr.bf16.mxu0 %v1004_v8  ;;  %v1054_v35 = vld [vmem:[%s1151_s28 + $0x110] ss:$8 sps:$4 sm:$0xff]   ;;  %v1058_v37 = vld [vmem:[%s1151_s28 + $0x104] ss:$8 sps:$4 sm:$0xff]   ;;  %v1033_v38 = vld [vmem:[%s1151_s28 + $0xe0] ss:$8 sps:$4 sm:$0xff]  }
  0x22   : > { %696 = vmatpush1.bf16.msra.mxu1 %v1030_v18  ;;  %v1037_v39 = vld [vmem:[%s1151_s28 + $0xd4] ss:$8 sps:$4 sm:$0xff]   ;;  %v1060_v40 = vld [vmem:[%s1151_s28 + $0x100] ss:$8 sps:$4 sm:$0xff]   ;;  %v1039_v41 = vld [vmem:[%s1151_s28 + $0xd0] ss:$8 sps:$4 sm:$0xff]  }
  0x23   : > { %697 = vmatprep.subr.bf16.mxu1 %v1034_v19  ;;  %v1043_v42 = vld [vmem:[%s1151_s28 + $0xc4] ss:$8 sps:$4 sm:$0xff]   ;;  %v1064_v43 = vld [vmem:[%s1146_s24 + $0x8] ss:$0 sps:$4 sm:$0xff]   ;;  %v1049_v45 = vld [vmem:[%s1151_s28 + $0xb4] ss:$8 sps:$4 sm:$0xff]  }
  0x24   : > { %657 = vmatpush1.bf16.msra.mxu0 %v1006_v11  ;;  %v1045_v44 = vld [vmem:[%s1151_s28 + $0xc0] ss:$8 sps:$4 sm:$0xff]   ;;  %v1051_v46 = vld [vmem:[%s1151_s28 + $0xb0] ss:$8 sps:$4 sm:$0xff]   ;;  %v1055_v47 = vld [vmem:[%s1151_s28 + $0xa4] ss:$8 sps:$4 sm:$0xff]  }
  0x25   : > { %658 = vmatprep.subr.bf16.mxu0 %v1007_v12  ;;  %v1057_v48 = vld [vmem:[%s1151_s28 + $0xa0] ss:$8 sps:$4 sm:$0xff]   ;;  %v1061_v49 = vld [vmem:[%s1151_s28 + $0x94] ss:$8 sps:$4 sm:$0xff]   ;;  %v1063_v50 = vld [vmem:[%s1151_s28 + $0x90] ss:$8 sps:$4 sm:$0xff]  }
  0x26   : > { %698 = vmatpush1.bf16.msra.mxu1 %v1036_v22  ;;  %v1065_v51 = vld [vmem:[%s1151_s28 + $0x84] ss:$8 sps:$4 sm:$0xff]   ;;  %v1067_v52 = vld [vmem:[%s1151_s28 + $0x80] ss:$8 sps:$4 sm:$0xff]   ;;  %p963_p7 = scmp.ne.s32.totalorder %s1084_s15, 5 }
  0x27   : > { %699 = vmatprep.subr.bf16.mxu1 %v1040_v23  ;;  %v347_v58 = vld [vmem:[#allocation2] sm:$0xff]  ;;  %v348_v61 = vld [vmem:[#allocation2 + $0x8] sm:$0xff] }
  0x28   : > { %659 = vmatpush1.bf16.msra.mxu0 %v1009_v15 }
  0x29   : > { %660 = vmatprep.subr.bf16.mxu0 %v1010_v17 }
  0x2a   : > { %700 = vmatpush1.bf16.msra.mxu1 %v1042_v26 }
  0x2b   : > { %701 = vmatprep.subr.bf16.mxu1 %v1046_v27 }
  0x2c   : > { %661 = vmatpush1.bf16.msra.mxu0 %v1012_v20 }
  0x2d   : > { %662 = vmatprep.subr.bf16.mxu0 %v1013_v21 }
  0x2e   : > { %702 = vmatpush1.bf16.msra.mxu1 %v1048_v30 }
  0x2f   : > { %703 = vmatprep.subr.bf16.mxu1 %v1052_v31 }
  0x30   : > { %663 = vmatpush1.bf16.msra.mxu0 %v1015_v24 }
  0x31   : > { %664 = vmatprep.subr.bf16.mxu0 %v1019_v25 }
  0x32   : > { %704 = vmatpush1.bf16.msra.mxu1 %v1054_v35 }
  0x33   : > { %705 = vmatprep.subr.bf16.mxu1 %v1058_v37 }
  0x34   : > { %665 = vmatpush1.bf16.msra.mxu0 %v1021_v28 }
  0x35   : > { %666 = vmatprep.subr.bf16.mxu0 %v1025_v29 }
  0x36   : > { %706 = vmatpush1.bf16.msra.mxu1 %v1060_v40 }
  0x38   : > { %667 = vmatpush2.bf16.msra.mxu0 %v1027_v32 }
  0x39   : > { %668 = vmatprep.subr.bf16.mxu0 %v1031_v33  ;;  %724 = vmatmul.mubr.bf16.vlgmr.msra.gmra.mxu1 %v1064_v43 }
  0x3c   : > { %669 = vmatpush2.bf16.msra.mxu0 %v1033_v38 }
  0x3d   : > { %670 = vmatprep.subr.bf16.mxu0 %v1037_v39 }
  0x40   : > { %671 = vmatpush2.bf16.msra.mxu0 %v1039_v41 }
  0x41   : > { %672 = vmatprep.subr.bf16.mxu0 %v1043_v42 }
  0x44   : > { %673 = vmatpush2.bf16.msra.mxu0 %v1045_v44 }
  0x45   : > { %674 = vmatprep.subr.bf16.mxu0 %v1049_v45 }
  0x48   : > { %675 = vmatpush2.bf16.msra.mxu0 %v1051_v46 }
  0x49   : > { %676 = vmatprep.subr.bf16.mxu0 %v1055_v47 }
  0x4c   : > { %677 = vmatpush2.bf16.msra.mxu0 %v1057_v48 }
  0x4d   : > { %678 = vmatprep.subr.bf16.mxu0 %v1061_v49 }
  0x50   : > { %679 = vmatpush2.bf16.msra.mxu0 %v1063_v50 }
  0x51   : > { %680 = vmatprep.subr.bf16.mxu0 %v1065_v51 }
  0x54   : > { %681 = vmatpush2.bf16.msra.mxu0 %v1067_v52 }
  0x57   : > { %683 = vmatmul.mubr.bf16.vlgmr.msra.gmra.mxu0 %v912_v53 }
  0xf9   : > { %v725_v54 = vpop.f32.mrf.mxu1 }
  0xfb   : > { %v727_v55 = vpop.f32.mrf.mxu1 }
  0xfd   : > { %v729_v56 = vpop.f32.mrf.mxu1 }
  0xff   : > { %v730_v57 = vpop.f32.mrf.mxu1 }
 0x117   : > { %v684_v59 = vpop.f32.mrf.mxu0 }
 0x118   : > { %v726_v60 = vadd.f32 %v725_v54, %v684_v59 }
 0x119   : > { %v686_v62 = vpop.f32.mrf.mxu0 }
 0x11a   : > { %v732_v63 = vadd.f32 %v726_v60, %v347_v58  ;;  %v728_v0 = vadd.f32 %v727_v55, %v686_v62  ;;  %739 = sbr.rel (%p963_p7) target bundleno = 302 (0x12e), region = 44 }
 0x11b   : > { %v688_v1 = vpop.f32.mrf.mxu0 }
 0x11c   : > { %734 = vst [vmem:[#allocation2] sm:$0xff] %v732_v63  ;;  %v733_v2 = vadd.f32 %v728_v0, %v348_v61 }
 0x11d   : > { %v689_v3 = vpop.f32.mrf.mxu0 }
 0x11e   : > { %735 = vst [vmem:[#allocation2 + $0x8] sm:$0xff] %v733_v2 }
 0x11f   : > { %v744_v4 = vlaneseq  ;;  %v742_v6 = vld [vmem:[%s1231_s2] sm:$0x3]  ;;  %v757_v14 = vld [vmem:[%s1232_s3 + $0x8] sm:$0xff] }
 0x120   : > { %v756_v13 = vld [vmem:[%s1232_s3] sm:$0xff] }
 0x121   : > { %v745_v5 = vshrl.u32 %v744_v4, 7 }
 0x123   : > { %v746_v7 = vsub.s32 0, %v745_v5  ;;  %v750_v8 = vsub.s32 1, %v745_v5  ;;  %v740_v9 = vld [vmem:[#allocation2] sm:$0xff] }
 0x125   : > { %v741_v10 = vld [vmem:[#allocation2 + $0x8] sm:$0xff]  ;;  %v747_v11 = vrot.slane %v742_v6, %v746_v7  ;;  %v751_v12 = vrot.slane %v742_v6, %v750_v8 }
 0x127   : > { %v754_v15 = vadd.f32 %v747_v11, %v740_v9  ;;  %v755_v16 = vadd.f32 %v751_v12, %v741_v10 }
 0x129   : > { %v758_v17 = vadd.f32 %v756_v13, %v754_v15  ;;  %v759_v18 = vadd.f32 %v757_v14, %v755_v16 }
 0x12b   : > { %v760_v19 = vmax.f32 %v758_v17, 0.0  ;;  %v761_v20 = vmax.f32 %v759_v18, 0.0 }
 0x12d   : > { %762 = vst [vmem:[%s1233_s4] sm:$0xff] %v760_v19  ;;  %763 = vst [vmem:[%s1233_s4 + $0x8] sm:$0xff] %v761_v20 }
 0x12e PF: > { %s14_s17 = sadd.s32 1, %s1092_s17   ;;  %s1234_s15 = smov %s1088_s16 }
 0x12f   : > { %p11_p8 = scmp.ge.s32.totalorder %s14_s17, 8   ;;  %s1235_s16 = smov %s1237_s18 }
 0x131   :  { %13 = sbr.rel (!%p11_p8) target bundleno = 2 (0x2), region = 83 }

// kernel: _lambda_.68
= control target key start
LH: loop header
LB: loop body
LE: loop exit
PB: predicated region body
PF: predicated region fallthrough
CT: control target
= control target key end

     0   :  { %s1311_s12 = smov 0   ;;  %s1313_s13 = smov 0   ;;  %s1575_s0 = inlined_call_operand.vmem [shape: bf16[8,2304], index: 0, kind: input, shape index: {}]   ;;  %s1576_s1 = inlined_call_operand.vmem [shape: bf16[2304,512], index: 1, kind: input, shape index: {}]   ;;  %s1577_s2 = inlined_call_operand.vmem [shape: f32[1,512], index: 2, kind: input, shape index: {}]   ;;  %s1578_s3 = inlined_call_operand.vmem [shape: f32[8,512], index: 3, kind: output, shape index: {}]  }
   0x1   :  { %s1315_s14 = smov 0   ;;  %s1317_s15 = smov 0  }
   0x2   :  { %s1319_s16 = smov 0   ;;  %s1321_s17 = smov 0  }
   0x3   :  { %s1323_s18 = smov 0  }
   0x4 LB: > { %s25_s19 = sadd.s32 1, %s1279_s16  ;;  %s32_s20 = sadd.s32 1, %s1283_s17  ;;  %s1287_s18 = sphi %s1323_s18, %s13_s18   ;;  %s1283_s17 = sphi %s1321_s17, %s1584_s17   ;;  %s1279_s16 = sphi %s1319_s16, %s1583_s16   ;;  %s1275_s15 = sphi %s1317_s15, %s1582_s15   ;;  %s1271_s14 = sphi %s1315_s14, %s1581_s14   ;;  %s1267_s13 = sphi %s1313_s13, %s1580_s13   ;;  %s1263_s12 = sphi %s1311_s12, %s1579_s12  }
   0x5   : > { %p26_p0 = scmp.ge.s32.totalorder %s25_s19, 6  ;;  %p76_p1 = scmp.ne.s32.totalorder %s1267_s13, %s1263_s12 }
   0x6   : > { %p77_p2 = scmp.eq.s32.totalorder %s1287_s18, 0  ;;  %s69_s24 = sadd.s32 1, %s1267_s13 }
   0x7   : > { %s1586_s19 = smov (%p26_p0, %s25_s19), 0  ;;  %s1588_s20 = smov (!%p26_p0, %s32_s20), %s1283_s17 }
   0x8   : > { %p78_p3 = por %p77_p2, %p76_p1  ;;  %p34_p4 = scmp.ge.s32.totalorder %s1588_s20, 2 }
   0x9   : > { %s64_s21 = ssub.s32 %s1279_s16, %s1586_s19  ;;  %p1033_p6 = scmp.ge.s32.totalorder %s1287_s18, 12 }
   0xa   : > { %s1590_s20 = smov (%p34_p4, %s1588_s20), 0 }
   0xb   : > { %s65_s22 = ssub.s32 %s1283_s17, %s1590_s20  ;;  %156 = sbr.rel (%p1033_p6) target bundleno = 48 (0x30), region = 16 }
   0xc   : > { %s66_s23 = sor.u32 %s65_s22, %s64_s21 }
   0xd   : > { %p67_p5 = scmp.eq.s32.totalorder %s66_s23, 0 }
   0xf   : > { %s1362_s25 = scalar_select %p67_p5, %s1267_s13, %s69_s24  }
  0x10   : > { %172 = sbr.rel (!%p78_p3) target bundleno = 48 (0x30), region = 24  ;;  %s174_s26 = sand.u32 (%p78_p3), 1, %s1267_s13  }
  0x11   : > { %s1098_s27 = smul.u32 (%p78_p3), 384, %s174_s26  ;;  %s1034_s28 = sshll.u32 (%p78_p3), %s1283_s17, 1 }
  0x12   : > { %s1097_s29 = smul.u32 (%p78_p3), 192, %s1279_s16 }
  0x13   : > { %s1376_s8 = scalar_lea.vmem (%p78_p3), [#allocation3], %s1098_s27 }
  0x14   : > { %s180_s30 = sadd.s32 (%p78_p3), %s1097_s29, %s1034_s28 }
  0x15   : > { %s1036_s4 = sshll.u32 %s180_s30, 2 }
  0x16   : > { %s1371_s7 = scalar_lea.vmem %s1576_s1, %s1036_s4 }
  0x17   : > { %v305_v0 = vld [vmem:[%s1371_s7] sm:$0xff]  ;;  %v307_v1 = vld [vmem:[%s1371_s7 + $0x10] sm:$0xff] }
  0x18   : > { %v309_v2 = vld [vmem:[%s1371_s7 + $0x20] sm:$0xff]  ;;  %306 = vst [vmem:[%s1376_s8] sm:$0xff] %v305_v0  ;;  %308 = vst [vmem:[%s1376_s8 + $0x8] sm:$0xff] %v307_v1  ;;  %v311_v3 = vld [vmem:[%s1371_s7 + $0x30] sm:$0xff] }
  0x19   : > { %310 = vst [vmem:[%s1376_s8 + $0x10] sm:$0xff] %v309_v2  ;;  %v313_v4 = vld [vmem:[%s1371_s7 + $0x40] sm:$0xff]  ;;  %v315_v5 = vld [vmem:[%s1371_s7 + $0x50] sm:$0xff]  ;;  %312 = vst [vmem:[%s1376_s8 + $0x18] sm:$0xff] %v311_v3 }
  0x1a   : > { %314 = vst [vmem:[%s1376_s8 + $0x20] sm:$0xff] %v313_v4  ;;  %316 = vst [vmem:[%s1376_s8 + $0x28] sm:$0xff] %v315_v5  ;;  %v317_v6 = vld [vmem:[%s1371_s7 + $0x60] sm:$0xff]  ;;  %v319_v7 = vld [vmem:[%s1371_s7 + $0x70] sm:$0xff] }
  0x1b   : > { %v321_v8 = vld [vmem:[%s1371_s7 + $0x80] sm:$0xff]  ;;  %318 = vst [vmem:[%s1376_s8 + $0x30] sm:$0xff] %v317_v6  ;;  %320 = vst [vmem:[%s1376_s8 + $0x38] sm:$0xff] %v319_v7  ;;  %v323_v9 = vld [vmem:[%s1371_s7 + $0x90] sm:$0xff] }
  0x1c   : > { %322 = vst [vmem:[%s1376_s8 + $0x40] sm:$0xff] %v321_v8  ;;  %v325_v10 = vld [vmem:[%s1371_s7 + $0xa0] sm:$0xff]  ;;  %v327_v11 = vld [vmem:[%s1371_s7 + $0xb0] sm:$0xff]  ;;  %324 = vst [vmem:[%s1376_s8 + $0x48] sm:$0xff] %v323_v9 }
  0x1d   : > { %326 = vst [vmem:[%s1376_s8 + $0x50] sm:$0xff] %v325_v10  ;;  %328 = vst [vmem:[%s1376_s8 + $0x58] sm:$0xff] %v327_v11  ;;  %v329_v12 = vld [vmem:[%s1371_s7 + $0xc0] sm:$0xff]  ;;  %v331_v13 = vld [vmem:[%s1371_s7 + $0xd0] sm:$0xff] }
  0x1e   : > { %v333_v14 = vld [vmem:[%s1371_s7 + $0xe0] sm:$0xff]  ;;  %330 = vst [vmem:[%s1376_s8 + $0x60] sm:$0xff] %v329_v12  ;;  %332 = vst [vmem:[%s1376_s8 + $0x68] sm:$0xff] %v331_v13  ;;  %v335_v15 = vld [vmem:[%s1371_s7 + $0xf0] sm:$0xff] }
  0x1f   : > { %334 = vst [vmem:[%s1376_s8 + $0x70] sm:$0xff] %v333_v14  ;;  %v337_v16 = vld [vmem:[%s1371_s7 + $0x100] sm:$0xff]  ;;  %v339_v17 = vld [vmem:[%s1371_s7 + $0x110] sm:$0xff]  ;;  %336 = vst [vmem:[%s1376_s8 + $0x78] sm:$0xff] %v335_v15 }
  0x20   : > { %338 = vst [vmem:[%s1376_s8 + $0x80] sm:$0xff] %v337_v16  ;;  %340 = vst [vmem:[%s1376_s8 + $0x88] sm:$0xff] %v339_v17  ;;  %v341_v18 = vld [vmem:[%s1371_s7 + $0x120] sm:$0xff]  ;;  %v343_v19 = vld [vmem:[%s1371_s7 + $0x130] sm:$0xff] }
  0x21   : > { %v345_v20 = vld [vmem:[%s1371_s7 + $0x140] sm:$0xff]  ;;  %342 = vst [vmem:[%s1376_s8 + $0x90] sm:$0xff] %v341_v18  ;;  %344 = vst [vmem:[%s1376_s8 + $0x98] sm:$0xff] %v343_v19  ;;  %v347_v21 = vld [vmem:[%s1371_s7 + $0x150] sm:$0xff] }
  0x22   : > { %346 = vst [vmem:[%s1376_s8 + $0xa0] sm:$0xff] %v345_v20  ;;  %v349_v22 = vld [vmem:[%s1371_s7 + $0x160] sm:$0xff]  ;;  %v351_v23 = vld [vmem:[%s1371_s7 + $0x170] sm:$0xff]  ;;  %348 = vst [vmem:[%s1376_s8 + $0xa8] sm:$0xff] %v347_v21 }
  0x23   : > { %350 = vst [vmem:[%s1376_s8 + $0xb0] sm:$0xff] %v349_v22  ;;  %352 = vst [vmem:[%s1376_s8 + $0xb8] sm:$0xff] %v351_v23  ;;  %v353_v24 = vld [vmem:[%s1371_s7 + $0x180] sm:$0xff]  ;;  %v355_v25 = vld [vmem:[%s1371_s7 + $0x190] sm:$0xff] }
  0x24   : > { %v357_v26 = vld [vmem:[%s1371_s7 + $0x1a0] sm:$0xff]  ;;  %354 = vst [vmem:[%s1376_s8 + $0xc0] sm:$0xff] %v353_v24  ;;  %356 = vst [vmem:[%s1376_s8 + $0xc8] sm:$0xff] %v355_v25  ;;  %v359_v27 = vld [vmem:[%s1371_s7 + $0x1b0] sm:$0xff] }
  0x25   : > { %358 = vst [vmem:[%s1376_s8 + $0xd0] sm:$0xff] %v357_v26  ;;  %v361_v28 = vld [vmem:[%s1371_s7 + $0x1c0] sm:$0xff]  ;;  %v363_v29 = vld [vmem:[%s1371_s7 + $0x1d0] sm:$0xff]  ;;  %360 = vst [vmem:[%s1376_s8 + $0xd8] sm:$0xff] %v359_v27 }
  0x26   : > { %362 = vst [vmem:[%s1376_s8 + $0xe0] sm:$0xff] %v361_v28  ;;  %364 = vst [vmem:[%s1376_s8 + $0xe8] sm:$0xff] %v363_v29  ;;  %v365_v30 = vld [vmem:[%s1371_s7 + $0x1e0] sm:$0xff]  ;;  %v367_v31 = vld [vmem:[%s1371_s7 + $0x1f0] sm:$0xff] }
  0x27   : > { %v369_v32 = vld [vmem:[%s1371_s7 + $0x200] sm:$0xff]  ;;  %366 = vst [vmem:[%s1376_s8 + $0xf0] sm:$0xff] %v365_v30  ;;  %368 = vst [vmem:[%s1376_s8 + $0xf8] sm:$0xff] %v367_v31  ;;  %v371_v33 = vld [vmem:[%s1371_s7 + $0x210] sm:$0xff] }
  0x28   : > { %370 = vst [vmem:[%s1376_s8 + $0x100] sm:$0xff] %v369_v32  ;;  %v373_v34 = vld [vmem:[%s1371_s7 + $0x220] sm:$0xff]  ;;  %v375_v35 = vld [vmem:[%s1371_s7 + $0x230] sm:$0xff]  ;;  %372 = vst [vmem:[%s1376_s8 + $0x108] sm:$0xff] %v371_v33 }
  0x29   : > { %374 = vst [vmem:[%s1376_s8 + $0x110] sm:$0xff] %v373_v34  ;;  %376 = vst [vmem:[%s1376_s8 + $0x118] sm:$0xff] %v375_v35  ;;  %v377_v36 = vld [vmem:[%s1371_s7 + $0x240] sm:$0xff]  ;;  %v379_v37 = vld [vmem:[%s1371_s7 + $0x250] sm:$0xff] }
  0x2a   : > { %v381_v38 = vld [vmem:[%s1371_s7 + $0x260] sm:$0xff]  ;;  %378 = vst [vmem:[%s1376_s8 + $0x120] sm:$0xff] %v377_v36  ;;  %380 = vst [vmem:[%s1376_s8 + $0x128] sm:$0xff] %v379_v37  ;;  %v383_v39 = vld [vmem:[%s1371_s7 + $0x270] sm:$0xff] }
  0x2b   : > { %382 = vst [vmem:[%s1376_s8 + $0x130] sm:$0xff] %v381_v38  ;;  %v385_v40 = vld [vmem:[%s1371_s7 + $0x280] sm:$0xff]  ;;  %v387_v41 = vld [vmem:[%s1371_s7 + $0x290] sm:$0xff]  ;;  %384 = vst [vmem:[%s1376_s8 + $0x138] sm:$0xff] %v383_v39 }
  0x2c   : > { %386 = vst [vmem:[%s1376_s8 + $0x140] sm:$0xff] %v385_v40  ;;  %388 = vst [vmem:[%s1376_s8 + $0x148] sm:$0xff] %v387_v41  ;;  %v389_v42 = vld [vmem:[%s1371_s7 + $0x2a0] sm:$0xff]  ;;  %v391_v43 = vld [vmem:[%s1371_s7 + $0x2b0] sm:$0xff] }
  0x2d   : > { %v393_v44 = vld [vmem:[%s1371_s7 + $0x2c0] sm:$0xff]  ;;  %390 = vst [vmem:[%s1376_s8 + $0x150] sm:$0xff] %v389_v42  ;;  %392 = vst [vmem:[%s1376_s8 + $0x158] sm:$0xff] %v391_v43  ;;  %v395_v45 = vld [vmem:[%s1371_s7 + $0x2d0] sm:$0xff] }
  0x2e   : > { %394 = vst [vmem:[%s1376_s8 + $0x160] sm:$0xff] %v393_v44  ;;  %v397_v46 = vld [vmem:[%s1371_s7 + $0x2e0] sm:$0xff]  ;;  %v399_v47 = vld [vmem:[%s1371_s7 + $0x2f0] sm:$0xff]  ;;  %396 = vst [vmem:[%s1376_s8 + $0x168] sm:$0xff] %v395_v45 }
  0x2f   : > { %398 = vst [vmem:[%s1376_s8 + $0x170] sm:$0xff] %v397_v46  ;;  %400 = vst [vmem:[%s1376_s8 + $0x178] sm:$0xff] %v399_v47 }
  0x30 PF: > { %p1037_p7 = scmp.ge.s32.totalorder %s1287_s18, 1  ;;  %p413_p8 = scmp.lt.s32.totalorder %s1287_s18, 13 }
  0x32   : > { %p414_p9 = pnand %p1037_p7, %p413_p8 }
  0x33   : > { %s420_s9 = sand.u32 (!%p414_p9), 1, %s1263_s12   ;;  %s460_s10 = smul.u32 (!%p414_p9), 3, %s1271_s14 }
  0x34   : > { %417 = sbr.rel (%p414_p9) target bundleno = 345 (0x159), region = 66  ;;  %s1039_s21 = sshll.u32 (!%p414_p9), %s1275_s15, 1 }
  0x35   : > { %s1099_s11 = smul.u32 (!%p414_p9), 384, %s420_s9  ;;  %p463_p10 = scmp.lt.s32.totalorder (!%p414_p9), %s460_s10, 17 }
  0x36   : > { %p473_p11 = scmp.lt.s32.totalorder (!%p414_p9), %s1039_s21, 3  ;;  %p1042_p12 = scmp.ne.s32.totalorder (!%p414_p9), %s1271_s14, 0 }
  0x37   : > { %s1493_s5 = scalar_lea.vmem (!%p414_p9), [#allocation3], %s1099_s11 }
  0x39   : > { %s1592_s10 = smov (!%p463_p10, %s460_s10), 17  ;;  %s1594_s21 = smov (!%p473_p11, %s1039_s21), 3 }
  0x3a   : > { %s1038_s22 = sshll.u32 %s1592_s10, 2  ;;  %s475_s12 = scalar_lea.vmem %s1577_s2, %s1594_s21 }
  0x3b   : > { %s1481_s26 = scalar_lea.vmem %s1575_s0, %s1038_s22  ;;  %s1041_s29 = sshll.u32 %s1594_s21, 3 }
  0x3c   : > { %s1491_s4 = scalar_lea.vmem %s1578_s3, %s1041_s29  ;;  %491 = sbr.rel (%p1042_p12) target bundleno = 67 (0x43), region = 74 }
  0x41   : > { %v1289_v48 = vmov 0.0  }
  0x42   : > { %492 = vst [vmem:[#allocation2] sm:$0xff] %v1289_v48  ;;  %493 = vst [vmem:[#allocation2 + $0x8] sm:$0xff] %v1289_v48 }
  0x43 PF: > { %v1158_v49 = vld [vmem:[%s1493_s5 + $0x74] ss:$8 sps:$4 sm:$0xff]   ;;  %v1160_v50 = vld [vmem:[%s1493_s5 + $0x70] ss:$8 sps:$4 sm:$0xff]   ;;  %v1290_v51 = vmov 0   ;;  %p1094_p13 = scmp.ne.s32.totalorder %s1271_s14, 5 }
  0x44   : > { %870 = vmatprep.mubr.bf16.mxu1 %v1290_v51  ;;  %797 = vmatprep.subr.bf16.mxu0 %v1158_v49  ;;  %v1161_v52 = vld [vmem:[%s1493_s5 + $0x64] ss:$8 sps:$4 sm:$0xff]   ;;  %v1163_v53 = vld [vmem:[%s1493_s5 + $0x60] ss:$8 sps:$4 sm:$0xff]   ;;  %v1164_v54 = vld [vmem:[%s1493_s5 + $0x54] ss:$8 sps:$4 sm:$0xff]  }
  0x45   : > { %798 = vmatpush1.bf16.msra.mxu0 %v1160_v50  ;;  %v1166_v55 = vld [vmem:[%s1493_s5 + $0x50] ss:$8 sps:$4 sm:$0xff]   ;;  %v1167_v56 = vld [vmem:[%s1493_s5 + $0x44] ss:$8 sps:$4 sm:$0xff]   ;;  %v1179_v57 = vld [vmem:[%s1493_s5 + $0x174] ss:$8 sps:$4 sm:$0xff]  }
  0x46   : > { %799 = vmatprep.subr.bf16.mxu0 %v1161_v52  ;;  %v1181_v58 = vld [vmem:[%s1493_s5 + $0x170] ss:$8 sps:$4 sm:$0xff]   ;;  %v1169_v59 = vld [vmem:[%s1493_s5 + $0x40] ss:$8 sps:$4 sm:$0xff]   ;;  %v1170_v60 = vld [vmem:[%s1493_s5 + $0x34] ss:$8 sps:$4 sm:$0xff]   ;;  %838 = vmatprep.subr.bf16.mxu1 %v1179_v57 }
  0x47   : > { %v1185_v61 = vld [vmem:[%s1493_s5 + $0x164] ss:$8 sps:$4 sm:$0xff]   ;;  %839 = vmatpush1.bf16.msra.mxu1 %v1181_v58  ;;  %v1187_v62 = vld [vmem:[%s1493_s5 + $0x160] ss:$8 sps:$4 sm:$0xff]   ;;  %v1172_v63 = vld [vmem:[%s1493_s5 + $0x30] ss:$8 sps:$4 sm:$0xff]  }
  0x48   : > { %840 = vmatprep.subr.bf16.mxu1 %v1185_v61  ;;  %v1191_v0 = vld [vmem:[%s1493_s5 + $0x154] ss:$8 sps:$4 sm:$0xff]   ;;  %v1173_v1 = vld [vmem:[%s1493_s5 + $0x24] ss:$8 sps:$4 sm:$0xff]   ;;  %v1193_v2 = vld [vmem:[%s1493_s5 + $0x150] ss:$8 sps:$4 sm:$0xff]  }
  0x49   : > { %800 = vmatpush1.bf16.msra.mxu0 %v1163_v53  ;;  %v1197_v3 = vld [vmem:[%s1493_s5 + $0x144] ss:$8 sps:$4 sm:$0xff]   ;;  %v1175_v4 = vld [vmem:[%s1493_s5 + $0x20] ss:$8 sps:$4 sm:$0xff]   ;;  %v1176_v5 = vld [vmem:[%s1493_s5 + $0x14] ss:$8 sps:$4 sm:$0xff]  }
  0x4a   : > { %801 = vmatprep.subr.bf16.mxu0 %v1164_v54  ;;  %v1199_v6 = vld [vmem:[%s1493_s5 + $0x140] ss:$8 sps:$4 sm:$0xff]   ;;  %v1203_v7 = vld [vmem:[%s1493_s5 + $0x134] ss:$8 sps:$4 sm:$0xff]   ;;  %v1178_v8 = vld [vmem:[%s1493_s5 + $0x10] ss:$8 sps:$4 sm:$0xff]  }
  0x4b   : > { %841 = vmatpush1.bf16.msra.mxu1 %v1187_v62  ;;  %v1182_v9 = vld [vmem:[%s1493_s5 + $0x4] ss:$8 sps:$4 sm:$0xff]   ;;  %v1205_v10 = vld [vmem:[%s1493_s5 + $0x130] ss:$8 sps:$4 sm:$0xff]   ;;  %v1184_v12 = vld [vmem:[%s1493_s5] ss:$8 sps:$4 sm:$0xff]  }
  0x4c   : > { %842 = vmatprep.subr.bf16.mxu1 %v1191_v0  ;;  %v1209_v11 = vld [vmem:[%s1493_s5 + $0x124] ss:$8 sps:$4 sm:$0xff]   ;;  %v1188_v13 = vld [vmem:[%s1493_s5 + $0xf4] ss:$8 sps:$4 sm:$0xff]   ;;  %v1211_v14 = vld [vmem:[%s1493_s5 + $0x120] ss:$8 sps:$4 sm:$0xff]  }
  0x4d   : > { %802 = vmatpush1.bf16.msra.mxu0 %v1166_v55  ;;  %v1215_v15 = vld [vmem:[%s1493_s5 + $0x114] ss:$8 sps:$4 sm:$0xff]   ;;  %v1190_v16 = vld [vmem:[%s1493_s5 + $0xf0] ss:$8 sps:$4 sm:$0xff]   ;;  %v1194_v17 = vld [vmem:[%s1493_s5 + $0xe4] ss:$8 sps:$4 sm:$0xff]  }
  0x4e   : > { %803 = vmatprep.subr.bf16.mxu0 %v1167_v56  ;;  %v496_v18 = vld [vmem:[%s1481_s26] sm:$0xff]  ;;  %v1221_v21 = vld [vmem:[%s1493_s5 + $0x104] ss:$8 sps:$4 sm:$0xff]   ;;  %v1196_v22 = vld [vmem:[%s1493_s5 + $0xe0] ss:$8 sps:$4 sm:$0xff]  }
  0x4f   : > { %843 = vmatpush1.bf16.msra.mxu1 %v1193_v2  ;;  %v1217_v19 = vld [vmem:[%s1493_s5 + $0x110] ss:$8 sps:$4 sm:$0xff]   ;;  %v1044_v20 = vcombine.high %v496_v18, %v496_v18  ;;  %v1200_v23 = vld [vmem:[%s1493_s5 + $0xd4] ss:$8 sps:$4 sm:$0xff]   ;;  %v1223_v24 = vld [vmem:[%s1493_s5 + $0x100] ss:$8 sps:$4 sm:$0xff]   ;;  %v1043_v37 = vcombine.low %v496_v18, %v496_v18 }
  0x50   : > { %844 = vmatprep.subr.bf16.mxu1 %v1197_v3  ;;  %v1202_v25 = vld [vmem:[%s1493_s5 + $0xd0] ss:$8 sps:$4 sm:$0xff]   ;;  %v1206_v26 = vld [vmem:[%s1493_s5 + $0xc4] ss:$8 sps:$4 sm:$0xff]   ;;  %v1208_v28 = vld [vmem:[%s1493_s5 + $0xc0] ss:$8 sps:$4 sm:$0xff]  }
  0x51   : > { %804 = vmatpush1.bf16.msra.mxu0 %v1169_v59  ;;  %829 = vmatprep.mubr.bf16.mxu0 %v1044_v20  ;;  %v1227_v27 = vld [vmem:[%s1481_s26 + $0x8] ss:$0 sps:$4 sm:$0xff]   ;;  %v1212_v29 = vld [vmem:[%s1493_s5 + $0xb4] ss:$8 sps:$4 sm:$0xff]   ;;  %v1218_v31 = vld [vmem:[%s1493_s5 + $0xa4] ss:$8 sps:$4 sm:$0xff]  }
  0x52   : > { %805 = vmatprep.subr.bf16.mxu0 %v1170_v60  ;;  %v1214_v30 = vld [vmem:[%s1493_s5 + $0xb0] ss:$8 sps:$4 sm:$0xff]   ;;  %v1220_v32 = vld [vmem:[%s1493_s5 + $0xa0] ss:$8 sps:$4 sm:$0xff]   ;;  %v1224_v33 = vld [vmem:[%s1493_s5 + $0x94] ss:$8 sps:$4 sm:$0xff]  }
  0x53   : > { %845 = vmatpush1.bf16.msra.mxu1 %v1199_v6  ;;  %v1226_v34 = vld [vmem:[%s1493_s5 + $0x90] ss:$8 sps:$4 sm:$0xff]   ;;  %v1228_v35 = vld [vmem:[%s1493_s5 + $0x84] ss:$8 sps:$4 sm:$0xff]   ;;  %v1230_v36 = vld [vmem:[%s1493_s5 + $0x80] ss:$8 sps:$4 sm:$0xff]  }
  0x54   : > { %846 = vmatprep.subr.bf16.mxu1 %v1203_v7  ;;  %v494_v42 = vld [vmem:[#allocation2] sm:$0xff]  ;;  %v495_v45 = vld [vmem:[#allocation2 + $0x8] sm:$0xff] }
  0x55   : > { %806 = vmatpush1.bf16.msra.mxu0 %v1172_v63 }
  0x56   : > { %807 = vmatprep.subr.bf16.mxu0 %v1173_v1 }
  0x57   : > { %847 = vmatpush1.bf16.msra.mxu1 %v1205_v10 }
  0x58   : > { %848 = vmatprep.subr.bf16.mxu1 %v1209_v11 }
  0x59   : > { %808 = vmatpush1.bf16.msra.mxu0 %v1175_v4 }
  0x5a   : > { %809 = vmatprep.subr.bf16.mxu0 %v1176_v5 }
  0x5b   : > { %849 = vmatpush1.bf16.msra.mxu1 %v1211_v14 }
  0x5c   : > { %850 = vmatprep.subr.bf16.mxu1 %v1215_v15 }
  0x5d   : > { %810 = vmatpush1.bf16.msra.mxu0 %v1178_v8 }
  0x5e   : > { %811 = vmatprep.subr.bf16.mxu0 %v1182_v9 }
  0x5f   : > { %851 = vmatpush1.bf16.msra.mxu1 %v1217_v19 }
  0x60   : > { %852 = vmatprep.subr.bf16.mxu1 %v1221_v21 }
  0x61   : > { %812 = vmatpush1.bf16.msra.mxu0 %v1184_v12 }
  0x62   : > { %813 = vmatprep.subr.bf16.mxu0 %v1188_v13 }
  0x63   : > { %853 = vmatpush1.bf16.msra.mxu1 %v1223_v24 }
  0x65   : > { %814 = vmatpush2.bf16.msra.mxu0 %v1190_v16 }
  0x66   : > { %815 = vmatprep.subr.bf16.mxu0 %v1194_v17  ;;  %871 = vmatmul.mubr.bf16.vlgmr.msra.gmra.mxu1 %v1227_v27 }
  0x69   : > { %816 = vmatpush2.bf16.msra.mxu0 %v1196_v22 }
  0x6a   : > { %817 = vmatprep.subr.bf16.mxu0 %v1200_v23 }
  0x6d   : > { %818 = vmatpush2.bf16.msra.mxu0 %v1202_v25 }
  0x6e   : > { %819 = vmatprep.subr.bf16.mxu0 %v1206_v26 }
  0x71   : > { %820 = vmatpush2.bf16.msra.mxu0 %v1208_v28 }
  0x72   : > { %821 = vmatprep.subr.bf16.mxu0 %v1212_v29 }
  0x75   : > { %822 = vmatpush2.bf16.msra.mxu0 %v1214_v30 }
  0x76   : > { %823 = vmatprep.subr.bf16.mxu0 %v1218_v31 }
  0x79   : > { %824 = vmatpush2.bf16.msra.mxu0 %v1220_v32 }
  0x7a   : > { %825 = vmatprep.subr.bf16.mxu0 %v1224_v33 }
  0x7d   : > { %826 = vmatpush2.bf16.msra.mxu0 %v1226_v34 }
  0x7e   : > { %827 = vmatprep.subr.bf16.mxu0 %v1228_v35 }
  0x81   : > { %828 = vmatpush2.bf16.msra.mxu0 %v1230_v36 }
  0x84   : > { %830 = vmatmul.mubr.bf16.vlgmr.msra.gmra.mxu0 %v1043_v37 }
 0x126   : > { %v872_v38 = vpop.f32.mrf.mxu1 }
 0x128   : > { %v874_v39 = vpop.f32.mrf.mxu1 }
 0x12a   : > { %v876_v40 = vpop.f32.mrf.mxu1 }
 0x12c   : > { %v877_v41 = vpop.f32.mrf.mxu1 }
 0x144   : > { %v831_v43 = vpop.f32.mrf.mxu0 }
 0x145   : > { %v873_v44 = vadd.f32 %v872_v38, %v831_v43 }
 0x146   : > { %v833_v46 = vpop.f32.mrf.mxu0 }
 0x147   : > { %v879_v47 = vadd.f32 %v873_v44, %v494_v42  ;;  %v875_v48 = vadd.f32 %v874_v39, %v833_v46  ;;  %886 = sbr.rel (%p1094_p13) target bundleno = 345 (0x159), region = 78 }
 0x148   : > { %v835_v49 = vpop.f32.mrf.mxu0 }
 0x149   : > { %881 = vst [vmem:[#allocation2] sm:$0xff] %v879_v47  ;;  %v880_v50 = vadd.f32 %v875_v48, %v495_v45 }
 0x14a   : > { %v836_v51 = vpop.f32.mrf.mxu0 }
 0x14b   : > { %882 = vst [vmem:[#allocation2 + $0x8] sm:$0xff] %v880_v50 }
 0x14c   : > { %v891_v52 = vlaneseq  ;;  %v889_v54 = vld [vmem:[%s475_s12] sm:$0x3] }
 0x14e   : > { %v892_v53 = vshrl.u32 %v891_v52, 7 }
 0x150   : > { %v893_v55 = vsub.s32 0, %v892_v53  ;;  %v897_v56 = vsub.s32 1, %v892_v53  ;;  %v887_v57 = vld [vmem:[#allocation2] sm:$0xff] }
 0x152   : > { %v888_v58 = vld [vmem:[#allocation2 + $0x8] sm:$0xff]  ;;  %v894_v59 = vrot.slane %v889_v54, %v893_v55  ;;  %v898_v60 = vrot.slane %v889_v54, %v897_v56 }
 0x154   : > { %v901_v61 = vadd.f32 %v894_v59, %v887_v57  ;;  %v902_v62 = vadd.f32 %v898_v60, %v888_v58 }
 0x156   : > { %v903_v63 = vmax.f32 %v901_v61, 0.0  ;;  %v904_v0 = vmax.f32 %v902_v62, 0.0 }
 0x158   : > { %905 = vst [vmem:[%s1491_s4] sm:$0xff] %v903_v63  ;;  %906 = vst [vmem:[%s1491_s4 + $0x8] sm:$0xff] %v904_v0 }
 0x159 PF: > { %s13_s18 = sadd.s32 1, %s1287_s18   ;;  %s1579_s12 = smov %s1267_s13 }
 0x15a   : > { %p10_p0 = scmp.ge.s32.totalorder %s13_s18, 14   ;;  %s1580_s13 = smov %s1362_s25 }
 0x15b   : > { %s1581_s14 = smov %s1279_s16  ;;  %s1582_s15 = smov %s1283_s17 }
 0x15c   : > { %s1583_s16 = smov %s1586_s19  ;;  %s1584_s17 = smov %s1590_s20 }
 0x15d   :  { %12 = sbr.rel (!%p10_p0) target bundleno = 4 (0x4), region = 119 }

// kernel: _lambda_.69
= control target key start
LH: loop header
LB: loop body
LE: loop exit
PB: predicated region body
PF: predicated region fallthrough
CT: control target
= control target key end

     0   :  { %8 = vsyncpa [#allocation4], 0  ;;  %s1084_s0 = inlined_call_operand.vmem [shape: bf16[8,256], index: 0, kind: input, shape index: {}]   ;;  %s1085_s1 = inlined_call_operand.hbm [shape: bf16[256,512], index: 1, kind: input, shape index: {}]   ;;  %s1086_s2 = inlined_call_operand.vmem [shape: f32[1,512], index: 2, kind: input, shape index: {}]   ;;  %s1087_s3 = inlined_call_operand.vmem [shape: f32[8,512], index: 3, kind: output, shape index: {}]  }
   0x1   :  { %10 = vsyncpa [#allocation4 + $0x1], 0  ;;  %s947_s12 = smov 0   ;;  %s949_s13 = smov 0  }
   0x2   :  { %s951_s14 = smov 0   ;;  %s953_s15 = smov 0  }
   0x3   :  { %s955_s16 = smov 0   ;;  %s957_s17 = smov 0  }
   0x4 LB: > { %s685_s18 = sadd.s32 4294967295, %s921_s17   ;;  %s35_s19 = sadd.s32 1, %s917_s16  ;;  %s921_s17 = sphi %s957_s17, %s16_s17   ;;  %s917_s16 = sphi %s955_s16, %s1095_s16   ;;  %s913_s15 = sphi %s953_s15, %s1094_s15   ;;  %s909_s14 = sphi %s951_s14, %s1093_s14   ;;  %s905_s13 = sphi %s949_s13, %s1092_s13   ;;  %s901_s12 = sphi %s947_s12, %s1091_s12  }
   0x5   : > { %p37_p0 = scmp.ge.s32.totalorder %s35_s19, 2  ;;  %s72_s20 = sadd.s32 1, %s909_s14 }
   0x6   : > { %p79_p1 = scmp.ne.s32.totalorder %s909_s14, %s905_s13  ;;  %p80_p2 = scmp.eq.s32.totalorder %s921_s17, 0 }
   0x7   : > { %s1097_s19 = smov (%p37_p0, %s35_s19), 0  ;;  %p85_p4 = scmp.ne.s32.totalorder %s905_s13, %s901_s12 }
   0x8   : > { %p983_p3 = por %p80_p2, %p79_p1  ;;  %s68_s22 = ssub.s32 %s917_s16, %s1097_s19 }
   0x9   : > { %p86_p5 = scmp.eq.s32.totalorder %s685_s18, 0  ;;  %p70_p6 = scmp.eq.s32.totalorder %s68_s22, 0 }
   0xa   : > { %p741_p8 = scmp.lt.s32.totalorder %s921_s17, 2  ;;  %s176_s25 = sand.u32 1, %s909_s14  }
   0xb   : > { %p990_p7 = por %p86_p5, %p85_p4  ;;  %s734_s26 = sshll.u32 %s917_s16, 7 }
   0xc   : > { %s996_s24 = scalar_select %p70_p6, %s909_s14, %s72_s20  }
   0xd   : > { %s690_s27 = sshll.u32 %s176_s25, 8  ;;  %s189_s30 = scalar_lea.hbm %s1085_s1, %s734_s26 }
   0xe   : > { %s180_s4 = scalar_lea.vmem [#allocation3], %s690_s27  ;;  %p1005_p9 = pnand %p741_p8, %p983_p3 }
   0xf   : > { %s190_s5 = sshll.u32 %s180_s4, 4  ;;  %p693_p10 = scmp.ge.s32.totalorder %s921_s17, 1  ;;  %s191_s5 = int_to_ptr.vmem [resolvable:$true] %s190_s5 }
  0x10   : > { %s177_s7 = scalar_lea.sflag [#allocation4], %s176_s25  ;;  %p845_p11 = pneg %p1005_p9 }
  0x11   : > { %s856_s8 = scalar_lea.vmem %s191_s5, 4096  ;;  %s923_s9 = smov [#allocation3]  }
  0x12   : > { %p857_p12 = scmp.ne.s32.totalorder %s191_s5, %s856_s8  ;;  %s861_s10 = sshll.u32 %s923_s9, 4  ;;  %s862_s10 = int_to_ptr.vmem [resolvable:$false] %s861_s10 }
  0x13   : > { %s863_s11 = scalar_lea.vmem %s862_s10, 8192  ;;  %p864_p1 = scmp.lt.s32.totalorder %s191_s5, %s862_s10 }
  0x14   : > { %p859_p13 = pnand %p857_p12, %p845_p11  ;;  %p865_p2 = scmp.lt.s32.totalorder %s863_s11, %s856_s8 }
  0x16   : > { %p860_p0 = pneg %p859_p13  ;;  %p866_p3 = por %p865_p2, %p864_p1 }
  0x18   : > { %p867_p4 = pnand %p866_p3, %p860_p0 }
  0x1a   : > { %870 = shalt.err (!%p867_p4)
}
  0x1b   : > { %s924_s12 = smov 256   ;;  %s925_s18 = smov 128  }
  0x1c   : > { %s926_s20 = smov 8   ;;  %p206_p5 = scmp.lt.s32.totalorder %s921_s17, 3 }
  0x1d   : > { %740 = dma.hbm_to_vmem [thread:$0]  (!%p1005_p9), %s189_s30, 4096, %s191_s5, %s177_s7, %s924_s12, %s925_s18, %s926_s20  }
  0x1e   : > { %p207_p6 = pnand %p693_p10, %p206_p5 }
  0x1f   : > { %s212_s21 = sand.u32 (!%p207_p6), 1, %s905_s13  }
  0x20   : > { %210 = sbr.rel (%p207_p6) target bundleno = 302 (0x12e), region = 32  ;;  %s694_s22 = sshll.u32 (!%p207_p6), %s212_s21, 8 }
  0x21   : > { %s213_s25 = scalar_lea.sflag (!%p207_p6), [#allocation4], %s212_s21  ;;  %s1018_s26 = scalar_lea.vmem (!%p207_p6), [#allocation3], %s694_s22 }
  0x25   : > { %896 = dma.done.wait (%p990_p7), %s213_s25, 4096  }
  0x26   : > { %898 = vsyncadd (%p990_p7), %s213_s25, 4294963200  ;;  %v793_v0 = vld [vmem:[%s1018_s26 + $0x74] ss:$8 sps:$4 sm:$0xff]   ;;  %v795_v1 = vld [vmem:[%s1018_s26 + $0x70] ss:$8 sps:$4 sm:$0xff]   ;;  %s695_s28 = sshll.u32 %s913_s15, 1  ;;  %v543_v35 = vlaneseq }
  0x27   : > { %491 = vmatprep.subr.bf16.mxu0 %v793_v0  ;;  %v796_v2 = vld [vmem:[%s1018_s26 + $0x64] ss:$8 sps:$4 sm:$0xff]   ;;  %v798_v3 = vld [vmem:[%s1018_s26 + $0x60] ss:$8 sps:$4 sm:$0xff]   ;;  %v799_v4 = vld [vmem:[%s1018_s26 + $0x54] ss:$8 sps:$4 sm:$0xff]  }
  0x28   : > { %492 = vmatpush1.bf16.msra.mxu0 %v795_v1  ;;  %v801_v5 = vld [vmem:[%s1018_s26 + $0x50] ss:$8 sps:$4 sm:$0xff]   ;;  %v802_v6 = vld [vmem:[%s1018_s26 + $0x44] ss:$8 sps:$4 sm:$0xff]   ;;  %v804_v7 = vld [vmem:[%s1018_s26 + $0x40] ss:$8 sps:$4 sm:$0xff]  }
  0x29   : > { %493 = vmatprep.subr.bf16.mxu0 %v796_v2  ;;  %v805_v8 = vld [vmem:[%s1018_s26 + $0x34] ss:$8 sps:$4 sm:$0xff]   ;;  %v807_v9 = vld [vmem:[%s1018_s26 + $0x30] ss:$8 sps:$4 sm:$0xff]   ;;  %v808_v10 = vld [vmem:[%s1018_s26 + $0x24] ss:$8 sps:$4 sm:$0xff]  }
  0x2a   : > { %v810_v11 = vld [vmem:[%s1018_s26 + $0x20] ss:$8 sps:$4 sm:$0xff]   ;;  %v811_v12 = vld [vmem:[%s1018_s26 + $0x14] ss:$8 sps:$4 sm:$0xff]   ;;  %v813_v15 = vld [vmem:[%s1018_s26 + $0x10] ss:$8 sps:$4 sm:$0xff]  }
  0x2b   : > { %v291_v13 = vld [vmem:[%s1084_s0] sm:$0xff]  ;;  %v817_v18 = vld [vmem:[%s1018_s26 + $0xf4] ss:$8 sps:$4 sm:$0xff]   ;;  %v819_v19 = vld [vmem:[%s1018_s26 + $0xf0] ss:$8 sps:$4 sm:$0xff]   ;;  %p269_p7 = scmp.lt.s32.totalorder %s695_s28, 3 }
  0x2c   : > { %494 = vmatpush1.bf16.msra.mxu0 %v798_v3  ;;  %v699_v14 = vcombine.high %v291_v13, %v291_v13  ;;  %v814_v16 = vld [vmem:[%s1018_s26 + $0x4] ss:$8 sps:$4 sm:$0xff]   ;;  %v816_v17 = vld [vmem:[%s1018_s26] ss:$8 sps:$4 sm:$0xff]   ;;  %v823_v22 = vld [vmem:[%s1018_s26 + $0xd4] ss:$8 sps:$4 sm:$0xff]   ;;  %v698_v34 = vcombine.low %v291_v13, %v291_v13 }
  0x2d   : > { %495 = vmatprep.subr.bf16.mxu0 %v799_v4  ;;  %v820_v20 = vld [vmem:[%s1018_s26 + $0xe4] ss:$8 sps:$4 sm:$0xff]   ;;  %v822_v21 = vld [vmem:[%s1018_s26 + $0xe0] ss:$8 sps:$4 sm:$0xff]   ;;  %v825_v23 = vld [vmem:[%s1018_s26 + $0xd0] ss:$8 sps:$4 sm:$0xff]  }
  0x2e   : > { %523 = vmatprep.mubr.bf16.mxu0 %v699_v14  ;;  %v826_v24 = vld [vmem:[%s1018_s26 + $0xc4] ss:$8 sps:$4 sm:$0xff]   ;;  %v828_v25 = vld [vmem:[%s1018_s26 + $0xc0] ss:$8 sps:$4 sm:$0xff]   ;;  %v829_v26 = vld [vmem:[%s1018_s26 + $0xb4] ss:$8 sps:$4 sm:$0xff]  }
  0x2f   : > { %v831_v27 = vld [vmem:[%s1018_s26 + $0xb0] ss:$8 sps:$4 sm:$0xff]   ;;  %v832_v28 = vld [vmem:[%s1018_s26 + $0xa4] ss:$8 sps:$4 sm:$0xff]   ;;  %v834_v29 = vld [vmem:[%s1018_s26 + $0xa0] ss:$8 sps:$4 sm:$0xff]  }
  0x30   : > { %496 = vmatpush1.bf16.msra.mxu0 %v801_v5  ;;  %v835_v30 = vld [vmem:[%s1018_s26 + $0x94] ss:$8 sps:$4 sm:$0xff]   ;;  %v837_v31 = vld [vmem:[%s1018_s26 + $0x90] ss:$8 sps:$4 sm:$0xff]   ;;  %v838_v32 = vld [vmem:[%s1018_s26 + $0x84] ss:$8 sps:$4 sm:$0xff]  }
  0x31   : > { %497 = vmatprep.subr.bf16.mxu0 %v802_v6  ;;  %v840_v33 = vld [vmem:[%s1018_s26 + $0x80] ss:$8 sps:$4 sm:$0xff]   ;;  %s1099_s28 = smov (!%p269_p7, %s695_s28), 3  ;;  %v544_v36 = vshrl.u32 %v543_v35, 7 }
  0x32   : > { %s271_s4 = scalar_lea.vmem %s1086_s2, %s1099_s28  ;;  %s697_s5 = sshll.u32 %s1099_s28, 3 }
  0x33   : > { %v545_v37 = vsub.s32 0, %v544_v36  ;;  %v541_v38 = vld [vmem:[%s271_s4] sm:$0x3]  ;;  %v549_v39 = vsub.s32 1, %v544_v36  ;;  %s281_s8 = scalar_lea.vmem %s1087_s3, %s697_s5 }
  0x34   : > { %498 = vmatpush1.bf16.msra.mxu0 %v804_v7 }
  0x35   : > { %499 = vmatprep.subr.bf16.mxu0 %v805_v8  ;;  %v546_v40 = vrot.slane %v541_v38, %v545_v37  ;;  %v550_v41 = vrot.slane %v541_v38, %v549_v39 }
  0x38   : > { %500 = vmatpush1.bf16.msra.mxu0 %v807_v9 }
  0x39   : > { %501 = vmatprep.subr.bf16.mxu0 %v808_v10 }
  0x3c   : > { %502 = vmatpush1.bf16.msra.mxu0 %v810_v11 }
  0x3d   : > { %503 = vmatprep.subr.bf16.mxu0 %v811_v12 }
  0x40   : > { %504 = vmatpush1.bf16.msra.mxu0 %v813_v15 }
  0x41   : > { %505 = vmatprep.subr.bf16.mxu0 %v814_v16 }
  0x44   : > { %506 = vmatpush1.bf16.msra.mxu0 %v816_v17 }
  0x45   : > { %507 = vmatprep.subr.bf16.mxu0 %v817_v18 }
  0x48   : > { %508 = vmatpush2.bf16.msra.mxu0 %v819_v19 }
  0x49   : > { %509 = vmatprep.subr.bf16.mxu0 %v820_v20 }
  0x4c   : > { %510 = vmatpush2.bf16.msra.mxu0 %v822_v21 }
  0x4d   : > { %511 = vmatprep.subr.bf16.mxu0 %v823_v22 }
  0x50   : > { %512 = vmatpush2.bf16.msra.mxu0 %v825_v23 }
  0x51   : > { %513 = vmatprep.subr.bf16.mxu0 %v826_v24 }
  0x54   : > { %514 = vmatpush2.bf16.msra.mxu0 %v828_v25 }
  0x55   : > { %515 = vmatprep.subr.bf16.mxu0 %v829_v26 }
  0x58   : > { %516 = vmatpush2.bf16.msra.mxu0 %v831_v27 }
  0x59   : > { %517 = vmatprep.subr.bf16.mxu0 %v832_v28 }
  0x5c   : > { %518 = vmatpush2.bf16.msra.mxu0 %v834_v29 }
  0x5d   : > { %519 = vmatprep.subr.bf16.mxu0 %v835_v30 }
  0x60   : > { %520 = vmatpush2.bf16.msra.mxu0 %v837_v31 }
  0x61   : > { %521 = vmatprep.subr.bf16.mxu0 %v838_v32 }
  0x64   : > { %522 = vmatpush2.bf16.msra.mxu0 %v840_v33 }
  0x67   : > { %524 = vmatmul.mubr.bf16.vlgmr.msra.gmra.mxu0 %v698_v34 }
 0x127   : > { %v525_v42 = vpop.f32.mrf.mxu0 }
 0x128   : > { %v553_v43 = vadd.f32 %v546_v40, %v525_v42 }
 0x129   : > { %v527_v44 = vpop.f32.mrf.mxu0 }
 0x12a   : > { %555 = vst [vmem:[%s281_s8] sm:$0xff] %v553_v43  ;;  %v554_v45 = vadd.f32 %v550_v41, %v527_v44 }
 0x12b   : > { %v529_v46 = vpop.f32.mrf.mxu0 }
 0x12c   : > { %556 = vst [vmem:[%s281_s8 + $0x8] sm:$0xff] %v554_v45 }
 0x12d   : > { %v530_v47 = vpop.f32.mrf.mxu0 }
 0x12e PF: > { %s16_s17 = sadd.s32 1, %s921_s17   ;;  %s1091_s12 = smov %s905_s13 }
 0x12f   : > { %p13_p8 = scmp.ge.s32.totalorder %s16_s17, 4   ;;  %s1092_s13 = smov %s909_s14 }
 0x130   : > { %s1093_s14 = smov %s996_s24  ;;  %s1094_s15 = smov %s917_s16 }
 0x131   : > { %s1095_s16 = smov %s1097_s19  ;;  %15 = sbr.rel (!%p13_p8) target bundleno = 4 (0x4), region = 86 }
 0x136   :  { %587 = vsyncpa [#allocation4], 1 }
 0x137   :  { %589 = vsyncpa [#allocation4 + $0x1], 1 }

// kernel: _lambda_.70
= control target key start
LH: loop header
LB: loop body
LE: loop exit
PB: predicated region body
PF: predicated region fallthrough
CT: control target
= control target key end

     0   :  { %s1607_s15 = smov 0   ;;  %s1609_s16 = smov 0   ;;  %s1926_s0 = inlined_call_operand.vmem [shape: bf16[8,4608], index: 0, kind: input, shape index: {}]   ;;  %s1927_s1 = inlined_call_operand.vmem [shape: bf16[4608,512], index: 1, kind: input, shape index: {}]   ;;  %s1928_s2 = inlined_call_operand.vmem [shape: f32[1,512], index: 2, kind: input, shape index: {}]   ;;  %s1929_s3 = inlined_call_operand.vmem [shape: f32[8,512], index: 3, kind: input, shape index: {}]   ;;  %s1930_s4 = inlined_call_operand.vmem [shape: f32[8,512], index: 4, kind: output, shape index: {}]  }
   0x1   :  { %s1611_s17 = smov 0   ;;  %s1613_s18 = smov 0  }
   0x2   :  { %s1615_s19 = smov 0   ;;  %s1617_s20 = smov 0  }
   0x3   :  { %s1619_s21 = smov 0  }
   0x4 LB: > { %s26_s22 = sadd.s32 1, %s1571_s19  ;;  %s33_s23 = sadd.s32 1, %s1575_s20  ;;  %s1579_s21 = sphi %s1619_s21, %s14_s21   ;;  %s1575_s20 = sphi %s1617_s20, %s1936_s20   ;;  %s1571_s19 = sphi %s1615_s19, %s1935_s19   ;;  %s1567_s18 = sphi %s1613_s18, %s1934_s18   ;;  %s1563_s17 = sphi %s1611_s17, %s1933_s17   ;;  %s1559_s16 = sphi %s1609_s16, %s1932_s16   ;;  %s1555_s15 = sphi %s1607_s15, %s1931_s15  }
   0x5   : > { %p27_p0 = scmp.ge.s32.totalorder %s26_s22, 9  ;;  %p77_p1 = scmp.ne.s32.totalorder %s1559_s16, %s1555_s15 }
   0x6   : > { %p78_p2 = scmp.eq.s32.totalorder %s1579_s21, 0  ;;  %s70_s27 = sadd.s32 1, %s1559_s16 }
   0x7   : > { %s1938_s22 = smov (%p27_p0, %s26_s22), 0  ;;  %s1940_s23 = smov (!%p27_p0, %s33_s23), %s1575_s20 }
   0x8   : > { %p79_p3 = por %p78_p2, %p77_p1  ;;  %p35_p4 = scmp.ge.s32.totalorder %s1940_s23, 2 }
   0x9   : > { %s65_s24 = ssub.s32 %s1571_s19, %s1938_s22  ;;  %p1280_p6 = scmp.ge.s32.totalorder %s1579_s21, 18 }
   0xa   : > { %s1942_s23 = smov (%p35_p4, %s1940_s23), 0 }
   0xb   : > { %s66_s25 = ssub.s32 %s1575_s20, %s1942_s23  ;;  %185 = sbr.rel (%p1280_p6) target bundleno = 55 (0x37), region = 16 }
   0xc   : > { %s67_s26 = sor.u32 %s66_s25, %s65_s24 }
   0xd   : > { %p68_p5 = scmp.eq.s32.totalorder %s67_s26, 0 }
   0xf   : > { %s1658_s28 = scalar_select %p68_p5, %s1559_s16, %s70_s27  }
  0x10   : > { %201 = sbr.rel (!%p79_p3) target bundleno = 55 (0x37), region = 24  ;;  %s203_s29 = sand.u32 (%p79_p3), 1, %s1559_s16  }
  0x11   : > { %s1283_s30 = sshll.u32 (%p79_p3), %s1575_s20, 1  ;;  %s1281_s5 = sshll.u32 (%p79_p3), %s203_s29, 9 }
  0x12   : > { %s1367_s6 = sshll.u32 (%p79_p3), %s1571_s19, 8  ;;  %s1672_s12 = scalar_lea.vmem (%p79_p3), [#allocation3], %s1281_s5 }
  0x13   : > { %s209_s7 = sadd.s32 (%p79_p3), %s1367_s6, %s1283_s30 }
  0x14   : > { %s1285_s8 = sshll.u32 (%p79_p3), %s209_s7, 2 }
  0x15   : > { %s1667_s11 = scalar_lea.vmem %s1927_s1, %s1285_s8 }
  0x16   : > { %v366_v0 = vld [vmem:[%s1667_s11] sm:$0xff]  ;;  %v368_v1 = vld [vmem:[%s1667_s11 + $0x10] sm:$0xff] }
  0x17   : > { %v370_v2 = vld [vmem:[%s1667_s11 + $0x20] sm:$0xff]  ;;  %367 = vst [vmem:[%s1672_s12] sm:$0xff] %v366_v0  ;;  %369 = vst [vmem:[%s1672_s12 + $0x8] sm:$0xff] %v368_v1  ;;  %v372_v3 = vld [vmem:[%s1667_s11 + $0x30] sm:$0xff] }
  0x18   : > { %371 = vst [vmem:[%s1672_s12 + $0x10] sm:$0xff] %v370_v2  ;;  %v374_v4 = vld [vmem:[%s1667_s11 + $0x40] sm:$0xff]  ;;  %v376_v5 = vld [vmem:[%s1667_s11 + $0x50] sm:$0xff]  ;;  %373 = vst [vmem:[%s1672_s12 + $0x18] sm:$0xff] %v372_v3 }
  0x19   : > { %375 = vst [vmem:[%s1672_s12 + $0x20] sm:$0xff] %v374_v4  ;;  %377 = vst [vmem:[%s1672_s12 + $0x28] sm:$0xff] %v376_v5  ;;  %v378_v6 = vld [vmem:[%s1667_s11 + $0x60] sm:$0xff]  ;;  %v380_v7 = vld [vmem:[%s1667_s11 + $0x70] sm:$0xff] }
  0x1a   : > { %v382_v8 = vld [vmem:[%s1667_s11 + $0x80] sm:$0xff]  ;;  %379 = vst [vmem:[%s1672_s12 + $0x30] sm:$0xff] %v378_v6  ;;  %381 = vst [vmem:[%s1672_s12 + $0x38] sm:$0xff] %v380_v7  ;;  %v384_v9 = vld [vmem:[%s1667_s11 + $0x90] sm:$0xff] }
  0x1b   : > { %383 = vst [vmem:[%s1672_s12 + $0x40] sm:$0xff] %v382_v8  ;;  %v386_v10 = vld [vmem:[%s1667_s11 + $0xa0] sm:$0xff]  ;;  %v388_v11 = vld [vmem:[%s1667_s11 + $0xb0] sm:$0xff]  ;;  %385 = vst [vmem:[%s1672_s12 + $0x48] sm:$0xff] %v384_v9 }
  0x1c   : > { %387 = vst [vmem:[%s1672_s12 + $0x50] sm:$0xff] %v386_v10  ;;  %389 = vst [vmem:[%s1672_s12 + $0x58] sm:$0xff] %v388_v11  ;;  %v390_v12 = vld [vmem:[%s1667_s11 + $0xc0] sm:$0xff]  ;;  %v392_v13 = vld [vmem:[%s1667_s11 + $0xd0] sm:$0xff] }
  0x1d   : > { %v394_v14 = vld [vmem:[%s1667_s11 + $0xe0] sm:$0xff]  ;;  %391 = vst [vmem:[%s1672_s12 + $0x60] sm:$0xff] %v390_v12  ;;  %393 = vst [vmem:[%s1672_s12 + $0x68] sm:$0xff] %v392_v13  ;;  %v396_v15 = vld [vmem:[%s1667_s11 + $0xf0] sm:$0xff] }
  0x1e   : > { %395 = vst [vmem:[%s1672_s12 + $0x70] sm:$0xff] %v394_v14  ;;  %v398_v16 = vld [vmem:[%s1667_s11 + $0x100] sm:$0xff]  ;;  %v400_v17 = vld [vmem:[%s1667_s11 + $0x110] sm:$0xff]  ;;  %397 = vst [vmem:[%s1672_s12 + $0x78] sm:$0xff] %v396_v15 }
  0x1f   : > { %399 = vst [vmem:[%s1672_s12 + $0x80] sm:$0xff] %v398_v16  ;;  %401 = vst [vmem:[%s1672_s12 + $0x88] sm:$0xff] %v400_v17  ;;  %v402_v18 = vld [vmem:[%s1667_s11 + $0x120] sm:$0xff]  ;;  %v404_v19 = vld [vmem:[%s1667_s11 + $0x130] sm:$0xff] }
  0x20   : > { %v406_v20 = vld [vmem:[%s1667_s11 + $0x140] sm:$0xff]  ;;  %403 = vst [vmem:[%s1672_s12 + $0x90] sm:$0xff] %v402_v18  ;;  %405 = vst [vmem:[%s1672_s12 + $0x98] sm:$0xff] %v404_v19  ;;  %v408_v21 = vld [vmem:[%s1667_s11 + $0x150] sm:$0xff] }
  0x21   : > { %407 = vst [vmem:[%s1672_s12 + $0xa0] sm:$0xff] %v406_v20  ;;  %v410_v22 = vld [vmem:[%s1667_s11 + $0x160] sm:$0xff]  ;;  %v412_v23 = vld [vmem:[%s1667_s11 + $0x170] sm:$0xff]  ;;  %409 = vst [vmem:[%s1672_s12 + $0xa8] sm:$0xff] %v408_v21 }
  0x22   : > { %411 = vst [vmem:[%s1672_s12 + $0xb0] sm:$0xff] %v410_v22  ;;  %413 = vst [vmem:[%s1672_s12 + $0xb8] sm:$0xff] %v412_v23  ;;  %v414_v24 = vld [vmem:[%s1667_s11 + $0x180] sm:$0xff]  ;;  %v416_v25 = vld [vmem:[%s1667_s11 + $0x190] sm:$0xff] }
  0x23   : > { %v418_v26 = vld [vmem:[%s1667_s11 + $0x1a0] sm:$0xff]  ;;  %415 = vst [vmem:[%s1672_s12 + $0xc0] sm:$0xff] %v414_v24  ;;  %417 = vst [vmem:[%s1672_s12 + $0xc8] sm:$0xff] %v416_v25  ;;  %v420_v27 = vld [vmem:[%s1667_s11 + $0x1b0] sm:$0xff] }
  0x24   : > { %419 = vst [vmem:[%s1672_s12 + $0xd0] sm:$0xff] %v418_v26  ;;  %v422_v28 = vld [vmem:[%s1667_s11 + $0x1c0] sm:$0xff]  ;;  %v424_v29 = vld [vmem:[%s1667_s11 + $0x1d0] sm:$0xff]  ;;  %421 = vst [vmem:[%s1672_s12 + $0xd8] sm:$0xff] %v420_v27 }
  0x25   : > { %423 = vst [vmem:[%s1672_s12 + $0xe0] sm:$0xff] %v422_v28  ;;  %425 = vst [vmem:[%s1672_s12 + $0xe8] sm:$0xff] %v424_v29  ;;  %v426_v30 = vld [vmem:[%s1667_s11 + $0x1e0] sm:$0xff]  ;;  %v428_v31 = vld [vmem:[%s1667_s11 + $0x1f0] sm:$0xff] }
  0x26   : > { %v430_v32 = vld [vmem:[%s1667_s11 + $0x200] sm:$0xff]  ;;  %427 = vst [vmem:[%s1672_s12 + $0xf0] sm:$0xff] %v426_v30  ;;  %429 = vst [vmem:[%s1672_s12 + $0xf8] sm:$0xff] %v428_v31  ;;  %v432_v33 = vld [vmem:[%s1667_s11 + $0x210] sm:$0xff] }
  0x27   : > { %431 = vst [vmem:[%s1672_s12 + $0x100] sm:$0xff] %v430_v32  ;;  %v434_v34 = vld [vmem:[%s1667_s11 + $0x220] sm:$0xff]  ;;  %v436_v35 = vld [vmem:[%s1667_s11 + $0x230] sm:$0xff]  ;;  %433 = vst [vmem:[%s1672_s12 + $0x108] sm:$0xff] %v432_v33 }
  0x28   : > { %435 = vst [vmem:[%s1672_s12 + $0x110] sm:$0xff] %v434_v34  ;;  %437 = vst [vmem:[%s1672_s12 + $0x118] sm:$0xff] %v436_v35  ;;  %v438_v36 = vld [vmem:[%s1667_s11 + $0x240] sm:$0xff]  ;;  %v440_v37 = vld [vmem:[%s1667_s11 + $0x250] sm:$0xff] }
  0x29   : > { %v442_v38 = vld [vmem:[%s1667_s11 + $0x260] sm:$0xff]  ;;  %439 = vst [vmem:[%s1672_s12 + $0x120] sm:$0xff] %v438_v36  ;;  %441 = vst [vmem:[%s1672_s12 + $0x128] sm:$0xff] %v440_v37  ;;  %v444_v39 = vld [vmem:[%s1667_s11 + $0x270] sm:$0xff] }
  0x2a   : > { %443 = vst [vmem:[%s1672_s12 + $0x130] sm:$0xff] %v442_v38  ;;  %v446_v40 = vld [vmem:[%s1667_s11 + $0x280] sm:$0xff]  ;;  %v448_v41 = vld [vmem:[%s1667_s11 + $0x290] sm:$0xff]  ;;  %445 = vst [vmem:[%s1672_s12 + $0x138] sm:$0xff] %v444_v39 }
  0x2b   : > { %447 = vst [vmem:[%s1672_s12 + $0x140] sm:$0xff] %v446_v40  ;;  %449 = vst [vmem:[%s1672_s12 + $0x148] sm:$0xff] %v448_v41  ;;  %v450_v42 = vld [vmem:[%s1667_s11 + $0x2a0] sm:$0xff]  ;;  %v452_v43 = vld [vmem:[%s1667_s11 + $0x2b0] sm:$0xff] }
  0x2c   : > { %v454_v44 = vld [vmem:[%s1667_s11 + $0x2c0] sm:$0xff]  ;;  %451 = vst [vmem:[%s1672_s12 + $0x150] sm:$0xff] %v450_v42  ;;  %453 = vst [vmem:[%s1672_s12 + $0x158] sm:$0xff] %v452_v43  ;;  %v456_v45 = vld [vmem:[%s1667_s11 + $0x2d0] sm:$0xff] }
  0x2d   : > { %455 = vst [vmem:[%s1672_s12 + $0x160] sm:$0xff] %v454_v44  ;;  %v458_v46 = vld [vmem:[%s1667_s11 + $0x2e0] sm:$0xff]  ;;  %v460_v47 = vld [vmem:[%s1667_s11 + $0x2f0] sm:$0xff]  ;;  %457 = vst [vmem:[%s1672_s12 + $0x168] sm:$0xff] %v456_v45 }
  0x2e   : > { %459 = vst [vmem:[%s1672_s12 + $0x170] sm:$0xff] %v458_v46  ;;  %461 = vst [vmem:[%s1672_s12 + $0x178] sm:$0xff] %v460_v47  ;;  %v462_v48 = vld [vmem:[%s1667_s11 + $0x300] sm:$0xff]  ;;  %v464_v49 = vld [vmem:[%s1667_s11 + $0x310] sm:$0xff] }
  0x2f   : > { %v466_v50 = vld [vmem:[%s1667_s11 + $0x320] sm:$0xff]  ;;  %463 = vst [vmem:[%s1672_s12 + $0x180] sm:$0xff] %v462_v48  ;;  %465 = vst [vmem:[%s1672_s12 + $0x188] sm:$0xff] %v464_v49  ;;  %v468_v51 = vld [vmem:[%s1667_s11 + $0x330] sm:$0xff] }
  0x30   : > { %467 = vst [vmem:[%s1672_s12 + $0x190] sm:$0xff] %v466_v50  ;;  %v470_v52 = vld [vmem:[%s1667_s11 + $0x340] sm:$0xff]  ;;  %v472_v53 = vld [vmem:[%s1667_s11 + $0x350] sm:$0xff]  ;;  %469 = vst [vmem:[%s1672_s12 + $0x198] sm:$0xff] %v468_v51 }
  0x31   : > { %471 = vst [vmem:[%s1672_s12 + $0x1a0] sm:$0xff] %v470_v52  ;;  %473 = vst [vmem:[%s1672_s12 + $0x1a8] sm:$0xff] %v472_v53  ;;  %v474_v54 = vld [vmem:[%s1667_s11 + $0x360] sm:$0xff]  ;;  %v476_v55 = vld [vmem:[%s1667_s11 + $0x370] sm:$0xff] }
  0x32   : > { %v478_v56 = vld [vmem:[%s1667_s11 + $0x380] sm:$0xff]  ;;  %475 = vst [vmem:[%s1672_s12 + $0x1b0] sm:$0xff] %v474_v54  ;;  %477 = vst [vmem:[%s1672_s12 + $0x1b8] sm:$0xff] %v476_v55  ;;  %v480_v57 = vld [vmem:[%s1667_s11 + $0x390] sm:$0xff] }
  0x33   : > { %479 = vst [vmem:[%s1672_s12 + $0x1c0] sm:$0xff] %v478_v56  ;;  %v482_v58 = vld [vmem:[%s1667_s11 + $0x3a0] sm:$0xff]  ;;  %v484_v59 = vld [vmem:[%s1667_s11 + $0x3b0] sm:$0xff]  ;;  %481 = vst [vmem:[%s1672_s12 + $0x1c8] sm:$0xff] %v480_v57 }
  0x34   : > { %483 = vst [vmem:[%s1672_s12 + $0x1d0] sm:$0xff] %v482_v58  ;;  %485 = vst [vmem:[%s1672_s12 + $0x1d8] sm:$0xff] %v484_v59  ;;  %v486_v60 = vld [vmem:[%s1667_s11 + $0x3c0] sm:$0xff]  ;;  %v488_v61 = vld [vmem:[%s1667_s11 + $0x3d0] sm:$0xff] }
  0x35   : > { %v490_v62 = vld [vmem:[%s1667_s11 + $0x3e0] sm:$0xff]  ;;  %487 = vst [vmem:[%s1672_s12 + $0x1e0] sm:$0xff] %v486_v60  ;;  %489 = vst [vmem:[%s1672_s12 + $0x1e8] sm:$0xff] %v488_v61  ;;  %v492_v63 = vld [vmem:[%s1667_s11 + $0x3f0] sm:$0xff] }
  0x36   : > { %491 = vst [vmem:[%s1672_s12 + $0x1f0] sm:$0xff] %v490_v62  ;;  %493 = vst [vmem:[%s1672_s12 + $0x1f8] sm:$0xff] %v492_v63 }
  0x37 PF: > { %p1286_p7 = scmp.ge.s32.totalorder %s1579_s21, 1  ;;  %p519_p8 = scmp.lt.s32.totalorder %s1579_s21, 19 }
  0x39   : > { %p520_p9 = pnand %p1286_p7, %p519_p8 }
  0x3a   : > { %s526_s13 = sand.u32 (!%p520_p9), 1, %s1555_s15   ;;  %s1288_s14 = sshll.u32 (!%p520_p9), %s1563_s17, 2 }
  0x3b   : > { %523 = sbr.rel (%p520_p9) target bundleno = 356 (0x164), region = 70  ;;  %s1287_s24 = sshll.u32 (!%p520_p9), %s526_s13, 9 }
  0x3c   : > { %p580_p10 = scmp.lt.s32.totalorder (!%p520_p9), %s1288_s14, 35  ;;  %s1290_s25 = sshll.u32 (!%p520_p9), %s1567_s18, 1 }
  0x3d   : > { %p590_p11 = scmp.lt.s32.totalorder (!%p520_p9), %s1290_s25, 3  ;;  %s1826_s13 = scalar_lea.vmem (!%p520_p9), [#allocation3], %s1287_s24 }
  0x3e   : > { %p1295_p12 = scmp.ne.s32.totalorder (!%p520_p9), %s1563_s17, 0 }
  0x40   : > { %s1944_s14 = smov (!%p580_p10, %s1288_s14), 35  ;;  %s1946_s25 = smov (!%p590_p11, %s1290_s25), 3 }
  0x41   : > { %s1289_s26 = sshll.u32 %s1944_s14, 2  ;;  %s592_s15 = scalar_lea.vmem %s1928_s2, %s1946_s25 }
  0x42   : > { %s1807_s30 = scalar_lea.vmem %s1926_s0, %s1289_s26  ;;  %s1292_s7 = sshll.u32 %s1946_s25, 3 }
  0x43   : > { %s1819_s18 = scalar_lea.vmem %s1929_s3, %s1292_s7  ;;  %s1824_s12 = scalar_lea.vmem %s1930_s4, %s1292_s7 }
  0x44   : > { %617 = sbr.rel (%p1295_p12) target bundleno = 75 (0x4b), region = 78 }
  0x49   : > { %v1581_v0 = vmov 0.0  }
  0x4a   : > { %618 = vst [vmem:[#allocation2] sm:$0xff] %v1581_v0  ;;  %619 = vst [vmem:[#allocation2 + $0x8] sm:$0xff] %v1581_v0 }
  0x4b PF: > { %v1425_v1 = vld [vmem:[%s1826_s13 + $0x74] ss:$8 sps:$4 sm:$0xff]   ;;  %v1429_v3 = vld [vmem:[%s1826_s13 + $0x70] ss:$8 sps:$4 sm:$0xff]   ;;  %v1431_v5 = vld [vmem:[%s1826_s13 + $0x64] ss:$8 sps:$4 sm:$0xff]  }
  0x4c   : > { %v1427_v2 = vld [vmem:[%s1826_s13 + $0x174] ss:$8 sps:$4 sm:$0xff]   ;;  %1022 = vmatprep.subr.bf16.mxu0 %v1425_v1  ;;  %v1430_v4 = vld [vmem:[%s1826_s13 + $0x170] ss:$8 sps:$4 sm:$0xff]   ;;  %v1433_v6 = vld [vmem:[%s1826_s13 + $0x164] ss:$8 sps:$4 sm:$0xff]  }
  0x4d   : > { %1063 = vmatprep.subr.bf16.mxu1 %v1427_v2  ;;  %1023 = vmatpush1.bf16.msra.mxu0 %v1429_v3  ;;  %v1435_v7 = vld [vmem:[%s1826_s13 + $0x60] ss:$8 sps:$4 sm:$0xff]   ;;  %v1437_v9 = vld [vmem:[%s1826_s13 + $0x54] ss:$8 sps:$4 sm:$0xff]   ;;  %v1441_v11 = vld [vmem:[%s1826_s13 + $0x50] ss:$8 sps:$4 sm:$0xff]  }
  0x4e   : > { %1064 = vmatpush1.bf16.msra.mxu1 %v1430_v4  ;;  %1024 = vmatprep.subr.bf16.mxu0 %v1431_v5  ;;  %v1436_v8 = vld [vmem:[%s1826_s13 + $0x160] ss:$8 sps:$4 sm:$0xff]   ;;  %v1439_v10 = vld [vmem:[%s1826_s13 + $0x154] ss:$8 sps:$4 sm:$0xff]   ;;  %v1442_v12 = vld [vmem:[%s1826_s13 + $0x150] ss:$8 sps:$4 sm:$0xff]  }
  0x4f   : > { %1065 = vmatprep.subr.bf16.mxu1 %v1433_v6  ;;  %v1443_v13 = vld [vmem:[%s1826_s13 + $0x44] ss:$8 sps:$4 sm:$0xff]   ;;  %v1447_v15 = vld [vmem:[%s1826_s13 + $0x40] ss:$8 sps:$4 sm:$0xff]   ;;  %v1449_v17 = vld [vmem:[%s1826_s13 + $0x34] ss:$8 sps:$4 sm:$0xff]  }
  0x50   : > { %v1445_v14 = vld [vmem:[%s1826_s13 + $0x144] ss:$8 sps:$4 sm:$0xff]   ;;  %v1448_v16 = vld [vmem:[%s1826_s13 + $0x140] ss:$8 sps:$4 sm:$0xff]   ;;  %v1451_v18 = vld [vmem:[%s1826_s13 + $0x134] ss:$8 sps:$4 sm:$0xff]  }
  0x51   : > { %1025 = vmatpush1.bf16.msra.mxu0 %v1435_v7  ;;  %v1453_v19 = vld [vmem:[%s1826_s13 + $0x30] ss:$8 sps:$4 sm:$0xff]   ;;  %v1455_v21 = vld [vmem:[%s1826_s13 + $0x24] ss:$8 sps:$4 sm:$0xff]   ;;  %v1459_v23 = vld [vmem:[%s1826_s13 + $0x20] ss:$8 sps:$4 sm:$0xff]  }
  0x52   : > { %1066 = vmatpush1.bf16.msra.mxu1 %v1436_v8  ;;  %1026 = vmatprep.subr.bf16.mxu0 %v1437_v9  ;;  %v1454_v20 = vld [vmem:[%s1826_s13 + $0x130] ss:$8 sps:$4 sm:$0xff]   ;;  %v1457_v22 = vld [vmem:[%s1826_s13 + $0x124] ss:$8 sps:$4 sm:$0xff]   ;;  %v1460_v24 = vld [vmem:[%s1826_s13 + $0x120] ss:$8 sps:$4 sm:$0xff]  }
  0x53   : > { %1067 = vmatprep.subr.bf16.mxu1 %v1439_v10  ;;  %v1461_v25 = vld [vmem:[%s1826_s13 + $0x14] ss:$8 sps:$4 sm:$0xff]   ;;  %v1465_v27 = vld [vmem:[%s1826_s13 + $0x10] ss:$8 sps:$4 sm:$0xff]   ;;  %v1467_v29 = vld [vmem:[%s1826_s13 + $0x4] ss:$8 sps:$4 sm:$0xff]  }
  0x54   : > { %v1463_v26 = vld [vmem:[%s1826_s13 + $0x114] ss:$8 sps:$4 sm:$0xff]   ;;  %v1466_v28 = vld [vmem:[%s1826_s13 + $0x110] ss:$8 sps:$4 sm:$0xff]   ;;  %v1469_v30 = vld [vmem:[%s1826_s13 + $0x104] ss:$8 sps:$4 sm:$0xff]  }
  0x55   : > { %1027 = vmatpush1.bf16.msra.mxu0 %v1441_v11  ;;  %v1471_v31 = vld [vmem:[%s1826_s13] ss:$8 sps:$4 sm:$0xff]   ;;  %v1473_v33 = vld [vmem:[%s1826_s13 + $0xf4] ss:$8 sps:$4 sm:$0xff]   ;;  %v1477_v35 = vld [vmem:[%s1826_s13 + $0xf0] ss:$8 sps:$4 sm:$0xff]  }
  0x56   : > { %1068 = vmatpush1.bf16.msra.mxu1 %v1442_v12  ;;  %1028 = vmatprep.subr.bf16.mxu0 %v1443_v13  ;;  %v1472_v32 = vld [vmem:[%s1826_s13 + $0x100] ss:$8 sps:$4 sm:$0xff]   ;;  %v1475_v34 = vld [vmem:[%s1826_s13 + $0x1f4] ss:$8 sps:$4 sm:$0xff]   ;;  %v1478_v36 = vld [vmem:[%s1826_s13 + $0x1f0] ss:$8 sps:$4 sm:$0xff]  }
  0x57   : > { %1069 = vmatprep.subr.bf16.mxu1 %v1445_v14  ;;  %v1479_v37 = vld [vmem:[%s1826_s13 + $0xe4] ss:$8 sps:$4 sm:$0xff]   ;;  %v1483_v39 = vld [vmem:[%s1826_s13 + $0xe0] ss:$8 sps:$4 sm:$0xff]   ;;  %v1485_v41 = vld [vmem:[%s1826_s13 + $0xd4] ss:$8 sps:$4 sm:$0xff]  }
  0x58   : > { %v1481_v38 = vld [vmem:[%s1826_s13 + $0x1e4] ss:$8 sps:$4 sm:$0xff]   ;;  %v1484_v40 = vld [vmem:[%s1826_s13 + $0x1e0] ss:$8 sps:$4 sm:$0xff]   ;;  %v1487_v42 = vld [vmem:[%s1826_s13 + $0x1d4] ss:$8 sps:$4 sm:$0xff]  }
  0x59   : > { %1029 = vmatpush1.bf16.msra.mxu0 %v1447_v15  ;;  %v1489_v43 = vld [vmem:[%s1826_s13 + $0xd0] ss:$8 sps:$4 sm:$0xff]   ;;  %v1491_v45 = vld [vmem:[%s1826_s13 + $0xc4] ss:$8 sps:$4 sm:$0xff]   ;;  %v1495_v50 = vld [vmem:[%s1826_s13 + $0xc0] ss:$8 sps:$4 sm:$0xff]  }
  0x5a   : > { %1070 = vmatpush1.bf16.msra.mxu1 %v1448_v16  ;;  %1030 = vmatprep.subr.bf16.mxu0 %v1449_v17  ;;  %v1490_v44 = vld [vmem:[%s1826_s13 + $0x1d0] ss:$8 sps:$4 sm:$0xff]   ;;  %v1493_v46 = vld [vmem:[%s1826_s13 + $0x1c4] ss:$8 sps:$4 sm:$0xff]   ;;  %v1496_v51 = vld [vmem:[%s1826_s13 + $0x1c0] ss:$8 sps:$4 sm:$0xff]  }
  0x5b   : > { %1071 = vmatprep.subr.bf16.mxu1 %v1451_v18  ;;  %v622_v47 = vld [vmem:[%s1807_s30] sm:$0xff]  ;;  %v623_v49 = vld [vmem:[%s1807_s30 + $0x8] sm:$0xff]  ;;  %v1503_v57 = vld [vmem:[%s1826_s13 + $0xa4] ss:$8 sps:$4 sm:$0xff]   ;;  %p1364_p13 = scmp.ne.s32.totalorder %s1563_s17, 8 }
  0x5c   : > { %v1297_v48 = vcombine.high %v622_v47, %v622_v47  ;;  %v1299_v52 = vcombine.high %v623_v49, %v623_v49  ;;  %v1497_v53 = vld [vmem:[%s1826_s13 + $0xb4] ss:$8 sps:$4 sm:$0xff]   ;;  %v1501_v55 = vld [vmem:[%s1826_s13 + $0xb0] ss:$8 sps:$4 sm:$0xff]   ;;  %v1505_v58 = vld [vmem:[%s1826_s13 + $0x1a4] ss:$8 sps:$4 sm:$0xff]   ;;  %v1296_v5 = vcombine.low %v622_v47, %v622_v47  ;;  %v1298_v6 = vcombine.low %v623_v49, %v623_v49 }
  0x5d   : > { %1031 = vmatpush1.bf16.msra.mxu0 %v1453_v19  ;;  %v1499_v54 = vld [vmem:[%s1826_s13 + $0x1b4] ss:$8 sps:$4 sm:$0xff]   ;;  %v1502_v56 = vld [vmem:[%s1826_s13 + $0x1b0] ss:$8 sps:$4 sm:$0xff]   ;;  %v1507_v59 = vld [vmem:[%s1826_s13 + $0xa0] ss:$8 sps:$4 sm:$0xff]  }
  0x5e   : > { %1072 = vmatpush1.bf16.msra.mxu1 %v1454_v20  ;;  %1032 = vmatprep.subr.bf16.mxu0 %v1455_v21  ;;  %v1508_v60 = vld [vmem:[%s1826_s13 + $0x1a0] ss:$8 sps:$4 sm:$0xff]   ;;  %v1509_v61 = vld [vmem:[%s1826_s13 + $0x94] ss:$8 sps:$4 sm:$0xff]   ;;  %v1513_v63 = vld [vmem:[%s1826_s13 + $0x90] ss:$8 sps:$4 sm:$0xff]  }
  0x5f   : > { %1073 = vmatprep.subr.bf16.mxu1 %v1457_v22  ;;  %1054 = vmatprep.mubr.bf16.mxu0 %v1297_v48  ;;  %v1511_v62 = vld [vmem:[%s1826_s13 + $0x194] ss:$8 sps:$4 sm:$0xff]   ;;  %v1514_v0 = vld [vmem:[%s1826_s13 + $0x190] ss:$8 sps:$4 sm:$0xff]   ;;  %v1515_v1 = vld [vmem:[%s1826_s13 + $0x84] ss:$8 sps:$4 sm:$0xff]  }
  0x60   : > { %1095 = vmatprep.mubr.bf16.mxu1 %v1299_v52  ;;  %v1517_v2 = vld [vmem:[%s1826_s13 + $0x184] ss:$8 sps:$4 sm:$0xff]   ;;  %v1519_v3 = vld [vmem:[%s1826_s13 + $0x80] ss:$8 sps:$4 sm:$0xff]   ;;  %v620_v8 = vld [vmem:[#allocation2] sm:$0xff] }
  0x61   : > { %1033 = vmatpush1.bf16.msra.mxu0 %v1459_v23  ;;  %v1520_v4 = vld [vmem:[%s1826_s13 + $0x180] ss:$8 sps:$4 sm:$0xff]   ;;  %v621_v12 = vld [vmem:[#allocation2 + $0x8] sm:$0xff] }
  0x62   : > { %1074 = vmatpush1.bf16.msra.mxu1 %v1460_v24  ;;  %1034 = vmatprep.subr.bf16.mxu0 %v1461_v25 }
  0x63   : > { %1075 = vmatprep.subr.bf16.mxu1 %v1463_v26 }
  0x65   : > { %1035 = vmatpush1.bf16.msra.mxu0 %v1465_v27 }
  0x66   : > { %1076 = vmatpush1.bf16.msra.mxu1 %v1466_v28  ;;  %1036 = vmatprep.subr.bf16.mxu0 %v1467_v29 }
  0x67   : > { %1077 = vmatprep.subr.bf16.mxu1 %v1469_v30 }
  0x69   : > { %1037 = vmatpush1.bf16.msra.mxu0 %v1471_v31 }
  0x6a   : > { %1078 = vmatpush1.bf16.msra.mxu1 %v1472_v32  ;;  %1038 = vmatprep.subr.bf16.mxu0 %v1473_v33 }
  0x6b   : > { %1079 = vmatprep.subr.bf16.mxu1 %v1475_v34 }
  0x6d   : > { %1039 = vmatpush2.bf16.msra.mxu0 %v1477_v35 }
  0x6e   : > { %1080 = vmatpush2.bf16.msra.mxu1 %v1478_v36  ;;  %1040 = vmatprep.subr.bf16.mxu0 %v1479_v37 }
  0x6f   : > { %1081 = vmatprep.subr.bf16.mxu1 %v1481_v38 }
  0x71   : > { %1041 = vmatpush2.bf16.msra.mxu0 %v1483_v39 }
  0x72   : > { %1082 = vmatpush2.bf16.msra.mxu1 %v1484_v40  ;;  %1042 = vmatprep.subr.bf16.mxu0 %v1485_v41 }
  0x73   : > { %1083 = vmatprep.subr.bf16.mxu1 %v1487_v42 }
  0x75   : > { %1043 = vmatpush2.bf16.msra.mxu0 %v1489_v43 }
  0x76   : > { %1084 = vmatpush2.bf16.msra.mxu1 %v1490_v44  ;;  %1044 = vmatprep.subr.bf16.mxu0 %v1491_v45 }
  0x77   : > { %1085 = vmatprep.subr.bf16.mxu1 %v1493_v46 }
  0x79   : > { %1045 = vmatpush2.bf16.msra.mxu0 %v1495_v50 }
  0x7a   : > { %1086 = vmatpush2.bf16.msra.mxu1 %v1496_v51  ;;  %1046 = vmatprep.subr.bf16.mxu0 %v1497_v53 }
  0x7b   : > { %1087 = vmatprep.subr.bf16.mxu1 %v1499_v54 }
  0x7d   : > { %1047 = vmatpush2.bf16.msra.mxu0 %v1501_v55 }
  0x7e   : > { %1088 = vmatpush2.bf16.msra.mxu1 %v1502_v56  ;;  %1048 = vmatprep.subr.bf16.mxu0 %v1503_v57 }
  0x7f   : > { %1089 = vmatprep.subr.bf16.mxu1 %v1505_v58 }
  0x81   : > { %1049 = vmatpush2.bf16.msra.mxu0 %v1507_v59 }
  0x82   : > { %1090 = vmatpush2.bf16.msra.mxu1 %v1508_v60  ;;  %1050 = vmatprep.subr.bf16.mxu0 %v1509_v61 }
  0x83   : > { %1091 = vmatprep.subr.bf16.mxu1 %v1511_v62 }
  0x85   : > { %1051 = vmatpush2.bf16.msra.mxu0 %v1513_v63 }
  0x86   : > { %1092 = vmatpush2.bf16.msra.mxu1 %v1514_v0  ;;  %1052 = vmatprep.subr.bf16.mxu0 %v1515_v1 }
  0x87   : > { %1093 = vmatprep.subr.bf16.mxu1 %v1517_v2 }
  0x89   : > { %1053 = vmatpush2.bf16.msra.mxu0 %v1519_v3 }
  0x8a   : > { %1094 = vmatpush2.bf16.msra.mxu1 %v1520_v4 }
  0x8c   : > { %1055 = vmatmul.mubr.bf16.vlgmr.msra.gmra.mxu0 %v1296_v5 }
  0x8d   : > { %1096 = vmatmul.mubr.bf16.vlgmr.msra.gmra.mxu1 %v1298_v6 }
 0x14c   : > { %v1056_v7 = vpop.f32.mrf.mxu0 }
 0x14d   : > { %v1097_v9 = vpop.f32.mrf.mxu1 }
 0x14e   : > { %v1098_v10 = vadd.f32 %v1097_v9, %v1056_v7  ;;  %v1058_v11 = vpop.f32.mrf.mxu0 }
 0x14f   : > { %v1099_v13 = vpop.f32.mrf.mxu1 }
 0x150   : > { %v1104_v14 = vadd.f32 %v1098_v10, %v620_v8  ;;  %v1100_v15 = vadd.f32 %v1099_v13, %v1058_v11  ;;  %v1060_v16 = vpop.f32.mrf.mxu0  ;;  %1111 = sbr.rel (%p1364_p13) target bundleno = 356 (0x164), region = 82 }
 0x151   : > { %v1101_v17 = vpop.f32.mrf.mxu1 }
 0x152   : > { %1106 = vst [vmem:[#allocation2] sm:$0xff] %v1104_v14  ;;  %v1105_v18 = vadd.f32 %v1100_v15, %v621_v12  ;;  %v1061_v19 = vpop.f32.mrf.mxu0 }
 0x153   : > { %v1102_v20 = vpop.f32.mrf.mxu1 }
 0x154   : > { %1107 = vst [vmem:[#allocation2 + $0x8] sm:$0xff] %v1105_v18 }
 0x155   : > { %v1116_v21 = vlaneseq  ;;  %v1114_v23 = vld [vmem:[%s592_s15] sm:$0x3]  ;;  %v1129_v31 = vld [vmem:[%s1819_s18 + $0x8] sm:$0xff] }
 0x156   : > { %v1128_v30 = vld [vmem:[%s1819_s18] sm:$0xff] }
 0x157   : > { %v1117_v22 = vshrl.u32 %v1116_v21, 7 }
 0x159   : > { %v1118_v24 = vsub.s32 0, %v1117_v22  ;;  %v1122_v25 = vsub.s32 1, %v1117_v22  ;;  %v1112_v26 = vld [vmem:[#allocation2] sm:$0xff] }
 0x15b   : > { %v1113_v27 = vld [vmem:[#allocation2 + $0x8] sm:$0xff]  ;;  %v1119_v28 = vrot.slane %v1114_v23, %v1118_v24  ;;  %v1123_v29 = vrot.slane %v1114_v23, %v1122_v25 }
 0x15d   : > { %v1126_v32 = vadd.f32 %v1119_v28, %v1112_v26  ;;  %v1127_v33 = vadd.f32 %v1123_v29, %v1113_v27 }
 0x15f   : > { %v1130_v34 = vadd.f32 %v1128_v30, %v1126_v32  ;;  %v1131_v35 = vadd.f32 %v1129_v31, %v1127_v33 }
 0x161   : > { %v1132_v36 = vmax.f32 %v1130_v34, 0.0  ;;  %v1133_v37 = vmax.f32 %v1131_v35, 0.0 }
 0x163   : > { %1134 = vst [vmem:[%s1824_s12] sm:$0xff] %v1132_v36  ;;  %1135 = vst [vmem:[%s1824_s12 + $0x8] sm:$0xff] %v1133_v37 }
 0x164 PF: > { %s14_s21 = sadd.s32 1, %s1579_s21   ;;  %s1931_s15 = smov %s1559_s16 }
 0x165   : > { %p11_p0 = scmp.ge.s32.totalorder %s14_s21, 20   ;;  %s1932_s16 = smov %s1658_s28 }
 0x166   : > { %s1933_s17 = smov %s1571_s19  ;;  %s1934_s18 = smov %s1575_s20 }
 0x167   : > { %s1935_s19 = smov %s1938_s22  ;;  %s1936_s20 = smov %s1942_s23 }
 0x168   :  { %13 = sbr.rel (!%p11_p0) target bundleno = 4 (0x4), region = 126 }

// kernel: _lambda_.71
= control target key start
LH: loop header
LB: loop body
LE: loop exit
PB: predicated region body
PF: predicated region fallthrough
CT: control target
= control target key end

     0   :  { %s1515_s12 = smov 0   ;;  %s1517_s13 = smov 0   ;;  %s1827_s0 = inlined_call_operand.vmem [shape: bf16[8,4608], index: 0, kind: input, shape index: {}]   ;;  %s1828_s1 = inlined_call_operand.vmem [shape: bf16[4608,512], index: 1, kind: input, shape index: {}]   ;;  %s1829_s2 = inlined_call_operand.vmem [shape: f32[1,512], index: 2, kind: input, shape index: {}]   ;;  %s1830_s3 = inlined_call_operand.vmem [shape: f32[8,512], index: 3, kind: output, shape index: {}]  }
   0x1   :  { %s1519_s14 = smov 0   ;;  %s1521_s15 = smov 0  }
   0x2   :  { %s1523_s16 = smov 0   ;;  %s1525_s17 = smov 0  }
   0x3   :  { %s1527_s18 = smov 0  }
   0x4 LB: > { %s25_s19 = sadd.s32 1, %s1484_s16  ;;  %s32_s20 = sadd.s32 1, %s1488_s17  ;;  %s1492_s18 = sphi %s1527_s18, %s13_s18   ;;  %s1488_s17 = sphi %s1525_s17, %s1836_s17   ;;  %s1484_s16 = sphi %s1523_s16, %s1835_s16   ;;  %s1480_s15 = sphi %s1521_s15, %s1834_s15   ;;  %s1476_s14 = sphi %s1519_s14, %s1833_s14   ;;  %s1472_s13 = sphi %s1517_s13, %s1832_s13   ;;  %s1468_s12 = sphi %s1515_s12, %s1831_s12  }
   0x5   : > { %p26_p0 = scmp.ge.s32.totalorder %s25_s19, 9  ;;  %p76_p1 = scmp.ne.s32.totalorder %s1472_s13, %s1468_s12 }
   0x6   : > { %p77_p2 = scmp.eq.s32.totalorder %s1492_s18, 0  ;;  %s69_s24 = sadd.s32 1, %s1472_s13 }
   0x7   : > { %s1838_s19 = smov (%p26_p0, %s25_s19), 0  ;;  %s1840_s20 = smov (!%p26_p0, %s32_s20), %s1488_s17 }
   0x8   : > { %p78_p3 = por %p77_p2, %p76_p1  ;;  %p34_p4 = scmp.ge.s32.totalorder %s1840_s20, 2 }
   0x9   : > { %s64_s21 = ssub.s32 %s1484_s16, %s1838_s19  ;;  %p1195_p6 = scmp.ge.s32.totalorder %s1492_s18, 18 }
   0xa   : > { %s1842_s20 = smov (%p34_p4, %s1840_s20), 0 }
   0xb   : > { %s65_s22 = ssub.s32 %s1488_s17, %s1842_s20  ;;  %156 = sbr.rel (%p1195_p6) target bundleno = 55 (0x37), region = 16 }
   0xc   : > { %s66_s23 = sor.u32 %s65_s22, %s64_s21 }
   0xd   : > { %p67_p5 = scmp.eq.s32.totalorder %s66_s23, 0 }
   0xf   : > { %s1566_s25 = scalar_select %p67_p5, %s1472_s13, %s69_s24  }
  0x10   : > { %172 = sbr.rel (!%p78_p3) target bundleno = 55 (0x37), region = 24  ;;  %s174_s26 = sand.u32 (%p78_p3), 1, %s1472_s13  }
  0x11   : > { %s1198_s27 = sshll.u32 (%p78_p3), %s1488_s17, 1  ;;  %s1196_s28 = sshll.u32 (%p78_p3), %s174_s26, 9 }
  0x12   : > { %s1280_s29 = sshll.u32 (%p78_p3), %s1484_s16, 8  ;;  %s1580_s8 = scalar_lea.vmem (%p78_p3), [#allocation3], %s1196_s28 }
  0x13   : > { %s180_s30 = sadd.s32 (%p78_p3), %s1280_s29, %s1198_s27 }
  0x14   : > { %s1200_s4 = sshll.u32 (%p78_p3), %s180_s30, 2 }
  0x15   : > { %s1575_s7 = scalar_lea.vmem %s1828_s1, %s1200_s4 }
  0x16   : > { %v337_v0 = vld [vmem:[%s1575_s7] sm:$0xff]  ;;  %v339_v1 = vld [vmem:[%s1575_s7 + $0x10] sm:$0xff] }
  0x17   : > { %v341_v2 = vld [vmem:[%s1575_s7 + $0x20] sm:$0xff]  ;;  %338 = vst [vmem:[%s1580_s8] sm:$0xff] %v337_v0  ;;  %340 = vst [vmem:[%s1580_s8 + $0x8] sm:$0xff] %v339_v1  ;;  %v343_v3 = vld [vmem:[%s1575_s7 + $0x30] sm:$0xff] }
  0x18   : > { %342 = vst [vmem:[%s1580_s8 + $0x10] sm:$0xff] %v341_v2  ;;  %v345_v4 = vld [vmem:[%s1575_s7 + $0x40] sm:$0xff]  ;;  %v347_v5 = vld [vmem:[%s1575_s7 + $0x50] sm:$0xff]  ;;  %344 = vst [vmem:[%s1580_s8 + $0x18] sm:$0xff] %v343_v3 }
  0x19   : > { %346 = vst [vmem:[%s1580_s8 + $0x20] sm:$0xff] %v345_v4  ;;  %348 = vst [vmem:[%s1580_s8 + $0x28] sm:$0xff] %v347_v5  ;;  %v349_v6 = vld [vmem:[%s1575_s7 + $0x60] sm:$0xff]  ;;  %v351_v7 = vld [vmem:[%s1575_s7 + $0x70] sm:$0xff] }
  0x1a   : > { %v353_v8 = vld [vmem:[%s1575_s7 + $0x80] sm:$0xff]  ;;  %350 = vst [vmem:[%s1580_s8 + $0x30] sm:$0xff] %v349_v6  ;;  %352 = vst [vmem:[%s1580_s8 + $0x38] sm:$0xff] %v351_v7  ;;  %v355_v9 = vld [vmem:[%s1575_s7 + $0x90] sm:$0xff] }
  0x1b   : > { %354 = vst [vmem:[%s1580_s8 + $0x40] sm:$0xff] %v353_v8  ;;  %v357_v10 = vld [vmem:[%s1575_s7 + $0xa0] sm:$0xff]  ;;  %v359_v11 = vld [vmem:[%s1575_s7 + $0xb0] sm:$0xff]  ;;  %356 = vst [vmem:[%s1580_s8 + $0x48] sm:$0xff] %v355_v9 }
  0x1c   : > { %358 = vst [vmem:[%s1580_s8 + $0x50] sm:$0xff] %v357_v10  ;;  %360 = vst [vmem:[%s1580_s8 + $0x58] sm:$0xff] %v359_v11  ;;  %v361_v12 = vld [vmem:[%s1575_s7 + $0xc0] sm:$0xff]  ;;  %v363_v13 = vld [vmem:[%s1575_s7 + $0xd0] sm:$0xff] }
  0x1d   : > { %v365_v14 = vld [vmem:[%s1575_s7 + $0xe0] sm:$0xff]  ;;  %362 = vst [vmem:[%s1580_s8 + $0x60] sm:$0xff] %v361_v12  ;;  %364 = vst [vmem:[%s1580_s8 + $0x68] sm:$0xff] %v363_v13  ;;  %v367_v15 = vld [vmem:[%s1575_s7 + $0xf0] sm:$0xff] }
  0x1e   : > { %366 = vst [vmem:[%s1580_s8 + $0x70] sm:$0xff] %v365_v14  ;;  %v369_v16 = vld [vmem:[%s1575_s7 + $0x100] sm:$0xff]  ;;  %v371_v17 = vld [vmem:[%s1575_s7 + $0x110] sm:$0xff]  ;;  %368 = vst [vmem:[%s1580_s8 + $0x78] sm:$0xff] %v367_v15 }
  0x1f   : > { %370 = vst [vmem:[%s1580_s8 + $0x80] sm:$0xff] %v369_v16  ;;  %372 = vst [vmem:[%s1580_s8 + $0x88] sm:$0xff] %v371_v17  ;;  %v373_v18 = vld [vmem:[%s1575_s7 + $0x120] sm:$0xff]  ;;  %v375_v19 = vld [vmem:[%s1575_s7 + $0x130] sm:$0xff] }
  0x20   : > { %v377_v20 = vld [vmem:[%s1575_s7 + $0x140] sm:$0xff]  ;;  %374 = vst [vmem:[%s1580_s8 + $0x90] sm:$0xff] %v373_v18  ;;  %376 = vst [vmem:[%s1580_s8 + $0x98] sm:$0xff] %v375_v19  ;;  %v379_v21 = vld [vmem:[%s1575_s7 + $0x150] sm:$0xff] }
  0x21   : > { %378 = vst [vmem:[%s1580_s8 + $0xa0] sm:$0xff] %v377_v20  ;;  %v381_v22 = vld [vmem:[%s1575_s7 + $0x160] sm:$0xff]  ;;  %v383_v23 = vld [vmem:[%s1575_s7 + $0x170] sm:$0xff]  ;;  %380 = vst [vmem:[%s1580_s8 + $0xa8] sm:$0xff] %v379_v21 }
  0x22   : > { %382 = vst [vmem:[%s1580_s8 + $0xb0] sm:$0xff] %v381_v22  ;;  %384 = vst [vmem:[%s1580_s8 + $0xb8] sm:$0xff] %v383_v23  ;;  %v385_v24 = vld [vmem:[%s1575_s7 + $0x180] sm:$0xff]  ;;  %v387_v25 = vld [vmem:[%s1575_s7 + $0x190] sm:$0xff] }
  0x23   : > { %v389_v26 = vld [vmem:[%s1575_s7 + $0x1a0] sm:$0xff]  ;;  %386 = vst [vmem:[%s1580_s8 + $0xc0] sm:$0xff] %v385_v24  ;;  %388 = vst [vmem:[%s1580_s8 + $0xc8] sm:$0xff] %v387_v25  ;;  %v391_v27 = vld [vmem:[%s1575_s7 + $0x1b0] sm:$0xff] }
  0x24   : > { %390 = vst [vmem:[%s1580_s8 + $0xd0] sm:$0xff] %v389_v26  ;;  %v393_v28 = vld [vmem:[%s1575_s7 + $0x1c0] sm:$0xff]  ;;  %v395_v29 = vld [vmem:[%s1575_s7 + $0x1d0] sm:$0xff]  ;;  %392 = vst [vmem:[%s1580_s8 + $0xd8] sm:$0xff] %v391_v27 }
  0x25   : > { %394 = vst [vmem:[%s1580_s8 + $0xe0] sm:$0xff] %v393_v28  ;;  %396 = vst [vmem:[%s1580_s8 + $0xe8] sm:$0xff] %v395_v29  ;;  %v397_v30 = vld [vmem:[%s1575_s7 + $0x1e0] sm:$0xff]  ;;  %v399_v31 = vld [vmem:[%s1575_s7 + $0x1f0] sm:$0xff] }
  0x26   : > { %v401_v32 = vld [vmem:[%s1575_s7 + $0x200] sm:$0xff]  ;;  %398 = vst [vmem:[%s1580_s8 + $0xf0] sm:$0xff] %v397_v30  ;;  %400 = vst [vmem:[%s1580_s8 + $0xf8] sm:$0xff] %v399_v31  ;;  %v403_v33 = vld [vmem:[%s1575_s7 + $0x210] sm:$0xff] }
  0x27   : > { %402 = vst [vmem:[%s1580_s8 + $0x100] sm:$0xff] %v401_v32  ;;  %v405_v34 = vld [vmem:[%s1575_s7 + $0x220] sm:$0xff]  ;;  %v407_v35 = vld [vmem:[%s1575_s7 + $0x230] sm:$0xff]  ;;  %404 = vst [vmem:[%s1580_s8 + $0x108] sm:$0xff] %v403_v33 }
  0x28   : > { %406 = vst [vmem:[%s1580_s8 + $0x110] sm:$0xff] %v405_v34  ;;  %408 = vst [vmem:[%s1580_s8 + $0x118] sm:$0xff] %v407_v35  ;;  %v409_v36 = vld [vmem:[%s1575_s7 + $0x240] sm:$0xff]  ;;  %v411_v37 = vld [vmem:[%s1575_s7 + $0x250] sm:$0xff] }
  0x29   : > { %v413_v38 = vld [vmem:[%s1575_s7 + $0x260] sm:$0xff]  ;;  %410 = vst [vmem:[%s1580_s8 + $0x120] sm:$0xff] %v409_v36  ;;  %412 = vst [vmem:[%s1580_s8 + $0x128] sm:$0xff] %v411_v37  ;;  %v415_v39 = vld [vmem:[%s1575_s7 + $0x270] sm:$0xff] }
  0x2a   : > { %414 = vst [vmem:[%s1580_s8 + $0x130] sm:$0xff] %v413_v38  ;;  %v417_v40 = vld [vmem:[%s1575_s7 + $0x280] sm:$0xff]  ;;  %v419_v41 = vld [vmem:[%s1575_s7 + $0x290] sm:$0xff]  ;;  %416 = vst [vmem:[%s1580_s8 + $0x138] sm:$0xff] %v415_v39 }
  0x2b   : > { %418 = vst [vmem:[%s1580_s8 + $0x140] sm:$0xff] %v417_v40  ;;  %420 = vst [vmem:[%s1580_s8 + $0x148] sm:$0xff] %v419_v41  ;;  %v421_v42 = vld [vmem:[%s1575_s7 + $0x2a0] sm:$0xff]  ;;  %v423_v43 = vld [vmem:[%s1575_s7 + $0x2b0] sm:$0xff] }
  0x2c   : > { %v425_v44 = vld [vmem:[%s1575_s7 + $0x2c0] sm:$0xff]  ;;  %422 = vst [vmem:[%s1580_s8 + $0x150] sm:$0xff] %v421_v42  ;;  %424 = vst [vmem:[%s1580_s8 + $0x158] sm:$0xff] %v423_v43  ;;  %v427_v45 = vld [vmem:[%s1575_s7 + $0x2d0] sm:$0xff] }
  0x2d   : > { %426 = vst [vmem:[%s1580_s8 + $0x160] sm:$0xff] %v425_v44  ;;  %v429_v46 = vld [vmem:[%s1575_s7 + $0x2e0] sm:$0xff]  ;;  %v431_v47 = vld [vmem:[%s1575_s7 + $0x2f0] sm:$0xff]  ;;  %428 = vst [vmem:[%s1580_s8 + $0x168] sm:$0xff] %v427_v45 }
  0x2e   : > { %430 = vst [vmem:[%s1580_s8 + $0x170] sm:$0xff] %v429_v46  ;;  %432 = vst [vmem:[%s1580_s8 + $0x178] sm:$0xff] %v431_v47  ;;  %v433_v48 = vld [vmem:[%s1575_s7 + $0x300] sm:$0xff]  ;;  %v435_v49 = vld [vmem:[%s1575_s7 + $0x310] sm:$0xff] }
  0x2f   : > { %v437_v50 = vld [vmem:[%s1575_s7 + $0x320] sm:$0xff]  ;;  %434 = vst [vmem:[%s1580_s8 + $0x180] sm:$0xff] %v433_v48  ;;  %436 = vst [vmem:[%s1580_s8 + $0x188] sm:$0xff] %v435_v49  ;;  %v439_v51 = vld [vmem:[%s1575_s7 + $0x330] sm:$0xff] }
  0x30   : > { %438 = vst [vmem:[%s1580_s8 + $0x190] sm:$0xff] %v437_v50  ;;  %v441_v52 = vld [vmem:[%s1575_s7 + $0x340] sm:$0xff]  ;;  %v443_v53 = vld [vmem:[%s1575_s7 + $0x350] sm:$0xff]  ;;  %440 = vst [vmem:[%s1580_s8 + $0x198] sm:$0xff] %v439_v51 }
  0x31   : > { %442 = vst [vmem:[%s1580_s8 + $0x1a0] sm:$0xff] %v441_v52  ;;  %444 = vst [vmem:[%s1580_s8 + $0x1a8] sm:$0xff] %v443_v53  ;;  %v445_v54 = vld [vmem:[%s1575_s7 + $0x360] sm:$0xff]  ;;  %v447_v55 = vld [vmem:[%s1575_s7 + $0x370] sm:$0xff] }
  0x32   : > { %v449_v56 = vld [vmem:[%s1575_s7 + $0x380] sm:$0xff]  ;;  %446 = vst [vmem:[%s1580_s8 + $0x1b0] sm:$0xff] %v445_v54  ;;  %448 = vst [vmem:[%s1580_s8 + $0x1b8] sm:$0xff] %v447_v55  ;;  %v451_v57 = vld [vmem:[%s1575_s7 + $0x390] sm:$0xff] }
  0x33   : > { %450 = vst [vmem:[%s1580_s8 + $0x1c0] sm:$0xff] %v449_v56  ;;  %v453_v58 = vld [vmem:[%s1575_s7 + $0x3a0] sm:$0xff]  ;;  %v455_v59 = vld [vmem:[%s1575_s7 + $0x3b0] sm:$0xff]  ;;  %452 = vst [vmem:[%s1580_s8 + $0x1c8] sm:$0xff] %v451_v57 }
  0x34   : > { %454 = vst [vmem:[%s1580_s8 + $0x1d0] sm:$0xff] %v453_v58  ;;  %456 = vst [vmem:[%s1580_s8 + $0x1d8] sm:$0xff] %v455_v59  ;;  %v457_v60 = vld [vmem:[%s1575_s7 + $0x3c0] sm:$0xff]  ;;  %v459_v61 = vld [vmem:[%s1575_s7 + $0x3d0] sm:$0xff] }
  0x35   : > { %v461_v62 = vld [vmem:[%s1575_s7 + $0x3e0] sm:$0xff]  ;;  %458 = vst [vmem:[%s1580_s8 + $0x1e0] sm:$0xff] %v457_v60  ;;  %460 = vst [vmem:[%s1580_s8 + $0x1e8] sm:$0xff] %v459_v61  ;;  %v463_v63 = vld [vmem:[%s1575_s7 + $0x3f0] sm:$0xff] }
  0x36   : > { %462 = vst [vmem:[%s1580_s8 + $0x1f0] sm:$0xff] %v461_v62  ;;  %464 = vst [vmem:[%s1580_s8 + $0x1f8] sm:$0xff] %v463_v63 }
  0x37 PF: > { %p1201_p7 = scmp.ge.s32.totalorder %s1492_s18, 1  ;;  %p477_p8 = scmp.lt.s32.totalorder %s1492_s18, 19 }
  0x39   : > { %p478_p9 = pnand %p1201_p7, %p477_p8 }
  0x3a   : > { %s484_s9 = sand.u32 (!%p478_p9), 1, %s1468_s12   ;;  %s1203_s10 = sshll.u32 (!%p478_p9), %s1476_s14, 2 }
  0x3b   : > { %481 = sbr.rel (%p478_p9) target bundleno = 353 (0x161), region = 66  ;;  %s1202_s11 = sshll.u32 (!%p478_p9), %s484_s9, 9 }
  0x3c   : > { %p527_p10 = scmp.lt.s32.totalorder (!%p478_p9), %s1203_s10, 35  ;;  %s1205_s21 = sshll.u32 (!%p478_p9), %s1480_s15, 1 }
  0x3d   : > { %p537_p11 = scmp.lt.s32.totalorder (!%p478_p9), %s1205_s21, 3  ;;  %s1729_s5 = scalar_lea.vmem (!%p478_p9), [#allocation3], %s1202_s11 }
  0x3e   : > { %p1208_p12 = scmp.ne.s32.totalorder (!%p478_p9), %s1476_s14, 0 }
  0x40   : > { %s1844_s10 = smov (!%p527_p10, %s1203_s10), 35  ;;  %s1846_s21 = smov (!%p537_p11, %s1205_s21), 3 }
  0x41   : > { %s1204_s22 = sshll.u32 %s1844_s10, 2  ;;  %s539_s12 = scalar_lea.vmem %s1829_s2, %s1846_s21 }
  0x42   : > { %s1715_s26 = scalar_lea.vmem %s1827_s0, %s1204_s22  ;;  %s1207_s29 = sshll.u32 %s1846_s21, 3 }
  0x43   : > { %s1727_s15 = scalar_lea.vmem %s1830_s3, %s1207_s29  ;;  %554 = sbr.rel (%p1208_p12) target bundleno = 74 (0x4a), region = 74 }
  0x48   : > { %v1494_v0 = vmov 0.0  }
  0x49   : > { %555 = vst [vmem:[#allocation2] sm:$0xff] %v1494_v0  ;;  %556 = vst [vmem:[#allocation2 + $0x8] sm:$0xff] %v1494_v0 }
  0x4a PF: > { %v1338_v1 = vld [vmem:[%s1729_s5 + $0x74] ss:$8 sps:$4 sm:$0xff]   ;;  %v1342_v3 = vld [vmem:[%s1729_s5 + $0x70] ss:$8 sps:$4 sm:$0xff]   ;;  %v1344_v5 = vld [vmem:[%s1729_s5 + $0x64] ss:$8 sps:$4 sm:$0xff]  }
  0x4b   : > { %v1340_v2 = vld [vmem:[%s1729_s5 + $0x174] ss:$8 sps:$4 sm:$0xff]   ;;  %959 = vmatprep.subr.bf16.mxu0 %v1338_v1  ;;  %v1343_v4 = vld [vmem:[%s1729_s5 + $0x170] ss:$8 sps:$4 sm:$0xff]   ;;  %v1346_v6 = vld [vmem:[%s1729_s5 + $0x164] ss:$8 sps:$4 sm:$0xff]  }
  0x4c   : > { %1000 = vmatprep.subr.bf16.mxu1 %v1340_v2  ;;  %960 = vmatpush1.bf16.msra.mxu0 %v1342_v3  ;;  %v1348_v7 = vld [vmem:[%s1729_s5 + $0x60] ss:$8 sps:$4 sm:$0xff]   ;;  %v1350_v9 = vld [vmem:[%s1729_s5 + $0x54] ss:$8 sps:$4 sm:$0xff]   ;;  %v1354_v11 = vld [vmem:[%s1729_s5 + $0x50] ss:$8 sps:$4 sm:$0xff]  }
  0x4d   : > { %1001 = vmatpush1.bf16.msra.mxu1 %v1343_v4  ;;  %961 = vmatprep.subr.bf16.mxu0 %v1344_v5  ;;  %v1349_v8 = vld [vmem:[%s1729_s5 + $0x160] ss:$8 sps:$4 sm:$0xff]   ;;  %v1352_v10 = vld [vmem:[%s1729_s5 + $0x154] ss:$8 sps:$4 sm:$0xff]   ;;  %v1355_v12 = vld [vmem:[%s1729_s5 + $0x150] ss:$8 sps:$4 sm:$0xff]  }
  0x4e   : > { %1002 = vmatprep.subr.bf16.mxu1 %v1346_v6  ;;  %v1356_v13 = vld [vmem:[%s1729_s5 + $0x44] ss:$8 sps:$4 sm:$0xff]   ;;  %v1360_v15 = vld [vmem:[%s1729_s5 + $0x40] ss:$8 sps:$4 sm:$0xff]   ;;  %v1362_v17 = vld [vmem:[%s1729_s5 + $0x34] ss:$8 sps:$4 sm:$0xff]  }
  0x4f   : > { %v1358_v14 = vld [vmem:[%s1729_s5 + $0x144] ss:$8 sps:$4 sm:$0xff]   ;;  %v1361_v16 = vld [vmem:[%s1729_s5 + $0x140] ss:$8 sps:$4 sm:$0xff]   ;;  %v1364_v18 = vld [vmem:[%s1729_s5 + $0x134] ss:$8 sps:$4 sm:$0xff]  }
  0x50   : > { %962 = vmatpush1.bf16.msra.mxu0 %v1348_v7  ;;  %v1366_v19 = vld [vmem:[%s1729_s5 + $0x30] ss:$8 sps:$4 sm:$0xff]   ;;  %v1368_v21 = vld [vmem:[%s1729_s5 + $0x24] ss:$8 sps:$4 sm:$0xff]   ;;  %v1372_v23 = vld [vmem:[%s1729_s5 + $0x20] ss:$8 sps:$4 sm:$0xff]  }
  0x51   : > { %1003 = vmatpush1.bf16.msra.mxu1 %v1349_v8  ;;  %963 = vmatprep.subr.bf16.mxu0 %v1350_v9  ;;  %v1367_v20 = vld [vmem:[%s1729_s5 + $0x130] ss:$8 sps:$4 sm:$0xff]   ;;  %v1370_v22 = vld [vmem:[%s1729_s5 + $0x124] ss:$8 sps:$4 sm:$0xff]   ;;  %v1373_v24 = vld [vmem:[%s1729_s5 + $0x120] ss:$8 sps:$4 sm:$0xff]  }
  0x52   : > { %1004 = vmatprep.subr.bf16.mxu1 %v1352_v10  ;;  %v1374_v25 = vld [vmem:[%s1729_s5 + $0x14] ss:$8 sps:$4 sm:$0xff]   ;;  %v1378_v27 = vld [vmem:[%s1729_s5 + $0x10] ss:$8 sps:$4 sm:$0xff]   ;;  %v1380_v29 = vld [vmem:[%s1729_s5 + $0x4] ss:$8 sps:$4 sm:$0xff]  }
  0x53   : > { %v1376_v26 = vld [vmem:[%s1729_s5 + $0x114] ss:$8 sps:$4 sm:$0xff]   ;;  %v1379_v28 = vld [vmem:[%s1729_s5 + $0x110] ss:$8 sps:$4 sm:$0xff]   ;;  %v1382_v30 = vld [vmem:[%s1729_s5 + $0x104] ss:$8 sps:$4 sm:$0xff]  }
  0x54   : > { %964 = vmatpush1.bf16.msra.mxu0 %v1354_v11  ;;  %v1384_v31 = vld [vmem:[%s1729_s5] ss:$8 sps:$4 sm:$0xff]   ;;  %v1386_v33 = vld [vmem:[%s1729_s5 + $0xf4] ss:$8 sps:$4 sm:$0xff]   ;;  %v1390_v35 = vld [vmem:[%s1729_s5 + $0xf0] ss:$8 sps:$4 sm:$0xff]  }
  0x55   : > { %1005 = vmatpush1.bf16.msra.mxu1 %v1355_v12  ;;  %965 = vmatprep.subr.bf16.mxu0 %v1356_v13  ;;  %v1385_v32 = vld [vmem:[%s1729_s5 + $0x100] ss:$8 sps:$4 sm:$0xff]   ;;  %v1388_v34 = vld [vmem:[%s1729_s5 + $0x1f4] ss:$8 sps:$4 sm:$0xff]   ;;  %v1391_v36 = vld [vmem:[%s1729_s5 + $0x1f0] ss:$8 sps:$4 sm:$0xff]  }
  0x56   : > { %1006 = vmatprep.subr.bf16.mxu1 %v1358_v14  ;;  %v1392_v37 = vld [vmem:[%s1729_s5 + $0xe4] ss:$8 sps:$4 sm:$0xff]   ;;  %v1396_v39 = vld [vmem:[%s1729_s5 + $0xe0] ss:$8 sps:$4 sm:$0xff]   ;;  %v1398_v41 = vld [vmem:[%s1729_s5 + $0xd4] ss:$8 sps:$4 sm:$0xff]  }
  0x57   : > { %v1394_v38 = vld [vmem:[%s1729_s5 + $0x1e4] ss:$8 sps:$4 sm:$0xff]   ;;  %v1397_v40 = vld [vmem:[%s1729_s5 + $0x1e0] ss:$8 sps:$4 sm:$0xff]   ;;  %v1400_v42 = vld [vmem:[%s1729_s5 + $0x1d4] ss:$8 sps:$4 sm:$0xff]  }
  0x58   : > { %966 = vmatpush1.bf16.msra.mxu0 %v1360_v15  ;;  %v1402_v43 = vld [vmem:[%s1729_s5 + $0xd0] ss:$8 sps:$4 sm:$0xff]   ;;  %v1404_v45 = vld [vmem:[%s1729_s5 + $0xc4] ss:$8 sps:$4 sm:$0xff]   ;;  %v1408_v50 = vld [vmem:[%s1729_s5 + $0xc0] ss:$8 sps:$4 sm:$0xff]  }
  0x59   : > { %1007 = vmatpush1.bf16.msra.mxu1 %v1361_v16  ;;  %967 = vmatprep.subr.bf16.mxu0 %v1362_v17  ;;  %v1403_v44 = vld [vmem:[%s1729_s5 + $0x1d0] ss:$8 sps:$4 sm:$0xff]   ;;  %v1406_v46 = vld [vmem:[%s1729_s5 + $0x1c4] ss:$8 sps:$4 sm:$0xff]   ;;  %v1409_v51 = vld [vmem:[%s1729_s5 + $0x1c0] ss:$8 sps:$4 sm:$0xff]  }
  0x5a   : > { %1008 = vmatprep.subr.bf16.mxu1 %v1364_v18  ;;  %v559_v47 = vld [vmem:[%s1715_s26] sm:$0xff]  ;;  %v560_v49 = vld [vmem:[%s1715_s26 + $0x8] sm:$0xff]  ;;  %v1416_v57 = vld [vmem:[%s1729_s5 + $0xa4] ss:$8 sps:$4 sm:$0xff]   ;;  %p1277_p13 = scmp.ne.s32.totalorder %s1476_s14, 8 }
  0x5b   : > { %v1210_v48 = vcombine.high %v559_v47, %v559_v47  ;;  %v1212_v52 = vcombine.high %v560_v49, %v560_v49  ;;  %v1410_v53 = vld [vmem:[%s1729_s5 + $0xb4] ss:$8 sps:$4 sm:$0xff]   ;;  %v1414_v55 = vld [vmem:[%s1729_s5 + $0xb0] ss:$8 sps:$4 sm:$0xff]   ;;  %v1418_v58 = vld [vmem:[%s1729_s5 + $0x1a4] ss:$8 sps:$4 sm:$0xff]   ;;  %v1209_v5 = vcombine.low %v559_v47, %v559_v47  ;;  %v1211_v6 = vcombine.low %v560_v49, %v560_v49 }
  0x5c   : > { %968 = vmatpush1.bf16.msra.mxu0 %v1366_v19  ;;  %v1412_v54 = vld [vmem:[%s1729_s5 + $0x1b4] ss:$8 sps:$4 sm:$0xff]   ;;  %v1415_v56 = vld [vmem:[%s1729_s5 + $0x1b0] ss:$8 sps:$4 sm:$0xff]   ;;  %v1420_v59 = vld [vmem:[%s1729_s5 + $0xa0] ss:$8 sps:$4 sm:$0xff]  }
  0x5d   : > { %1009 = vmatpush1.bf16.msra.mxu1 %v1367_v20  ;;  %969 = vmatprep.subr.bf16.mxu0 %v1368_v21  ;;  %v1421_v60 = vld [vmem:[%s1729_s5 + $0x1a0] ss:$8 sps:$4 sm:$0xff]   ;;  %v1422_v61 = vld [vmem:[%s1729_s5 + $0x94] ss:$8 sps:$4 sm:$0xff]   ;;  %v1426_v63 = vld [vmem:[%s1729_s5 + $0x90] ss:$8 sps:$4 sm:$0xff]  }
  0x5e   : > { %1010 = vmatprep.subr.bf16.mxu1 %v1370_v22  ;;  %991 = vmatprep.mubr.bf16.mxu0 %v1210_v48  ;;  %v1424_v62 = vld [vmem:[%s1729_s5 + $0x194] ss:$8 sps:$4 sm:$0xff]   ;;  %v1427_v0 = vld [vmem:[%s1729_s5 + $0x190] ss:$8 sps:$4 sm:$0xff]   ;;  %v1428_v1 = vld [vmem:[%s1729_s5 + $0x84] ss:$8 sps:$4 sm:$0xff]  }
  0x5f   : > { %1032 = vmatprep.mubr.bf16.mxu1 %v1212_v52  ;;  %v1430_v2 = vld [vmem:[%s1729_s5 + $0x184] ss:$8 sps:$4 sm:$0xff]   ;;  %v1432_v3 = vld [vmem:[%s1729_s5 + $0x80] ss:$8 sps:$4 sm:$0xff]   ;;  %v557_v8 = vld [vmem:[#allocation2] sm:$0xff] }
  0x60   : > { %970 = vmatpush1.bf16.msra.mxu0 %v1372_v23  ;;  %v1433_v4 = vld [vmem:[%s1729_s5 + $0x180] ss:$8 sps:$4 sm:$0xff]   ;;  %v558_v12 = vld [vmem:[#allocation2 + $0x8] sm:$0xff] }
  0x61   : > { %1011 = vmatpush1.bf16.msra.mxu1 %v1373_v24  ;;  %971 = vmatprep.subr.bf16.mxu0 %v1374_v25 }
  0x62   : > { %1012 = vmatprep.subr.bf16.mxu1 %v1376_v26 }
  0x64   : > { %972 = vmatpush1.bf16.msra.mxu0 %v1378_v27 }
  0x65   : > { %1013 = vmatpush1.bf16.msra.mxu1 %v1379_v28  ;;  %973 = vmatprep.subr.bf16.mxu0 %v1380_v29 }
  0x66   : > { %1014 = vmatprep.subr.bf16.mxu1 %v1382_v30 }
  0x68   : > { %974 = vmatpush1.bf16.msra.mxu0 %v1384_v31 }
  0x69   : > { %1015 = vmatpush1.bf16.msra.mxu1 %v1385_v32  ;;  %975 = vmatprep.subr.bf16.mxu0 %v1386_v33 }
  0x6a   : > { %1016 = vmatprep.subr.bf16.mxu1 %v1388_v34 }
  0x6c   : > { %976 = vmatpush2.bf16.msra.mxu0 %v1390_v35 }
  0x6d   : > { %1017 = vmatpush2.bf16.msra.mxu1 %v1391_v36  ;;  %977 = vmatprep.subr.bf16.mxu0 %v1392_v37 }
  0x6e   : > { %1018 = vmatprep.subr.bf16.mxu1 %v1394_v38 }
  0x70   : > { %978 = vmatpush2.bf16.msra.mxu0 %v1396_v39 }
  0x71   : > { %1019 = vmatpush2.bf16.msra.mxu1 %v1397_v40  ;;  %979 = vmatprep.subr.bf16.mxu0 %v1398_v41 }
  0x72   : > { %1020 = vmatprep.subr.bf16.mxu1 %v1400_v42 }
  0x74   : > { %980 = vmatpush2.bf16.msra.mxu0 %v1402_v43 }
  0x75   : > { %1021 = vmatpush2.bf16.msra.mxu1 %v1403_v44  ;;  %981 = vmatprep.subr.bf16.mxu0 %v1404_v45 }
  0x76   : > { %1022 = vmatprep.subr.bf16.mxu1 %v1406_v46 }
  0x78   : > { %982 = vmatpush2.bf16.msra.mxu0 %v1408_v50 }
  0x79   : > { %1023 = vmatpush2.bf16.msra.mxu1 %v1409_v51  ;;  %983 = vmatprep.subr.bf16.mxu0 %v1410_v53 }
  0x7a   : > { %1024 = vmatprep.subr.bf16.mxu1 %v1412_v54 }
  0x7c   : > { %984 = vmatpush2.bf16.msra.mxu0 %v1414_v55 }
  0x7d   : > { %1025 = vmatpush2.bf16.msra.mxu1 %v1415_v56  ;;  %985 = vmatprep.subr.bf16.mxu0 %v1416_v57 }
  0x7e   : > { %1026 = vmatprep.subr.bf16.mxu1 %v1418_v58 }
  0x80   : > { %986 = vmatpush2.bf16.msra.mxu0 %v1420_v59 }
  0x81   : > { %1027 = vmatpush2.bf16.msra.mxu1 %v1421_v60  ;;  %987 = vmatprep.subr.bf16.mxu0 %v1422_v61 }
  0x82   : > { %1028 = vmatprep.subr.bf16.mxu1 %v1424_v62 }
  0x84   : > { %988 = vmatpush2.bf16.msra.mxu0 %v1426_v63 }
  0x85   : > { %1029 = vmatpush2.bf16.msra.mxu1 %v1427_v0  ;;  %989 = vmatprep.subr.bf16.mxu0 %v1428_v1 }
  0x86   : > { %1030 = vmatprep.subr.bf16.mxu1 %v1430_v2 }
  0x88   : > { %990 = vmatpush2.bf16.msra.mxu0 %v1432_v3 }
  0x89   : > { %1031 = vmatpush2.bf16.msra.mxu1 %v1433_v4 }
  0x8b   : > { %992 = vmatmul.mubr.bf16.vlgmr.msra.gmra.mxu0 %v1209_v5 }
  0x8c   : > { %1033 = vmatmul.mubr.bf16.vlgmr.msra.gmra.mxu1 %v1211_v6 }
 0x14b   : > { %v993_v7 = vpop.f32.mrf.mxu0 }
 0x14c   : > { %v1034_v9 = vpop.f32.mrf.mxu1 }
 0x14d   : > { %v1035_v10 = vadd.f32 %v1034_v9, %v993_v7  ;;  %v995_v11 = vpop.f32.mrf.mxu0 }
 0x14e   : > { %v1036_v13 = vpop.f32.mrf.mxu1 }
 0x14f   : > { %v1041_v14 = vadd.f32 %v1035_v10, %v557_v8  ;;  %v1037_v15 = vadd.f32 %v1036_v13, %v995_v11  ;;  %v997_v16 = vpop.f32.mrf.mxu0  ;;  %1048 = sbr.rel (%p1277_p13) target bundleno = 353 (0x161), region = 78 }
 0x150   : > { %v1038_v17 = vpop.f32.mrf.mxu1 }
 0x151   : > { %1043 = vst [vmem:[#allocation2] sm:$0xff] %v1041_v14  ;;  %v1042_v18 = vadd.f32 %v1037_v15, %v558_v12  ;;  %v998_v19 = vpop.f32.mrf.mxu0 }
 0x152   : > { %v1039_v20 = vpop.f32.mrf.mxu1 }
 0x153   : > { %1044 = vst [vmem:[#allocation2 + $0x8] sm:$0xff] %v1042_v18 }
 0x154   : > { %v1053_v21 = vlaneseq  ;;  %v1051_v23 = vld [vmem:[%s539_s12] sm:$0x3] }
 0x156   : > { %v1054_v22 = vshrl.u32 %v1053_v21, 7 }
 0x158   : > { %v1055_v24 = vsub.s32 0, %v1054_v22  ;;  %v1059_v25 = vsub.s32 1, %v1054_v22  ;;  %v1049_v26 = vld [vmem:[#allocation2] sm:$0xff] }
 0x15a   : > { %v1050_v27 = vld [vmem:[#allocation2 + $0x8] sm:$0xff]  ;;  %v1056_v28 = vrot.slane %v1051_v23, %v1055_v24  ;;  %v1060_v29 = vrot.slane %v1051_v23, %v1059_v25 }
 0x15c   : > { %v1063_v30 = vadd.f32 %v1056_v28, %v1049_v26  ;;  %v1064_v31 = vadd.f32 %v1060_v29, %v1050_v27 }
 0x15e   : > { %v1065_v32 = vmax.f32 %v1063_v30, 0.0  ;;  %v1066_v33 = vmax.f32 %v1064_v31, 0.0 }
 0x160   : > { %1067 = vst [vmem:[%s1727_s15] sm:$0xff] %v1065_v32  ;;  %1068 = vst [vmem:[%s1727_s15 + $0x8] sm:$0xff] %v1066_v33 }
 0x161 PF: > { %s13_s18 = sadd.s32 1, %s1492_s18   ;;  %s1831_s12 = smov %s1472_s13 }
 0x162   : > { %p10_p0 = scmp.ge.s32.totalorder %s13_s18, 20   ;;  %s1832_s13 = smov %s1566_s25 }
 0x163   : > { %s1833_s14 = smov %s1484_s16  ;;  %s1834_s15 = smov %s1488_s17 }
 0x164   : > { %s1835_s16 = smov %s1838_s19  ;;  %s1836_s17 = smov %s1842_s20 }
 0x165   :  { %12 = sbr.rel (!%p10_p0) target bundleno = 4 (0x4), region = 119 }

// kernel: _lambda_.75
= control target key start
LH: loop header
LB: loop body
LE: loop exit
PB: predicated region body
PF: predicated region fallthrough
CT: control target
= control target key end

     0   :  { %s2874_s0 = inlined_call_operand.vmem [shape: f32[2,1,512], index: 0, kind: input, shape index: {}]   ;;  %s2875_s1 = inlined_call_operand.vmem [shape: f32[512,1000], index: 1, kind: input, shape index: {}]   ;;  %s2876_s2 = inlined_call_operand.vmem [shape: f32[1,1000], index: 2, kind: input, shape index: {}]   ;;  %s2877_s3 = inlined_call_operand.hbm [shape: f32[2,1000], index: 3, kind: output, shape index: {}]  }
   0x1   :  { %v140_v0 = vld [vmem:[%s2875_s1 + $0x3c8] sm:$0xff]  ;;  %v139_v2 = vld [vmem:[%s2875_s1 + $0x3c0] sm:$0xff] }
   0x2   :  { %v396_v1 = vld [vmem:[%s2875_s1 + $0xbc8] sm:$0xff]  ;;  %604 = vmatprep.subr.mxu0 %v140_v0  ;;  %v395_v3 = vld [vmem:[%s2875_s1 + $0xbc0] sm:$0xff] }
   0x3   :  { %675 = vmatprep.subr.mxu1 %v396_v1  ;;  %v132_v4 = vld [vmem:[%s2875_s1 + $0x388] sm:$0xff]  ;;  %605 = vmatpush1.msra.mxu0 %v139_v2  ;;  %v131_v6 = vld [vmem:[%s2875_s1 + $0x380] sm:$0xff] }
   0x4   :  { %v388_v5 = vld [vmem:[%s2875_s1 + $0xb88] sm:$0xff]  ;;  %676 = vmatpush1.msra.mxu1 %v395_v3  ;;  %v387_v7 = vld [vmem:[%s2875_s1 + $0xb80] sm:$0xff]  ;;  %606 = vmatprep.subr.mxu0 %v132_v4 }
   0x5   :  { %v124_v8 = vld [vmem:[%s2875_s1 + $0x348] sm:$0xff]  ;;  %677 = vmatprep.subr.mxu1 %v388_v5  ;;  %v123_v10 = vld [vmem:[%s2875_s1 + $0x340] sm:$0xff]  ;;  %607 = vmatpush1.msra.mxu0 %v131_v6 }
   0x6   :  { %v380_v9 = vld [vmem:[%s2875_s1 + $0xb48] sm:$0xff]  ;;  %v379_v11 = vld [vmem:[%s2875_s1 + $0xb40] sm:$0xff]  ;;  %678 = vmatpush1.msra.mxu1 %v387_v7  ;;  %608 = vmatprep.subr.mxu0 %v124_v8 }
   0x7   :  { %v116_v12 = vld [vmem:[%s2875_s1 + $0x308] sm:$0xff]  ;;  %679 = vmatprep.subr.mxu1 %v380_v9  ;;  %v115_v14 = vld [vmem:[%s2875_s1 + $0x300] sm:$0xff]  ;;  %609 = vmatpush1.msra.mxu0 %v123_v10 }
   0x8   :  { %v372_v13 = vld [vmem:[%s2875_s1 + $0xb08] sm:$0xff]  ;;  %v371_v15 = vld [vmem:[%s2875_s1 + $0xb00] sm:$0xff]  ;;  %680 = vmatpush1.msra.mxu1 %v379_v11  ;;  %610 = vmatprep.subr.mxu0 %v116_v12 }
   0x9   :  { %v108_v16 = vld [vmem:[%s2875_s1 + $0x2c8] sm:$0xff]  ;;  %681 = vmatprep.subr.mxu1 %v372_v13  ;;  %v107_v18 = vld [vmem:[%s2875_s1 + $0x2c0] sm:$0xff]  ;;  %611 = vmatpush1.msra.mxu0 %v115_v14 }
   0xa   :  { %v364_v17 = vld [vmem:[%s2875_s1 + $0xac8] sm:$0xff]  ;;  %v363_v19 = vld [vmem:[%s2875_s1 + $0xac0] sm:$0xff]  ;;  %682 = vmatpush1.msra.mxu1 %v371_v15  ;;  %612 = vmatprep.subr.mxu0 %v108_v16 }
   0xb   :  { %v100_v20 = vld [vmem:[%s2875_s1 + $0x288] sm:$0xff]  ;;  %683 = vmatprep.subr.mxu1 %v364_v17  ;;  %v99_v22 = vld [vmem:[%s2875_s1 + $0x280] sm:$0xff]  ;;  %613 = vmatpush1.msra.mxu0 %v107_v18  ;;  %v533_v18 = vlaneseq }
   0xc   :  { %v356_v21 = vld [vmem:[%s2875_s1 + $0xa88] sm:$0xff]  ;;  %v355_v23 = vld [vmem:[%s2875_s1 + $0xa80] sm:$0xff]  ;;  %684 = vmatpush1.msra.mxu1 %v363_v19  ;;  %614 = vmatprep.subr.mxu0 %v100_v20  ;;  %v1266_v19 = vmov 1966171168  }
   0xd   :  { %v92_v24 = vld [vmem:[%s2875_s1 + $0x248] sm:$0xff]  ;;  %685 = vmatprep.subr.mxu1 %v356_v21  ;;  %v91_v26 = vld [vmem:[%s2875_s1 + $0x240] sm:$0xff]  ;;  %615 = vmatpush1.msra.mxu0 %v99_v22  ;;  %v577_v20 = vunpack.c.l.s4 %v1266_v19  ;;  %v389_v19 = vld [vmem:[%s2875_s1 + $0xb90] sm:$0xff] }
   0xe   :  { %v348_v25 = vld [vmem:[%s2875_s1 + $0xa48] sm:$0xff]  ;;  %v347_v27 = vld [vmem:[%s2875_s1 + $0xa40] sm:$0xff]  ;;  %686 = vmatpush1.msra.mxu1 %v355_v23  ;;  %616 = vmatprep.subr.mxu0 %v92_v24 }
   0xf   :  { %v84_v28 = vld [vmem:[%s2875_s1 + $0x208] sm:$0xff]  ;;  %687 = vmatprep.subr.mxu1 %v348_v25  ;;  %v83_v30 = vld [vmem:[%s2875_s1 + $0x200] sm:$0xff]  ;;  %617 = vmatpush1.msra.mxu0 %v91_v26 }
  0x10   :  { %v340_v29 = vld [vmem:[%s2875_s1 + $0xa08] sm:$0xff]  ;;  %v339_v31 = vld [vmem:[%s2875_s1 + $0xa00] sm:$0xff]  ;;  %688 = vmatpush1.msra.mxu1 %v347_v27  ;;  %618 = vmatprep.subr.mxu0 %v84_v28 }
  0x11   :  { %v76_v32 = vld [vmem:[%s2875_s1 + $0x1c8] sm:$0xff]  ;;  %689 = vmatprep.subr.mxu1 %v340_v29  ;;  %v75_v34 = vld [vmem:[%s2875_s1 + $0x1c0] sm:$0xff]  ;;  %619 = vmatpush1.msra.mxu0 %v83_v30  ;;  %v1559_v29 = vshrl.u32 %v533_v18, 7  ;;  %v578_v30 = vunpack.c.0.s8 %v577_v20  ;;  %v133_v18 = vld [vmem:[%s2875_s1 + $0x390] sm:$0xff] }
  0x12   :  { %v332_v33 = vld [vmem:[%s2875_s1 + $0x9c8] sm:$0xff]  ;;  %v331_v35 = vld [vmem:[%s2875_s1 + $0x9c0] sm:$0xff]  ;;  %690 = vmatpush1.msra.mxu1 %v339_v31  ;;  %620 = vmatprep.subr.mxu0 %v76_v32  ;;  %v126_v20 = vld [vmem:[%s2875_s1 + $0x358] sm:$0xff] }
  0x13   :  { %v68_v36 = vld [vmem:[%s2875_s1 + $0x188] sm:$0xff]  ;;  %691 = vmatprep.subr.mxu1 %v332_v33  ;;  %v67_v38 = vld [vmem:[%s2875_s1 + $0x180] sm:$0xff]  ;;  %621 = vmatpush1.msra.mxu0 %v75_v34 }
  0x14   :  { %v324_v37 = vld [vmem:[%s2875_s1 + $0x988] sm:$0xff]  ;;  %v323_v39 = vld [vmem:[%s2875_s1 + $0x980] sm:$0xff]  ;;  %692 = vmatpush1.msra.mxu1 %v331_v35  ;;  %622 = vmatprep.subr.mxu0 %v68_v36 }
  0x15   :  { %v60_v40 = vld [vmem:[%s2875_s1 + $0x148] sm:$0xff]  ;;  %693 = vmatprep.subr.mxu1 %v324_v37  ;;  %v59_v42 = vld [vmem:[%s2875_s1 + $0x140] sm:$0xff]  ;;  %623 = vmatpush1.msra.mxu0 %v67_v38 }
  0x16   :  { %v316_v41 = vld [vmem:[%s2875_s1 + $0x948] sm:$0xff]  ;;  %v315_v43 = vld [vmem:[%s2875_s1 + $0x940] sm:$0xff]  ;;  %694 = vmatpush1.msra.mxu1 %v323_v39  ;;  %624 = vmatprep.subr.mxu0 %v60_v40  ;;  %v581_v40 = vsub.s32 %v578_v30, %v1559_v29  ;;  %v366_v30 = vld [vmem:[%s2875_s1 + $0xad8] sm:$0xff] }
  0x17   :  { %v52_v44 = vld [vmem:[%s2875_s1 + $0x108] sm:$0xff]  ;;  %695 = vmatprep.subr.mxu1 %v316_v41  ;;  %v51_v46 = vld [vmem:[%s2875_s1 + $0x100] sm:$0xff]  ;;  %625 = vmatpush1.msra.mxu0 %v59_v42 }
  0x18   :  { %v308_v45 = vld [vmem:[%s2875_s1 + $0x908] sm:$0xff]  ;;  %v307_v47 = vld [vmem:[%s2875_s1 + $0x900] sm:$0xff]  ;;  %696 = vmatpush1.msra.mxu1 %v315_v43  ;;  %626 = vmatprep.subr.mxu0 %v52_v44 }
  0x19   :  { %v44_v48 = vld [vmem:[%s2875_s1 + $0xc8] sm:$0xff]  ;;  %697 = vmatprep.subr.mxu1 %v308_v45  ;;  %v43_v50 = vld [vmem:[%s2875_s1 + $0xc0] sm:$0xff]  ;;  %627 = vmatpush1.msra.mxu0 %v51_v46 }
  0x1a   :  { %v300_v49 = vld [vmem:[%s2875_s1 + $0x8c8] sm:$0xff]  ;;  %v299_v51 = vld [vmem:[%s2875_s1 + $0x8c0] sm:$0xff]  ;;  %698 = vmatpush1.msra.mxu1 %v307_v47  ;;  %628 = vmatprep.subr.mxu0 %v44_v48 }
  0x1b   :  { %v36_v52 = vld [vmem:[%s2875_s1 + $0x88] sm:$0xff]  ;;  %699 = vmatprep.subr.mxu1 %v300_v49  ;;  %v35_v54 = vld [vmem:[%s2875_s1 + $0x80] sm:$0xff]  ;;  %629 = vmatpush1.msra.mxu0 %v43_v50 }
  0x1c   :  { %v292_v53 = vld [vmem:[%s2875_s1 + $0x888] sm:$0xff]  ;;  %v291_v55 = vld [vmem:[%s2875_s1 + $0x880] sm:$0xff]  ;;  %700 = vmatpush1.msra.mxu1 %v299_v51  ;;  %630 = vmatprep.subr.mxu0 %v36_v52 }
  0x1d   :  { %v28_v56 = vld [vmem:[%s2875_s1 + $0x48] sm:$0xff]  ;;  %701 = vmatprep.subr.mxu1 %v292_v53  ;;  %v27_v58 = vld [vmem:[%s2875_s1 + $0x40] sm:$0xff]  ;;  %631 = vmatpush1.msra.mxu0 %v35_v54 }
  0x1e   :  { %v284_v57 = vld [vmem:[%s2875_s1 + $0x848] sm:$0xff]  ;;  %v283_v59 = vld [vmem:[%s2875_s1 + $0x840] sm:$0xff]  ;;  %702 = vmatpush1.msra.mxu1 %v291_v55  ;;  %632 = vmatprep.subr.mxu0 %v28_v56 }
  0x1f   :  { %v20_v60 = vld [vmem:[%s2875_s1 + $0x8] sm:$0xff]  ;;  %703 = vmatprep.subr.mxu1 %v284_v57  ;;  %v19_v62 = vld [vmem:[%s2875_s1] sm:$0xff]  ;;  %633 = vmatpush1.msra.mxu0 %v27_v58 }
  0x20   :  { %v276_v61 = vld [vmem:[%s2875_s1 + $0x808] sm:$0xff]  ;;  %v275_v63 = vld [vmem:[%s2875_s1 + $0x800] sm:$0xff]  ;;  %704 = vmatpush1.msra.mxu1 %v283_v59  ;;  %634 = vmatprep.subr.mxu0 %v20_v60 }
  0x21   :  { %v268_v0 = vld [vmem:[%s2875_s1 + $0x7c8] sm:$0xff]  ;;  %705 = vmatprep.subr.mxu1 %v276_v61  ;;  %v267_v2 = vld [vmem:[%s2875_s1 + $0x7c0] sm:$0xff]  ;;  %635 = vmatpush1.msra.mxu0 %v19_v62 }
  0x22   :  { %v524_v1 = vld [vmem:[%s2875_s1 + $0xfc8] sm:$0xff]  ;;  %v523_v3 = vld [vmem:[%s2875_s1 + $0xfc0] sm:$0xff]  ;;  %706 = vmatpush1.msra.mxu1 %v275_v63  ;;  %636 = vmatprep.subr.mxu0 %v268_v0 }
  0x23   :  { %v260_v4 = vld [vmem:[%s2875_s1 + $0x788] sm:$0xff]  ;;  %707 = vmatprep.subr.mxu1 %v524_v1  ;;  %v259_v6 = vld [vmem:[%s2875_s1 + $0x780] sm:$0xff]  ;;  %637 = vmatpush2.msra.mxu0 %v267_v2 }
  0x24   :  { %v516_v5 = vld [vmem:[%s2875_s1 + $0xf88] sm:$0xff]  ;;  %v515_v7 = vld [vmem:[%s2875_s1 + $0xf80] sm:$0xff]  ;;  %708 = vmatpush2.msra.mxu1 %v523_v3  ;;  %638 = vmatprep.subr.mxu0 %v260_v4 }
  0x25   :  { %v252_v8 = vld [vmem:[%s2875_s1 + $0x748] sm:$0xff]  ;;  %709 = vmatprep.subr.mxu1 %v516_v5  ;;  %v251_v10 = vld [vmem:[%s2875_s1 + $0x740] sm:$0xff]  ;;  %639 = vmatpush2.msra.mxu0 %v259_v6 }
  0x26   :  { %v508_v9 = vld [vmem:[%s2875_s1 + $0xf48] sm:$0xff]  ;;  %v507_v11 = vld [vmem:[%s2875_s1 + $0xf40] sm:$0xff]  ;;  %710 = vmatpush2.msra.mxu1 %v515_v7  ;;  %640 = vmatprep.subr.mxu0 %v252_v8 }
  0x27   :  { %v244_v12 = vld [vmem:[%s2875_s1 + $0x708] sm:$0xff]  ;;  %711 = vmatprep.subr.mxu1 %v508_v9  ;;  %v243_v14 = vld [vmem:[%s2875_s1 + $0x700] sm:$0xff]  ;;  %641 = vmatpush2.msra.mxu0 %v251_v10 }
  0x28   :  { %v500_v13 = vld [vmem:[%s2875_s1 + $0xf08] sm:$0xff]  ;;  %v499_v15 = vld [vmem:[%s2875_s1 + $0xf00] sm:$0xff]  ;;  %712 = vmatpush2.msra.mxu1 %v507_v11  ;;  %642 = vmatprep.subr.mxu0 %v244_v12  ;;  %v142_v11 = vld [vmem:[%s2875_s1 + $0x3d8] sm:$0xff] }
  0x29   :  { %v236_v16 = vld [vmem:[%s2875_s1 + $0x6c8] sm:$0xff]  ;;  %713 = vmatprep.subr.mxu1 %v500_v13  ;;  %v235_v21 = vld [vmem:[%s2875_s1 + $0x6c0] sm:$0xff]  ;;  %643 = vmatpush2.msra.mxu0 %v243_v14  ;;  %v398_v13 = vld [vmem:[%s2875_s1 + $0xbd8] sm:$0xff] }
  0x2a   :  { %v492_v17 = vld [vmem:[%s2875_s1 + $0xec8] sm:$0xff]  ;;  %v491_v22 = vld [vmem:[%s2875_s1 + $0xec0] sm:$0xff]  ;;  %714 = vmatpush2.msra.mxu1 %v499_v15  ;;  %644 = vmatprep.subr.mxu0 %v236_v16  ;;  %v141_v14 = vld [vmem:[%s2875_s1 + $0x3d0] sm:$0xff] }
  0x2b   :  { %v228_v23 = vld [vmem:[%s2875_s1 + $0x688] sm:$0xff]  ;;  %715 = vmatprep.subr.mxu1 %v492_v17  ;;  %v227_v25 = vld [vmem:[%s2875_s1 + $0x680] sm:$0xff]  ;;  %645 = vmatpush2.msra.mxu0 %v235_v21  ;;  %v397_v15 = vld [vmem:[%s2875_s1 + $0xbd0] sm:$0xff] }
  0x2c   :  { %v484_v24 = vld [vmem:[%s2875_s1 + $0xe88] sm:$0xff]  ;;  %v483_v26 = vld [vmem:[%s2875_s1 + $0xe80] sm:$0xff]  ;;  %716 = vmatpush2.msra.mxu1 %v491_v22  ;;  %646 = vmatprep.subr.mxu0 %v228_v23  ;;  %v134_v16 = vld [vmem:[%s2875_s1 + $0x398] sm:$0xff] }
  0x2d   :  { %v220_v27 = vld [vmem:[%s2875_s1 + $0x648] sm:$0xff]  ;;  %717 = vmatprep.subr.mxu1 %v484_v24  ;;  %v219_v31 = vld [vmem:[%s2875_s1 + $0x640] sm:$0xff]  ;;  %647 = vmatpush2.msra.mxu0 %v227_v25  ;;  %v390_v17 = vld [vmem:[%s2875_s1 + $0xb98] sm:$0xff] }
  0x2e   :  { %v476_v28 = vld [vmem:[%s2875_s1 + $0xe48] sm:$0xff]  ;;  %v475_v32 = vld [vmem:[%s2875_s1 + $0xe40] sm:$0xff]  ;;  %718 = vmatpush2.msra.mxu1 %v483_v26  ;;  %648 = vmatprep.subr.mxu0 %v220_v27  ;;  %v382_v21 = vld [vmem:[%s2875_s1 + $0xb58] sm:$0xff] }
  0x2f   :  { %v212_v33 = vld [vmem:[%s2875_s1 + $0x608] sm:$0xff]  ;;  %719 = vmatprep.subr.mxu1 %v476_v28  ;;  %v211_v35 = vld [vmem:[%s2875_s1 + $0x600] sm:$0xff]  ;;  %649 = vmatpush2.msra.mxu0 %v219_v31  ;;  %v125_v22 = vld [vmem:[%s2875_s1 + $0x350] sm:$0xff] }
  0x30   :  { %v468_v34 = vld [vmem:[%s2875_s1 + $0xe08] sm:$0xff]  ;;  %v467_v36 = vld [vmem:[%s2875_s1 + $0xe00] sm:$0xff]  ;;  %720 = vmatpush2.msra.mxu1 %v475_v32  ;;  %650 = vmatprep.subr.mxu0 %v212_v33  ;;  %v381_v23 = vld [vmem:[%s2875_s1 + $0xb50] sm:$0xff] }
  0x31   :  { %v204_v37 = vld [vmem:[%s2875_s1 + $0x5c8] sm:$0xff]  ;;  %v1243_v39 = vld.sshfl [vmem:[%s2874_s0] sm:$0xff pattern:$0x75316420]  ;;  %721 = vmatprep.subr.mxu1 %v468_v34  ;;  %651 = vmatpush2.msra.mxu0 %v211_v35  ;;  %v118_v24 = vld [vmem:[%s2875_s1 + $0x318] sm:$0xff] }
  0x32   :  { %v460_v38 = vld [vmem:[%s2875_s1 + $0xdc8] sm:$0xff]  ;;  %v203_v41 = vld [vmem:[%s2875_s1 + $0x5c0] sm:$0xff]  ;;  %722 = vmatpush2.msra.mxu1 %v467_v36  ;;  %652 = vmatprep.subr.mxu0 %v204_v37  ;;  %v583_v57 = vcombine.high %v1243_v39, %v1243_v39  ;;  %v1669_v5 = vrot.slane %v1243_v39, %v581_v40  ;;  %v374_v25 = vld [vmem:[%s2875_s1 + $0xb18] sm:$0xff] }
  0x33   :  { %v459_v42 = vld [vmem:[%s2875_s1 + $0xdc0] sm:$0xff]  ;;  %v196_v43 = vld [vmem:[%s2875_s1 + $0x588] sm:$0xff]  ;;  %723 = vmatprep.subr.mxu1 %v460_v38  ;;  %653 = vmatpush2.msra.mxu0 %v203_v41  ;;  %v117_v26 = vld [vmem:[%s2875_s1 + $0x310] sm:$0xff] }
  0x34   :  { %v452_v44 = vld [vmem:[%s2875_s1 + $0xd88] sm:$0xff]  ;;  %v195_v45 = vld [vmem:[%s2875_s1 + $0x580] sm:$0xff]  ;;  %724 = vmatpush2.msra.mxu1 %v459_v42  ;;  %654 = vmatprep.subr.mxu0 %v196_v43  ;;  %v1661_v2 = vrot.slane %v583_v57, %v581_v40  ;;  %v1692_v12 = vcombine.high %v1669_v5, %v1669_v5  ;;  %v373_v27 = vld [vmem:[%s2875_s1 + $0xb10] sm:$0xff] }
  0x35   :  { %v451_v46 = vld [vmem:[%s2875_s1 + $0xd80] sm:$0xff]  ;;  %v188_v47 = vld [vmem:[%s2875_s1 + $0x548] sm:$0xff]  ;;  %725 = vmatprep.subr.mxu1 %v452_v44  ;;  %655 = vmatpush2.msra.mxu0 %v195_v45  ;;  %v110_v28 = vld [vmem:[%s2875_s1 + $0x2d8] sm:$0xff] }
  0x36   :  { %v444_v48 = vld [vmem:[%s2875_s1 + $0xd48] sm:$0xff]  ;;  %v187_v49 = vld [vmem:[%s2875_s1 + $0x540] sm:$0xff]  ;;  %726 = vmatpush2.msra.mxu1 %v451_v46  ;;  %656 = vmatprep.subr.mxu0 %v188_v47  ;;  %v1685_v10 = vcombine.high %v1661_v2, %v1661_v2  ;;  %v109_v31 = vld [vmem:[%s2875_s1 + $0x2d0] sm:$0xff] }
  0x37   :  { %v443_v50 = vld [vmem:[%s2875_s1 + $0xd40] sm:$0xff]  ;;  %v180_v51 = vld [vmem:[%s2875_s1 + $0x508] sm:$0xff]  ;;  %727 = vmatprep.subr.mxu1 %v444_v48  ;;  %657 = vmatpush2.msra.mxu0 %v187_v49  ;;  %v365_v32 = vld [vmem:[%s2875_s1 + $0xad0] sm:$0xff] }
  0x38   :  { %v436_v52 = vld [vmem:[%s2875_s1 + $0xd08] sm:$0xff]  ;;  %v179_v53 = vld [vmem:[%s2875_s1 + $0x500] sm:$0xff]  ;;  %728 = vmatpush2.msra.mxu1 %v443_v50  ;;  %658 = vmatprep.subr.mxu0 %v180_v51  ;;  %v102_v33 = vld [vmem:[%s2875_s1 + $0x298] sm:$0xff] }
  0x39   :  { %v435_v54 = vld [vmem:[%s2875_s1 + $0xd00] sm:$0xff]  ;;  %v172_v55 = vld [vmem:[%s2875_s1 + $0x4c8] sm:$0xff]  ;;  %729 = vmatprep.subr.mxu1 %v436_v52  ;;  %659 = vmatpush2.msra.mxu0 %v179_v53  ;;  %v358_v34 = vld [vmem:[%s2875_s1 + $0xa98] sm:$0xff] }
  0x3a   :  { %v428_v56 = vld [vmem:[%s2875_s1 + $0xcc8] sm:$0xff]  ;;  %v171_v58 = vld [vmem:[%s2875_s1 + $0x4c0] sm:$0xff]  ;;  %730 = vmatpush2.msra.mxu1 %v435_v54  ;;  %660 = vmatprep.subr.mxu0 %v172_v55  ;;  %v101_v35 = vld [vmem:[%s2875_s1 + $0x290] sm:$0xff] }
  0x3b   :  { %v427_v59 = vld [vmem:[%s2875_s1 + $0xcc0] sm:$0xff]  ;;  %v164_v60 = vld [vmem:[%s2875_s1 + $0x488] sm:$0xff]  ;;  %731 = vmatprep.subr.mxu1 %v428_v56  ;;  %661 = vmatpush2.msra.mxu0 %v171_v58  ;;  %v357_v36 = vld [vmem:[%s2875_s1 + $0xa90] sm:$0xff] }
  0x3c   :  { %v420_v61 = vld [vmem:[%s2875_s1 + $0xc88] sm:$0xff]  ;;  %v163_v62 = vld [vmem:[%s2875_s1 + $0x480] sm:$0xff]  ;;  %732 = vmatpush2.msra.mxu1 %v427_v59  ;;  %662 = vmatprep.subr.mxu0 %v164_v60  ;;  %v94_v37 = vld [vmem:[%s2875_s1 + $0x258] sm:$0xff] }
  0x3d   :  { %v419_v63 = vld [vmem:[%s2875_s1 + $0xc80] sm:$0xff]  ;;  %v156_v0 = vld [vmem:[%s2875_s1 + $0x448] sm:$0xff]  ;;  %733 = vmatprep.subr.mxu1 %v420_v61  ;;  %663 = vmatpush2.msra.mxu0 %v163_v62  ;;  %v350_v38 = vld [vmem:[%s2875_s1 + $0xa58] sm:$0xff] }
  0x3e   :  { %v412_v1 = vld [vmem:[%s2875_s1 + $0xc48] sm:$0xff]  ;;  %v155_v3 = vld [vmem:[%s2875_s1 + $0x440] sm:$0xff]  ;;  %734 = vmatpush2.msra.mxu1 %v419_v63  ;;  %664 = vmatprep.subr.mxu0 %v156_v0  ;;  %v93_v39 = vld [vmem:[%s2875_s1 + $0x250] sm:$0xff] }
  0x3f   :  { %v411_v4 = vld [vmem:[%s2875_s1 + $0xc40] sm:$0xff]  ;;  %v148_v6 = vld [vmem:[%s2875_s1 + $0x408] sm:$0xff]  ;;  %735 = vmatprep.subr.mxu1 %v412_v1  ;;  %665 = vmatpush2.msra.mxu0 %v155_v3  ;;  %v349_v40 = vld [vmem:[%s2875_s1 + $0xa50] sm:$0xff] }
  0x40   :  { %v404_v7 = vld [vmem:[%s2875_s1 + $0xc08] sm:$0xff]  ;;  %v147_v8 = vld [vmem:[%s2875_s1 + $0x400] sm:$0xff]  ;;  %736 = vmatpush2.msra.mxu1 %v411_v4  ;;  %666 = vmatprep.subr.mxu0 %v148_v6  ;;  %v86_v41 = vld [vmem:[%s2875_s1 + $0x218] sm:$0xff] }
  0x41   :  { %v403_v9 = vld [vmem:[%s2875_s1 + $0xc00] sm:$0xff]  ;;  %737 = vmatprep.subr.mxu1 %v404_v7  ;;  %667 = vmatpush2.msra.mxu0 %v147_v8  ;;  %v342_v42 = vld [vmem:[%s2875_s1 + $0xa18] sm:$0xff]  ;;  %v85_v43 = vld [vmem:[%s2875_s1 + $0x210] sm:$0xff] }
  0x42   :  { %668 = vmatprep.mubr.f32.mxu0 %v1661_v2  ;;  %738 = vmatpush2.msra.mxu1 %v403_v9  ;;  %v341_v44 = vld [vmem:[%s2875_s1 + $0xa10] sm:$0xff]  ;;  %v78_v45 = vld [vmem:[%s2875_s1 + $0x1d8] sm:$0xff] }
  0x43   :  { %669 = vmatmul.mubr.f32.vlgmr.msra.gmra.mxu0 %v1669_v5  ;;  %739 = vmatprep.mubr.f32.mxu1 %v1685_v10  ;;  %v334_v46 = vld [vmem:[%s2875_s1 + $0x9d8] sm:$0xff]  ;;  %v77_v47 = vld [vmem:[%s2875_s1 + $0x1d0] sm:$0xff] }
  0x44   :  { %746 = vmatprep.subr.mxu0 %v142_v11  ;;  %817 = vmatprep.subr.mxu1 %v398_v13  ;;  %v333_v48 = vld [vmem:[%s2875_s1 + $0x9d0] sm:$0xff]  ;;  %v70_v49 = vld [vmem:[%s2875_s1 + $0x198] sm:$0xff] }
  0x45   :  { %740 = vmatmul.mubr.f32.vlgmr.msra.gmra.mxu1 %v1692_v12  ;;  %747 = vmatpush1.msra.mxu0 %v141_v14  ;;  %v326_v50 = vld [vmem:[%s2875_s1 + $0x998] sm:$0xff]  ;;  %v69_v51 = vld [vmem:[%s2875_s1 + $0x190] sm:$0xff] }
  0x46   :  { %818 = vmatpush1.msra.mxu1 %v397_v15  ;;  %748 = vmatprep.subr.mxu0 %v134_v16  ;;  %v325_v52 = vld [vmem:[%s2875_s1 + $0x990] sm:$0xff]  ;;  %v62_v53 = vld [vmem:[%s2875_s1 + $0x158] sm:$0xff] }
  0x47   :  { %819 = vmatprep.subr.mxu1 %v390_v17  ;;  %749 = vmatpush1.msra.mxu0 %v133_v18  ;;  %v318_v54 = vld [vmem:[%s2875_s1 + $0x958] sm:$0xff]  ;;  %v61_v55 = vld [vmem:[%s2875_s1 + $0x150] sm:$0xff] }
  0x48   :  { %820 = vmatpush1.msra.mxu1 %v389_v19  ;;  %750 = vmatprep.subr.mxu0 %v126_v20  ;;  %v317_v56 = vld [vmem:[%s2875_s1 + $0x950] sm:$0xff]  ;;  %v54_v57 = vld [vmem:[%s2875_s1 + $0x118] sm:$0xff] }
  0x49   :  { %821 = vmatprep.subr.mxu1 %v382_v21  ;;  %751 = vmatpush1.msra.mxu0 %v125_v22  ;;  %v310_v58 = vld [vmem:[%s2875_s1 + $0x918] sm:$0xff]  ;;  %v53_v59 = vld [vmem:[%s2875_s1 + $0x110] sm:$0xff] }
  0x4a   :  { %822 = vmatpush1.msra.mxu1 %v381_v23  ;;  %752 = vmatprep.subr.mxu0 %v118_v24  ;;  %v309_v60 = vld [vmem:[%s2875_s1 + $0x910] sm:$0xff]  ;;  %v46_v61 = vld [vmem:[%s2875_s1 + $0xd8] sm:$0xff] }
  0x4b   :  { %823 = vmatprep.subr.mxu1 %v374_v25  ;;  %753 = vmatpush1.msra.mxu0 %v117_v26  ;;  %v302_v62 = vld [vmem:[%s2875_s1 + $0x8d8] sm:$0xff]  ;;  %v45_v63 = vld [vmem:[%s2875_s1 + $0xd0] sm:$0xff] }
  0x4c   :  { %824 = vmatpush1.msra.mxu1 %v373_v27  ;;  %754 = vmatprep.subr.mxu0 %v110_v28  ;;  %v301_v0 = vld [vmem:[%s2875_s1 + $0x8d0] sm:$0xff]  ;;  %v38_v1 = vld [vmem:[%s2875_s1 + $0x98] sm:$0xff] }
  0x4d   :  { %825 = vmatprep.subr.mxu1 %v366_v30  ;;  %755 = vmatpush1.msra.mxu0 %v109_v31  ;;  %v294_v3 = vld [vmem:[%s2875_s1 + $0x898] sm:$0xff]  ;;  %v37_v4 = vld [vmem:[%s2875_s1 + $0x90] sm:$0xff] }
  0x4e   :  { %826 = vmatpush1.msra.mxu1 %v365_v32  ;;  %756 = vmatprep.subr.mxu0 %v102_v33  ;;  %v293_v6 = vld [vmem:[%s2875_s1 + $0x890] sm:$0xff]  ;;  %v30_v7 = vld [vmem:[%s2875_s1 + $0x58] sm:$0xff] }
  0x4f   :  { %827 = vmatprep.subr.mxu1 %v358_v34  ;;  %757 = vmatpush1.msra.mxu0 %v101_v35  ;;  %v286_v8 = vld [vmem:[%s2875_s1 + $0x858] sm:$0xff]  ;;  %v29_v9 = vld [vmem:[%s2875_s1 + $0x50] sm:$0xff] }
  0x50   :  { %828 = vmatpush1.msra.mxu1 %v357_v36  ;;  %758 = vmatprep.subr.mxu0 %v94_v37  ;;  %v285_v11 = vld [vmem:[%s2875_s1 + $0x850] sm:$0xff]  ;;  %v22_v13 = vld [vmem:[%s2875_s1 + $0x18] sm:$0xff] }
  0x51   :  { %829 = vmatprep.subr.mxu1 %v350_v38  ;;  %759 = vmatpush1.msra.mxu0 %v93_v39  ;;  %v278_v14 = vld [vmem:[%s2875_s1 + $0x818] sm:$0xff]  ;;  %v21_v15 = vld [vmem:[%s2875_s1 + $0x10] sm:$0xff] }
  0x52   :  { %830 = vmatpush1.msra.mxu1 %v349_v40  ;;  %760 = vmatprep.subr.mxu0 %v86_v41  ;;  %v277_v16 = vld [vmem:[%s2875_s1 + $0x810] sm:$0xff]  ;;  %v270_v17 = vld [vmem:[%s2875_s1 + $0x7d8] sm:$0xff] }
  0x53   :  { %831 = vmatprep.subr.mxu1 %v342_v42  ;;  %761 = vmatpush1.msra.mxu0 %v85_v43  ;;  %v526_v18 = vld [vmem:[%s2875_s1 + $0xfd8] sm:$0xff]  ;;  %v269_v19 = vld [vmem:[%s2875_s1 + $0x7d0] sm:$0xff] }
  0x54   :  { %832 = vmatpush1.msra.mxu1 %v341_v44  ;;  %762 = vmatprep.subr.mxu0 %v78_v45  ;;  %v525_v20 = vld [vmem:[%s2875_s1 + $0xfd0] sm:$0xff]  ;;  %v262_v21 = vld [vmem:[%s2875_s1 + $0x798] sm:$0xff] }
  0x55   :  { %833 = vmatprep.subr.mxu1 %v334_v46  ;;  %763 = vmatpush1.msra.mxu0 %v77_v47  ;;  %v518_v22 = vld [vmem:[%s2875_s1 + $0xf98] sm:$0xff]  ;;  %v261_v23 = vld [vmem:[%s2875_s1 + $0x790] sm:$0xff] }
  0x56   :  { %834 = vmatpush1.msra.mxu1 %v333_v48  ;;  %764 = vmatprep.subr.mxu0 %v70_v49  ;;  %v517_v24 = vld [vmem:[%s2875_s1 + $0xf90] sm:$0xff]  ;;  %v254_v25 = vld [vmem:[%s2875_s1 + $0x758] sm:$0xff] }
  0x57   :  { %835 = vmatprep.subr.mxu1 %v326_v50  ;;  %765 = vmatpush1.msra.mxu0 %v69_v51  ;;  %v510_v26 = vld [vmem:[%s2875_s1 + $0xf58] sm:$0xff]  ;;  %v253_v27 = vld [vmem:[%s2875_s1 + $0x750] sm:$0xff] }
  0x58   :  { %836 = vmatpush1.msra.mxu1 %v325_v52  ;;  %766 = vmatprep.subr.mxu0 %v62_v53  ;;  %v509_v28 = vld [vmem:[%s2875_s1 + $0xf50] sm:$0xff]  ;;  %v246_v30 = vld [vmem:[%s2875_s1 + $0x718] sm:$0xff] }
  0x59   :  { %837 = vmatprep.subr.mxu1 %v318_v54  ;;  %767 = vmatpush1.msra.mxu0 %v61_v55  ;;  %v502_v31 = vld [vmem:[%s2875_s1 + $0xf18] sm:$0xff]  ;;  %v245_v32 = vld [vmem:[%s2875_s1 + $0x710] sm:$0xff] }
  0x5a   :  { %838 = vmatpush1.msra.mxu1 %v317_v56  ;;  %768 = vmatprep.subr.mxu0 %v54_v57  ;;  %v501_v33 = vld [vmem:[%s2875_s1 + $0xf10] sm:$0xff]  ;;  %v238_v34 = vld [vmem:[%s2875_s1 + $0x6d8] sm:$0xff] }
  0x5b   :  { %839 = vmatprep.subr.mxu1 %v310_v58  ;;  %769 = vmatpush1.msra.mxu0 %v53_v59  ;;  %v494_v35 = vld [vmem:[%s2875_s1 + $0xed8] sm:$0xff]  ;;  %v237_v36 = vld [vmem:[%s2875_s1 + $0x6d0] sm:$0xff] }
  0x5c   :  { %840 = vmatpush1.msra.mxu1 %v309_v60  ;;  %770 = vmatprep.subr.mxu0 %v46_v61  ;;  %v493_v37 = vld [vmem:[%s2875_s1 + $0xed0] sm:$0xff]  ;;  %v230_v38 = vld [vmem:[%s2875_s1 + $0x698] sm:$0xff] }
  0x5d   :  { %841 = vmatprep.subr.mxu1 %v302_v62  ;;  %771 = vmatpush1.msra.mxu0 %v45_v63  ;;  %v486_v39 = vld [vmem:[%s2875_s1 + $0xe98] sm:$0xff]  ;;  %v229_v40 = vld [vmem:[%s2875_s1 + $0x690] sm:$0xff] }
  0x5e   :  { %842 = vmatpush1.msra.mxu1 %v301_v0  ;;  %772 = vmatprep.subr.mxu0 %v38_v1  ;;  %v485_v41 = vld [vmem:[%s2875_s1 + $0xe90] sm:$0xff]  ;;  %v222_v42 = vld [vmem:[%s2875_s1 + $0x658] sm:$0xff] }
  0x5f   :  { %843 = vmatprep.subr.mxu1 %v294_v3  ;;  %773 = vmatpush1.msra.mxu0 %v37_v4  ;;  %v478_v43 = vld [vmem:[%s2875_s1 + $0xe58] sm:$0xff]  ;;  %v221_v44 = vld [vmem:[%s2875_s1 + $0x650] sm:$0xff] }
  0x60   :  { %844 = vmatpush1.msra.mxu1 %v293_v6  ;;  %774 = vmatprep.subr.mxu0 %v30_v7  ;;  %v477_v45 = vld [vmem:[%s2875_s1 + $0xe50] sm:$0xff]  ;;  %v214_v46 = vld [vmem:[%s2875_s1 + $0x618] sm:$0xff] }
  0x61   :  { %845 = vmatprep.subr.mxu1 %v286_v8  ;;  %775 = vmatpush1.msra.mxu0 %v29_v9  ;;  %v470_v47 = vld [vmem:[%s2875_s1 + $0xe18] sm:$0xff]  ;;  %v213_v48 = vld [vmem:[%s2875_s1 + $0x610] sm:$0xff] }
  0x62   :  { %846 = vmatpush1.msra.mxu1 %v285_v11  ;;  %776 = vmatprep.subr.mxu0 %v22_v13  ;;  %v469_v49 = vld [vmem:[%s2875_s1 + $0xe10] sm:$0xff]  ;;  %v206_v50 = vld [vmem:[%s2875_s1 + $0x5d8] sm:$0xff] }
  0x63   :  { %847 = vmatprep.subr.mxu1 %v278_v14  ;;  %777 = vmatpush1.msra.mxu0 %v21_v15  ;;  %v462_v51 = vld [vmem:[%s2875_s1 + $0xdd8] sm:$0xff]  ;;  %v205_v52 = vld [vmem:[%s2875_s1 + $0x5d0] sm:$0xff] }
  0x64   :  { %848 = vmatpush1.msra.mxu1 %v277_v16  ;;  %778 = vmatprep.subr.mxu0 %v270_v17  ;;  %v461_v53 = vld [vmem:[%s2875_s1 + $0xdd0] sm:$0xff]  ;;  %v198_v54 = vld [vmem:[%s2875_s1 + $0x598] sm:$0xff] }
  0x65   :  { %849 = vmatprep.subr.mxu1 %v526_v18  ;;  %779 = vmatpush2.msra.mxu0 %v269_v19  ;;  %v454_v55 = vld [vmem:[%s2875_s1 + $0xd98] sm:$0xff]  ;;  %v197_v56 = vld [vmem:[%s2875_s1 + $0x590] sm:$0xff] }
  0x66   :  { %850 = vmatpush2.msra.mxu1 %v525_v20  ;;  %780 = vmatprep.subr.mxu0 %v262_v21  ;;  %v453_v57 = vld [vmem:[%s2875_s1 + $0xd90] sm:$0xff]  ;;  %v190_v58 = vld [vmem:[%s2875_s1 + $0x558] sm:$0xff] }
  0x67   :  { %851 = vmatprep.subr.mxu1 %v518_v22  ;;  %781 = vmatpush2.msra.mxu0 %v261_v23  ;;  %v446_v59 = vld [vmem:[%s2875_s1 + $0xd58] sm:$0xff]  ;;  %v189_v60 = vld [vmem:[%s2875_s1 + $0x550] sm:$0xff]  ;;  %v144_v22 = vld [vmem:[%s2875_s1 + $0x3e8] sm:$0xff] }
  0x68   :  { %852 = vmatpush2.msra.mxu1 %v517_v24  ;;  %782 = vmatprep.subr.mxu0 %v254_v25  ;;  %v445_v61 = vld [vmem:[%s2875_s1 + $0xd50] sm:$0xff]  ;;  %v182_v62 = vld [vmem:[%s2875_s1 + $0x518] sm:$0xff]  ;;  %v400_v23 = vld [vmem:[%s2875_s1 + $0xbe8] sm:$0xff] }
  0x69   :  { %853 = vmatprep.subr.mxu1 %v510_v26  ;;  %783 = vmatpush2.msra.mxu0 %v253_v27  ;;  %v438_v63 = vld [vmem:[%s2875_s1 + $0xd18] sm:$0xff]  ;;  %v181_v0 = vld [vmem:[%s2875_s1 + $0x510] sm:$0xff]  ;;  %v143_v24 = vld [vmem:[%s2875_s1 + $0x3e0] sm:$0xff] }
  0x6a   :  { %854 = vmatpush2.msra.mxu1 %v509_v28  ;;  %784 = vmatprep.subr.mxu0 %v246_v30  ;;  %v437_v1 = vld [vmem:[%s2875_s1 + $0xd10] sm:$0xff]  ;;  %v174_v3 = vld [vmem:[%s2875_s1 + $0x4d8] sm:$0xff]  ;;  %v399_v25 = vld [vmem:[%s2875_s1 + $0xbe0] sm:$0xff] }
  0x6b   :  { %855 = vmatprep.subr.mxu1 %v502_v31  ;;  %785 = vmatpush2.msra.mxu0 %v245_v32  ;;  %v430_v4 = vld [vmem:[%s2875_s1 + $0xcd8] sm:$0xff]  ;;  %v173_v6 = vld [vmem:[%s2875_s1 + $0x4d0] sm:$0xff]  ;;  %v136_v26 = vld [vmem:[%s2875_s1 + $0x3a8] sm:$0xff] }
  0x6c   :  { %856 = vmatpush2.msra.mxu1 %v501_v33  ;;  %786 = vmatprep.subr.mxu0 %v238_v34  ;;  %v429_v7 = vld [vmem:[%s2875_s1 + $0xcd0] sm:$0xff]  ;;  %v166_v8 = vld [vmem:[%s2875_s1 + $0x498] sm:$0xff]  ;;  %v392_v27 = vld [vmem:[%s2875_s1 + $0xba8] sm:$0xff] }
  0x6d   :  { %857 = vmatprep.subr.mxu1 %v494_v35  ;;  %787 = vmatpush2.msra.mxu0 %v237_v36  ;;  %v422_v9 = vld [vmem:[%s2875_s1 + $0xc98] sm:$0xff]  ;;  %v165_v11 = vld [vmem:[%s2875_s1 + $0x490] sm:$0xff]  ;;  %v135_v28 = vld [vmem:[%s2875_s1 + $0x3a0] sm:$0xff] }
  0x6e   :  { %858 = vmatpush2.msra.mxu1 %v493_v37  ;;  %788 = vmatprep.subr.mxu0 %v230_v38  ;;  %v421_v13 = vld [vmem:[%s2875_s1 + $0xc90] sm:$0xff]  ;;  %v158_v14 = vld [vmem:[%s2875_s1 + $0x458] sm:$0xff]  ;;  %v391_v30 = vld [vmem:[%s2875_s1 + $0xba0] sm:$0xff] }
  0x6f   :  { %859 = vmatprep.subr.mxu1 %v486_v39  ;;  %789 = vmatpush2.msra.mxu0 %v229_v40  ;;  %v414_v15 = vld [vmem:[%s2875_s1 + $0xc58] sm:$0xff]  ;;  %v157_v16 = vld [vmem:[%s2875_s1 + $0x450] sm:$0xff]  ;;  %v128_v31 = vld [vmem:[%s2875_s1 + $0x368] sm:$0xff] }
  0x70   :  { %860 = vmatpush2.msra.mxu1 %v485_v41  ;;  %790 = vmatprep.subr.mxu0 %v222_v42  ;;  %v413_v17 = vld [vmem:[%s2875_s1 + $0xc50] sm:$0xff]  ;;  %v150_v18 = vld [vmem:[%s2875_s1 + $0x418] sm:$0xff]  ;;  %v384_v32 = vld [vmem:[%s2875_s1 + $0xb68] sm:$0xff] }
  0x71   :  { %861 = vmatprep.subr.mxu1 %v478_v43  ;;  %791 = vmatpush2.msra.mxu0 %v221_v44  ;;  %v406_v19 = vld [vmem:[%s2875_s1 + $0xc18] sm:$0xff]  ;;  %v149_v20 = vld [vmem:[%s2875_s1 + $0x410] sm:$0xff]  ;;  %v127_v33 = vld [vmem:[%s2875_s1 + $0x360] sm:$0xff] }
  0x72   :  { %862 = vmatpush2.msra.mxu1 %v477_v45  ;;  %792 = vmatprep.subr.mxu0 %v214_v46  ;;  %v405_v21 = vld [vmem:[%s2875_s1 + $0xc10] sm:$0xff]  ;;  %v383_v34 = vld [vmem:[%s2875_s1 + $0xb60] sm:$0xff]  ;;  %v120_v35 = vld [vmem:[%s2875_s1 + $0x328] sm:$0xff] }
  0x73   :  { %863 = vmatprep.subr.mxu1 %v470_v47  ;;  %793 = vmatpush2.msra.mxu0 %v213_v48  ;;  %v376_v36 = vld [vmem:[%s2875_s1 + $0xb28] sm:$0xff]  ;;  %v119_v37 = vld [vmem:[%s2875_s1 + $0x320] sm:$0xff] }
  0x74   :  { %864 = vmatpush2.msra.mxu1 %v469_v49  ;;  %794 = vmatprep.subr.mxu0 %v206_v50  ;;  %v375_v38 = vld [vmem:[%s2875_s1 + $0xb20] sm:$0xff]  ;;  %v112_v39 = vld [vmem:[%s2875_s1 + $0x2e8] sm:$0xff] }
  0x75   :  { %865 = vmatprep.subr.mxu1 %v462_v51  ;;  %795 = vmatpush2.msra.mxu0 %v205_v52  ;;  %v368_v40 = vld [vmem:[%s2875_s1 + $0xae8] sm:$0xff]  ;;  %v111_v41 = vld [vmem:[%s2875_s1 + $0x2e0] sm:$0xff] }
  0x76   :  { %866 = vmatpush2.msra.mxu1 %v461_v53  ;;  %796 = vmatprep.subr.mxu0 %v198_v54  ;;  %v367_v42 = vld [vmem:[%s2875_s1 + $0xae0] sm:$0xff]  ;;  %v104_v43 = vld [vmem:[%s2875_s1 + $0x2a8] sm:$0xff] }
  0x77   :  { %867 = vmatprep.subr.mxu1 %v454_v55  ;;  %797 = vmatpush2.msra.mxu0 %v197_v56  ;;  %v360_v44 = vld [vmem:[%s2875_s1 + $0xaa8] sm:$0xff]  ;;  %v103_v45 = vld [vmem:[%s2875_s1 + $0x2a0] sm:$0xff] }
  0x78   :  { %868 = vmatpush2.msra.mxu1 %v453_v57  ;;  %798 = vmatprep.subr.mxu0 %v190_v58  ;;  %v359_v46 = vld [vmem:[%s2875_s1 + $0xaa0] sm:$0xff]  ;;  %v96_v47 = vld [vmem:[%s2875_s1 + $0x268] sm:$0xff] }
  0x79   :  { %869 = vmatprep.subr.mxu1 %v446_v59  ;;  %799 = vmatpush2.msra.mxu0 %v189_v60  ;;  %v352_v48 = vld [vmem:[%s2875_s1 + $0xa68] sm:$0xff]  ;;  %v95_v49 = vld [vmem:[%s2875_s1 + $0x260] sm:$0xff] }
  0x7a   :  { %870 = vmatpush2.msra.mxu1 %v445_v61  ;;  %800 = vmatprep.subr.mxu0 %v182_v62  ;;  %v351_v50 = vld [vmem:[%s2875_s1 + $0xa60] sm:$0xff]  ;;  %v88_v51 = vld [vmem:[%s2875_s1 + $0x228] sm:$0xff] }
  0x7b   :  { %871 = vmatprep.subr.mxu1 %v438_v63  ;;  %801 = vmatpush2.msra.mxu0 %v181_v0  ;;  %v344_v52 = vld [vmem:[%s2875_s1 + $0xa28] sm:$0xff]  ;;  %v87_v53 = vld [vmem:[%s2875_s1 + $0x220] sm:$0xff] }
  0x7c   :  { %872 = vmatpush2.msra.mxu1 %v437_v1  ;;  %802 = vmatprep.subr.mxu0 %v174_v3  ;;  %v343_v54 = vld [vmem:[%s2875_s1 + $0xa20] sm:$0xff]  ;;  %v80_v55 = vld [vmem:[%s2875_s1 + $0x1e8] sm:$0xff] }
  0x7d   :  { %873 = vmatprep.subr.mxu1 %v430_v4  ;;  %803 = vmatpush2.msra.mxu0 %v173_v6  ;;  %v336_v56 = vld [vmem:[%s2875_s1 + $0x9e8] sm:$0xff]  ;;  %v79_v57 = vld [vmem:[%s2875_s1 + $0x1e0] sm:$0xff] }
  0x7e   :  { %874 = vmatpush2.msra.mxu1 %v429_v7  ;;  %804 = vmatprep.subr.mxu0 %v166_v8  ;;  %v335_v58 = vld [vmem:[%s2875_s1 + $0x9e0] sm:$0xff]  ;;  %v72_v59 = vld [vmem:[%s2875_s1 + $0x1a8] sm:$0xff] }
  0x7f   :  { %875 = vmatprep.subr.mxu1 %v422_v9  ;;  %805 = vmatpush2.msra.mxu0 %v165_v11  ;;  %v328_v60 = vld [vmem:[%s2875_s1 + $0x9a8] sm:$0xff]  ;;  %v71_v61 = vld [vmem:[%s2875_s1 + $0x1a0] sm:$0xff] }
  0x80   :  { %876 = vmatpush2.msra.mxu1 %v421_v13  ;;  %806 = vmatprep.subr.mxu0 %v158_v14  ;;  %v327_v62 = vld [vmem:[%s2875_s1 + $0x9a0] sm:$0xff]  ;;  %v64_v63 = vld [vmem:[%s2875_s1 + $0x168] sm:$0xff] }
  0x81   :  { %877 = vmatprep.subr.mxu1 %v414_v15  ;;  %807 = vmatpush2.msra.mxu0 %v157_v16  ;;  %v320_v0 = vld [vmem:[%s2875_s1 + $0x968] sm:$0xff]  ;;  %v63_v1 = vld [vmem:[%s2875_s1 + $0x160] sm:$0xff] }
  0x82   :  { %878 = vmatpush2.msra.mxu1 %v413_v17  ;;  %808 = vmatprep.subr.mxu0 %v150_v18  ;;  %v319_v3 = vld [vmem:[%s2875_s1 + $0x960] sm:$0xff]  ;;  %v56_v4 = vld [vmem:[%s2875_s1 + $0x128] sm:$0xff] }
  0x83   :  { %879 = vmatprep.subr.mxu1 %v406_v19  ;;  %809 = vmatpush2.msra.mxu0 %v149_v20  ;;  %v312_v6 = vld [vmem:[%s2875_s1 + $0x928] sm:$0xff]  ;;  %v55_v7 = vld [vmem:[%s2875_s1 + $0x120] sm:$0xff] }
  0x84   :  { %810 = vmatprep.mubr.f32.mxu0 %v1661_v2  ;;  %880 = vmatpush2.msra.mxu1 %v405_v21  ;;  %v311_v8 = vld [vmem:[%s2875_s1 + $0x920] sm:$0xff]  ;;  %v48_v9 = vld [vmem:[%s2875_s1 + $0xe8] sm:$0xff] }
  0x85   :  { %811 = vmatmul.mubr.f32.vlgmr.msra.gmra.mxu0 %v1669_v5  ;;  %881 = vmatprep.mubr.f32.mxu1 %v1685_v10  ;;  %v304_v11 = vld [vmem:[%s2875_s1 + $0x8e8] sm:$0xff]  ;;  %v47_v13 = vld [vmem:[%s2875_s1 + $0xe0] sm:$0xff] }
  0x86   :  { %888 = vmatprep.subr.mxu0 %v144_v22  ;;  %959 = vmatprep.subr.mxu1 %v400_v23  ;;  %v303_v14 = vld [vmem:[%s2875_s1 + $0x8e0] sm:$0xff]  ;;  %v40_v15 = vld [vmem:[%s2875_s1 + $0xa8] sm:$0xff] }
  0x87   :  { %882 = vmatmul.mubr.f32.vlgmr.msra.gmra.mxu1 %v1692_v12  ;;  %889 = vmatpush1.msra.mxu0 %v143_v24  ;;  %v296_v16 = vld [vmem:[%s2875_s1 + $0x8a8] sm:$0xff]  ;;  %v39_v17 = vld [vmem:[%s2875_s1 + $0xa0] sm:$0xff] }
  0x88   :  { %960 = vmatpush1.msra.mxu1 %v399_v25  ;;  %890 = vmatprep.subr.mxu0 %v136_v26  ;;  %v295_v18 = vld [vmem:[%s2875_s1 + $0x8a0] sm:$0xff]  ;;  %v32_v19 = vld [vmem:[%s2875_s1 + $0x68] sm:$0xff] }
  0x89   :  { %961 = vmatprep.subr.mxu1 %v392_v27  ;;  %891 = vmatpush1.msra.mxu0 %v135_v28  ;;  %v288_v20 = vld [vmem:[%s2875_s1 + $0x868] sm:$0xff]  ;;  %v31_v21 = vld [vmem:[%s2875_s1 + $0x60] sm:$0xff] }
  0x8a   :  { %962 = vmatpush1.msra.mxu1 %v391_v30  ;;  %892 = vmatprep.subr.mxu0 %v128_v31  ;;  %v287_v22 = vld [vmem:[%s2875_s1 + $0x860] sm:$0xff]  ;;  %v24_v23 = vld [vmem:[%s2875_s1 + $0x28] sm:$0xff] }
  0x8b   :  { %963 = vmatprep.subr.mxu1 %v384_v32  ;;  %893 = vmatpush1.msra.mxu0 %v127_v33  ;;  %v280_v24 = vld [vmem:[%s2875_s1 + $0x828] sm:$0xff]  ;;  %v23_v25 = vld [vmem:[%s2875_s1 + $0x20] sm:$0xff] }
  0x8c   :  { %964 = vmatpush1.msra.mxu1 %v383_v34  ;;  %894 = vmatprep.subr.mxu0 %v120_v35  ;;  %v279_v26 = vld [vmem:[%s2875_s1 + $0x820] sm:$0xff]  ;;  %v272_v27 = vld [vmem:[%s2875_s1 + $0x7e8] sm:$0xff] }
  0x8d   :  { %965 = vmatprep.subr.mxu1 %v376_v36  ;;  %895 = vmatpush1.msra.mxu0 %v119_v37  ;;  %v528_v28 = vld [vmem:[%s2875_s1 + $0xfe8] sm:$0xff]  ;;  %v271_v30 = vld [vmem:[%s2875_s1 + $0x7e0] sm:$0xff] }
  0x8e   :  { %966 = vmatpush1.msra.mxu1 %v375_v38  ;;  %896 = vmatprep.subr.mxu0 %v112_v39  ;;  %v527_v31 = vld [vmem:[%s2875_s1 + $0xfe0] sm:$0xff]  ;;  %v264_v32 = vld [vmem:[%s2875_s1 + $0x7a8] sm:$0xff] }
  0x8f   :  { %967 = vmatprep.subr.mxu1 %v368_v40  ;;  %897 = vmatpush1.msra.mxu0 %v111_v41  ;;  %v520_v33 = vld [vmem:[%s2875_s1 + $0xfa8] sm:$0xff]  ;;  %v263_v34 = vld [vmem:[%s2875_s1 + $0x7a0] sm:$0xff] }
  0x90   :  { %968 = vmatpush1.msra.mxu1 %v367_v42  ;;  %898 = vmatprep.subr.mxu0 %v104_v43  ;;  %v519_v35 = vld [vmem:[%s2875_s1 + $0xfa0] sm:$0xff]  ;;  %v256_v36 = vld [vmem:[%s2875_s1 + $0x768] sm:$0xff] }
  0x91   :  { %969 = vmatprep.subr.mxu1 %v360_v44  ;;  %899 = vmatpush1.msra.mxu0 %v103_v45  ;;  %v512_v37 = vld [vmem:[%s2875_s1 + $0xf68] sm:$0xff]  ;;  %v255_v38 = vld [vmem:[%s2875_s1 + $0x760] sm:$0xff] }
  0x92   :  { %970 = vmatpush1.msra.mxu1 %v359_v46  ;;  %900 = vmatprep.subr.mxu0 %v96_v47  ;;  %v511_v39 = vld [vmem:[%s2875_s1 + $0xf60] sm:$0xff]  ;;  %v248_v40 = vld [vmem:[%s2875_s1 + $0x728] sm:$0xff] }
  0x93   :  { %971 = vmatprep.subr.mxu1 %v352_v48  ;;  %901 = vmatpush1.msra.mxu0 %v95_v49  ;;  %v504_v41 = vld [vmem:[%s2875_s1 + $0xf28] sm:$0xff]  ;;  %v247_v42 = vld [vmem:[%s2875_s1 + $0x720] sm:$0xff] }
  0x94   :  { %972 = vmatpush1.msra.mxu1 %v351_v50  ;;  %902 = vmatprep.subr.mxu0 %v88_v51  ;;  %v503_v43 = vld [vmem:[%s2875_s1 + $0xf20] sm:$0xff]  ;;  %v240_v44 = vld [vmem:[%s2875_s1 + $0x6e8] sm:$0xff] }
  0x95   :  { %973 = vmatprep.subr.mxu1 %v344_v52  ;;  %903 = vmatpush1.msra.mxu0 %v87_v53  ;;  %v496_v45 = vld [vmem:[%s2875_s1 + $0xee8] sm:$0xff]  ;;  %v239_v46 = vld [vmem:[%s2875_s1 + $0x6e0] sm:$0xff] }
  0x96   :  { %974 = vmatpush1.msra.mxu1 %v343_v54  ;;  %904 = vmatprep.subr.mxu0 %v80_v55  ;;  %v495_v47 = vld [vmem:[%s2875_s1 + $0xee0] sm:$0xff]  ;;  %v232_v48 = vld [vmem:[%s2875_s1 + $0x6a8] sm:$0xff] }
  0x97   :  { %975 = vmatprep.subr.mxu1 %v336_v56  ;;  %905 = vmatpush1.msra.mxu0 %v79_v57  ;;  %v488_v49 = vld [vmem:[%s2875_s1 + $0xea8] sm:$0xff] }
  0x98   :  { %976 = vmatpush1.msra.mxu1 %v335_v58  ;;  %906 = vmatprep.subr.mxu0 %v72_v59 }
  0x99   :  { %977 = vmatprep.subr.mxu1 %v328_v60  ;;  %907 = vmatpush1.msra.mxu0 %v71_v61 }
  0x9a   :  { %978 = vmatpush1.msra.mxu1 %v327_v62  ;;  %908 = vmatprep.subr.mxu0 %v64_v63 }
  0x9b   :  { %979 = vmatprep.subr.mxu1 %v320_v0  ;;  %909 = vmatpush1.msra.mxu0 %v63_v1 }
  0x9c   :  { %980 = vmatpush1.msra.mxu1 %v319_v3  ;;  %910 = vmatprep.subr.mxu0 %v56_v4 }
  0x9d   :  { %981 = vmatprep.subr.mxu1 %v312_v6  ;;  %911 = vmatpush1.msra.mxu0 %v55_v7 }
  0x9e   :  { %982 = vmatpush1.msra.mxu1 %v311_v8  ;;  %912 = vmatprep.subr.mxu0 %v48_v9 }
  0x9f   :  { %983 = vmatprep.subr.mxu1 %v304_v11  ;;  %913 = vmatpush1.msra.mxu0 %v47_v13 }
  0xa0   :  { %984 = vmatpush1.msra.mxu1 %v303_v14  ;;  %914 = vmatprep.subr.mxu0 %v40_v15 }
  0xa1   :  { %985 = vmatprep.subr.mxu1 %v296_v16  ;;  %915 = vmatpush1.msra.mxu0 %v39_v17 }
  0xa2   :  { %986 = vmatpush1.msra.mxu1 %v295_v18  ;;  %916 = vmatprep.subr.mxu0 %v32_v19 }
  0xa3   :  { %987 = vmatprep.subr.mxu1 %v288_v20  ;;  %917 = vmatpush1.msra.mxu0 %v31_v21 }
  0xa4   :  { %988 = vmatpush1.msra.mxu1 %v287_v22  ;;  %918 = vmatprep.subr.mxu0 %v24_v23 }
  0xa5   :  { %989 = vmatprep.subr.mxu1 %v280_v24  ;;  %919 = vmatpush1.msra.mxu0 %v23_v25 }
  0xa6   :  { %990 = vmatpush1.msra.mxu1 %v279_v26  ;;  %920 = vmatprep.subr.mxu0 %v272_v27 }
  0xa7   :  { %991 = vmatprep.subr.mxu1 %v528_v28  ;;  %921 = vmatpush2.msra.mxu0 %v271_v30 }
  0xa8   :  { %992 = vmatpush2.msra.mxu1 %v527_v31  ;;  %922 = vmatprep.subr.mxu0 %v264_v32 }
  0xa9   :  { %993 = vmatprep.subr.mxu1 %v520_v33  ;;  %923 = vmatpush2.msra.mxu0 %v263_v34 }
  0xaa   :  { %994 = vmatpush2.msra.mxu1 %v519_v35  ;;  %924 = vmatprep.subr.mxu0 %v256_v36 }
  0xab   :  { %995 = vmatprep.subr.mxu1 %v512_v37  ;;  %925 = vmatpush2.msra.mxu0 %v255_v38 }
  0xac   :  { %996 = vmatpush2.msra.mxu1 %v511_v39  ;;  %926 = vmatprep.subr.mxu0 %v248_v40 }
  0xad   :  { %997 = vmatprep.subr.mxu1 %v504_v41  ;;  %927 = vmatpush2.msra.mxu0 %v247_v42 }
  0xae   :  { %998 = vmatpush2.msra.mxu1 %v503_v43 }
  0xaf   :  { %8 = vsyncpa [#allocation3], 0  ;;  %928 = vmatprep.subr.mxu0 %v240_v44  ;;  %999 = vmatprep.subr.mxu1 %v496_v45  ;;  %v231_v50 = vld [vmem:[%s2875_s1 + $0x6a0] sm:$0xff]  ;;  %v224_v52 = vld [vmem:[%s2875_s1 + $0x668] sm:$0xff]  ;;  %vm1217_vm0 = vcmask 1041408   ;;  %vm1218_vm1 = vcmask 1043458  }
  0xb0   :  { %v487_v51 = vld [vmem:[%s2875_s1 + $0xea0] sm:$0xff]  ;;  %929 = vmatpush2.msra.mxu0 %v239_v46  ;;  %1000 = vmatpush2.msra.mxu1 %v495_v47  ;;  %v480_v53 = vld [vmem:[%s2875_s1 + $0xe68] sm:$0xff]  ;;  %v146_v33 = vld [vmem:[%s2875_s1 + $0x3f8] sm:$0xff]  ;;  %vm1220_vm3 = vcmask 1045508   ;;  %vm1222_vm5 = vcmask 850950  }
  0xb1   :  { %930 = vmatprep.subr.mxu0 %v232_v48  ;;  %1001 = vmatprep.subr.mxu1 %v488_v49  ;;  %v223_v54 = vld [vmem:[%s2875_s1 + $0x660] sm:$0xff]  ;;  %v216_v56 = vld [vmem:[%s2875_s1 + $0x628] sm:$0xff]  ;;  %v402_v34 = vld [vmem:[%s2875_s1 + $0xbf8] sm:$0xff] }
  0xb2   :  { %v479_v55 = vld [vmem:[%s2875_s1 + $0xe60] sm:$0xff]  ;;  %931 = vmatpush2.msra.mxu0 %v231_v50  ;;  %1002 = vmatpush2.msra.mxu1 %v487_v51  ;;  %v472_v57 = vld [vmem:[%s2875_s1 + $0xe28] sm:$0xff]  ;;  %v145_v35 = vld [vmem:[%s2875_s1 + $0x3f0] sm:$0xff] }
  0xb3   :  { %932 = vmatprep.subr.mxu0 %v224_v52  ;;  %1003 = vmatprep.subr.mxu1 %v480_v53  ;;  %v215_v58 = vld [vmem:[%s2875_s1 + $0x620] sm:$0xff]  ;;  %v208_v60 = vld [vmem:[%s2875_s1 + $0x5e8] sm:$0xff]  ;;  %v401_v36 = vld [vmem:[%s2875_s1 + $0xbf0] sm:$0xff] }
  0xb4   :  { %v471_v59 = vld [vmem:[%s2875_s1 + $0xe20] sm:$0xff]  ;;  %933 = vmatpush2.msra.mxu0 %v223_v54  ;;  %1004 = vmatpush2.msra.mxu1 %v479_v55  ;;  %v464_v61 = vld [vmem:[%s2875_s1 + $0xde8] sm:$0xff]  ;;  %v138_v37 = vld [vmem:[%s2875_s1 + $0x3b8] sm:$0xff] }
  0xb5   :  { %934 = vmatprep.subr.mxu0 %v216_v56  ;;  %1005 = vmatprep.subr.mxu1 %v472_v57  ;;  %v207_v62 = vld [vmem:[%s2875_s1 + $0x5e0] sm:$0xff]  ;;  %v200_v0 = vld [vmem:[%s2875_s1 + $0x5a8] sm:$0xff]  ;;  %v394_v38 = vld [vmem:[%s2875_s1 + $0xbb8] sm:$0xff] }
  0xb6   :  { %v463_v63 = vld [vmem:[%s2875_s1 + $0xde0] sm:$0xff]  ;;  %935 = vmatpush2.msra.mxu0 %v215_v58  ;;  %1006 = vmatpush2.msra.mxu1 %v471_v59  ;;  %v456_v1 = vld [vmem:[%s2875_s1 + $0xda8] sm:$0xff]  ;;  %v137_v39 = vld [vmem:[%s2875_s1 + $0x3b0] sm:$0xff] }
  0xb7   :  { %936 = vmatprep.subr.mxu0 %v208_v60  ;;  %1007 = vmatprep.subr.mxu1 %v464_v61  ;;  %v199_v3 = vld [vmem:[%s2875_s1 + $0x5a0] sm:$0xff]  ;;  %v192_v6 = vld [vmem:[%s2875_s1 + $0x568] sm:$0xff]  ;;  %v393_v40 = vld [vmem:[%s2875_s1 + $0xbb0] sm:$0xff] }
  0xb8   :  { %v455_v4 = vld [vmem:[%s2875_s1 + $0xda0] sm:$0xff]  ;;  %937 = vmatpush2.msra.mxu0 %v207_v62  ;;  %1008 = vmatpush2.msra.mxu1 %v463_v63  ;;  %v448_v7 = vld [vmem:[%s2875_s1 + $0xd68] sm:$0xff]  ;;  %v130_v41 = vld [vmem:[%s2875_s1 + $0x378] sm:$0xff] }
  0xb9   :  { %938 = vmatprep.subr.mxu0 %v200_v0  ;;  %1009 = vmatprep.subr.mxu1 %v456_v1  ;;  %v191_v8 = vld [vmem:[%s2875_s1 + $0x560] sm:$0xff]  ;;  %v184_v11 = vld [vmem:[%s2875_s1 + $0x528] sm:$0xff]  ;;  %v386_v42 = vld [vmem:[%s2875_s1 + $0xb78] sm:$0xff] }
  0xba   :  { %v447_v9 = vld [vmem:[%s2875_s1 + $0xd60] sm:$0xff]  ;;  %939 = vmatpush2.msra.mxu0 %v199_v3  ;;  %1010 = vmatpush2.msra.mxu1 %v455_v4  ;;  %v440_v13 = vld [vmem:[%s2875_s1 + $0xd28] sm:$0xff]  ;;  %v129_v43 = vld [vmem:[%s2875_s1 + $0x370] sm:$0xff] }
  0xbb   :  { %940 = vmatprep.subr.mxu0 %v192_v6  ;;  %1011 = vmatprep.subr.mxu1 %v448_v7  ;;  %v183_v14 = vld [vmem:[%s2875_s1 + $0x520] sm:$0xff]  ;;  %v176_v16 = vld [vmem:[%s2875_s1 + $0x4e8] sm:$0xff]  ;;  %v385_v44 = vld [vmem:[%s2875_s1 + $0xb70] sm:$0xff] }
  0xbc   :  { %v439_v15 = vld [vmem:[%s2875_s1 + $0xd20] sm:$0xff]  ;;  %941 = vmatpush2.msra.mxu0 %v191_v8  ;;  %1012 = vmatpush2.msra.mxu1 %v447_v9  ;;  %v432_v17 = vld [vmem:[%s2875_s1 + $0xce8] sm:$0xff]  ;;  %v122_v45 = vld [vmem:[%s2875_s1 + $0x338] sm:$0xff] }
  0xbd   :  { %942 = vmatprep.subr.mxu0 %v184_v11  ;;  %1013 = vmatprep.subr.mxu1 %v440_v13  ;;  %v175_v18 = vld [vmem:[%s2875_s1 + $0x4e0] sm:$0xff]  ;;  %v168_v20 = vld [vmem:[%s2875_s1 + $0x4a8] sm:$0xff]  ;;  %v378_v46 = vld [vmem:[%s2875_s1 + $0xb38] sm:$0xff] }
  0xbe   :  { %v431_v19 = vld [vmem:[%s2875_s1 + $0xce0] sm:$0xff]  ;;  %943 = vmatpush2.msra.mxu0 %v183_v14  ;;  %1014 = vmatpush2.msra.mxu1 %v439_v15  ;;  %v424_v21 = vld [vmem:[%s2875_s1 + $0xca8] sm:$0xff]  ;;  %v121_v47 = vld [vmem:[%s2875_s1 + $0x330] sm:$0xff] }
  0xbf   :  { %944 = vmatprep.subr.mxu0 %v176_v16  ;;  %1015 = vmatprep.subr.mxu1 %v432_v17  ;;  %v167_v22 = vld [vmem:[%s2875_s1 + $0x4a0] sm:$0xff]  ;;  %v160_v24 = vld [vmem:[%s2875_s1 + $0x468] sm:$0xff]  ;;  %v377_v48 = vld [vmem:[%s2875_s1 + $0xb30] sm:$0xff] }
  0xc0   :  { %v423_v23 = vld [vmem:[%s2875_s1 + $0xca0] sm:$0xff]  ;;  %945 = vmatpush2.msra.mxu0 %v175_v18  ;;  %1016 = vmatpush2.msra.mxu1 %v431_v19  ;;  %v416_v25 = vld [vmem:[%s2875_s1 + $0xc68] sm:$0xff]  ;;  %v114_v49 = vld [vmem:[%s2875_s1 + $0x2f8] sm:$0xff] }
  0xc1   :  { %946 = vmatprep.subr.mxu0 %v168_v20  ;;  %1017 = vmatprep.subr.mxu1 %v424_v21  ;;  %v159_v26 = vld [vmem:[%s2875_s1 + $0x460] sm:$0xff]  ;;  %v152_v28 = vld [vmem:[%s2875_s1 + $0x428] sm:$0xff]  ;;  %v370_v50 = vld [vmem:[%s2875_s1 + $0xaf8] sm:$0xff] }
  0xc2   :  { %v415_v27 = vld [vmem:[%s2875_s1 + $0xc60] sm:$0xff]  ;;  %947 = vmatpush2.msra.mxu0 %v167_v22  ;;  %1018 = vmatpush2.msra.mxu1 %v423_v23  ;;  %v408_v30 = vld [vmem:[%s2875_s1 + $0xc28] sm:$0xff]  ;;  %v113_v51 = vld [vmem:[%s2875_s1 + $0x2f0] sm:$0xff] }
  0xc3   :  { %948 = vmatprep.subr.mxu0 %v160_v24  ;;  %1019 = vmatprep.subr.mxu1 %v416_v25  ;;  %v151_v31 = vld [vmem:[%s2875_s1 + $0x420] sm:$0xff]  ;;  %v369_v52 = vld [vmem:[%s2875_s1 + $0xaf0] sm:$0xff]  ;;  %v106_v53 = vld [vmem:[%s2875_s1 + $0x2b8] sm:$0xff] }
  0xc4   :  { %949 = vmatpush2.msra.mxu0 %v159_v26  ;;  %1020 = vmatpush2.msra.mxu1 %v415_v27  ;;  %v407_v32 = vld [vmem:[%s2875_s1 + $0xc20] sm:$0xff]  ;;  %v362_v54 = vld [vmem:[%s2875_s1 + $0xab8] sm:$0xff]  ;;  %v105_v55 = vld [vmem:[%s2875_s1 + $0x2b0] sm:$0xff] }
  0xc5   :  { %950 = vmatprep.subr.mxu0 %v152_v28  ;;  %1021 = vmatprep.subr.mxu1 %v408_v30  ;;  %v361_v56 = vld [vmem:[%s2875_s1 + $0xab0] sm:$0xff]  ;;  %v98_v57 = vld [vmem:[%s2875_s1 + $0x278] sm:$0xff]  ;;  %vm1219_vm2 = vmor %vm1218_vm1, %vm1217_vm0 }
  0xc6   :  { %951 = vmatpush2.msra.mxu0 %v151_v31  ;;  %952 = vmatprep.mubr.f32.mxu0 %v1661_v2  ;;  %v354_v58 = vld [vmem:[%s2875_s1 + $0xa78] sm:$0xff]  ;;  %v97_v59 = vld [vmem:[%s2875_s1 + $0x270] sm:$0xff]  ;;  %vm1221_vm4 = vmor %vm1220_vm3, %vm1219_vm2 }
  0xc7   :  { %1022 = vmatpush2.msra.mxu1 %v407_v32  ;;  %953 = vmatmul.mubr.f32.vlgmr.msra.gmra.mxu0 %v1669_v5  ;;  %v353_v60 = vld [vmem:[%s2875_s1 + $0xa70] sm:$0xff]  ;;  %v90_v61 = vld [vmem:[%s2875_s1 + $0x238] sm:$0xff]  ;;  %vm1223_vm6 = vmor %vm1222_vm5, %vm1221_vm4 }
  0xc8   :  { %1023 = vmatprep.mubr.f32.mxu1 %v1685_v10  ;;  %1030 = vmatprep.subr.mxu0 %v146_v33  ;;  %v346_v62 = vld [vmem:[%s2875_s1 + $0xa38] sm:$0xff]  ;;  %v89_v63 = vld [vmem:[%s2875_s1 + $0x230] sm:$0xff] }
  0xc9   :  { %1101 = vmatprep.subr.mxu1 %v402_v34  ;;  %1024 = vmatmul.mubr.f32.vlgmr.msra.gmra.mxu1 %v1692_v12  ;;  %v345_v0 = vld [vmem:[%s2875_s1 + $0xa30] sm:$0xff]  ;;  %v82_v1 = vld [vmem:[%s2875_s1 + $0x1f8] sm:$0xff] }
  0xca   :  { %1031 = vmatpush1.msra.mxu0 %v145_v35  ;;  %1102 = vmatpush1.msra.mxu1 %v401_v36  ;;  %v338_v3 = vld [vmem:[%s2875_s1 + $0x9f8] sm:$0xff]  ;;  %v81_v4 = vld [vmem:[%s2875_s1 + $0x1f0] sm:$0xff] }
  0xcb   :  { %1032 = vmatprep.subr.mxu0 %v138_v37  ;;  %1103 = vmatprep.subr.mxu1 %v394_v38  ;;  %v337_v6 = vld [vmem:[%s2875_s1 + $0x9f0] sm:$0xff]  ;;  %v74_v7 = vld [vmem:[%s2875_s1 + $0x1b8] sm:$0xff] }
  0xcc   :  { %1033 = vmatpush1.msra.mxu0 %v137_v39  ;;  %1104 = vmatpush1.msra.mxu1 %v393_v40  ;;  %v330_v8 = vld [vmem:[%s2875_s1 + $0x9b8] sm:$0xff]  ;;  %v73_v9 = vld [vmem:[%s2875_s1 + $0x1b0] sm:$0xff] }
  0xcd   :  { %1034 = vmatprep.subr.mxu0 %v130_v41  ;;  %1105 = vmatprep.subr.mxu1 %v386_v42  ;;  %v329_v11 = vld [vmem:[%s2875_s1 + $0x9b0] sm:$0xff]  ;;  %v66_v13 = vld [vmem:[%s2875_s1 + $0x178] sm:$0xff] }
  0xce   :  { %1035 = vmatpush1.msra.mxu0 %v129_v43  ;;  %1106 = vmatpush1.msra.mxu1 %v385_v44  ;;  %v322_v14 = vld [vmem:[%s2875_s1 + $0x978] sm:$0xff]  ;;  %v65_v15 = vld [vmem:[%s2875_s1 + $0x170] sm:$0xff] }
  0xcf   :  { %1036 = vmatprep.subr.mxu0 %v122_v45  ;;  %1107 = vmatprep.subr.mxu1 %v378_v46  ;;  %v321_v16 = vld [vmem:[%s2875_s1 + $0x970] sm:$0xff]  ;;  %v58_v17 = vld [vmem:[%s2875_s1 + $0x138] sm:$0xff] }
  0xd0   :  { %1037 = vmatpush1.msra.mxu0 %v121_v47  ;;  %1108 = vmatpush1.msra.mxu1 %v377_v48  ;;  %v314_v18 = vld [vmem:[%s2875_s1 + $0x938] sm:$0xff]  ;;  %v57_v19 = vld [vmem:[%s2875_s1 + $0x130] sm:$0xff] }
  0xd1   :  { %1038 = vmatprep.subr.mxu0 %v114_v49  ;;  %1109 = vmatprep.subr.mxu1 %v370_v50  ;;  %v313_v20 = vld [vmem:[%s2875_s1 + $0x930] sm:$0xff]  ;;  %v50_v21 = vld [vmem:[%s2875_s1 + $0xf8] sm:$0xff] }
  0xd2   :  { %1039 = vmatpush1.msra.mxu0 %v113_v51  ;;  %1110 = vmatpush1.msra.mxu1 %v369_v52  ;;  %v306_v22 = vld [vmem:[%s2875_s1 + $0x8f8] sm:$0xff]  ;;  %v49_v23 = vld [vmem:[%s2875_s1 + $0xf0] sm:$0xff] }
  0xd3   :  { %1040 = vmatprep.subr.mxu0 %v106_v53  ;;  %1111 = vmatprep.subr.mxu1 %v362_v54  ;;  %v305_v24 = vld [vmem:[%s2875_s1 + $0x8f0] sm:$0xff]  ;;  %v42_v25 = vld [vmem:[%s2875_s1 + $0xb8] sm:$0xff] }
  0xd4   :  { %1041 = vmatpush1.msra.mxu0 %v105_v55  ;;  %1112 = vmatpush1.msra.mxu1 %v361_v56  ;;  %v298_v26 = vld [vmem:[%s2875_s1 + $0x8b8] sm:$0xff]  ;;  %v41_v27 = vld [vmem:[%s2875_s1 + $0xb0] sm:$0xff] }
  0xd5   :  { %1042 = vmatprep.subr.mxu0 %v98_v57  ;;  %1113 = vmatprep.subr.mxu1 %v354_v58  ;;  %v297_v28 = vld [vmem:[%s2875_s1 + $0x8b0] sm:$0xff]  ;;  %v34_v30 = vld [vmem:[%s2875_s1 + $0x78] sm:$0xff] }
  0xd6   :  { %1043 = vmatpush1.msra.mxu0 %v97_v59  ;;  %1114 = vmatpush1.msra.mxu1 %v353_v60  ;;  %v290_v31 = vld [vmem:[%s2875_s1 + $0x878] sm:$0xff]  ;;  %v33_v32 = vld [vmem:[%s2875_s1 + $0x70] sm:$0xff] }
  0xd7   :  { %1044 = vmatprep.subr.mxu0 %v90_v61  ;;  %1115 = vmatprep.subr.mxu1 %v346_v62  ;;  %v289_v33 = vld [vmem:[%s2875_s1 + $0x870] sm:$0xff]  ;;  %v26_v34 = vld [vmem:[%s2875_s1 + $0x38] sm:$0xff] }
  0xd8   :  { %1045 = vmatpush1.msra.mxu0 %v89_v63  ;;  %1116 = vmatpush1.msra.mxu1 %v345_v0  ;;  %v282_v35 = vld [vmem:[%s2875_s1 + $0x838] sm:$0xff]  ;;  %v25_v36 = vld [vmem:[%s2875_s1 + $0x30] sm:$0xff] }
  0xd9   :  { %1046 = vmatprep.subr.mxu0 %v82_v1  ;;  %1117 = vmatprep.subr.mxu1 %v338_v3  ;;  %v281_v37 = vld [vmem:[%s2875_s1 + $0x830] sm:$0xff]  ;;  %v274_v38 = vld [vmem:[%s2875_s1 + $0x7f8] sm:$0xff] }
  0xda   :  { %1047 = vmatpush1.msra.mxu0 %v81_v4  ;;  %1118 = vmatpush1.msra.mxu1 %v337_v6  ;;  %v530_v39 = vld [vmem:[%s2875_s1 + $0xff8] sm:$0xff]  ;;  %v273_v40 = vld [vmem:[%s2875_s1 + $0x7f0] sm:$0xff] }
  0xdb   :  { %1048 = vmatprep.subr.mxu0 %v74_v7  ;;  %1119 = vmatprep.subr.mxu1 %v330_v8  ;;  %v529_v41 = vld [vmem:[%s2875_s1 + $0xff0] sm:$0xff]  ;;  %v266_v42 = vld [vmem:[%s2875_s1 + $0x7b8] sm:$0xff] }
  0xdc   :  { %1049 = vmatpush1.msra.mxu0 %v73_v9  ;;  %1120 = vmatpush1.msra.mxu1 %v329_v11  ;;  %v522_v43 = vld [vmem:[%s2875_s1 + $0xfb8] sm:$0xff]  ;;  %v265_v44 = vld [vmem:[%s2875_s1 + $0x7b0] sm:$0xff] }
  0xdd   :  { %1050 = vmatprep.subr.mxu0 %v66_v13  ;;  %1121 = vmatprep.subr.mxu1 %v322_v14  ;;  %v521_v45 = vld [vmem:[%s2875_s1 + $0xfb0] sm:$0xff]  ;;  %v258_v46 = vld [vmem:[%s2875_s1 + $0x778] sm:$0xff] }
  0xde   :  { %1051 = vmatpush1.msra.mxu0 %v65_v15  ;;  %1122 = vmatpush1.msra.mxu1 %v321_v16  ;;  %v514_v47 = vld [vmem:[%s2875_s1 + $0xf78] sm:$0xff]  ;;  %v257_v48 = vld [vmem:[%s2875_s1 + $0x770] sm:$0xff] }
  0xdf   :  { %1052 = vmatprep.subr.mxu0 %v58_v17  ;;  %1123 = vmatprep.subr.mxu1 %v314_v18  ;;  %v513_v49 = vld [vmem:[%s2875_s1 + $0xf70] sm:$0xff]  ;;  %v250_v50 = vld [vmem:[%s2875_s1 + $0x738] sm:$0xff] }
  0xe0   :  { %1053 = vmatpush1.msra.mxu0 %v57_v19  ;;  %1124 = vmatpush1.msra.mxu1 %v313_v20  ;;  %v506_v51 = vld [vmem:[%s2875_s1 + $0xf38] sm:$0xff]  ;;  %v249_v52 = vld [vmem:[%s2875_s1 + $0x730] sm:$0xff] }
  0xe1   :  { %1054 = vmatprep.subr.mxu0 %v50_v21  ;;  %1125 = vmatprep.subr.mxu1 %v306_v22  ;;  %v505_v53 = vld [vmem:[%s2875_s1 + $0xf30] sm:$0xff]  ;;  %v242_v54 = vld [vmem:[%s2875_s1 + $0x6f8] sm:$0xff] }
  0xe2   :  { %1055 = vmatpush1.msra.mxu0 %v49_v23  ;;  %1126 = vmatpush1.msra.mxu1 %v305_v24  ;;  %v498_v55 = vld [vmem:[%s2875_s1 + $0xef8] sm:$0xff]  ;;  %v241_v56 = vld [vmem:[%s2875_s1 + $0x6f0] sm:$0xff] }
  0xe3   :  { %1056 = vmatprep.subr.mxu0 %v42_v25  ;;  %1127 = vmatprep.subr.mxu1 %v298_v26  ;;  %v497_v57 = vld [vmem:[%s2875_s1 + $0xef0] sm:$0xff]  ;;  %v234_v58 = vld [vmem:[%s2875_s1 + $0x6b8] sm:$0xff] }
  0xe4   :  { %1057 = vmatpush1.msra.mxu0 %v41_v27  ;;  %1128 = vmatpush1.msra.mxu1 %v297_v28  ;;  %v490_v59 = vld [vmem:[%s2875_s1 + $0xeb8] sm:$0xff]  ;;  %v233_v60 = vld [vmem:[%s2875_s1 + $0x6b0] sm:$0xff] }
  0xe5   :  { %1058 = vmatprep.subr.mxu0 %v34_v30  ;;  %1129 = vmatprep.subr.mxu1 %v290_v31  ;;  %v489_v61 = vld [vmem:[%s2875_s1 + $0xeb0] sm:$0xff]  ;;  %v226_v62 = vld [vmem:[%s2875_s1 + $0x678] sm:$0xff] }
  0xe6   :  { %1059 = vmatpush1.msra.mxu0 %v33_v32  ;;  %1130 = vmatpush1.msra.mxu1 %v289_v33  ;;  %v482_v63 = vld [vmem:[%s2875_s1 + $0xe78] sm:$0xff]  ;;  %v225_v0 = vld [vmem:[%s2875_s1 + $0x670] sm:$0xff] }
  0xe7   :  { %1060 = vmatprep.subr.mxu0 %v26_v34  ;;  %1131 = vmatprep.subr.mxu1 %v282_v35  ;;  %v481_v1 = vld [vmem:[%s2875_s1 + $0xe70] sm:$0xff]  ;;  %v218_v3 = vld [vmem:[%s2875_s1 + $0x638] sm:$0xff] }
  0xe8   :  { %1061 = vmatpush1.msra.mxu0 %v25_v36  ;;  %1132 = vmatpush1.msra.mxu1 %v281_v37  ;;  %v474_v4 = vld [vmem:[%s2875_s1 + $0xe38] sm:$0xff]  ;;  %v217_v6 = vld [vmem:[%s2875_s1 + $0x630] sm:$0xff] }
  0xe9   :  { %1062 = vmatprep.subr.mxu0 %v274_v38  ;;  %1133 = vmatprep.subr.mxu1 %v530_v39  ;;  %v473_v7 = vld [vmem:[%s2875_s1 + $0xe30] sm:$0xff]  ;;  %v210_v8 = vld [vmem:[%s2875_s1 + $0x5f8] sm:$0xff] }
  0xea   :  { %1063 = vmatpush2.msra.mxu0 %v273_v40  ;;  %1134 = vmatpush2.msra.mxu1 %v529_v41  ;;  %v466_v9 = vld [vmem:[%s2875_s1 + $0xdf8] sm:$0xff]  ;;  %v209_v11 = vld [vmem:[%s2875_s1 + $0x5f0] sm:$0xff] }
  0xeb   :  { %1064 = vmatprep.subr.mxu0 %v266_v42  ;;  %1135 = vmatprep.subr.mxu1 %v522_v43  ;;  %v465_v13 = vld [vmem:[%s2875_s1 + $0xdf0] sm:$0xff]  ;;  %v202_v14 = vld [vmem:[%s2875_s1 + $0x5b8] sm:$0xff]  ;;  %v535_v43 = vsub.s32 0, %v1559_v29 }
  0xec   :  { %1065 = vmatpush2.msra.mxu0 %v265_v44  ;;  %1136 = vmatpush2.msra.mxu1 %v521_v45  ;;  %v458_v15 = vld [vmem:[%s2875_s1 + $0xdb8] sm:$0xff]  ;;  %v201_v16 = vld [vmem:[%s2875_s1 + $0x5b0] sm:$0xff]  ;;  %v539_v44 = vsub.s32 1, %v1559_v29  ;;  %v531_v45 = vld [vmem:[%s2876_s2] sm:$0xff] }
  0xed   :  { %1066 = vmatprep.subr.mxu0 %v258_v46  ;;  %1137 = vmatprep.subr.mxu1 %v514_v47  ;;  %v457_v17 = vld [vmem:[%s2875_s1 + $0xdb0] sm:$0xff]  ;;  %v194_v18 = vld [vmem:[%s2875_s1 + $0x578] sm:$0xff]  ;;  %v536_v47 = vrot.slane %v531_v45, %v535_v43 }
  0xee   :  { %1067 = vmatpush2.msra.mxu0 %v257_v48  ;;  %1138 = vmatpush2.msra.mxu1 %v513_v49  ;;  %v450_v19 = vld [vmem:[%s2875_s1 + $0xd78] sm:$0xff]  ;;  %v193_v20 = vld [vmem:[%s2875_s1 + $0x570] sm:$0xff]  ;;  %v540_v48 = vrot.slane %v531_v45, %v539_v44 }
  0xef   :  { %1068 = vmatprep.subr.mxu0 %v250_v50  ;;  %1139 = vmatprep.subr.mxu1 %v506_v51  ;;  %v449_v21 = vld [vmem:[%s2875_s1 + $0xd70] sm:$0xff]  ;;  %v186_v22 = vld [vmem:[%s2875_s1 + $0x538] sm:$0xff] }
  0xf0   :  { %1069 = vmatpush2.msra.mxu0 %v249_v52  ;;  %1140 = vmatpush2.msra.mxu1 %v505_v53  ;;  %v442_v23 = vld [vmem:[%s2875_s1 + $0xd38] sm:$0xff]  ;;  %v185_v24 = vld [vmem:[%s2875_s1 + $0x530] sm:$0xff] }
  0xf1   :  { %1070 = vmatprep.subr.mxu0 %v242_v54  ;;  %1141 = vmatprep.subr.mxu1 %v498_v55  ;;  %v441_v25 = vld [vmem:[%s2875_s1 + $0xd30] sm:$0xff]  ;;  %v178_v26 = vld [vmem:[%s2875_s1 + $0x4f8] sm:$0xff] }
  0xf2   :  { %1071 = vmatpush2.msra.mxu0 %v241_v56  ;;  %1142 = vmatpush2.msra.mxu1 %v497_v57  ;;  %v434_v27 = vld [vmem:[%s2875_s1 + $0xcf8] sm:$0xff]  ;;  %v177_v28 = vld [vmem:[%s2875_s1 + $0x4f0] sm:$0xff] }
  0xf3   :  { %1072 = vmatprep.subr.mxu0 %v234_v58  ;;  %1143 = vmatprep.subr.mxu1 %v490_v59  ;;  %v433_v30 = vld [vmem:[%s2875_s1 + $0xcf0] sm:$0xff]  ;;  %v170_v31 = vld [vmem:[%s2875_s1 + $0x4b8] sm:$0xff] }
  0xf4   :  { %1073 = vmatpush2.msra.mxu0 %v233_v60  ;;  %1144 = vmatpush2.msra.mxu1 %v489_v61  ;;  %v426_v32 = vld [vmem:[%s2875_s1 + $0xcb8] sm:$0xff]  ;;  %v169_v33 = vld [vmem:[%s2875_s1 + $0x4b0] sm:$0xff] }
  0xf5   :  { %1074 = vmatprep.subr.mxu0 %v226_v62  ;;  %1145 = vmatprep.subr.mxu1 %v482_v63  ;;  %v425_v34 = vld [vmem:[%s2875_s1 + $0xcb0] sm:$0xff]  ;;  %v162_v35 = vld [vmem:[%s2875_s1 + $0x478] sm:$0xff] }
  0xf6   :  { %1075 = vmatpush2.msra.mxu0 %v225_v0  ;;  %1146 = vmatpush2.msra.mxu1 %v481_v1  ;;  %v418_v36 = vld [vmem:[%s2875_s1 + $0xc78] sm:$0xff]  ;;  %v161_v37 = vld [vmem:[%s2875_s1 + $0x470] sm:$0xff] }
  0xf7   :  { %1076 = vmatprep.subr.mxu0 %v218_v3  ;;  %1147 = vmatprep.subr.mxu1 %v474_v4  ;;  %v417_v38 = vld [vmem:[%s2875_s1 + $0xc70] sm:$0xff]  ;;  %v154_v39 = vld [vmem:[%s2875_s1 + $0x438] sm:$0xff] }
  0xf8   :  { %1077 = vmatpush2.msra.mxu0 %v217_v6  ;;  %1148 = vmatpush2.msra.mxu1 %v473_v7  ;;  %v410_v40 = vld [vmem:[%s2875_s1 + $0xc38] sm:$0xff]  ;;  %v153_v41 = vld [vmem:[%s2875_s1 + $0x430] sm:$0xff] }
  0xf9   :  { %1078 = vmatprep.subr.mxu0 %v210_v8  ;;  %1149 = vmatprep.subr.mxu1 %v466_v9  ;;  %v409_v42 = vld [vmem:[%s2875_s1 + $0xc30] sm:$0xff]  ;;  %s1268_s1 = smov [#allocation2]  }
  0xfa   :  { %1079 = vmatpush2.msra.mxu0 %v209_v11  ;;  %1150 = vmatpush2.msra.mxu1 %v465_v13  ;;  %v551_v13 = vsub.s32 4, %v1559_v29  ;;  %s1231_s2 = sshll.u32 %s1268_s1, 4  ;;  %s1232_s2 = int_to_ptr.vmem [resolvable:$true] %s1231_s2 }
  0xfb   :  { %1080 = vmatprep.subr.mxu0 %v202_v14  ;;  %1151 = vmatprep.subr.mxu1 %v458_v15  ;;  %v555_v14 = vsub.s32 5, %v1559_v29  ;;  %s1244_s11 = scalar_lea.vmem %s1232_s2, 256  ;;  %p1249_p1 = scmp.lt.s32.totalorder %s1232_s2, %s1232_s2 }
  0xfc   :  { %1081 = vmatpush2.msra.mxu0 %v201_v16  ;;  %1152 = vmatpush2.msra.mxu1 %v457_v17  ;;  %v552_v16 = vrot.slane %v531_v45, %v551_v13  ;;  %p1245_p0 = scmp.ne.s32.totalorder %s1232_s2, %s1244_s11  ;;  %p1250_p2 = scmp.lt.s32.totalorder %s1244_s11, %s1244_s11 }
  0xfd   :  { %1082 = vmatprep.subr.mxu0 %v194_v18  ;;  %1153 = vmatprep.subr.mxu1 %v450_v19  ;;  %v556_v17 = vrot.slane %v531_v45, %v555_v14  ;;  %v559_v18 = vsub.s32 6, %v1559_v29 }
  0xfe   :  { %1083 = vmatpush2.msra.mxu0 %v193_v20  ;;  %1154 = vmatpush2.msra.mxu1 %v449_v21  ;;  %v563_v21 = vsub.s32 7, %v1559_v29  ;;  %p1251_p3 = por %p1250_p2, %p1249_p1 }
  0xff   :  { %1084 = vmatprep.subr.mxu0 %v186_v22  ;;  %1155 = vmatprep.subr.mxu1 %v442_v23 }
 0x100   :  { %1085 = vmatpush2.msra.mxu0 %v185_v24  ;;  %1156 = vmatpush2.msra.mxu1 %v441_v25  ;;  %v560_v24 = vrot.slane %v531_v45, %v559_v18  ;;  %p1252_p4 = pnand %p1251_p3, %p1245_p0 }
 0x101   :  { %1086 = vmatprep.subr.mxu0 %v178_v26  ;;  %1157 = vmatprep.subr.mxu1 %v434_v27  ;;  %v564_v26 = vrot.slane %v531_v45, %v563_v21 }
 0x102   :  { %1087 = vmatpush2.msra.mxu0 %v177_v28  ;;  %1158 = vmatpush2.msra.mxu1 %v433_v30 }
 0x103   :  { %1088 = vmatprep.subr.mxu0 %v170_v31  ;;  %1159 = vmatprep.subr.mxu1 %v426_v32  ;;  %v670_v46 = vpop.f32.mrf.mxu0 }
 0x104   :  { %1089 = vmatpush2.msra.mxu0 %v169_v33  ;;  %1160 = vmatpush2.msra.mxu1 %v425_v34 }
 0x105   :  { %1090 = vmatprep.subr.mxu0 %v162_v35  ;;  %1161 = vmatprep.subr.mxu1 %v418_v36  ;;  %v741_v49 = vpop.f32.mrf.mxu1  ;;  %v672_v50 = vpop.f32.mrf.mxu0 }
 0x106   :  { %1091 = vmatpush2.msra.mxu0 %v161_v37  ;;  %1162 = vmatpush2.msra.mxu1 %v417_v38  ;;  %v673_v51 = vadd.f32 %v672_v50, %v540_v48 }
 0x107   :  { %1092 = vmatprep.subr.mxu0 %v154_v39  ;;  %1163 = vmatprep.subr.mxu1 %v410_v40  ;;  %v743_v54 = vpop.f32.mrf.mxu1 }
 0x108   :  { %1093 = vmatpush2.msra.mxu0 %v153_v41  ;;  %1094 = vmatprep.mubr.f32.mxu0 %v1661_v2  ;;  %v543_v2 = vsub.s32 2, %v1559_v29  ;;  %v744_v58 = vadd.f32 %v743_v54, %v673_v51 }
 0x109   :  { %1164 = vmatpush2.msra.mxu1 %v409_v42  ;;  %1165 = vmatprep.mubr.f32.mxu1 %v1685_v10  ;;  %v547_v10 = vsub.s32 3, %v1559_v29 }
 0x10a   :  { %1095 = vmatmul.mubr.f32.vlgmr.msra.gmra.mxu0 %v1669_v5  ;;  %1166 = vmatmul.mubr.f32.vlgmr.msra.gmra.mxu1 %v1692_v12  ;;  %v671_v5 = vadd.f32 %v670_v46, %v536_v47  ;;  %v1267_v12 = vmov 1983009808   ;;  %v544_v53 = vrot.slane %v531_v45, %v543_v2 }
 0x10b   :  { %v1183_v52 = vunpack.c.l.s4 %v1267_v12  ;;  %v548_v55 = vrot.slane %v531_v45, %v547_v10 }
 0x10c   :  { %v742_v57 = vadd.f32 %v741_v49, %v671_v5 }
 0x10d   :  { %v1184_v59 = vunpack.c.0.s8 %v1183_v52 }
 0x10e   :  { %v1180_v3 = vcombine.low %v742_v57, %v744_v58 }
 0x10f   :  { %v1187_v4 = vsub.s32 %v1184_v59, %v1559_v29 }
 0x111   :  { %v1188_v8 = vrot.slane %v1180_v3, %v1187_v4 }
 0x145   :  { %v812_v56 = vpop.f32.mrf.mxu0 }
 0x146   :  { %v813_v60 = vadd.f32 %v812_v56, %v544_v53 }
 0x147   :  { %v883_v61 = vpop.f32.mrf.mxu1  ;;  %v814_v62 = vpop.f32.mrf.mxu0 }
 0x148   :  { %v884_v63 = vadd.f32 %v883_v61, %v813_v60  ;;  %v815_v0 = vadd.f32 %v814_v62, %v548_v55 }
 0x149   :  { %v885_v1 = vpop.f32.mrf.mxu1 }
 0x14a   :  { %v886_v6 = vadd.f32 %v885_v1, %v815_v0 }
 0x14c   :  { %v1181_v7 = vcombine.low %v884_v63, %v886_v6 }
 0x14e   :  { %v1195_v9 = vrot.slane %v1181_v7, %v1187_v4 }
 0x150   :  { %v1196_v11 = vcombine.low %v1188_v8, %v1195_v9 }
 0x152   :  { %1216 = vst [vmem:[#allocation2] sm:$0xff] %v1196_v11 }
 0x187   :  { %v954_v15 = vpop.f32.mrf.mxu0 }
 0x188   :  { %v955_v22 = vadd.f32 %v954_v15, %v552_v16 }
 0x189   :  { %v1025_v19 = vpop.f32.mrf.mxu1  ;;  %v956_v20 = vpop.f32.mrf.mxu0 }
 0x18a   :  { %v957_v23 = vadd.f32 %v956_v20, %v556_v17  ;;  %v1026_v30 = vadd.f32 %v1025_v19, %v955_v22 }
 0x18b   :  { %v1027_v25 = vpop.f32.mrf.mxu1 }
 0x18c   :  { %v1028_v31 = vadd.f32 %v1027_v25, %v957_v23 }
 0x18e   :  { %v1197_v36 = vcombine.low %v1026_v30, %v1028_v31 }
 0x190   :  { %v1205_v39 = vrot.slane %v1197_v36, %v1187_v4 }
 0x1ca   :  { %v1096_v27 = vpop.f32.mrf.mxu0  ;;  %v1167_v28 = vpop.f32.mrf.mxu1 }
 0x1cb   :  { %v1097_v32 = vadd.f32 %v1096_v27, %v560_v24 }
 0x1cc   :  { %v1098_v33 = vpop.f32.mrf.mxu0  ;;  %v1169_v35 = vpop.f32.mrf.mxu1 }
 0x1cd   :  { %v1099_v34 = vadd.f32 %v1098_v33, %v564_v26  ;;  %v1168_v37 = vadd.f32 %v1167_v28, %v1097_v32 }
 0x1cf   :  { %v1170_v29 = vadd.f32 %v1169_v35, %v1099_v34 }
 0x1d1   :  { %v1198_v38 = vcombine.low %v1168_v37, %v1170_v29 }
 0x1d3   :  { %v1212_v40 = vrot.slane %v1198_v38, %v1187_v4 }
 0x1d5   :  { %v1213_v41 = vcombine.low %v1205_v39, %v1212_v40 }
 0x1d7   :  { %1224 = vst.msk [vmem:[#allocation2 + $0x8] sm:$0xff] %vm1223_vm6, %v1213_v41 }
 0x1d8   :  { %1255 = shalt.err (!%p1252_p4)
}
 0x1d9   :  { %1234 = dma.vmem_to_hbm [thread:$0]  %s1232_s2, 256, %s2877_s3, [#allocation3]  }
 0x1da   :  { %1264 = dma.done.wait [#allocation3], 256  }
 0x1db   :  { %1265 = vsyncadd [#allocation3], 4294967040 }
 0x1dc   :  { %1238 = vsyncpa [#allocation3], 1 }

</bundles_post_ra>
